<compile_context>
chip_gen: v5e
topology: v5e:2x2
jax: 0.10.0
libtpu: 0.0.40
codegen_flags: <defaults>
</compile_context>

<pallas_src>
import functools

import jax
import jax.numpy as jnp
from jax.experimental import pallas as pl
from jax.experimental.pallas import tpu as pltpu

KERNEL_SIZE = 7
PAD = 3
LN_EPS = 1e-5


def _round_up(x, m):
    return ((x + m - 1) // m) * m


def _erf(x):
    # Abramowitz & Stegun 7.1.26 (max abs error ~1.5e-7): exact-GELU fidelity using
    # only exp/abs/where/mul/add (no reliance on an erf lowering in Mosaic).
    p = 0.3275911
    a1, a2, a3, a4, a5 = (0.254829592, -0.284496736, 1.421413741,
                          -1.453152027, 1.061405429)
    s = jnp.where(x >= 0.0, 1.0, -1.0)
    ax = jnp.abs(x)
    t = 1.0 / (1.0 + p * ax)
    poly = ((((a5 * t + a4) * t + a3) * t + a2) * t + a1) * t
    return s * (1.0 - poly * jnp.exp(-ax * ax))


def _gelu_exact(x):
    return 0.5 * x * (1.0 + _erf(x * 0.7071067811865476))


def _make_kernel(num_layers, c_real, c_pad, t_tile, halo, win):
    L, TT, HALO, WIN, CP = num_layers, t_tile, halo, win, c_pad
    inv_c = 1.0 / float(c_real)

    def kernel(
        len_ref,                                  # SMEM (B,) int32 (scalar prefetch)
        x_hbm,                                    # ANY  (B, T_full, Cp) bf16
        dw_w_ref, dw_b_ref, ln_g_ref, ln_b_ref,
        w1_ref, b1_ref, w2_ref, b2_ref, scale_ref,
        out_w_ref, out_b_ref,
        o_ref,                                    # (1, O, TT) f32
        xw_ref, sem,                              # (2, WIN, Cp) bf16 double buffer, DMA sems (2,)
    ):
        b = pl.program_id(0)
        t = pl.program_id(1)
        n_t = pl.num_programs(1)
        length = len_ref[b]

        def issue(tile_idx, slot):
            col = pl.multiple_of(tile_idx * TT, 8)      # window start in padded coords
            pltpu.make_async_copy(
                x_hbm.at[b, pl.ds(col, WIN), :], xw_ref.at[slot], sem.at[slot]
            ).start()

        valid_cur = (t * TT) < length                    # tile has any valid rows

        # Prime the double buffer on the first tile of each batch row.
        @pl.when(jnp.logical_and(t == 0, valid_cur))
        def _():
            issue(t, 0)

        # Prefetch the next tile into the other slot (overlaps this tile's compute).
        nxt = t + 1
        valid_nxt = jnp.logical_and(nxt < n_t, (nxt * TT) < length)

        @pl.when(valid_nxt)
        def _():
            issue(nxt, nxt % 2)

        @pl.when(valid_cur)
        def _():
            slot = t % 2
            pltpu.make_async_copy(
                x_hbm.at[b, pl.ds(0, WIN), :], xw_ref.at[slot], sem.at[slot]
            ).wait()

            x = xw_ref[slot].astype(jnp.float32)         # (WIN, Cp), time on sublanes

            # Per-row mask from global positions (prefix/length mask). 0 outside
            # [0, length), reproducing both `* mask` and the conv zero padding at
            # the sequence edges.  Lane broadcast hoisted out of the layer loop.
            pos = (t * TT - HALO) + jax.lax.broadcasted_iota(jnp.int32, (WIN, 1), 0)
            m = jnp.logical_and(pos >= 0, pos < length).astype(jnp.float32)
            mb = jnp.broadcast_to(m, (WIN, CP))

            # TODO(synk): shrink LN/MLP to the valid sub-window per layer for tiny
            # t_tile; negligible overhead at the default t_tile >= 1024.
            for l in range(L):
                res = x

                # depthwise conv1d (k=7, pad=3, groups=C): shifted adds via XLU roll;
                # wrap-around garbage stays inside the discarded halo (HALO >= 3*L).
                dw = dw_w_ref[l]                          # (7, Cp), taps lane-aligned
                y = x * dw[PAD:PAD + 1, :]
                for k in range(KERNEL_SIZE):
                    if k == PAD:
                        continue
                    xs = pltpu.roll(x, shift=(PAD - k) % WIN, axis=0)  # xs[r]=x[r+k-PAD]
                    y = y + xs * dw[k:k + 1, :]
                y = y + dw_b_ref[l][None, :]

                # LayerNorm over the *real* C channels: padded lanes are exactly 0,
                # so lane-sums are correct; divide by real C, var = E[y^2] - mu^2.
                # (If XLU-bound, these two lane reductions could become MXU matvecs.)
                s1 = jnp.sum(y, axis=-1, keepdims=True)
                s2 = jnp.sum(y * y, axis=-1, keepdims=True)
                mu = s1 * inv_c
                var = s2 * inv_c - mu * mu
                y = (y - mu) * jax.lax.rsqrt(var + LN_EPS)
                y = y * ln_g_ref[l][None, :] + ln_b_ref[l][None, :]

                # pointwise MLP: bf16 MXU matmuls, f32 accumulation, exact-erf GELU.
                h = jnp.dot(y.astype(jnp.bfloat16), w1_ref[l],
                            preferred_element_type=jnp.float32) + b1_ref[l][None, :]
                h = _gelu_exact(h)
                z = jnp.dot(h.astype(jnp.bfloat16), w2_ref[l],
                            preferred_element_type=jnp.float32) + b2_ref[l][None, :]

                # layer scale + residual, then mask (VariancePredictor: x = layer(x)*mask)
                x = (res + z * scale_ref[l][None, :]) * mb

            # out_conv: Conv1d(C, O, 1).  Lane-dense (O, TT) result -> unmasked
            # 128-wide stores, output already in PyTorch (B, O, T) layout.
            xv = x[HALO:HALO + TT, :].astype(jnp.bfloat16)
            o = jnp.einsum("oc,tc->ot", out_w_ref[...], xv,
                           preferred_element_type=jnp.float32)
            tpos = t * TT + jax.lax.broadcasted_iota(jnp.int32, (1, TT), 1)
            mlane = (tpos < length).astype(jnp.float32)
            o_ref[0, :, :] = (o + out_b_ref[...]) * mlane

        # Fully padded tile: no DMA wait, no compute — just write zeros.
        @pl.when(jnp.logical_not(valid_cur))
        def _():
            o_ref[...] = jnp.zeros_like(o_ref)

    return kernel


def variance_predictor_pallas(x_bct, mask_b1t, params, *, t_tile=1024):
    """x_bct: (B, C, T) f32, mask_b1t: (B, 1, T) prefix/length mask -> (B, O, T) f32."""
    (dw_w, dw_b, ln_g, ln_b, w1, b1, w2, b2, scale, out_w, out_b) = params
    B, C, T = x_bct.shape
    L = dw_w.shape[0]
    H = w1.shape[2]
    O = out_w.shape[0]

    assert t_tile % 128 == 0, "t_tile must be a multiple of 128"
    # Halo covers the receptive-field growth of L depthwise convs (3 rows/layer),
    # rounded up to a sublane multiple so every window stays 8-aligned.
    HALO = max(8, _round_up(PAD * L, 8))
    assert HALO >= PAD * L, "halo must cover the depthwise receptive field (roll wrap safety)"
    TT = min(_round_up(T, 128), t_tile)          # lane-dense output tiles
    T_out = _round_up(T, TT)
    nT = T_out // TT
    WIN = TT + 2 * HALO
    T_full = T_out + 2 * HALO

    # Pad channel dims to the 128-lane width (padded lanes stay exactly 0 everywhere).
    Cp = _round_up(C, 128)
    Hp = _round_up(H, 128)

    def pad_to(a, axis, n):
        pad = [(0, 0)] * a.ndim
        pad[axis] = (0, n - a.shape[axis])
        return jnp.pad(a, pad)

    # Channels-last, channel-padded, T-padded (HALO left, HALO + T_out-T right),
    # bf16 activations in HBM: halves the per-tile window DMA on every chip.
    x_btc = pad_to(jnp.transpose(x_bct, (0, 2, 1)).astype(jnp.float32), 2, Cp)
    x_pad = jnp.pad(x_btc, ((0, 0), (HALO, T_full - T - HALO), (0, 0))).astype(jnp.bfloat16)

    # Prefix mask -> per-batch lengths (scalar-prefetched; mask rebuilt in-kernel).
    lengths = jnp.sum(mask_b1t[:, 0, :] != 0, axis=-1).astype(jnp.int32)

    dw_wp = pad_to(dw_w, 2, Cp).astype(jnp.float32)     # (L, 7, Cp) taps lane-aligned
    dw_bp = pad_to(dw_b, 1, Cp).astype(jnp.float32)
    ln_gp = pad_to(ln_g, 1, Cp).astype(jnp.float32)     # pad with 0 -> padded lanes stay 0
    ln_bp = pad_to(ln_b, 1, Cp).astype(jnp.float32)
    w1p = pad_to(pad_to(w1, 1, Cp), 2, Hp).astype(jnp.bfloat16)
    b1p = pad_to(b1, 1, Hp).astype(jnp.float32)
    w2p = pad_to(pad_to(w2, 1, Hp), 2, Cp).astype(jnp.bfloat16)
    b2p = pad_to(b2, 1, Cp).astype(jnp.float32)
    scalep = pad_to(scale, 1, Cp).astype(jnp.float32)
    out_wp = pad_to(out_w, 1, Cp).astype(jnp.bfloat16)
    out_b2d = out_b.reshape(O, 1).astype(jnp.float32)

    param_list = [dw_wp, dw_bp, ln_gp, ln_bp, w1p, b1p, w2p, b2p, scalep, out_wp, out_b2d]

    def full_spec(p):
        # Full-array block with a constant index map: fetched once, resident in VMEM.
        nd = p.ndim
        return pl.BlockSpec(p.shape, lambda b, t, lens, _nd=nd: (0,) * _nd)

    in_specs = [pl.BlockSpec(memory_space=pl.ANY)] + [full_spec(p) for p in param_list]

    kernel = _make_kernel(L, C, Cp, TT, HALO, WIN)

    out = pl.pallas_call(
        kernel,
        out_shape=jax.ShapeDtypeStruct((B, O, T_out), jnp.float32),
        grid_spec=pltpu.PrefetchScalarGridSpec(
            num_scalar_prefetch=1,
            grid=(B, nT),
            in_specs=in_specs,
            out_specs=pl.BlockSpec((1, O, TT), lambda b, t, lens: (b, 0, t)),
            scratch_shapes=[
                pltpu.VMEM((2, WIN, Cp), jnp.bfloat16),   # double-buffered halo window
                pltpu.SemaphoreType.DMA((2,)),            # one DMA sem per slot
            ],
        ),
        compiler_params=pltpu.CompilerParams(
            # T tiles carry the double-buffer state -> "arbitrary"; batch shards cores.
            dimension_semantics=("parallel", "arbitrary"),
            vmem_limit_bytes=48 * 1024 * 1024,            # fits v7x's 64 MiB per TC
        ),
    )(lengths, x_pad, *param_list)

    return out[:, :, :T]   # drop T padding; already in PyTorch (B, O, T) layout


def variance_predictor_ref(x_bct, mask_b1t, params):
    """Plain-JAX f32 reference with exact (erf) GELU, identical to the PyTorch module."""
    (dw_w, dw_b, ln_g, ln_b, w1, b1, w2, b2, scale, out_w, out_b) = params
    B, C, T = x_bct.shape
    L = dw_w.shape[0]
    x = jnp.transpose(x_bct, (0, 2, 1))            # (B, T, C)
    m = jnp.transpose(mask_b1t, (0, 2, 1))         # (B, T, 1)
    for l in range(L):
        res = x
        xp = jnp.pad(x, ((0, 0), (PAD, PAD), (0, 0)))
        y = jnp.zeros_like(x)
        for k in range(KERNEL_SIZE):
            y = y + xp[:, k:k + T, :] * dw_w[l, k][None, None, :]
        y = y + dw_b[l][None, None, :]
        mu = jnp.mean(y, axis=-1, keepdims=True)
        var = jnp.mean((y - mu) ** 2, axis=-1, keepdims=True)
        y = (y - mu) * jax.lax.rsqrt(var + LN_EPS)
        y = y * ln_g[l] + ln_b[l]
        h = jax.nn.gelu(jnp.einsum("btc,ch->bth", y, w1[l]) + b1[l], approximate=False)
        y = jnp.einsum("bth,hc->btc", h, w2[l]) + b2[l]
        x = (res + y * scale[l]) * m
    o = (jnp.einsum("btc,oc->bto", x, out_w) + out_b) * m
    return jnp.transpose(o, (0, 2, 1))


def init_params(key, channels, out_channels, num_layers):
    C, O, L, H = channels, out_channels, num_layers, channels
    ks = jax.random.split(key, 8)
    dw_w = 0.1 * jax.random.normal(ks[0], (L, KERNEL_SIZE, C), jnp.float32)
    dw_b = 0.1 * jax.random.normal(ks[1], (L, C), jnp.float32)
    ln_g = jnp.ones((L, C), jnp.float32)
    ln_b = jnp.zeros((L, C), jnp.float32)
    w1 = 0.1 * jax.random.normal(ks[2], (L, C, H), jnp.float32)   # (in, out) layout
    b1 = 0.1 * jax.random.normal(ks[3], (L, H), jnp.float32)
    w2 = 0.1 * jax.random.normal(ks[4], (L, H, C), jnp.float32)
    b2 = 0.1 * jax.random.normal(ks[5], (L, C), jnp.float32)
    scale = jnp.full((L, C), 1.0 / L, jnp.float32)                # torch.full init (1/num_layers)
    out_w = 0.1 * jax.random.normal(ks[6], (O, C), jnp.float32)   # Conv1d(C,O,1).weight squeezed
    out_b = 0.1 * jax.random.normal(ks[7], (O,), jnp.float32)
    return (dw_w, dw_b, ln_g, ln_b, w1, b1, w2, b2, scale, out_w, out_b)


if __name__ == "__main__":
    key = jax.random.PRNGKey(0)
    k_x, k_p, k_x2, k_p2 = jax.random.split(key, 4)

    B, C, L, O = 2, 32, 2, 1

    # Case 1: tiny single-T-tile problem.
    T = 16
    x = jax.random.normal(k_x, (B, C, T), jnp.float32)                         # 'b c t'
    lengths = jnp.array([T, T - 4], jnp.int32)
    mask = (jnp.arange(T)[None, :] < lengths[:, None]).astype(jnp.float32)[:, None, :]
    params = init_params(k_p, C, O, L)

    out = jax.jit(functools.partial(variance_predictor_pallas, params=params))(x, mask)
    out = jax.block_until_ready(out)
    ref = variance_predictor_ref(x, mask, params)
    assert out.shape == (B, O, T)
    assert jnp.allclose(out, ref, atol=5e-2, rtol=5e-2), "mismatch vs reference (single tile)"

    # Case 2: multiple T tiles + a fully padded tile for batch 1 (exercises the
    # double-buffered halo DMA, in-kernel length mask, and padded-tile early exit).
    T2 = 300
    x2 = jax.random.normal(k_x2, (B, C, T2), jnp.float32)
    lengths2 = jnp.array([T2, 201], jnp.int32)
    mask2 = (jnp.arange(T2)[None, :] < lengths2[:, None]).astype(jnp.float32)[:, None, :]
    params2 = init_params(k_p2, C, O, L)

    out2 = jax.jit(functools.partial(variance_predictor_pallas, params=params2, t_tile=128))(x2, mask2)
    out2 = jax.block_until_ready(out2)
    ref2 = variance_predictor_ref(x2, mask2, params2)
    assert out2.shape == (B, O, T2)
    assert jnp.allclose(out2, ref2, atol=5e-2, rtol=5e-2), "mismatch vs reference (tiled T)"

    print("KERNEL_OK")
</pallas_src>

<mosaic_0001>
module attributes {stable_mosaic.version = 11 : i64} {
  func.func @kernel(%arg0: i32, %arg1: i32, %arg2: memref<2xi32, #tpu.memory_space<smem>>, %arg3: memref<2x144x128xbf16, #tpu.memory_space<any>>, %arg4: memref<2x7x128xf32, #tpu.memory_space<vmem>>, %arg5: memref<2x128xf32, #tpu.memory_space<vmem>>, %arg6: memref<2x128xf32, #tpu.memory_space<vmem>>, %arg7: memref<2x128xf32, #tpu.memory_space<vmem>>, %arg8: memref<2x128x128xbf16, #tpu.memory_space<vmem>>, %arg9: memref<2x128xf32, #tpu.memory_space<vmem>>, %arg10: memref<2x128x128xbf16, #tpu.memory_space<vmem>>, %arg11: memref<2x128xf32, #tpu.memory_space<vmem>>, %arg12: memref<2x128xf32, #tpu.memory_space<vmem>>, %arg13: memref<1x128xbf16, #tpu.memory_space<vmem>>, %arg14: memref<1x1xf32, #tpu.memory_space<vmem>>, %arg15: memref<1x1x128xf32, #tpu.memory_space<vmem>>, %arg16: memref<2x144x128xbf16, #tpu.memory_space<vmem>>, %arg17: memref<2x!tpu.dma_semaphore, #tpu.memory_space<semaphore_mem>>) attributes {dimension_semantics = [#tpu.dimension_semantics<parallel>, #tpu.dimension_semantics<arbitrary>], iteration_bounds = array<i64: 2, 1>, scalar_prefetch = 1 : i64, scratch_operands = 2 : i64, tpu.core_type = #tpu.core_type<tc>, window_params = [{}, {pipeline_mode = #tpu.pipeline_mode<synchronous>, transform_indices = @transform_1, window_bounds = array<i64: 2, 7, 128>}, {pipeline_mode = #tpu.pipeline_mode<synchronous>, transform_indices = @transform_2, window_bounds = array<i64: 2, 128>}, {pipeline_mode = #tpu.pipeline_mode<synchronous>, transform_indices = @transform_3, window_bounds = array<i64: 2, 128>}, {pipeline_mode = #tpu.pipeline_mode<synchronous>, transform_indices = @transform_4, window_bounds = array<i64: 2, 128>}, {pipeline_mode = #tpu.pipeline_mode<synchronous>, transform_indices = @transform_5, window_bounds = array<i64: 2, 128, 128>}, {pipeline_mode = #tpu.pipeline_mode<synchronous>, transform_indices = @transform_6, window_bounds = array<i64: 2, 128>}, {pipeline_mode = #tpu.pipeline_mode<synchronous>, transform_indices = @transform_7, window_bounds = array<i64: 2, 128, 128>}, {pipeline_mode = #tpu.pipeline_mode<synchronous>, transform_indices = @transform_8, window_bounds = array<i64: 2, 128>}, {pipeline_mode = #tpu.pipeline_mode<synchronous>, transform_indices = @transform_9, window_bounds = array<i64: 2, 128>}, {pipeline_mode = #tpu.pipeline_mode<synchronous>, transform_indices = @transform_10, window_bounds = array<i64: 1, 128>}, {pipeline_mode = #tpu.pipeline_mode<synchronous>, transform_indices = @transform_11, window_bounds = array<i64: 1, 1>}, {transform_indices = @transform_12, window_bounds = array<i64: 1, 1, 128>}]} {
    %0 = arith.index_cast %arg0 : i32 to index
    %1 = memref.load %arg2[%0] : memref<2xi32, #tpu.memory_space<smem>>
    %c128_i32 = arith.constant 128 : i32
    %2 = arith.muli %arg1, %c128_i32 : i32
    %3 = arith.cmpi slt, %2, %1 : i32
    %c0_i32 = arith.constant 0 : i32
    %4 = arith.cmpi eq, %arg1, %c0_i32 : i32
    %5 = arith.andi %4, %3 : i1
    %6 = arith.extui %5 : i1 to i32
    %c0_i32_0 = arith.constant 0 : i32
    %7 = arith.cmpi ne, %6, %c0_i32_0 : i32
    scf.if %7 {
      %c128_i32_6 = arith.constant 128 : i32
      %20 = arith.muli %arg1, %c128_i32_6 : i32
      %21 = tpu.assume_multiple %20, 8 : i32
      %c0_i32_7 = arith.constant 0 : i32
      %c0_i32_8 = arith.constant 0 : i32
      %c0_i32_9 = arith.constant 0 : i32
      %22 = tpu.memref_slice %arg3[%arg0, %21, %c0_i32_9] : memref<2x144x128xbf16, #tpu.memory_space<any>> -> memref<1x144x128xbf16, #tpu.memory_space<any>>
      %23 = tpu.memref_squeeze %22 : memref<1x144x128xbf16, #tpu.memory_space<any>> -> memref<144x128xbf16, #tpu.memory_space<any>>
      %c0_i32_10 = arith.constant 0 : i32
      %c0_i32_11 = arith.constant 0 : i32
      %24 = tpu.memref_slice %arg16[%c0_i32_7, %c0_i32_10, %c0_i32_11] : memref<2x144x128xbf16, #tpu.memory_space<vmem>> -> memref<1x144x128xbf16, #tpu.memory_space<vmem>>
      %25 = tpu.memref_squeeze %24 : memref<1x144x128xbf16, #tpu.memory_space<vmem>> -> memref<144x128xbf16, #tpu.memory_space<vmem>>
      %26 = tpu.memref_slice %arg17[%c0_i32_8] : memref<2x!tpu.dma_semaphore, #tpu.memory_space<semaphore_mem>> -> memref<1x!tpu.dma_semaphore, #tpu.memory_space<semaphore_mem>>
      %27 = tpu.memref_squeeze %26 : memref<1x!tpu.dma_semaphore, #tpu.memory_space<semaphore_mem>> -> memref<!tpu.dma_semaphore, #tpu.memory_space<semaphore_mem>>
      tpu.enqueue_dma source(%23 : memref<144x128xbf16, #tpu.memory_space<any>>) target(%25 : memref<144x128xbf16, #tpu.memory_space<vmem>>) target_semaphore(%27 : memref<!tpu.dma_semaphore, #tpu.memory_space<semaphore_mem>>)
    } else {
    }
    %c1_i32 = arith.constant 1 : i32
    %8 = arith.addi %arg1, %c1_i32 : i32
    %c1_i32_1 = arith.constant 1 : i32
    %9 = arith.cmpi slt, %8, %c1_i32_1 : i32
    %c128_i32_2 = arith.constant 128 : i32
    %10 = arith.muli %8, %c128_i32_2 : i32
    %11 = arith.cmpi slt, %10, %1 : i32
    %12 = arith.andi %9, %11 : i1
    %13 = arith.extui %12 : i1 to i32
    %c0_i32_3 = arith.constant 0 : i32
    %14 = arith.cmpi ne, %13, %c0_i32_3 : i32
    scf.if %14 {
      %c2_i32 = arith.constant 2 : i32
      %c0_i32_6 = arith.constant 0 : i32
      %20 = arith.cmpi eq, %c2_i32, %c0_i32_6 : i32
      %c1_i32_7 = arith.constant 1 : i32
      %21 = arith.select %20, %c1_i32_7, %c2_i32 : i32
      %22 = arith.remsi %8, %21 : i32
      %c0_i32_8 = arith.constant 0 : i32
      %23 = arith.cmpi ne, %22, %c0_i32_8 : i32
      %c0_i32_9 = arith.constant 0 : i32
      %24 = arith.cmpi slt, %22, %c0_i32_9 : i32
      %c0_i32_10 = arith.constant 0 : i32
      %25 = arith.cmpi slt, %21, %c0_i32_10 : i32
      %26 = arith.xori %24, %25 : i1
      %27 = arith.andi %26, %23 : i1
      %28 = arith.addi %22, %21 : i32
      %29 = arith.select %27, %28, %22 : i32
      %c128_i32_11 = arith.constant 128 : i32
      %30 = arith.muli %8, %c128_i32_11 : i32
      %31 = tpu.assume_multiple %30, 8 : i32
      %c0_i32_12 = arith.constant 0 : i32
      %32 = tpu.memref_slice %arg3[%arg0, %31, %c0_i32_12] : memref<2x144x128xbf16, #tpu.memory_space<any>> -> memref<1x144x128xbf16, #tpu.memory_space<any>>
      %33 = tpu.memref_squeeze %32 : memref<1x144x128xbf16, #tpu.memory_space<any>> -> memref<144x128xbf16, #tpu.memory_space<any>>
      %c0_i32_13 = arith.constant 0 : i32
      %c0_i32_14 = arith.constant 0 : i32
      %34 = tpu.memref_slice %arg16[%29, %c0_i32_13, %c0_i32_14] : memref<2x144x128xbf16, #tpu.memory_space<vmem>> -> memref<1x144x128xbf16, #tpu.memory_space<vmem>>
      %35 = tpu.memref_squeeze %34 : memref<1x144x128xbf16, #tpu.memory_space<vmem>> -> memref<144x128xbf16, #tpu.memory_space<vmem>>
      %36 = tpu.memref_slice %arg17[%29] : memref<2x!tpu.dma_semaphore, #tpu.memory_space<semaphore_mem>> -> memref<1x!tpu.dma_semaphore, #tpu.memory_space<semaphore_mem>>
      %37 = tpu.memref_squeeze %36 : memref<1x!tpu.dma_semaphore, #tpu.memory_space<semaphore_mem>> -> memref<!tpu.dma_semaphore, #tpu.memory_space<semaphore_mem>>
      tpu.enqueue_dma source(%33 : memref<144x128xbf16, #tpu.memory_space<any>>) target(%35 : memref<144x128xbf16, #tpu.memory_space<vmem>>) target_semaphore(%37 : memref<!tpu.dma_semaphore, #tpu.memory_space<semaphore_mem>>)
    } else {
    }
    %15 = arith.extui %3 : i1 to i32
    %c0_i32_4 = arith.constant 0 : i32
    %16 = arith.cmpi ne, %15, %c0_i32_4 : i32
    scf.if %16 {
      %c2_i32 = arith.constant 2 : i32
      %c0_i32_6 = arith.constant 0 : i32
      %20 = arith.cmpi eq, %c2_i32, %c0_i32_6 : i32
      %c1_i32_7 = arith.constant 1 : i32
      %21 = arith.select %20, %c1_i32_7, %c2_i32 : i32
      %22 = arith.remsi %arg1, %21 : i32
      %c0_i32_8 = arith.constant 0 : i32
      %23 = arith.cmpi ne, %22, %c0_i32_8 : i32
      %c0_i32_9 = arith.constant 0 : i32
      %24 = arith.cmpi slt, %22, %c0_i32_9 : i32
      %c0_i32_10 = arith.constant 0 : i32
      %25 = arith.cmpi slt, %21, %c0_i32_10 : i32
      %26 = arith.xori %24, %25 : i1
      %27 = arith.andi %26, %23 : i1
      %28 = arith.addi %22, %21 : i32
      %29 = arith.select %27, %28, %22 : i32
      %c0_i32_11 = arith.constant 0 : i32
      %c0_i32_12 = arith.constant 0 : i32
      %30 = tpu.memref_slice %arg3[%arg0, %c0_i32_11, %c0_i32_12] : memref<2x144x128xbf16, #tpu.memory_space<any>> -> memref<1x144x128xbf16, #tpu.memory_space<any>>
      %31 = tpu.memref_squeeze %30 : memref<1x144x128xbf16, #tpu.memory_space<any>> -> memref<144x128xbf16, #tpu.memory_space<any>>
      %c0_i32_13 = arith.constant 0 : i32
      %c0_i32_14 = arith.constant 0 : i32
      %32 = tpu.memref_slice %arg16[%29, %c0_i32_13, %c0_i32_14] : memref<2x144x128xbf16, #tpu.memory_space<vmem>> -> memref<1x144x128xbf16, #tpu.memory_space<vmem>>
      %33 = tpu.memref_squeeze %32 : memref<1x144x128xbf16, #tpu.memory_space<vmem>> -> memref<144x128xbf16, #tpu.memory_space<vmem>>
      %34 = tpu.memref_slice %arg17[%29] : memref<2x!tpu.dma_semaphore, #tpu.memory_space<semaphore_mem>> -> memref<1x!tpu.dma_semaphore, #tpu.memory_space<semaphore_mem>>
      %35 = tpu.memref_squeeze %34 : memref<1x!tpu.dma_semaphore, #tpu.memory_space<semaphore_mem>> -> memref<!tpu.dma_semaphore, #tpu.memory_space<semaphore_mem>>
      tpu.wait_dma2 semaphore(%35 : memref<!tpu.dma_semaphore, #tpu.memory_space<semaphore_mem>>) src(%31 : memref<144x128xbf16, #tpu.memory_space<any>>) dst(%33 : memref<144x128xbf16, #tpu.memory_space<vmem>>)
      %36 = arith.index_cast %29 : i32 to index
      %c0 = arith.constant 0 : index
      %c0_15 = arith.constant 0 : index
      %37 = vector.load %arg16[%36, %c0, %c0_15] : memref<2x144x128xbf16, #tpu.memory_space<vmem>>, vector<1x144x128xbf16>
      %38 = vector.shape_cast %37 : vector<1x144x128xbf16> to vector<144x128xbf16>
      %39 = arith.extf %38 : vector<144x128xbf16> to vector<144x128xf32>
      %c128_i32_16 = arith.constant 128 : i32
      %40 = arith.muli %arg1, %c128_i32_16 : i32
      %c8_i32 = arith.constant 8 : i32
      %41 = arith.subi %40, %c8_i32 : i32
      %42 = tpu.iota {dimensions = array<i32: 0>} : vector<144x1xi32>
      %43 = vector.broadcast %41 : i32 to vector<144x1xi32>
      %44 = arith.addi %43, %42 : vector<144x1xi32>
      %c0_i32_17 = arith.constant 0 : i32
      %45 = vector.broadcast %c0_i32_17 : i32 to vector<144x1xi32>
      %46 = arith.cmpi sge, %44, %45 : vector<144x1xi32>
      %47 = vector.broadcast %1 : i32 to vector<144x1xi32>
      %48 = arith.cmpi slt, %44, %47 : vector<144x1xi32>
      %49 = arith.andi %46, %48 : vector<144x1xi1>
      %50 = arith.extui %49 : vector<144x1xi1> to vector<144x1xi32>
      %51 = arith.sitofp %50 : vector<144x1xi32> to vector<144x1xf32>
      %52 = vector.shape_cast %51 : vector<144x1xf32> to vector<144x1xf32>
      %53 = vector.broadcast %52 : vector<144x1xf32> to vector<144x128xf32>
      %c0_18 = arith.constant 0 : index
      %c0_19 = arith.constant 0 : index
      %c0_20 = arith.constant 0 : index
      %54 = vector.load %arg4[%c0_18, %c0_19, %c0_20] : memref<2x7x128xf32, #tpu.memory_space<vmem>>, vector<1x7x128xf32>
      %55 = vector.shape_cast %54 : vector<1x7x128xf32> to vector<7x128xf32>
      %56 = vector.extract_strided_slice %55 {offsets = [3, 0], sizes = [1, 128], strides = [1, 1]} : vector<7x128xf32> to vector<1x128xf32>
      %57 = vector.broadcast %56 : vector<1x128xf32> to vector<144x128xf32>
      %58 = arith.mulf %39, %57 : vector<144x128xf32>
      %c3_i32 = arith.constant 3 : i32
      %59 = tpu.dynamic_rotate %39 by %c3_i32 dim 0 : vector<144x128xf32>, i32 -> vector<144x128xf32>
      %60 = vector.extract_strided_slice %55 {offsets = [0, 0], sizes = [1, 128], strides = [1, 1]} : vector<7x128xf32> to vector<1x128xf32>
      %61 = vector.broadcast %60 : vector<1x128xf32> to vector<144x128xf32>
      %62 = arith.mulf %59, %61 : vector<144x128xf32>
      %63 = arith.addf %58, %62 : vector<144x128xf32>
      %c2_i32_21 = arith.constant 2 : i32
      %64 = tpu.dynamic_rotate %39 by %c2_i32_21 dim 0 : vector<144x128xf32>, i32 -> vector<144x128xf32>
      %65 = vector.extract_strided_slice %55 {offsets = [1, 0], sizes = [1, 128], strides = [1, 1]} : vector<7x128xf32> to vector<1x128xf32>
      %66 = vector.broadcast %65 : vector<1x128xf32> to vector<144x128xf32>
      %67 = arith.mulf %64, %66 : vector<144x128xf32>
      %68 = arith.addf %63, %67 : vector<144x128xf32>
      %c1_i32_22 = arith.constant 1 : i32
      %69 = tpu.dynamic_rotate %39 by %c1_i32_22 dim 0 : vector<144x128xf32>, i32 -> vector<144x128xf32>
      %70 = vector.extract_strided_slice %55 {offsets = [2, 0], sizes = [1, 128], strides = [1, 1]} : vector<7x128xf32> to vector<1x128xf32>
      %71 = vector.broadcast %70 : vector<1x128xf32> to vector<144x128xf32>
      %72 = arith.mulf %69, %71 : vector<144x128xf32>
      %73 = arith.addf %68, %72 : vector<144x128xf32>
      %c143_i32 = arith.constant 143 : i32
      %74 = tpu.dynamic_rotate %39 by %c143_i32 dim 0 : vector<144x128xf32>, i32 -> vector<144x128xf32>
      %75 = vector.extract_strided_slice %55 {offsets = [4, 0], sizes = [1, 128], strides = [1, 1]} : vector<7x128xf32> to vector<1x128xf32>
      %76 = vector.broadcast %75 : vector<1x128xf32> to vector<144x128xf32>
      %77 = arith.mulf %74, %76 : vector<144x128xf32>
      %78 = arith.addf %73, %77 : vector<144x128xf32>
      %c142_i32 = arith.constant 142 : i32
      %79 = tpu.dynamic_rotate %39 by %c142_i32 dim 0 : vector<144x128xf32>, i32 -> vector<144x128xf32>
      %80 = vector.extract_strided_slice %55 {offsets = [5, 0], sizes = [1, 128], strides = [1, 1]} : vector<7x128xf32> to vector<1x128xf32>
      %81 = vector.broadcast %80 : vector<1x128xf32> to vector<144x128xf32>
      %82 = arith.mulf %79, %81 : vector<144x128xf32>
      %83 = arith.addf %78, %82 : vector<144x128xf32>
      %c141_i32 = arith.constant 141 : i32
      %84 = tpu.dynamic_rotate %39 by %c141_i32 dim 0 : vector<144x128xf32>, i32 -> vector<144x128xf32>
      %85 = vector.extract_strided_slice %55 {offsets = [6, 0], sizes = [1, 128], strides = [1, 1]} : vector<7x128xf32> to vector<1x128xf32>
      %86 = vector.broadcast %85 : vector<1x128xf32> to vector<144x128xf32>
      %87 = arith.mulf %84, %86 : vector<144x128xf32>
      %88 = arith.addf %83, %87 : vector<144x128xf32>
      %c0_23 = arith.constant 0 : index
      %c0_24 = arith.constant 0 : index
      %89 = vector.load %arg5[%c0_23, %c0_24] : memref<2x128xf32, #tpu.memory_space<vmem>>, vector<1x128xf32>
      %90 = vector.shape_cast %89 : vector<1x128xf32> to vector<128xf32>
      %91 = vector.shape_cast %90 : vector<128xf32> to vector<1x128xf32>
      %92 = vector.broadcast %91 : vector<1x128xf32> to vector<144x128xf32>
      %93 = arith.addf %88, %92 : vector<144x128xf32>
      %cst = arith.constant dense<0.000000e+00> : vector<144xf32>
      %94 = vector.multi_reduction <add>, %93, %cst [1] : vector<144x128xf32> to vector<144xf32>
      %95 = vector.shape_cast %94 : vector<144xf32> to vector<144x1xf32>
      %96 = arith.mulf %93, %93 : vector<144x128xf32>
      %cst_25 = arith.constant dense<0.000000e+00> : vector<144xf32>
      %97 = vector.multi_reduction <add>, %96, %cst_25 [1] : vector<144x128xf32> to vector<144xf32>
      %98 = vector.shape_cast %97 : vector<144xf32> to vector<144x1xf32>
      %cst_26 = arith.constant 3.125000e-02 : f32
      %99 = vector.broadcast %cst_26 : f32 to vector<144x1xf32>
      %100 = arith.mulf %95, %99 : vector<144x1xf32>
      %cst_27 = arith.constant 3.125000e-02 : f32
      %101 = vector.broadcast %cst_27 : f32 to vector<144x1xf32>
      %102 = arith.mulf %98, %101 : vector<144x1xf32>
      %103 = arith.mulf %100, %100 : vector<144x1xf32>
      %104 = arith.subf %102, %103 : vector<144x1xf32>
      %105 = vector.broadcast %100 : vector<144x1xf32> to vector<144x128xf32>
      %106 = arith.subf %93, %105 : vector<144x128xf32>
      %cst_28 = arith.constant 9.99999974E-6 : f32
      %107 = vector.broadcast %cst_28 : f32 to vector<144x1xf32>
      %108 = arith.addf %104, %107 : vector<144x1xf32>
      %109 = math.rsqrt %108 : vector<144x1xf32>
      %110 = vector.broadcast %109 : vector<144x1xf32> to vector<144x128xf32>
      %111 = arith.mulf %106, %110 : vector<144x128xf32>
      %c0_29 = arith.constant 0 : index
      %c0_30 = arith.constant 0 : index
      %112 = vector.load %arg6[%c0_29, %c0_30] : memref<2x128xf32, #tpu.memory_space<vmem>>, vector<1x128xf32>
      %113 = vector.shape_cast %112 : vector<1x128xf32> to vector<128xf32>
      %114 = vector.shape_cast %113 : vector<128xf32> to vector<1x128xf32>
      %115 = vector.broadcast %114 : vector<1x128xf32> to vector<144x128xf32>
      %116 = arith.mulf %111, %115 : vector<144x128xf32>
      %c0_31 = arith.constant 0 : index
      %c0_32 = arith.constant 0 : index
      %117 = vector.load %arg7[%c0_31, %c0_32] : memref<2x128xf32, #tpu.memory_space<vmem>>, vector<1x128xf32>
      %118 = vector.shape_cast %117 : vector<1x128xf32> to vector<128xf32>
      %119 = vector.shape_cast %118 : vector<128xf32> to vector<1x128xf32>
      %120 = vector.broadcast %119 : vector<1x128xf32> to vector<144x128xf32>
      %121 = arith.addf %116, %120 : vector<144x128xf32>
      %122 = arith.truncf %121 : vector<144x128xf32> to vector<144x128xbf16>
      %c0_33 = arith.constant 0 : index
      %c0_34 = arith.constant 0 : index
      %c0_35 = arith.constant 0 : index
      %123 = vector.load %arg8[%c0_33, %c0_34, %c0_35] : memref<2x128x128xbf16, #tpu.memory_space<vmem>>, vector<1x128x128xbf16>
      %124 = vector.shape_cast %123 : vector<1x128x128xbf16> to vector<128x128xbf16>
      %cst_36 = arith.constant dense<0.000000e+00> : vector<144x128xf32>
      %125 = tpu.matmul %122, %124, %cst_36 {dimension_numbers = #tpu.dot_dimension_numbers<[1], [0], [0], [1], [0, 0, 1, 1], [], []>} : vector<144x128xbf16>, vector<128x128xbf16>, vector<144x128xf32> -> vector<144x128xf32>
      %c0_37 = arith.constant 0 : index
      %c0_38 = arith.constant 0 : index
      %126 = vector.load %arg9[%c0_37, %c0_38] : memref<2x128xf32, #tpu.memory_space<vmem>>, vector<1x128xf32>
      %127 = vector.shape_cast %126 : vector<1x128xf32> to vector<128xf32>
      %128 = vector.shape_cast %127 : vector<128xf32> to vector<1x128xf32>
      %129 = vector.broadcast %128 : vector<1x128xf32> to vector<144x128xf32>
      %130 = arith.addf %125, %129 : vector<144x128xf32>
      %cst_39 = arith.constant 5.000000e-01 : f32
      %131 = vector.broadcast %cst_39 : f32 to vector<144x128xf32>
      %132 = arith.mulf %131, %130 : vector<144x128xf32>
      %cst_40 = arith.constant 0.707106769 : f32
      %133 = vector.broadcast %cst_40 : f32 to vector<144x128xf32>
      %134 = arith.mulf %130, %133 : vector<144x128xf32>
      %cst_41 = arith.constant 0.000000e+00 : f32
      %135 = vector.broadcast %cst_41 : f32 to vector<144x128xf32>
      %136 = arith.cmpf oge, %134, %135 : vector<144x128xf32>
      %cst_42 = arith.constant 1.000000e+00 : f32
      %cst_43 = arith.constant -1.000000e+00 : f32
      %137 = vector.broadcast %cst_42 : f32 to vector<144x128xf32>
      %138 = vector.broadcast %cst_43 : f32 to vector<144x128xf32>
      %139 = arith.select %136, %137, %138 : vector<144x128xi1>, vector<144x128xf32>
      %140 = math.absf %134 : vector<144x128xf32>
      %cst_44 = arith.constant 0.327591091 : f32
      %141 = vector.broadcast %cst_44 : f32 to vector<144x128xf32>
      %142 = arith.mulf %141, %140 : vector<144x128xf32>
      %cst_45 = arith.constant 1.000000e+00 : f32
      %143 = vector.broadcast %cst_45 : f32 to vector<144x128xf32>
      %144 = arith.addf %143, %142 : vector<144x128xf32>
      %cst_46 = arith.constant 1.000000e+00 : f32
      %145 = vector.broadcast %cst_46 : f32 to vector<144x128xf32>
      %146 = arith.divf %145, %144 : vector<144x128xf32>
      %cst_47 = arith.constant 1.06140542 : f32
      %147 = vector.broadcast %cst_47 : f32 to vector<144x128xf32>
      %148 = arith.mulf %147, %146 : vector<144x128xf32>
      %cst_48 = arith.constant -1.45315206 : f32
      %149 = vector.broadcast %cst_48 : f32 to vector<144x128xf32>
      %150 = arith.addf %148, %149 : vector<144x128xf32>
      %151 = arith.mulf %150, %146 : vector<144x128xf32>
      %cst_49 = arith.constant 1.42141378 : f32
      %152 = vector.broadcast %cst_49 : f32 to vector<144x128xf32>
      %153 = arith.addf %151, %152 : vector<144x128xf32>
      %154 = arith.mulf %153, %146 : vector<144x128xf32>
      %cst_50 = arith.constant -0.284496725 : f32
      %155 = vector.broadcast %cst_50 : f32 to vector<144x128xf32>
      %156 = arith.addf %154, %155 : vector<144x128xf32>
      %157 = arith.mulf %156, %146 : vector<144x128xf32>
      %cst_51 = arith.constant 0.254829586 : f32
      %158 = vector.broadcast %cst_51 : f32 to vector<144x128xf32>
      %159 = arith.addf %157, %158 : vector<144x128xf32>
      %160 = arith.mulf %159, %146 : vector<144x128xf32>
      %cst_52 = arith.constant 0.000000e+00 : f32
      %161 = vector.broadcast %cst_52 : f32 to vector<144x128xf32>
      %162 = arith.subf %161, %140 : vector<144x128xf32>
      %163 = arith.mulf %162, %140 : vector<144x128xf32>
      %164 = math.exp %163 : vector<144x128xf32>
      %165 = arith.mulf %160, %164 : vector<144x128xf32>
      %cst_53 = arith.constant 1.000000e+00 : f32
      %166 = vector.broadcast %cst_53 : f32 to vector<144x128xf32>
      %167 = arith.subf %166, %165 : vector<144x128xf32>
      %168 = arith.mulf %139, %167 : vector<144x128xf32>
      %cst_54 = arith.constant 1.000000e+00 : f32
      %169 = vector.broadcast %cst_54 : f32 to vector<144x128xf32>
      %170 = arith.addf %169, %168 : vector<144x128xf32>
      %171 = arith.mulf %132, %170 : vector<144x128xf32>
      %172 = arith.truncf %171 : vector<144x128xf32> to vector<144x128xbf16>
      %c0_55 = arith.constant 0 : index
      %c0_56 = arith.constant 0 : index
      %c0_57 = arith.constant 0 : index
      %173 = vector.load %arg10[%c0_55, %c0_56, %c0_57] : memref<2x128x128xbf16, #tpu.memory_space<vmem>>, vector<1x128x128xbf16>
      %174 = vector.shape_cast %173 : vector<1x128x128xbf16> to vector<128x128xbf16>
      %cst_58 = arith.constant dense<0.000000e+00> : vector<144x128xf32>
      %175 = tpu.matmul %172, %174, %cst_58 {dimension_numbers = #tpu.dot_dimension_numbers<[1], [0], [0], [1], [0, 0, 1, 1], [], []>} : vector<144x128xbf16>, vector<128x128xbf16>, vector<144x128xf32> -> vector<144x128xf32>
      %c0_59 = arith.constant 0 : index
      %c0_60 = arith.constant 0 : index
      %176 = vector.load %arg11[%c0_59, %c0_60] : memref<2x128xf32, #tpu.memory_space<vmem>>, vector<1x128xf32>
      %177 = vector.shape_cast %176 : vector<1x128xf32> to vector<128xf32>
      %178 = vector.shape_cast %177 : vector<128xf32> to vector<1x128xf32>
      %179 = vector.broadcast %178 : vector<1x128xf32> to vector<144x128xf32>
      %180 = arith.addf %175, %179 : vector<144x128xf32>
      %c0_61 = arith.constant 0 : index
      %c0_62 = arith.constant 0 : index
      %181 = vector.load %arg12[%c0_61, %c0_62] : memref<2x128xf32, #tpu.memory_space<vmem>>, vector<1x128xf32>
      %182 = vector.shape_cast %181 : vector<1x128xf32> to vector<128xf32>
      %183 = vector.shape_cast %182 : vector<128xf32> to vector<1x128xf32>
      %184 = vector.broadcast %183 : vector<1x128xf32> to vector<144x128xf32>
      %185 = arith.mulf %180, %184 : vector<144x128xf32>
      %186 = arith.addf %39, %185 : vector<144x128xf32>
      %187 = arith.mulf %186, %53 : vector<144x128xf32>
      %c1 = arith.constant 1 : index
      %c0_63 = arith.constant 0 : index
      %c0_64 = arith.constant 0 : index
      %188 = vector.load %arg4[%c1, %c0_63, %c0_64] : memref<2x7x128xf32, #tpu.memory_space<vmem>>, vector<1x7x128xf32>
      %189 = vector.shape_cast %188 : vector<1x7x128xf32> to vector<7x128xf32>
      %190 = vector.extract_strided_slice %189 {offsets = [3, 0], sizes = [1, 128], strides = [1, 1]} : vector<7x128xf32> to vector<1x128xf32>
      %191 = vector.broadcast %190 : vector<1x128xf32> to vector<144x128xf32>
      %192 = arith.mulf %187, %191 : vector<144x128xf32>
      %c3_i32_65 = arith.constant 3 : i32
      %193 = tpu.dynamic_rotate %187 by %c3_i32_65 dim 0 : vector<144x128xf32>, i32 -> vector<144x128xf32>
      %194 = vector.extract_strided_slice %189 {offsets = [0, 0], sizes = [1, 128], strides = [1, 1]} : vector<7x128xf32> to vector<1x128xf32>
      %195 = vector.broadcast %194 : vector<1x128xf32> to vector<144x128xf32>
      %196 = arith.mulf %193, %195 : vector<144x128xf32>
      %197 = arith.addf %192, %196 : vector<144x128xf32>
      %c2_i32_66 = arith.constant 2 : i32
      %198 = tpu.dynamic_rotate %187 by %c2_i32_66 dim 0 : vector<144x128xf32>, i32 -> vector<144x128xf32>
      %199 = vector.extract_strided_slice %189 {offsets = [1, 0], sizes = [1, 128], strides = [1, 1]} : vector<7x128xf32> to vector<1x128xf32>
      %200 = vector.broadcast %199 : vector<1x128xf32> to vector<144x128xf32>
      %201 = arith.mulf %198, %200 : vector<144x128xf32>
      %202 = arith.addf %197, %201 : vector<144x128xf32>
      %c1_i32_67 = arith.constant 1 : i32
      %203 = tpu.dynamic_rotate %187 by %c1_i32_67 dim 0 : vector<144x128xf32>, i32 -> vector<144x128xf32>
      %204 = vector.extract_strided_slice %189 {offsets = [2, 0], sizes = [1, 128], strides = [1, 1]} : vector<7x128xf32> to vector<1x128xf32>
      %205 = vector.broadcast %204 : vector<1x128xf32> to vector<144x128xf32>
      %206 = arith.mulf %203, %205 : vector<144x128xf32>
      %207 = arith.addf %202, %206 : vector<144x128xf32>
      %c143_i32_68 = arith.constant 143 : i32
      %208 = tpu.dynamic_rotate %187 by %c143_i32_68 dim 0 : vector<144x128xf32>, i32 -> vector<144x128xf32>
      %209 = vector.extract_strided_slice %189 {offsets = [4, 0], sizes = [1, 128], strides = [1, 1]} : vector<7x128xf32> to vector<1x128xf32>
      %210 = vector.broadcast %209 : vector<1x128xf32> to vector<144x128xf32>
      %211 = arith.mulf %208, %210 : vector<144x128xf32>
      %212 = arith.addf %207, %211 : vector<144x128xf32>
      %c142_i32_69 = arith.constant 142 : i32
      %213 = tpu.dynamic_rotate %187 by %c142_i32_69 dim 0 : vector<144x128xf32>, i32 -> vector<144x128xf32>
      %214 = vector.extract_strided_slice %189 {offsets = [5, 0], sizes = [1, 128], strides = [1, 1]} : vector<7x128xf32> to vector<1x128xf32>
      %215 = vector.broadcast %214 : vector<1x128xf32> to vector<144x128xf32>
      %216 = arith.mulf %213, %215 : vector<144x128xf32>
      %217 = arith.addf %212, %216 : vector<144x128xf32>
      %c141_i32_70 = arith.constant 141 : i32
      %218 = tpu.dynamic_rotate %187 by %c141_i32_70 dim 0 : vector<144x128xf32>, i32 -> vector<144x128xf32>
      %219 = vector.extract_strided_slice %189 {offsets = [6, 0], sizes = [1, 128], strides = [1, 1]} : vector<7x128xf32> to vector<1x128xf32>
      %220 = vector.broadcast %219 : vector<1x128xf32> to vector<144x128xf32>
      %221 = arith.mulf %218, %220 : vector<144x128xf32>
      %222 = arith.addf %217, %221 : vector<144x128xf32>
      %c1_71 = arith.constant 1 : index
      %c0_72 = arith.constant 0 : index
      %223 = vector.load %arg5[%c1_71, %c0_72] : memref<2x128xf32, #tpu.memory_space<vmem>>, vector<1x128xf32>
      %224 = vector.shape_cast %223 : vector<1x128xf32> to vector<128xf32>
      %225 = vector.shape_cast %224 : vector<128xf32> to vector<1x128xf32>
      %226 = vector.broadcast %225 : vector<1x128xf32> to vector<144x128xf32>
      %227 = arith.addf %222, %226 : vector<144x128xf32>
      %cst_73 = arith.constant dense<0.000000e+00> : vector<144xf32>
      %228 = vector.multi_reduction <add>, %227, %cst_73 [1] : vector<144x128xf32> to vector<144xf32>
      %229 = vector.shape_cast %228 : vector<144xf32> to vector<144x1xf32>
      %230 = arith.mulf %227, %227 : vector<144x128xf32>
      %cst_74 = arith.constant dense<0.000000e+00> : vector<144xf32>
      %231 = vector.multi_reduction <add>, %230, %cst_74 [1] : vector<144x128xf32> to vector<144xf32>
      %232 = vector.shape_cast %231 : vector<144xf32> to vector<144x1xf32>
      %cst_75 = arith.constant 3.125000e-02 : f32
      %233 = vector.broadcast %cst_75 : f32 to vector<144x1xf32>
      %234 = arith.mulf %229, %233 : vector<144x1xf32>
      %cst_76 = arith.constant 3.125000e-02 : f32
      %235 = vector.broadcast %cst_76 : f32 to vector<144x1xf32>
      %236 = arith.mulf %232, %235 : vector<144x1xf32>
      %237 = arith.mulf %234, %234 : vector<144x1xf32>
      %238 = arith.subf %236, %237 : vector<144x1xf32>
      %239 = vector.broadcast %234 : vector<144x1xf32> to vector<144x128xf32>
      %240 = arith.subf %227, %239 : vector<144x128xf32>
      %cst_77 = arith.constant 9.99999974E-6 : f32
      %241 = vector.broadcast %cst_77 : f32 to vector<144x1xf32>
      %242 = arith.addf %238, %241 : vector<144x1xf32>
      %243 = math.rsqrt %242 : vector<144x1xf32>
      %244 = vector.broadcast %243 : vector<144x1xf32> to vector<144x128xf32>
      %245 = arith.mulf %240, %244 : vector<144x128xf32>
      %c1_78 = arith.constant 1 : index
      %c0_79 = arith.constant 0 : index
      %246 = vector.load %arg6[%c1_78, %c0_79] : memref<2x128xf32, #tpu.memory_space<vmem>>, vector<1x128xf32>
      %247 = vector.shape_cast %246 : vector<1x128xf32> to vector<128xf32>
      %248 = vector.shape_cast %247 : vector<128xf32> to vector<1x128xf32>
      %249 = vector.broadcast %248 : vector<1x128xf32> to vector<144x128xf32>
      %250 = arith.mulf %245, %249 : vector<144x128xf32>
      %c1_80 = arith.constant 1 : index
      %c0_81 = arith.constant 0 : index
      %251 = vector.load %arg7[%c1_80, %c0_81] : memref<2x128xf32, #tpu.memory_space<vmem>>, vector<1x128xf32>
      %252 = vector.shape_cast %251 : vector<1x128xf32> to vector<128xf32>
      %253 = vector.shape_cast %252 : vector<128xf32> to vector<1x128xf32>
      %254 = vector.broadcast %253 : vector<1x128xf32> to vector<144x128xf32>
      %255 = arith.addf %250, %254 : vector<144x128xf32>
      %256 = arith.truncf %255 : vector<144x128xf32> to vector<144x128xbf16>
      %c1_82 = arith.constant 1 : index
      %c0_83 = arith.constant 0 : index
      %c0_84 = arith.constant 0 : index
      %257 = vector.load %arg8[%c1_82, %c0_83, %c0_84] : memref<2x128x128xbf16, #tpu.memory_space<vmem>>, vector<1x128x128xbf16>
      %258 = vector.shape_cast %257 : vector<1x128x128xbf16> to vector<128x128xbf16>
      %cst_85 = arith.constant dense<0.000000e+00> : vector<144x128xf32>
      %259 = tpu.matmul %256, %258, %cst_85 {dimension_numbers = #tpu.dot_dimension_numbers<[1], [0], [0], [1], [0, 0, 1, 1], [], []>} : vector<144x128xbf16>, vector<128x128xbf16>, vector<144x128xf32> -> vector<144x128xf32>
      %c1_86 = arith.constant 1 : index
      %c0_87 = arith.constant 0 : index
      %260 = vector.load %arg9[%c1_86, %c0_87] : memref<2x128xf32, #tpu.memory_space<vmem>>, vector<1x128xf32>
      %261 = vector.shape_cast %260 : vector<1x128xf32> to vector<128xf32>
      %262 = vector.shape_cast %261 : vector<128xf32> to vector<1x128xf32>
      %263 = vector.broadcast %262 : vector<1x128xf32> to vector<144x128xf32>
      %264 = arith.addf %259, %263 : vector<144x128xf32>
      %cst_88 = arith.constant 5.000000e-01 : f32
      %265 = vector.broadcast %cst_88 : f32 to vector<144x128xf32>
      %266 = arith.mulf %265, %264 : vector<144x128xf32>
      %cst_89 = arith.constant 0.707106769 : f32
      %267 = vector.broadcast %cst_89 : f32 to vector<144x128xf32>
      %268 = arith.mulf %264, %267 : vector<144x128xf32>
      %cst_90 = arith.constant 0.000000e+00 : f32
      %269 = vector.broadcast %cst_90 : f32 to vector<144x128xf32>
      %270 = arith.cmpf oge, %268, %269 : vector<144x128xf32>
      %cst_91 = arith.constant 1.000000e+00 : f32
      %cst_92 = arith.constant -1.000000e+00 : f32
      %271 = vector.broadcast %cst_91 : f32 to vector<144x128xf32>
      %272 = vector.broadcast %cst_92 : f32 to vector<144x128xf32>
      %273 = arith.select %270, %271, %272 : vector<144x128xi1>, vector<144x128xf32>
      %274 = math.absf %268 : vector<144x128xf32>
      %cst_93 = arith.constant 0.327591091 : f32
      %275 = vector.broadcast %cst_93 : f32 to vector<144x128xf32>
      %276 = arith.mulf %275, %274 : vector<144x128xf32>
      %cst_94 = arith.constant 1.000000e+00 : f32
      %277 = vector.broadcast %cst_94 : f32 to vector<144x128xf32>
      %278 = arith.addf %277, %276 : vector<144x128xf32>
      %cst_95 = arith.constant 1.000000e+00 : f32
      %279 = vector.broadcast %cst_95 : f32 to vector<144x128xf32>
      %280 = arith.divf %279, %278 : vector<144x128xf32>
      %cst_96 = arith.constant 1.06140542 : f32
      %281 = vector.broadcast %cst_96 : f32 to vector<144x128xf32>
      %282 = arith.mulf %281, %280 : vector<144x128xf32>
      %cst_97 = arith.constant -1.45315206 : f32
      %283 = vector.broadcast %cst_97 : f32 to vector<144x128xf32>
      %284 = arith.addf %282, %283 : vector<144x128xf32>
      %285 = arith.mulf %284, %280 : vector<144x128xf32>
      %cst_98 = arith.constant 1.42141378 : f32
      %286 = vector.broadcast %cst_98 : f32 to vector<144x128xf32>
      %287 = arith.addf %285, %286 : vector<144x128xf32>
      %288 = arith.mulf %287, %280 : vector<144x128xf32>
      %cst_99 = arith.constant -0.284496725 : f32
      %289 = vector.broadcast %cst_99 : f32 to vector<144x128xf32>
      %290 = arith.addf %288, %289 : vector<144x128xf32>
      %291 = arith.mulf %290, %280 : vector<144x128xf32>
      %cst_100 = arith.constant 0.254829586 : f32
      %292 = vector.broadcast %cst_100 : f32 to vector<144x128xf32>
      %293 = arith.addf %291, %292 : vector<144x128xf32>
      %294 = arith.mulf %293, %280 : vector<144x128xf32>
      %cst_101 = arith.constant 0.000000e+00 : f32
      %295 = vector.broadcast %cst_101 : f32 to vector<144x128xf32>
      %296 = arith.subf %295, %274 : vector<144x128xf32>
      %297 = arith.mulf %296, %274 : vector<144x128xf32>
      %298 = math.exp %297 : vector<144x128xf32>
      %299 = arith.mulf %294, %298 : vector<144x128xf32>
      %cst_102 = arith.constant 1.000000e+00 : f32
      %300 = vector.broadcast %cst_102 : f32 to vector<144x128xf32>
      %301 = arith.subf %300, %299 : vector<144x128xf32>
      %302 = arith.mulf %273, %301 : vector<144x128xf32>
      %cst_103 = arith.constant 1.000000e+00 : f32
      %303 = vector.broadcast %cst_103 : f32 to vector<144x128xf32>
      %304 = arith.addf %303, %302 : vector<144x128xf32>
      %305 = arith.mulf %266, %304 : vector<144x128xf32>
      %306 = arith.truncf %305 : vector<144x128xf32> to vector<144x128xbf16>
      %c1_104 = arith.constant 1 : index
      %c0_105 = arith.constant 0 : index
      %c0_106 = arith.constant 0 : index
      %307 = vector.load %arg10[%c1_104, %c0_105, %c0_106] : memref<2x128x128xbf16, #tpu.memory_space<vmem>>, vector<1x128x128xbf16>
      %308 = vector.shape_cast %307 : vector<1x128x128xbf16> to vector<128x128xbf16>
      %cst_107 = arith.constant dense<0.000000e+00> : vector<144x128xf32>
      %309 = tpu.matmul %306, %308, %cst_107 {dimension_numbers = #tpu.dot_dimension_numbers<[1], [0], [0], [1], [0, 0, 1, 1], [], []>} : vector<144x128xbf16>, vector<128x128xbf16>, vector<144x128xf32> -> vector<144x128xf32>
      %c1_108 = arith.constant 1 : index
      %c0_109 = arith.constant 0 : index
      %310 = vector.load %arg11[%c1_108, %c0_109] : memref<2x128xf32, #tpu.memory_space<vmem>>, vector<1x128xf32>
      %311 = vector.shape_cast %310 : vector<1x128xf32> to vector<128xf32>
      %312 = vector.shape_cast %311 : vector<128xf32> to vector<1x128xf32>
      %313 = vector.broadcast %312 : vector<1x128xf32> to vector<144x128xf32>
      %314 = arith.addf %309, %313 : vector<144x128xf32>
      %c1_110 = arith.constant 1 : index
      %c0_111 = arith.constant 0 : index
      %315 = vector.load %arg12[%c1_110, %c0_111] : memref<2x128xf32, #tpu.memory_space<vmem>>, vector<1x128xf32>
      %316 = vector.shape_cast %315 : vector<1x128xf32> to vector<128xf32>
      %317 = vector.shape_cast %316 : vector<128xf32> to vector<1x128xf32>
      %318 = vector.broadcast %317 : vector<1x128xf32> to vector<144x128xf32>
      %319 = arith.mulf %314, %318 : vector<144x128xf32>
      %320 = arith.addf %187, %319 : vector<144x128xf32>
      %321 = arith.mulf %320, %53 : vector<144x128xf32>
      %322 = vector.extract_strided_slice %321 {offsets = [8, 0], sizes = [128, 128], strides = [1, 1]} : vector<144x128xf32> to vector<128x128xf32>
      %323 = arith.truncf %322 : vector<128x128xf32> to vector<128x128xbf16>
      %c0_112 = arith.constant 0 : index
      %c0_113 = arith.constant 0 : index
      %324 = vector.load %arg13[%c0_112, %c0_113] : memref<1x128xbf16, #tpu.memory_space<vmem>>, vector<1x128xbf16>
      "tpu.trace_start"() <{level = 10 : i32, message = "oc,tc->ot"}> : () -> ()
      %cst_114 = arith.constant dense<0.000000e+00> : vector<1x128xf32>
      %325 = tpu.matmul %324, %323, %cst_114 {dimension_numbers = #tpu.dot_dimension_numbers<[1], [1], [0], [0], [0, 0, 1, 0], [], []>} : vector<1x128xbf16>, vector<128x128xbf16>, vector<1x128xf32> -> vector<1x128xf32>
      "tpu.trace_stop"() : () -> ()
      %c128_i32_115 = arith.constant 128 : i32
      %326 = arith.muli %arg1, %c128_i32_115 : i32
      %327 = tpu.iota {dimensions = array<i32: 1>} : vector<1x128xi32>
      %328 = vector.broadcast %326 : i32 to vector<1x128xi32>
      %329 = arith.addi %328, %327 : vector<1x128xi32>
      %330 = vector.broadcast %1 : i32 to vector<1x128xi32>
      %331 = arith.cmpi slt, %329, %330 : vector<1x128xi32>
      %332 = arith.extui %331 : vector<1x128xi1> to vector<1x128xi32>
      %333 = arith.sitofp %332 : vector<1x128xi32> to vector<1x128xf32>
      %c0_116 = arith.constant 0 : index
      %c0_117 = arith.constant 0 : index
      %334 = vector.load %arg14[%c0_116, %c0_117] : memref<1x1xf32, #tpu.memory_space<vmem>>, vector<1x1xf32>
      %335 = vector.broadcast %334 : vector<1x1xf32> to vector<1x128xf32>
      %336 = arith.addf %325, %335 : vector<1x128xf32>
      %337 = arith.mulf %336, %333 : vector<1x128xf32>
      %c0_118 = arith.constant 0 : index
      %c0_119 = arith.constant 0 : index
      %c0_120 = arith.constant 0 : index
      %338 = vector.load %arg15[%c0_118, %c0_119, %c0_120] : memref<1x1x128xf32, #tpu.memory_space<vmem>>, vector<1x1x128xf32>
      %339 = vector.shape_cast %338 : vector<1x1x128xf32> to vector<1x128xf32>
      %340 = vector.shape_cast %337 : vector<1x128xf32> to vector<1x1x128xf32>
      tpu.vector_store %arg15[%c0_118, %c0_119, %c0_120], %340 {strides = array<i32>} : memref<1x1x128xf32, #tpu.memory_space<vmem>>, vector<1x1x128xf32>,
    } else {
    }
    %true = arith.constant true
    %17 = arith.xori %3, %true : i1
    %18 = arith.extui %17 : i1 to i32
    %c0_i32_5 = arith.constant 0 : i32
    %19 = arith.cmpi ne, %18, %c0_i32_5 : i32
    scf.if %19 {
      %cst = arith.constant 0.000000e+00 : f32
      %20 = vector.broadcast %cst : f32 to vector<1x1x128xf32>
      %c0 = arith.constant 0 : index
      %c0_6 = arith.constant 0 : index
      %c0_7 = arith.constant 0 : index
      %21 = vector.load %arg15[%c0, %c0_6, %c0_7] : memref<1x1x128xf32, #tpu.memory_space<vmem>>, vector<1x1x128xf32>
      tpu.vector_store %arg15[%c0, %c0_6, %c0_7], %20 {strides = array<i32>} : memref<1x1x128xf32, #tpu.memory_space<vmem>>, vector<1x1x128xf32>,
    } else {
    }
    return
  }
  func.func @transform_1(%arg0: i32, %arg1: i32, %arg2: memref<2xi32, #tpu.memory_space<smem>>) -> (i32, i32, i32) {
    %c0_i32 = arith.constant 0 : i32
    %c0_i32_0 = arith.constant 0 : i32
    %c0_i32_1 = arith.constant 0 : i32
    %c0_i32_2 = arith.constant 0 : i32
    return %c0_i32, %c0_i32_0, %c0_i32_1 : i32, i32, i32
  }
  func.func @transform_2(%arg0: i32, %arg1: i32, %arg2: memref<2xi32, #tpu.memory_space<smem>>) -> (i32, i32) {
    %c0_i32 = arith.constant 0 : i32
    %c0_i32_0 = arith.constant 0 : i32
    %c0_i32_1 = arith.constant 0 : i32
    return %c0_i32, %c0_i32_0 : i32, i32
  }
  func.func @transform_3(%arg0: i32, %arg1: i32, %arg2: memref<2xi32, #tpu.memory_space<smem>>) -> (i32, i32) {
    %c0_i32 = arith.constant 0 : i32
    %c0_i32_0 = arith.constant 0 : i32
    %c0_i32_1 = arith.constant 0 : i32
    return %c0_i32, %c0_i32_0 : i32, i32
  }
  func.func @transform_4(%arg0: i32, %arg1: i32, %arg2: memref<2xi32, #tpu.memory_space<smem>>) -> (i32, i32) {
    %c0_i32 = arith.constant 0 : i32
    %c0_i32_0 = arith.constant 0 : i32
    %c0_i32_1 = arith.constant 0 : i32
    return %c0_i32, %c0_i32_0 : i32, i32
  }
  func.func @transform_5(%arg0: i32, %arg1: i32, %arg2: memref<2xi32, #tpu.memory_space<smem>>) -> (i32, i32, i32) {
    %c0_i32 = arith.constant 0 : i32
    %c0_i32_0 = arith.constant 0 : i32
    %c0_i32_1 = arith.constant 0 : i32
    %c0_i32_2 = arith.constant 0 : i32
    return %c0_i32, %c0_i32_0, %c0_i32_1 : i32, i32, i32
  }
  func.func @transform_6(%arg0: i32, %arg1: i32, %arg2: memref<2xi32, #tpu.memory_space<smem>>) -> (i32, i32) {
    %c0_i32 = arith.constant 0 : i32
    %c0_i32_0 = arith.constant 0 : i32
    %c0_i32_1 = arith.constant 0 : i32
    return %c0_i32, %c0_i32_0 : i32, i32
  }
  func.func @transform_7(%arg0: i32, %arg1: i32, %arg2: memref<2xi32, #tpu.memory_space<smem>>) -> (i32, i32, i32) {
    %c0_i32 = arith.constant 0 : i32
    %c0_i32_0 = arith.constant 0 : i32
    %c0_i32_1 = arith.constant 0 : i32
    %c0_i32_2 = arith.constant 0 : i32
    return %c0_i32, %c0_i32_0, %c0_i32_1 : i32, i32, i32
  }
  func.func @transform_8(%arg0: i32, %arg1: i32, %arg2: memref<2xi32, #tpu.memory_space<smem>>) -> (i32, i32) {
    %c0_i32 = arith.constant 0 : i32
    %c0_i32_0 = arith.constant 0 : i32
    %c0_i32_1 = arith.constant 0 : i32
    return %c0_i32, %c0_i32_0 : i32, i32
  }
  func.func @transform_9(%arg0: i32, %arg1: i32, %arg2: memref<2xi32, #tpu.memory_space<smem>>) -> (i32, i32) {
    %c0_i32 = arith.constant 0 : i32
    %c0_i32_0 = arith.constant 0 : i32
    %c0_i32_1 = arith.constant 0 : i32
    return %c0_i32, %c0_i32_0 : i32, i32
  }
  func.func @transform_10(%arg0: i32, %arg1: i32, %arg2: memref<2xi32, #tpu.memory_space<smem>>) -> (i32, i32) {
    %c0_i32 = arith.constant 0 : i32
    %c0_i32_0 = arith.constant 0 : i32
    %c0_i32_1 = arith.constant 0 : i32
    return %c0_i32, %c0_i32_0 : i32, i32
  }
  func.func @transform_11(%arg0: i32, %arg1: i32, %arg2: memref<2xi32, #tpu.memory_space<smem>>) -> (i32, i32) {
    %c0_i32 = arith.constant 0 : i32
    %c0_i32_0 = arith.constant 0 : i32
    %c0_i32_1 = arith.constant 0 : i32
    return %c0_i32, %c0_i32_0 : i32, i32
  }
  func.func @transform_12(%arg0: i32, %arg1: i32, %arg2: memref<2xi32, #tpu.memory_space<smem>>) -> (i32, i32, i32) {
    %c0_i32 = arith.constant 0 : i32
    %c0_i32_0 = arith.constant 0 : i32
    return %arg0, %c0_i32, %arg1 : i32, i32, i32
  }
}

</mosaic_0001>

<bundles_post_ra>
// kernel: variance_predictor_pallas.1
= control target key start
LH: loop header
LB: loop body
LE: loop exit
PB: predicated region body
PF: predicated region fallthrough
CT: control target
= control target key end

     0   :  { %s5468_s30 = smov [#allocation5]   ;;  %s9878_s0 = inlined_call_operand.vmem [shape: s32[2], index: 0, kind: input, shape index: {}]   ;;  %s9879_s1 = inlined_call_operand.vmem [shape: bf16[2,144,128], index: 1, kind: input, shape index: {}]   ;;  %s9880_s2 = inlined_call_operand.vmem [shape: f32[2,7,128], index: 2, kind: input, shape index: {}]   ;;  %s9881_s3 = inlined_call_operand.vmem [shape: f32[2,128], index: 3, kind: input, shape index: {}]   ;;  %s9882_s4 = inlined_call_operand.vmem [shape: f32[2,128], index: 4, kind: input, shape index: {}]   ;;  %s9883_s5 = inlined_call_operand.vmem [shape: f32[2,128], index: 5, kind: input, shape index: {}]   ;;  %s9884_s6 = inlined_call_operand.vmem [shape: bf16[2,128,128], index: 6, kind: input, shape index: {}]   ;;  %s9885_s7 = inlined_call_operand.vmem [shape: f32[2,128], index: 7, kind: input, shape index: {}]   ;;  %s9886_s8 = inlined_call_operand.hbm [shape: bf16[2,128,128], index: 8, kind: input, shape index: {}]   ;;  %s9887_s9 = inlined_call_operand.vmem [shape: f32[2,128], index: 9, kind: input, shape index: {}]   ;;  %s9888_s10 = inlined_call_operand.vmem [shape: f32[2,128], index: 10, kind: input, shape index: {}]   ;;  %s9889_s11 = inlined_call_operand.vmem [shape: bf16[1,128], index: 11, kind: input, shape index: {}]   ;;  %s9890_s13 = inlined_call_operand.hbm [shape: f32[2,1,128], index: 13, kind: output, shape index: {}]   ;;  %s9891_s12 = inlined_call_operand.<no memory space> [shape: f32[1,1], index: 12, kind: input, shape index: {}]  }
   0x1   :  { %9969 = sst [smem:[#allocation51_spill]] %s9879_s1  ;;  %s19_s27 = sshll.u32 %s9878_s0, 4  ;;  %v23_v0 = vstv %s9891_s12  ;;  %s20_s27 = int_to_ptr.vmem [resolvable:$true] %s19_s27 }
   0x2   :  { %9970 = sst [smem:[#allocation52_spill]] %s9880_s2  ;;  %24 = vst [vmem:[#allocation6] sm:$0x1] %v23_v0 }
   0x3   :  { %9971 = sst [smem:[#allocation53_spill]] %s9881_s3 }
   0x4   :  { %9972 = sst [smem:[#allocation54_spill]] %s9882_s4 }
   0x5   :  { %22 = dma.vmem_to_smem %s20_s27, 16, %s5468_s30, [#allocation4] }
   0x6   :  { %5432 = dma.done.wait [#allocation4], 16 }
   0x7   :  { %5433 = vsyncadd [#allocation4], 4294967280 }
   0x8   :  { %27 = sfence }
   0x9   :  { %28 = vsyncpa [#allocation8], 0 }
   0xa   :  { %29 = vsyncpa [#allocation9], 0 }
   0xb   :  { %31 = vsyncpa [#allocation9 + $0x1], 0  ;;  %s5552_s14 = smov 0   ;;  %s5554_s15 = smov 0  }
   0xc   :  { %s5556_s16 = smov 0   ;;  %s5558_s0 = smov 0  }
   0xd   :  { %s5560_s17 = smov 0   ;;  %s5562_s12 = smov 0  }
   0xe LB: > { %s4761_s18 = sadd.s32 4294967295, %s5466_s12   ;;  %s4762_s19 = sadd.s32 4294967294, %s5466_s12   ;;  %s5466_s12 = sphi %s5562_s12, %s37_s12   ;;  %s5462_s17 = sphi %s5560_s17, %s10222_s17   ;;  %s5458_s0 = sphi %s5558_s0, %s10221_s0   ;;  %s5454_s16 = sphi %s5556_s16, %s10220_s16   ;;  %s5450_s15 = sphi %s5554_s15, %s10219_s15   ;;  %s5446_s14 = sphi %s5552_s14, %s10218_s14  }
   0xf   : > { %s49_s20 = sadd.s32 1, %s5462_s17  ;;  %s289_s21 = sadd.s32 1, %s5454_s16 }
  0x10   : > { %p51_p0 = scmp.ge.s32.totalorder %s49_s20, 2  ;;  %p299_p1 = scmp.ne.s32.totalorder %s5454_s16, %s5450_s15 }
  0x11   : > { %p300_p2 = scmp.eq.s32.totalorder %s4761_s18, 1  ;;  %p305_p3 = scmp.ne.s32.totalorder %s5450_s15, %s5446_s14 }
  0x12   : > { %s10224_s20 = smov (%p51_p0, %s49_s20), 0  ;;  %p306_p5 = scmp.eq.s32.totalorder %s4762_s19, 1 }
  0x13   : > { %p5592_p4 = por %p300_p2, %p299_p1  ;;  %s284_s23 = ssub.s32 %s5462_s17, %s10224_s20 }
  0x14   : > { %p4763_p6 = scmp.ge.s32.totalorder %s5466_s12, 1  ;;  %p287_p7 = scmp.eq.s32.totalorder %s284_s23, 0 }
  0x15   : > { %p5599_p8 = por %p306_p5, %p305_p3  ;;  %p313_p9 = scmp.lt.s32.totalorder %s5466_s12, 3 }
  0x16   : > { %s5605_s25 = scalar_select %p287_p7, %s5454_s16, %s289_s21  }
  0x17   : > { %p314_p10 = pnand %p4763_p6, %p313_p9  ;;  %p5045_p11 = scmp.eq.s32.totalorder %s4761_s18, 0 }
  0x18   : > { %s342_s28 = sshll.u32 %s9886_s8, 4  ;;  %s5469_s29 = smov [#allocation7]   ;;  %s343_s28 = int_to_ptr.hbm [resolvable:$true] %s342_s28 }
  0x19   : > { %p5037_p12 = pneg %p314_p10  ;;  %s344_s30 = sshll.u32 %s5469_s29, 4  ;;  %s345_s30 = int_to_ptr.vmem [resolvable:$true] %s344_s30 }
  0x1a   : > { %s5470_s19 = smov 64   ;;  %s5471_s23 = smov 4  }
  0x1b   : > { %p5038_p13 = pnand %p5045_p11, %p5037_p12  ;;  %372 = sbr.rel (%p314_p10) target bundleno = 1641 (0x669), region = 64 }
  0x1d   : > { %5040 = dma.hbm_to_vmem [thread:$0]  (!%p5038_p13), %s343_s28, 2048, %s345_s30, [#allocation8], %s5470_s19, %s5470_s19, %s5471_s23  }
  0x20   : > { %5435 = dma.done.wait (%p5045_p11), [#allocation8], 2048  }
  0x21   : > { %5437 = vsyncadd (%p5045_p11), [#allocation8], 4294965248  ;;  %s405_s18 = sand.u32 1, %s5450_s15   ;;  %s5612_s21 = sld [smem:[#allocation5 + %s5458_s0]] }
  0x22   : > { %s5617_s26 = scalar_lea.vmem [#allocation10], %s405_s18 }
  0x27   : > { %p4767_p0 = scmp.gt.s32.totalorder %s5612_s21, 0 }
  0x28   : > { %s4952_s27 = smul.u32 (%p4767_p0), 72, %s5458_s0  ;;  %s9975_s1 = sld [smem:[#allocation51_spill]] (%p4767_p0) }
  0x29   : > { %414 = sbr.rel (!%p4767_p0) target bundleno = 58 (0x3a), region = 72 }
  0x2e   : > { %s420_s30 = scalar_lea.vmem %s9975_s1, %s4952_s27 }
  0x2f   : > { %v431_v1 = vld [vmem:[%s420_s30] sm:$0xff]  ;;  %v433_v2 = vld [vmem:[%s420_s30 + $0x8] sm:$0xff]  ;;  %v435_v3 = vld [vmem:[%s420_s30 + $0x10] sm:$0xff] }
  0x30   : > { %432 = vst [vmem:[#allocation2 + $0x30] sm:$0xff] %v431_v1  ;;  %v437_v4 = vld [vmem:[%s420_s30 + $0x18] sm:$0xff]  ;;  %v439_v5 = vld [vmem:[%s420_s30 + $0x20] sm:$0xff]  ;;  %v441_v6 = vld [vmem:[%s420_s30 + $0x28] sm:$0xff] }
  0x31   : > { %434 = vst [vmem:[#allocation2] sm:$0xff] %v433_v2  ;;  %v443_v7 = vld [vmem:[%s420_s30 + $0x30] sm:$0xff]  ;;  %v445_v8 = vld [vmem:[%s420_s30 + $0x38] sm:$0xff]  ;;  %v447_v9 = vld [vmem:[%s420_s30 + $0x40] sm:$0xff] }
  0x32   : > { %436 = vst [vmem:[#allocation2 + $0x18] sm:$0xff] %v435_v3 }
  0x33   : > { %438 = vst [vmem:[#allocation2 + $0x10] sm:$0xff] %v437_v4 }
  0x34   : > { %440 = vst [vmem:[#allocation2 + $0x20] sm:$0xff] %v439_v5 }
  0x35   : > { %442 = vst [vmem:[#allocation2 + $0x28] sm:$0xff] %v441_v6 }
  0x36   : > { %444 = vst [vmem:[#allocation2 + $0x40] sm:$0xff] %v443_v7 }
  0x37   : > { %446 = vst [vmem:[#allocation2 + $0x38] sm:$0xff] %v445_v8 }
  0x38   : > { %448 = vst [vmem:[#allocation2 + $0x8] sm:$0xff] %v447_v9 }
  0x39   : > { %454 = vsyncadd [#allocation3], 1152 }
  0x3a PF: > { %p4781_p1 = scmp.le.s32.totalorder %s5612_s21, 0 }
  0x3c   : > { %521 = sbr.rel (%p4781_p1) target bundleno = 1620 (0x654), region = 118 }
  0x41   : > { %5438 = dma.done.wait [#allocation3], 1152 }
  0x42   : > { %5439 = vsyncadd [#allocation3], 4294966144  ;;  %v9892_v10 = vlaneseq  ;;  %v4988_v12 = vld [vmem:[#allocation2 + $0x30] sm:$0xff]   ;;  %v5633_v13 = vld [vmem:[#allocation2 + $0x8] sm:$0xff]   ;;  %s9976_s2 = sld [smem:[#allocation52_spill]] }
  0x43   : > { %v5640_v15 = vunpack.c.l.bf16 %v4988_v12  ;;  %v5642_v16 = vunpack.c.h.bf16 %v4988_v12  ;;  %v5645_v17 = vunpack.c.h.bf16 %v5633_v13  ;;  %v5023_v39 = vld [vmem:[#allocation2] sm:$0xff]   ;;  %s9981_s3 = sld [smem:[#allocation53_spill]] }
  0x44   : > { %v5627_v11 = vshrl.u32 %v9892_v10, 7  ;;  %v5706_v50 = vunpack.c.l.bf16 %v5023_v39  ;;  %v5708_v51 = vunpack.c.h.bf16 %v5023_v39  ;;  %s10003_s4 = sld [smem:[#allocation54_spill]] }
  0x45   : > { %9977 = vst [vmem:[#allocation17_spill] sm:$0xff] %v5642_v16  ;;  %v728_v24 = vrot.slane %v5640_v15, 5  ;;  %v9898_v25 = vrot.slane %v5645_v17, 5  ;;  %v802_v26 = vrot.slane %v5640_v15, 6  ;;  %v9897_v27 = vrot.slane %v5645_v17, 6 }
  0x46   : > { %vm746_vm0 = vcmp.lt.s32.totalorder %v5627_v11, 3  ;;  %vm820_vm1 = vcmp.lt.s32.totalorder %v5627_v11, 2  ;;  %vm894_vm2 = vcmp.lt.s32.totalorder %v5627_v11, 1  ;;  %vm968_vm3 = vcmp.lt.s32.totalorder %v5627_v11, 7  ;;  %9978 = vst [vmem:[#allocation18_spill] sm:$0xff] %v5645_v17 }
  0x47   : > { %vm1042_vm4 = vcmp.lt.s32.totalorder %v5627_v11, 6  ;;  %vm1116_vm5 = vcmp.lt.s32.totalorder %v5627_v11, 5  ;;  %v876_v28 = vrot.slane %v5640_v15, 7  ;;  %v9896_v29 = vrot.slane %v5645_v17, 7  ;;  %9979 = vst [vmem:[#allocation19_spill] sm:$0xff] %v5706_v50 }
  0x48   : > { %v708_v14 = vld [vmem:[%s9976_s2] sm:$0x7f]  ;;  %v9895_v30 = vrot.slane %v5640_v15, 1  ;;  %v764_v31 = vsel %vm746_vm0, %v9898_v25, %v728_v24  ;;  %v951_v32 = vrot.slane %v5642_v16, 1  ;;  %v9894_v33 = vrot.slane %v5640_v15, 2  ;;  %9980 = vst [vmem:[#allocation20_spill] sm:$0xff] %v5708_v51 }
  0x49   : > { %v5647_v18 = vperm.slane %v708_v14, 3  ;;  %v5649_v19 = vperm.slane %v708_v14, 0  ;;  %v5651_v20 = vperm.slane %v708_v14, 1  ;;  %v5653_v21 = vperm.slane %v708_v14, 2 }
  0x4a   : > { %v5655_v22 = vperm.slane %v708_v14, 4  ;;  %v1025_v34 = vrot.slane %v5642_v16, 2  ;;  %v838_v36 = vsel %vm820_vm1, %v9897_v27, %v802_v26  ;;  %v912_v37 = vsel %vm894_vm2, %v9896_v29, %v876_v28 }
  0x4b   : > { %v710_v23 = vmul.f32 %v5640_v15, %v5647_v18  ;;  %v766_v35 = vmul.f32 %v5649_v19, %v764_v31  ;;  %v5684_v38 = vperm.slane %v708_v14, 5  ;;  %v840_v40 = vmul.f32 %v5651_v20, %v838_v36 }
  0x4c   : > { %v914_v41 = vmul.f32 %v5653_v21, %v912_v37  ;;  %v985_v42 = vsel %vm968_vm3, %v9895_v30, %v951_v32  ;;  %v1059_v43 = vsel %vm1042_vm4, %v9894_v33, %v1025_v34  ;;  %v9893_v47 = vrot.slane %v5640_v15, 3 }
  0x4d   : > { %v784_v44 = vadd.f32 %v766_v35, %v710_v23  ;;  %v988_v45 = vmul.f32 %v5655_v22, %v985_v42  ;;  %v1062_v46 = vmul.f32 %v5684_v38, %v1059_v43  ;;  %v1099_v48 = vrot.slane %v5642_v16, 3  ;;  %v5743_v23 = vld [vmem:[%s9981_s3] ss:$0 sm:$0xff] }
  0x4e   : > { %v5704_v49 = vperm.slane %v708_v14, 6  ;;  %v729_v53 = vrot.slane %v5642_v16, 5  ;;  %v803_v54 = vrot.slane %v5642_v16, 6  ;;  %v877_v55 = vrot.slane %v5642_v16, 7 }
  0x4f   : > { %v858_v52 = vadd.f32 %v840_v40, %v784_v44  ;;  %v1133_v56 = vsel %vm1116_vm5, %v9893_v47, %v1099_v48  ;;  %v712_v57 = vmul.f32 %v5706_v50, %v5647_v18  ;;  %v730_v58 = vrot.slane %v5706_v50, 5 }
  0x50   : > { %v804_v59 = vrot.slane %v5706_v50, 6  ;;  %v1136_v61 = vmul.f32 %v5704_v49, %v1133_v56  ;;  %v878_v62 = vrot.slane %v5706_v50, 7  ;;  %v952_v63 = vrot.slane %v5706_v50, 1 }
  0x51   : > { %v932_v60 = vadd.f32 %v914_v41, %v858_v52  ;;  %v762_v0 = vsel %vm746_vm0, %v729_v53, %v730_v58  ;;  %v953_v2 = vrot.slane %v5708_v51, 1  ;;  %v1026_v3 = vrot.slane %v5706_v50, 2 }
  0x52   : > { %v836_v1 = vsel %vm820_vm1, %v803_v54, %v804_v59  ;;  %v768_v5 = vmul.f32 %v5649_v19, %v762_v0  ;;  %v910_v7 = vsel %vm894_vm2, %v877_v55, %v878_v62  ;;  %v1027_v9 = vrot.slane %v5708_v51, 2 }
  0x53   : > { %v1006_v4 = vadd.f32 %v988_v45, %v932_v60  ;;  %v842_v6 = vmul.f32 %v5651_v20, %v836_v1  ;;  %v983_v8 = vsel %vm968_vm3, %v952_v63, %v953_v2  ;;  %v1100_v12 = vrot.slane %v5706_v50, 3  ;;  %v5024_v60 = vld [vmem:[#allocation2 + $0x18] sm:$0xff]  }
  0x54   : > { %v786_v31 = vadd.f32 %v768_v5, %v712_v57  ;;  %v916_v35 = vmul.f32 %v5653_v21, %v910_v7  ;;  %v1101_v36 = vrot.slane %v5708_v51, 3  ;;  %v1057_v37 = vsel %vm1042_vm4, %v1026_v3, %v1027_v9 }
  0x55   : > { %v1080_v14 = vadd.f32 %v1062_v46, %v1006_v4  ;;  %v711_v39 = vmul.f32 %v5642_v16, %v5647_v18  ;;  %v763_v40 = vsel %vm746_vm0, %v728_v24, %v729_v53  ;;  %v837_v41 = vsel %vm820_vm1, %v802_v26, %v803_v54 }
  0x56   : > { %v860_v43 = vadd.f32 %v842_v6, %v786_v31  ;;  %v990_v44 = vmul.f32 %v5655_v22, %v983_v8  ;;  %v1131_v45 = vsel %vm1116_vm5, %v1100_v12, %v1101_v36  ;;  %v1064_v46 = vmul.f32 %v5684_v38, %v1057_v37 }
  0x57   : > { %v1154_v42 = vadd.f32 %v1136_v61, %v1080_v14  ;;  %v767_v52 = vmul.f32 %v5649_v19, %v763_v40  ;;  %v841_v56 = vmul.f32 %v5651_v20, %v837_v41  ;;  %v911_v24 = vsel %vm894_vm2, %v876_v28, %v877_v55 }
  0x58   : > { %v934_v53 = vadd.f32 %v916_v35, %v860_v43  ;;  %v1138_v54 = vmul.f32 %v5704_v49, %v1131_v45  ;;  %v984_v57 = vsel %vm968_vm3, %v951_v32, %v952_v63  ;;  %v915_v0 = vmul.f32 %v5653_v21, %v911_v24 }
  0x59   : > { %v5768_v26 = vadd.f32 %v5743_v23, %v1154_v42  ;;  %v785_v61 = vadd.f32 %v767_v52, %v711_v39  ;;  %v1058_v28 = vsel %vm1042_vm4, %v1025_v34, %v1026_v3  ;;  %v1132_v55 = vsel %vm1116_vm5, %v1099_v48, %v1100_v12 }
  0x5a   : > { %v1008_v1 = vadd.f32 %v990_v44, %v934_v53  ;;  %v989_v32 = vmul.f32 %v5655_v22, %v984_v57  ;;  %v1063_v63 = vmul.f32 %v5684_v38, %v1058_v28  ;;  %v1137_v6 = vmul.f32 %v5704_v49, %v1132_v55 }
  0x5b   : > { %1192 = vadd.xlane.f32.xlu0 %v5768_v26  ;;  %v1228_v4 = vmul.f32 %v5768_v26, %v5768_v26  ;;  %v859_v5 = vadd.f32 %v841_v56, %v785_v61  ;;  %v5788_v7 = vunpack.c.l.bf16 %v5024_v60  ;;  %v731_v34 = vrot.slane %v5708_v51, 5 }
  0x5c   : > { %v1082_v3 = vadd.f32 %v1064_v46, %v1008_v1  ;;  %v713_v48 = vmul.f32 %v5708_v51, %v5647_v18  ;;  %v805_v8 = vrot.slane %v5708_v51, 6  ;;  %v879_v12 = vrot.slane %v5708_v51, 7 }
  0x5d   : > { %9982 = vst [vmem:[#allocation21_spill] sm:$0xff] %v5788_v7  ;;  %1246 = vadd.xlane.f32.xlu1 %v1228_v4  ;;  %v933_v14 = vadd.f32 %v915_v0, %v859_v5  ;;  %v761_v31 = vsel %vm746_vm0, %v730_v58, %v731_v34  ;;  %v954_v35 = vrot.slane %v5788_v7, 1  ;;  %v1028_v37 = vrot.slane %v5788_v7, 2 }
  0x5e   : > { %v1156_v39 = vadd.f32 %v1138_v54, %v1082_v3  ;;  %v769_v40 = vmul.f32 %v5649_v19, %v761_v31  ;;  %v835_v41 = vsel %vm820_vm1, %v804_v59, %v805_v8  ;;  %v909_v42 = vsel %vm894_vm2, %v878_v62, %v879_v12 }
  0x5f   : > { %v1007_v43 = vadd.f32 %v989_v32, %v933_v14  ;;  %v843_v44 = vmul.f32 %v5651_v20, %v835_v41  ;;  %v982_v58 = vsel %vm968_vm3, %v953_v2, %v954_v35  ;;  %v5809_v45 = vunpack.c.h.bf16 %v5024_v60 }
  0x60   : > { %v5812_v46 = vadd.f32 %v5743_v23, %v1156_v39  ;;  %v787_v52 = vadd.f32 %v769_v40, %v713_v48  ;;  %v917_v56 = vmul.f32 %v5653_v21, %v909_v42  ;;  %v1056_v59 = vsel %vm1042_vm4, %v1027_v9, %v1028_v37  ;;  %v5025_v48 = vld [vmem:[#allocation2 + $0x10] sm:$0xff]  }
  0x61   : > { %9983 = vst [vmem:[#allocation22_spill] sm:$0xff] %v5809_v45  ;;  %v1081_v24 = vadd.f32 %v1063_v63, %v1007_v43  ;;  %v991_v62 = vmul.f32 %v5655_v22, %v982_v58  ;;  %v1065_v53 = vmul.f32 %v5684_v38, %v1056_v59  ;;  %v1102_v54 = vrot.slane %v5788_v7, 3 }
  0x62   : > { %1196 = vadd.xlane.f32.xlu2 %v5812_v46  ;;  %v861_v2 = vadd.f32 %v843_v44, %v787_v52  ;;  %v714_v57 = vmul.f32 %v5788_v7, %v5647_v18  ;;  %v732_v60 = vrot.slane %v5788_v7, 5  ;;  %v806_v61 = vrot.slane %v5788_v7, 6 }
  0x63   : > { %v1155_v0 = vadd.f32 %v1137_v6, %v1081_v24  ;;  %v1130_v9 = vsel %vm1116_vm5, %v1101_v36, %v1102_v54  ;;  %v880_v28 = vrot.slane %v5788_v7, 7  ;;  %v955_v55 = vrot.slane %v5809_v45, 1 }
  0x64   : > { %v935_v1 = vadd.f32 %v917_v56, %v861_v2  ;;  %v1230_v4 = vmul.f32 %v5812_v46, %v5812_v46  ;;  %v760_v32 = vsel %vm746_vm0, %v731_v34, %v732_v60  ;;  %v834_v63 = vsel %vm820_vm1, %v805_v8, %v806_v61 }
  0x65   : > { %v5838_v5 = vadd.f32 %v5743_v23, %v1155_v0  ;;  %v770_v6 = vmul.f32 %v5649_v19, %v760_v32  ;;  %v844_v36 = vmul.f32 %v5651_v20, %v834_v63  ;;  %v908_v3 = vsel %vm894_vm2, %v879_v12, %v880_v28 }
  0x66   : > { %v1009_v14 = vadd.f32 %v991_v62, %v935_v1  ;;  %v1139_v31 = vmul.f32 %v5704_v49, %v1130_v9  ;;  %v981_v34 = vsel %vm968_vm3, %v954_v35, %v955_v55  ;;  %v1029_v39 = vrot.slane %v5809_v45, 2 }
  0x67   : > { %1194 = vadd.xlane.f32.xlu0 %v5838_v5  ;;  %v1229_v8 = vmul.f32 %v5838_v5, %v5838_v5  ;;  %v788_v40 = vadd.f32 %v770_v6, %v714_v57  ;;  %v918_v41 = vmul.f32 %v5653_v21, %v908_v3  ;;  %v1103_v42 = vrot.slane %v5809_v45, 3 }
  0x68   : > { %v1083_v12 = vadd.f32 %v1065_v53, %v1009_v14  ;;  %v992_v43 = vmul.f32 %v5655_v22, %v981_v34  ;;  %v1055_v44 = vsel %vm1042_vm4, %v1028_v37, %v1029_v39  ;;  %v5856_v58 = vunpack.c.l.bf16 %v5025_v48 }
  0x69   : > { %1248 = vadd.xlane.f32.xlu1 %v1229_v8  ;;  %v862_v35 = vadd.f32 %v844_v36, %v788_v40  ;;  %v1066_v52 = vmul.f32 %v5684_v38, %v1055_v44  ;;  %v715_v56 = vmul.f32 %v5809_v45, %v5647_v18  ;;  %v733_v59 = vrot.slane %v5809_v45, 5 }
  0x6a   : > { %9984 = vst [vmem:[#allocation23_spill] sm:$0xff] %v5856_v58  ;;  %v1157_v24 = vadd.f32 %v1139_v31, %v1083_v12  ;;  %v1129_v62 = vsel %vm1116_vm5, %v1102_v54, %v1103_v42  ;;  %v807_v53 = vrot.slane %v5809_v45, 6  ;;  %v881_v2 = vrot.slane %v5809_v45, 7 }
  0x6b   : > { %v936_v37 = vadd.f32 %v918_v41, %v862_v35  ;;  %v759_v57 = vsel %vm746_vm0, %v732_v60, %v733_v59  ;;  %v956_v0 = vrot.slane %v5856_v58, 1  ;;  %v1030_v9 = vrot.slane %v5856_v58, 2 }
  0x6c   : > { %v5871_v1 = vadd.f32 %v5743_v23, %v1157_v24  ;;  %v771_v32 = vmul.f32 %v5649_v19, %v759_v57  ;;  %v833_v54 = vsel %vm820_vm1, %v806_v61, %v807_v53  ;;  %v907_v63 = vsel %vm894_vm2, %v880_v28, %v881_v2 }
  0x6d   : > { %v1010_v6 = vadd.f32 %v992_v43, %v936_v37  ;;  %v1140_v36 = vmul.f32 %v5704_v49, %v1129_v62  ;;  %v845_v60 = vmul.f32 %v5651_v20, %v833_v54  ;;  %v980_v3 = vsel %vm968_vm3, %v955_v55, %v956_v0  ;;  %v5026_v54 = vld [vmem:[#allocation2 + $0x20] sm:$0xff]  }
  0x6e   : > { %1198 = vadd.xlane.f32.xlu2 %v5871_v1  ;;  %v1231_v14 = vmul.f32 %v5871_v1, %v5871_v1  ;;  %v789_v31 = vadd.f32 %v771_v32, %v715_v56  ;;  %v919_v34 = vmul.f32 %v5653_v21, %v907_v63  ;;  %v993_v61 = vmul.f32 %v5655_v22, %v980_v3 }
  0x6f   : > { %1250 = vadd.xlane.f32.xlu0 %v1230_v4  ;;  %v1084_v28 = vadd.f32 %v1066_v52, %v1010_v6  ;;  %v1054_v8 = vsel %vm1042_vm4, %v1029_v39, %v1030_v9  ;;  %v1104_v40 = vrot.slane %v5856_v58, 3  ;;  %v5890_v41 = vunpack.c.h.bf16 %v5025_v48 }
  0x70   : > { %v863_v55 = vadd.f32 %v845_v60, %v789_v31  ;;  %v716_v12 = vmul.f32 %v5856_v58, %v5647_v18  ;;  %v734_v43 = vrot.slane %v5856_v58, 5  ;;  %v808_v44 = vrot.slane %v5856_v58, 6 }
  0x71   : > { %9985 = vst [vmem:[#allocation24_spill] sm:$0xff] %v5890_v41  ;;  %v1158_v35 = vadd.f32 %v1140_v36, %v1084_v28  ;;  %1252 = vadd.xlane.f32.xlu1 %v1231_v14  ;;  %v1128_v4 = vsel %vm1116_vm5, %v1103_v42, %v1104_v40  ;;  %v882_v52 = vrot.slane %v5856_v58, 7  ;;  %v957_v39 = vrot.slane %v5890_v41, 1 }
  0x72   : > { %v937_v56 = vadd.f32 %v919_v34, %v863_v55  ;;  %v1067_v48 = vmul.f32 %v5684_v38, %v1054_v8  ;;  %v758_v24 = vsel %vm746_vm0, %v733_v59, %v734_v43  ;;  %v832_v62 = vsel %vm820_vm1, %v807_v53, %v808_v44 }
  0x73   : > { %v5906_v37 = vadd.f32 %v5743_v23, %v1158_v35  ;;  %v772_v57 = vmul.f32 %v5649_v19, %v758_v24  ;;  %v846_v42 = vmul.f32 %v5651_v20, %v832_v62  ;;  %v906_v32 = vsel %vm894_vm2, %v881_v2, %v882_v52 }
  0x74   : > { %v1011_v63 = vadd.f32 %v993_v61, %v937_v56  ;;  %v1141_v6 = vmul.f32 %v5704_v49, %v1128_v4  ;;  %v979_v59 = vsel %vm968_vm3, %v956_v0, %v957_v39  ;;  %v1031_v36 = vrot.slane %v5890_v41, 2 }
  0x75   : > { %v1232_v53 = vmul.f32 %v5906_v37, %v5906_v37  ;;  %v790_v60 = vadd.f32 %v772_v57, %v716_v12  ;;  %v920_v3 = vmul.f32 %v5653_v21, %v906_v32  ;;  %v1105_v14 = vrot.slane %v5890_v41, 3 }
  0x76   : > { %1200 = vadd.xlane.f32.xlu2 %v5906_v37  ;;  %v1085_v2 = vadd.f32 %v1067_v48, %v1011_v63  ;;  %v994_v31 = vmul.f32 %v5655_v22, %v979_v59  ;;  %v1053_v34 = vsel %vm1042_vm4, %v1030_v9, %v1031_v36  ;;  %v5924_v61 = vunpack.c.l.bf16 %v5026_v54 }
  0x77   : > { %v864_v0 = vadd.f32 %v846_v42, %v790_v60  ;;  %v1068_v28 = vmul.f32 %v5684_v38, %v1053_v34  ;;  %v717_v8 = vmul.f32 %v5890_v41, %v5647_v18  ;;  %v735_v55 = vrot.slane %v5890_v41, 5 }
  0x78   : > { %9986 = vst [vmem:[#allocation25_spill] sm:$0xff] %v5924_v61  ;;  %v1159_v12 = vadd.f32 %v1141_v6, %v1085_v2  ;;  %v1127_v35 = vsel %vm1116_vm5, %v1104_v40, %v1105_v14  ;;  %v809_v4 = vrot.slane %v5890_v41, 6  ;;  %v883_v56 = vrot.slane %v5890_v41, 7 }
  0x79   : > { %1254 = vadd.xlane.f32.xlu1 %v1232_v53  ;;  %v938_v9 = vadd.f32 %v920_v3, %v864_v0  ;;  %v757_v48 = vsel %vm746_vm0, %v734_v43, %v735_v55  ;;  %v958_v24 = vrot.slane %v5924_v61, 1  ;;  %v1032_v62 = vrot.slane %v5924_v61, 2 }
  0x7a   : > { %v5939_v57 = vadd.f32 %v5743_v23, %v1159_v12  ;;  %v773_v42 = vmul.f32 %v5649_v19, %v757_v48  ;;  %v831_v40 = vsel %vm820_vm1, %v808_v44, %v809_v4  ;;  %v905_v32 = vsel %vm894_vm2, %v882_v52, %v883_v56 }
  0x7b   : > { %v1012_v63 = vadd.f32 %v994_v31, %v938_v9  ;;  %v1142_v6 = vmul.f32 %v5704_v49, %v1127_v35  ;;  %v847_v43 = vmul.f32 %v5651_v20, %v831_v40  ;;  %v978_v59 = vsel %vm968_vm3, %v957_v39, %v958_v24 }
  0x7c   : > { %1202 = vadd.xlane.f32.xlu0 %v5939_v57  ;;  %v1233_v53 = vmul.f32 %v5939_v57, %v5939_v57  ;;  %v791_v60 = vadd.f32 %v773_v42, %v717_v8  ;;  %v921_v3 = vmul.f32 %v5653_v21, %v905_v32  ;;  %v995_v44 = vmul.f32 %v5655_v22, %v978_v59 }
  0x7d   : > { %v1086_v2 = vadd.f32 %v1068_v28, %v1012_v63  ;;  %v1052_v52 = vsel %vm1042_vm4, %v1031_v36, %v1032_v62  ;;  %v1106_v31 = vrot.slane %v5924_v61, 3  ;;  %v5958_v34 = vunpack.c.h.bf16 %v5026_v54 }
  0x7e   : > { %1256 = vadd.xlane.f32.xlu2 %v1233_v53  ;;  %v865_v39 = vadd.f32 %v847_v43, %v791_v60  ;;  %v718_v0 = vmul.f32 %v5924_v61, %v5647_v18  ;;  %v736_v12 = vrot.slane %v5924_v61, 5  ;;  %v810_v8 = vrot.slane %v5924_v61, 6  ;;  %v5027_v43 = vld [vmem:[#allocation2 + $0x28] sm:$0xff]  }
  0x7f   : > { %9987 = vst [vmem:[#allocation26_spill] sm:$0xff] %v5958_v34  ;;  %v1160_v35 = vadd.f32 %v1142_v6, %v1086_v2  ;;  %v1126_v28 = vsel %vm1116_vm5, %v1105_v14, %v1106_v31  ;;  %v884_v9 = vrot.slane %v5924_v61, 7  ;;  %v959_v36 = vrot.slane %v5958_v34, 1 }
  0x80   : > { %v939_v48 = vadd.f32 %v921_v3, %v865_v39  ;;  %v1069_v54 = vmul.f32 %v5684_v38, %v1052_v52  ;;  %v756_v42 = vsel %vm746_vm0, %v735_v55, %v736_v12  ;;  %v830_v40 = vsel %vm820_vm1, %v809_v4, %v810_v8 }
  0x81   : > { %v5974_v32 = vadd.f32 %v5743_v23, %v1160_v35  ;;  %v774_v63 = vmul.f32 %v5649_v19, %v756_v42  ;;  %v848_v14 = vmul.f32 %v5651_v20, %v830_v40  ;;  %v904_v6 = vsel %vm894_vm2, %v883_v56, %v884_v9 }
  0x82   : > { %v1013_v59 = vadd.f32 %v995_v44, %v939_v48  ;;  %v1143_v53 = vmul.f32 %v5704_v49, %v1126_v28  ;;  %v977_v55 = vsel %vm968_vm3, %v958_v24, %v959_v36  ;;  %v1033_v60 = vrot.slane %v5958_v34, 2 }
  0x83   : > { %v1234_v4 = vmul.f32 %v5974_v32, %v5974_v32  ;;  %v792_v3 = vadd.f32 %v774_v63, %v718_v0  ;;  %v922_v2 = vmul.f32 %v5653_v21, %v904_v6  ;;  %v1107_v52 = vrot.slane %v5958_v34, 3 }
  0x84   : > { %1204 = vadd.xlane.f32.xlu0 %v5974_v32  ;;  %v1087_v56 = vadd.f32 %v1069_v54, %v1013_v59  ;;  %v996_v44 = vmul.f32 %v5655_v22, %v977_v55  ;;  %v1051_v39 = vsel %vm1042_vm4, %v1032_v62, %v1033_v60  ;;  %v5992_v35 = vunpack.c.l.bf16 %v5027_v43 }
  0x85   : > { %v866_v24 = vadd.f32 %v848_v14, %v792_v3  ;;  %v1070_v28 = vmul.f32 %v5684_v38, %v1051_v39  ;;  %v719_v0 = vmul.f32 %v5958_v34, %v5647_v18  ;;  %v737_v48 = vrot.slane %v5958_v34, 5 }
  0x86   : > { %9988 = vst [vmem:[#allocation27_spill] sm:$0xff] %v5992_v35  ;;  %1258 = vadd.xlane.f32.xlu2 %v1234_v4  ;;  %v1161_v42 = vadd.f32 %v1143_v53, %v1087_v56  ;;  %v1125_v54 = vsel %vm1116_vm5, %v1106_v31, %v1107_v52  ;;  %v811_v40 = vrot.slane %v5958_v34, 6  ;;  %v885_v63 = vrot.slane %v5958_v34, 7 }
  0x87   : > { %v940_v62 = vadd.f32 %v922_v2, %v866_v24  ;;  %v755_v14 = vsel %vm746_vm0, %v736_v12, %v737_v48  ;;  %v960_v6 = vrot.slane %v5992_v35, 1  ;;  %v1034_v59 = vrot.slane %v5992_v35, 2 }
  0x88   : > { %v6007_v55 = vadd.f32 %v5743_v23, %v1161_v42  ;;  %v775_v53 = vmul.f32 %v5649_v19, %v755_v14  ;;  %v829_v31 = vsel %vm820_vm1, %v810_v8, %v811_v40  ;;  %v903_v4 = vsel %vm894_vm2, %v884_v9, %v885_v63 }
  0x89   : > { %v1014_v3 = vadd.f32 %v996_v44, %v940_v62  ;;  %v1144_v2 = vmul.f32 %v5704_v49, %v1125_v54  ;;  %v849_v12 = vmul.f32 %v5651_v20, %v829_v31  ;;  %v976_v56 = vsel %vm968_vm3, %v959_v36, %v960_v6 }
  0x8a   : > { %1206 = vadd.xlane.f32.xlu1 %v6007_v55  ;;  %v1235_v39 = vmul.f32 %v6007_v55, %v6007_v55  ;;  %v793_v24 = vadd.f32 %v775_v53, %v719_v0  ;;  %v923_v42 = vmul.f32 %v5653_v21, %v903_v4  ;;  %v997_v8 = vmul.f32 %v5655_v22, %v976_v56 }
  0x8b   : > { %v1088_v14 = vadd.f32 %v1070_v28, %v1014_v3  ;;  %v1050_v9 = vsel %vm1042_vm4, %v1033_v60, %v1034_v59  ;;  %v1108_v44 = vrot.slane %v5992_v35, 3  ;;  %v6026_v54 = vunpack.c.h.bf16 %v5027_v43 }
  0x8c   : > { %1260 = vadd.xlane.f32.xlu0 %v1235_v39  ;;  %v867_v36 = vadd.f32 %v849_v12, %v793_v24  ;;  %v720_v62 = vmul.f32 %v5992_v35, %v5647_v18  ;;  %v738_v31 = vrot.slane %v5992_v35, 5  ;;  %v812_v0 = vrot.slane %v5992_v35, 6 }
  0x8d   : > { %9989 = vst [vmem:[#allocation28_spill] sm:$0xff] %v6026_v54  ;;  %v1162_v53 = vadd.f32 %v1144_v2, %v1088_v14  ;;  %v1124_v28 = vsel %vm1116_vm5, %v1107_v52, %v1108_v44  ;;  %v886_v4 = vrot.slane %v5992_v35, 7  ;;  %v961_v60 = vrot.slane %v6026_v54, 1  ;;  %v5028_v14 = vld [vmem:[#allocation2 + $0x40] sm:$0xff]  }
  0x8e   : > { %v941_v3 = vadd.f32 %v923_v42, %v867_v36  ;;  %v1071_v43 = vmul.f32 %v5684_v38, %v1050_v9  ;;  %v754_v12 = vsel %vm746_vm0, %v737_v48, %v738_v31  ;;  %v828_v56 = vsel %vm820_vm1, %v811_v40, %v812_v0 }
  0x8f   : > { %v6042_v39 = vadd.f32 %v5743_v23, %v1162_v53  ;;  %v776_v2 = vmul.f32 %v5649_v19, %v754_v12  ;;  %v850_v52 = vmul.f32 %v5651_v20, %v828_v56  ;;  %v902_v24 = vsel %vm894_vm2, %v885_v63, %v886_v4 }
  0x90   : > { %v1015_v42 = vadd.f32 %v997_v8, %v941_v3  ;;  %v1145_v9 = vmul.f32 %v5704_v49, %v1124_v28  ;;  %v975_v48 = vsel %vm968_vm3, %v960_v6, %v961_v60  ;;  %v1035_v36 = vrot.slane %v6026_v54, 2 }
  0x91   : > { %v1236_v40 = vmul.f32 %v6042_v39, %v6042_v39  ;;  %v794_v53 = vadd.f32 %v776_v2, %v720_v62  ;;  %v924_v12 = vmul.f32 %v5653_v21, %v902_v24  ;;  %v1109_v56 = vrot.slane %v6026_v54, 3 }
  0x92   : > { %1208 = vadd.xlane.f32.xlu1 %v6042_v39  ;;  %v1089_v63 = vadd.f32 %v1071_v43, %v1015_v42  ;;  %v998_v8 = vmul.f32 %v5655_v22, %v975_v48  ;;  %v1049_v28 = vsel %vm1042_vm4, %v1034_v59, %v1035_v36  ;;  %v6060_v3 = vunpack.c.l.bf16 %v5028_v14 }
  0x93   : > { %v868_v6 = vadd.f32 %v850_v52, %v794_v53  ;;  %v1072_v10 = vmul.f32 %v5684_v38, %v1049_v28  ;;  %v721_v62 = vmul.f32 %v6026_v54, %v5647_v18  ;;  %v739_v2 = vrot.slane %v6026_v54, 5 }
  0x94   : > { %9990 = vst [vmem:[#allocation29_spill] sm:$0xff] %v6060_v3  ;;  %v1163_v24 = vadd.f32 %v1145_v9, %v1089_v63  ;;  %1262 = vadd.xlane.f32.xlu0 %v1236_v40  ;;  %v1123_v43 = vsel %vm1116_vm5, %v1108_v44, %v1109_v56  ;;  %v813_v42 = vrot.slane %v6026_v54, 6  ;;  %v887_v48 = vrot.slane %v6026_v54, 7 }
  0x95   : > { %v942_v59 = vadd.f32 %v924_v12, %v868_v6  ;;  %v753_v52 = vsel %vm746_vm0, %v738_v31, %v739_v2  ;;  %v962_v53 = vrot.slane %v6060_v3, 1  ;;  %v1036_v28 = vrot.slane %v6060_v3, 2 }
  0x96   : > { %v6075_v47 = vadd.f32 %v5743_v23, %v1163_v24  ;;  %v777_v9 = vmul.f32 %v5649_v19, %v753_v52  ;;  %v827_v44 = vsel %vm820_vm1, %v812_v0, %v813_v42  ;;  %v901_v40 = vsel %vm894_vm2, %v886_v4, %v887_v48 }
  0x97   : > { %v1016_v63 = vadd.f32 %v998_v8, %v942_v59  ;;  %v1146_v12 = vmul.f32 %v5704_v49, %v1123_v43  ;;  %v851_v31 = vmul.f32 %v5651_v20, %v827_v44  ;;  %v974_v6 = vsel %vm968_vm3, %v961_v60, %v962_v53 }
  0x98   : > { %1210 = vadd.xlane.f32.xlu2 %v6075_v47  ;;  %v1237_v24 = vmul.f32 %v6075_v47, %v6075_v47  ;;  %v795_v52 = vadd.f32 %v777_v9, %v721_v62  ;;  %v925_v33 = vmul.f32 %v5653_v21, %v901_v40  ;;  %v999_v0 = vmul.f32 %v5655_v22, %v974_v6 }
  0x99   : > { %v1090_v30 = vadd.f32 %v1072_v10, %v1016_v63  ;;  %v1048_v4 = vsel %vm1042_vm4, %v1035_v36, %v1036_v28  ;;  %v1110_v8 = vrot.slane %v6060_v3, 3  ;;  %v6094_v43 = vunpack.c.h.bf16 %v5028_v14 }
  0x9a   : > { %1264 = vadd.xlane.f32.xlu1 %v1237_v24  ;;  %v869_v60 = vadd.f32 %v851_v31, %v795_v52  ;;  %v722_v59 = vmul.f32 %v6060_v3, %v5647_v18  ;;  %v740_v44 = vrot.slane %v6060_v3, 5  ;;  %v814_v62 = vrot.slane %v6060_v3, 6  ;;  %v5029_v52 = vld [vmem:[#allocation2 + $0x38] sm:$0xff]  }
  0x9b   : > { %9991 = vst [vmem:[#allocation30_spill] sm:$0xff] %v6094_v43  ;;  %v1164_v9 = vadd.f32 %v1146_v12, %v1090_v30  ;;  %v1122_v10 = vsel %vm1116_vm5, %v1109_v56, %v1110_v8  ;;  %v888_v40 = vrot.slane %v6060_v3, 7  ;;  %v963_v36 = vrot.slane %v6094_v43, 1 }
  0x9c   : > { %v943_v63 = vadd.f32 %v925_v33, %v869_v60  ;;  %v1073_v14 = vmul.f32 %v5684_v38, %v1048_v4  ;;  %v752_v31 = vsel %vm746_vm0, %v739_v2, %v740_v44  ;;  %v826_v6 = vsel %vm820_vm1, %v813_v42, %v814_v62 }
  0x9d   : > { %v6110_v24 = vadd.f32 %v5743_v23, %v1164_v9  ;;  %v778_v30 = vmul.f32 %v5649_v19, %v752_v31  ;;  %v852_v56 = vmul.f32 %v5651_v20, %v826_v6  ;;  %v900_v12 = vsel %vm894_vm2, %v887_v48, %v888_v40 }
  0x9e   : > { %v1017_v33 = vadd.f32 %v999_v0, %v943_v63  ;;  %v1147_v4 = vmul.f32 %v5704_v49, %v1122_v10  ;;  %v973_v2 = vsel %vm968_vm3, %v962_v53, %v963_v36  ;;  %v1037_v60 = vrot.slane %v6094_v43, 2 }
  0x9f   : > { %v1238_v42 = vmul.f32 %v6110_v24, %v6110_v24  ;;  %v796_v9 = vadd.f32 %v778_v30, %v722_v59  ;;  %v926_v31 = vmul.f32 %v5653_v21, %v900_v12  ;;  %v1111_v6 = vrot.slane %v6094_v43, 3 }
  0xa0   : > { %1212 = vadd.xlane.f32.xlu2 %v6110_v24  ;;  %v1091_v48 = vadd.f32 %v1073_v14, %v1017_v33  ;;  %v1000_v0 = vmul.f32 %v5655_v22, %v973_v2  ;;  %v1047_v10 = vsel %vm1042_vm4, %v1036_v28, %v1037_v60  ;;  %v6128_v63 = vunpack.c.l.bf16 %v5029_v52 }
  0xa1   : > { %v870_v53 = vadd.f32 %v852_v56, %v796_v9  ;;  %v1074_v29 = vmul.f32 %v5684_v38, %v1047_v10  ;;  %v723_v59 = vmul.f32 %v6094_v43, %v5647_v18  ;;  %v741_v30 = vrot.slane %v6094_v43, 5 }
  0xa2   : > { %9992 = vst [vmem:[#allocation31_spill] sm:$0xff] %v6128_v63  ;;  %v1165_v12 = vadd.f32 %v1147_v4, %v1091_v48  ;;  %1266 = vadd.xlane.f32.xlu1 %v1238_v42  ;;  %v1121_v14 = vsel %vm1116_vm5, %v1110_v8, %v1111_v6  ;;  %v815_v33 = vrot.slane %v6094_v43, 6  ;;  %v889_v2 = vrot.slane %v6094_v43, 7 }
  0xa3   : > { %v944_v28 = vadd.f32 %v926_v31, %v870_v53  ;;  %v751_v56 = vsel %vm746_vm0, %v740_v44, %v741_v30  ;;  %v964_v9 = vrot.slane %v6128_v63, 1  ;;  %v1038_v10 = vrot.slane %v6128_v63, 2 }
  0xa4   : > { %v6143_v27 = vadd.f32 %v5743_v23, %v1165_v12  ;;  %v779_v4 = vmul.f32 %v5649_v19, %v751_v56  ;;  %v825_v8 = vsel %vm820_vm1, %v814_v62, %v815_v33  ;;  %v899_v42 = vsel %vm894_vm2, %v888_v40, %v889_v2 }
  0xa5   : > { %v1018_v48 = vadd.f32 %v1000_v0, %v944_v28  ;;  %v1148_v31 = vmul.f32 %v5704_v49, %v1121_v14  ;;  %v853_v44 = vmul.f32 %v5651_v20, %v825_v8  ;;  %v972_v53 = vsel %vm968_vm3, %v963_v36, %v964_v9 }
  0xa6   : > { %1214 = vadd.xlane.f32.xlu0 %v6143_v27  ;;  %v1239_v12 = vmul.f32 %v6143_v27, %v6143_v27  ;;  %v797_v56 = vadd.f32 %v779_v4, %v723_v59  ;;  %v927_v25 = vmul.f32 %v5653_v21, %v899_v42  ;;  %v1001_v62 = vmul.f32 %v5655_v22, %v972_v53 }
  0xa7   : > { %v1092_v43 = vadd.f32 %v1074_v29, %v1018_v48  ;;  %v1046_v40 = vsel %vm1042_vm4, %v1037_v60, %v1038_v10  ;;  %v1112_v0 = vrot.slane %v6128_v63, 3  ;;  %v6162_v14 = vunpack.c.h.bf16 %v5029_v52 }
  0xa8   : > { %1268 = vadd.xlane.f32.xlu2 %v1239_v12  ;;  %v871_v36 = vadd.f32 %v853_v44, %v797_v56  ;;  %v724_v28 = vmul.f32 %v6128_v63, %v5647_v18  ;;  %v742_v8 = vrot.slane %v6128_v63, 5  ;;  %v816_v59 = vrot.slane %v6128_v63, 6 }
  0xa9   : > { %9993 = vst [vmem:[#allocation32_spill] sm:$0xff] %v6162_v14  ;;  %v1166_v4 = vadd.f32 %v1148_v31, %v1092_v43  ;;  %v1120_v29 = vsel %vm1116_vm5, %v1111_v6, %v1112_v0  ;;  %v890_v42 = vrot.slane %v6128_v63, 7  ;;  %v965_v60 = vrot.slane %v6162_v14, 1 }
  0xaa   : > { %v945_v48 = vadd.f32 %v927_v25, %v871_v36  ;;  %v1075_v52 = vmul.f32 %v5684_v38, %v1046_v40  ;;  %v750_v44 = vsel %vm746_vm0, %v741_v30, %v742_v8  ;;  %v824_v53 = vsel %vm820_vm1, %v815_v33, %v816_v59 }
  0xab   : > { %v6178_v12 = vadd.f32 %v5743_v23, %v1166_v4  ;;  %v780_v43 = vmul.f32 %v5649_v19, %v750_v44  ;;  %v854_v6 = vmul.f32 %v5651_v20, %v824_v53  ;;  %v898_v31 = vsel %vm894_vm2, %v889_v2, %v890_v42 }
  0xac   : > { %v1019_v56 = vadd.f32 %v1001_v62, %v945_v48  ;;  %v1149_v25 = vmul.f32 %v5704_v49, %v1120_v29  ;;  %v971_v40 = vsel %vm968_vm3, %v964_v9, %v965_v60  ;;  %v1039_v30 = vrot.slane %v6162_v14, 2 }
  0xad   : > { %v1240_v33 = vmul.f32 %v6178_v12, %v6178_v12  ;;  %v798_v36 = vadd.f32 %v780_v43, %v724_v28  ;;  %v928_v4 = vmul.f32 %v5653_v21, %v898_v31  ;;  %v1113_v44 = vrot.slane %v6162_v14, 3 }
  0xae   : > { %1216 = vadd.xlane.f32.xlu0 %v6178_v12  ;;  %v1093_v53 = vadd.f32 %v1075_v52, %v1019_v56  ;;  %v1002_v2 = vmul.f32 %v5655_v22, %v971_v40  ;;  %v1045_v62 = vsel %vm1042_vm4, %v1038_v10, %v1039_v30  ;;  %v6197_v9 = vunpack.c.l.bf16 %v5633_v13 }
  0xaf   : > { %v872_v29 = vadd.f32 %v854_v6, %v798_v36  ;;  %v1076_v48 = vmul.f32 %v5684_v38, %v1045_v62  ;;  %v725_v28 = vmul.f32 %v6162_v14, %v5647_v18  ;;  %v743_v43 = vrot.slane %v6162_v14, 5 }
  0xb0   : > { %9994 = vst [vmem:[#allocation33_spill] sm:$0xff] %v6197_v9  ;;  %v1167_v31 = vadd.f32 %v1149_v25, %v1093_v53  ;;  %1270 = vadd.xlane.f32.xlu2 %v1240_v33  ;;  %v1119_v52 = vsel %vm1116_vm5, %v1112_v0, %v1113_v44  ;;  %v817_v56 = vrot.slane %v6162_v14, 6  ;;  %v891_v10 = vrot.slane %v6162_v14, 7 }
  0xb1   : > { %v946_v40 = vadd.f32 %v928_v4, %v872_v29  ;;  %v749_v13 = vsel %vm746_vm0, %v742_v8, %v743_v43  ;;  %v966_v6 = vrot.slane %v6197_v9, 1  ;;  %v1040_v36 = vrot.slane %v6197_v9, 2 }
  0xb2   : > { %v6212_v62 = vadd.f32 %v5743_v23, %v1167_v31  ;;  %v781_v25 = vmul.f32 %v5649_v19, %v749_v13  ;;  %v823_v0 = vsel %vm820_vm1, %v816_v59, %v817_v56  ;;  %v897_v33 = vsel %vm894_vm2, %v890_v42, %v891_v10 }
  0xb3   : > { %v1020_v53 = vadd.f32 %v1002_v2, %v946_v40  ;;  %v1150_v4 = vmul.f32 %v5704_v49, %v1119_v52  ;;  %v855_v8 = vmul.f32 %v5651_v20, %v823_v0  ;;  %v970_v29 = vsel %vm968_vm3, %v965_v60, %v966_v6 }
  0xb4   : > { %1218 = vadd.xlane.f32.xlu1 %v6212_v62  ;;  %v1241_v31 = vmul.f32 %v6212_v62, %v6212_v62  ;;  %v799_v13 = vadd.f32 %v781_v25, %v725_v28  ;;  %v929_v14 = vmul.f32 %v5653_v21, %v897_v33  ;;  %v1003_v59 = vmul.f32 %v5655_v22, %v970_v29 }
  0xb5   : > { %v1094_v63 = vadd.f32 %v1076_v48, %v1020_v53  ;;  %v1044_v42 = vsel %vm1042_vm4, %v1039_v30, %v1040_v36  ;;  %v1114_v2 = vrot.slane %v6197_v9, 3  ;;  %v726_v52 = vmul.f32 %v6197_v9, %v5647_v18 }
  0xb6   : > { %1272 = vadd.xlane.f32.xlu0 %v1241_v31  ;;  %v873_v60 = vadd.f32 %v855_v8, %v799_v13  ;;  %v744_v40 = vrot.slane %v6197_v9, 5  ;;  %v818_v0 = vrot.slane %v6197_v9, 6  ;;  %v892_v28 = vrot.slane %v6197_v9, 7 }
  0xb7   : > { %v1168_v25 = vadd.f32 %v1150_v4, %v1094_v63  ;;  %v1118_v48 = vsel %vm1116_vm5, %v1113_v44, %v1114_v2  ;;  %v967_v33 = vrot.slane %v5645_v17, 1  ;;  %v1041_v30 = vrot.slane %v5645_v17, 2 }
  0xb8   : > { %v947_v53 = vadd.f32 %v929_v14, %v873_v60  ;;  %v1077_v29 = vmul.f32 %v5684_v38, %v1044_v42  ;;  %v748_v8 = vsel %vm746_vm0, %v743_v43, %v744_v40  ;;  %v822_v31 = vsel %vm820_vm1, %v817_v56, %v818_v0 }
  0xb9   : > { %v6246_v13 = vadd.f32 %v5743_v23, %v1168_v25  ;;  %v782_v63 = vmul.f32 %v5649_v19, %v748_v8  ;;  %v856_v44 = vmul.f32 %v5651_v20, %v822_v31  ;;  %v896_v4 = vsel %vm894_vm2, %v891_v10, %v892_v28 }
  0xba   : > { %v1021_v9 = vadd.f32 %v1003_v59, %v947_v53  ;;  %v1151_v14 = vmul.f32 %v5704_v49, %v1118_v48  ;;  %v930_v42 = vmul.f32 %v5653_v21, %v896_v4  ;;  %v969_v43 = vsel %vm968_vm3, %v966_v6, %v967_v33 }
  0xbb   : > { %v1242_v56 = vmul.f32 %v6246_v13, %v6246_v13  ;;  %v800_v60 = vadd.f32 %v782_v63, %v726_v52  ;;  %v1004_v25 = vmul.f32 %v5655_v22, %v969_v43  ;;  %v1043_v8 = vsel %vm1042_vm4, %v1040_v36, %v1041_v30 }
  0xbc   : > { %1220 = vadd.xlane.f32.xlu1 %v6246_v13  ;;  %v1095_v10 = vadd.f32 %v1077_v29, %v1021_v9  ;;  %v1115_v59 = vrot.slane %v5645_v17, 3  ;;  %v727_v48 = vmul.f32 %v5645_v17, %v5647_v18  ;;  %v9995_v53 = vrot.slane %v5645_v17, 5 }
  0xbd   : > { %v874_v31 = vadd.f32 %v856_v44, %v800_v60  ;;  %v9996_v63 = vrot.slane %v5645_v17, 6  ;;  %v9997_v9 = vrot.slane %v5645_v17, 7  ;;  %v1078_v18 = vmul.f32 %v5684_v38, %v1043_v8 }
  0xbe   : > { %v747_v6 = vsel %vm746_vm0, %v744_v40, %v9995_v53  ;;  %v1169_v4 = vadd.f32 %v1151_v14, %v1095_v10  ;;  %1274 = vadd.xlane.f32.xlu0 %v1242_v56  ;;  %v1117_v40 = vsel %vm1116_vm5, %v1114_v2, %v1115_v59  ;;  %v9999_v14 = vrot.slane %v5640_v15, 2 }
  0xbf   : > { %v783_v52 = vmul.f32 %v5649_v19, %v747_v6  ;;  %v821_v36 = vsel %vm820_vm1, %v818_v0, %v9996_v63  ;;  %v895_v29 = vsel %vm894_vm2, %v892_v28, %v9997_v9  ;;  %v948_v19 = vadd.f32 %v930_v42, %v874_v31 }
  0xc0   : > { %v857_v44 = vmul.f32 %v5651_v20, %v821_v36  ;;  %v931_v60 = vmul.f32 %v5653_v21, %v895_v29  ;;  %v9998_v0 = vrot.slane %v5640_v15, 1  ;;  %v6288_v28 = vadd.f32 %v5743_v23, %v1169_v4  ;;  %v4962_v36 = vld [vmem:[%s9884_s6 + $0x38] sm:$0xff] }
  0xc1   : > { %v801_v43 = vadd.f32 %v783_v52, %v727_v48  ;;  %v1060_v56 = vsel %vm1042_vm4, %v1041_v30, %v9999_v14  ;;  %v1022_v2 = vadd.f32 %v1004_v25, %v948_v19  ;;  %v1152_v20 = vmul.f32 %v5704_v49, %v1117_v40  ;;  %1703 = vmatpush.bf16.msra.mxu0 %v4962_v36  ;;  %v4958_v14 = vld [vmem:[%s9884_s6 + $0x18] sm:$0xff] }
  0xc2   : > { %v986_v53 = vsel %vm968_vm3, %v967_v33, %v9998_v0  ;;  %1222 = vadd.xlane.f32.xlu2 %v6288_v28  ;;  %v1243_v21 = vmul.f32 %v6288_v28, %v6288_v28  ;;  %v10000_v33 = vrot.slane %v5640_v15, 3  ;;  %v1079_v30 = vmul.f32 %v5684_v38, %v1060_v56 }
  0xc3   : > { %v875_v42 = vadd.f32 %v857_v44, %v801_v43  ;;  %v1005_v8 = vmul.f32 %v5655_v22, %v986_v53  ;;  %v1096_v48 = vadd.f32 %v1078_v18, %v1022_v2 }
  0xc4   : > { %v1134_v10 = vsel %vm1116_vm5, %v1115_v59, %v10000_v33  ;;  %1276 = vadd.xlane.f32.xlu1 %v1243_v21 }
  0xc5   : > { %v949_v6 = vadd.f32 %v931_v60, %v875_v42  ;;  %v1170_v25 = vadd.f32 %v1152_v20, %v1096_v48  ;;  %v1153_v52 = vmul.f32 %v5704_v49, %v1134_v10  ;;  %v4961_v49 = vld [vmem:[%s9884_s6 + $0x30] sm:$0xff]  ;;  %v4959_v60 = vld [vmem:[%s9884_s6 + $0x20] sm:$0xff] }
  0xc6   : > { %1704 = vmatpush.bf16.msra.mxu0 %v4961_v49  ;;  %v4957_v20 = vld [vmem:[%s9884_s6 + $0x10] sm:$0xff]  ;;  %v4955_v49 = vld [vmem:[%s9884_s6] sm:$0xff] }
  0xc7   : > { %v1023_v31 = vadd.f32 %v1005_v8, %v949_v6  ;;  %v6306_v22 = vadd.f32 %v5743_v23, %v1170_v25  ;;  %v4956_v6 = vld [vmem:[%s9884_s6 + $0x8] sm:$0xff] }
  0xc9   : > { %v1097_v63 = vadd.f32 %v1079_v30, %v1023_v31  ;;  %v1244_v59 = vmul.f32 %v6306_v22, %v6306_v22 }
  0xca   : > { %1224 = vadd.xlane.f32.xlu2 %v6306_v22 }
  0xcb   : > { %v1171_v9 = vadd.f32 %v1153_v52, %v1097_v63 }
  0xcc   : > { %1278 = vadd.xlane.f32.xlu1 %v1244_v59 }
  0xcd   : > { %v6315_v38 = vadd.f32 %v5743_v23, %v1171_v9  ;;  %v4960_v23 = vld [vmem:[%s9884_s6 + $0x28] sm:$0xff] }
  0xce   : > { %v1193_v29 = vpop.xlane.xlu0 %1192  ;;  %1705 = vmatpush.bf16.msra.mxu0 %v4960_v23 }
  0xcf   : > { %1226 = vadd.xlane.f32.xlu0 %v6315_v38  ;;  %v1245_v4 = vmul.f32 %v6315_v38, %v6315_v38  ;;  %v6323_v18 = vmul.f32 0.03125, %v1193_v29 }
  0xd0   : > { %v1247_v40 = vpop.xlane.xlu1 %1246 }
  0xd1   : > { %v1318_v44 = vmul.f32 %v6323_v18, %v6323_v18  ;;  %v1300_v19 = vmul.f32 0.03125, %v1247_v40 }
  0xd2   : > { %1280 = vadd.xlane.f32.xlu2 %v1245_v4  ;;  %1706 = vmatpush.bf16.msra.mxu0 %v4959_v60 }
  0xd3   : > { %v1336_v43 = vsub.f32 %v1300_v19, %v1318_v44 }
  0xd5   : > { %v1372_v0 = vadd.f32 1e-05, %v1336_v43  ;;  %v1197_v53 = vpop.xlane.xlu2 %1196 }
  0xd6   : > { %1707 = vmatpush.bf16.msra.mxu0 %v4958_v14  ;;  %v6343_v21 = vmul.f32 0.03125, %v1197_v53 }
  0xd7   : > { %5117 = vrsqrt.f32 %v1372_v0  ;;  %vm1396_vm7 = vweird.f32 %v1372_v0 }
  0xd8   : > { %v1320_v31 = vmul.f32 %v6343_v21, %v6343_v21 }
  0xda   : > { %v1195_v56 = vpop.xlane.xlu0 %1194  ;;  %1708 = vmatpush.bf16.msra.mxu0 %v4957_v20 }
  0xdb   : > { %v6336_v2 = vmul.f32 0.03125, %v1195_v56 }
  0xdc   : > { %v1249_v8 = vpop.xlane.xlu1 %1248 }
  0xdd   : > { %v6341_v42 = vpop.eup %5117  ;;  %v1319_v10 = vmul.f32 %v6336_v2, %v6336_v2  ;;  %v1301_v48 = vmul.f32 0.03125, %v1249_v8 }
  0xde   : > { %v1391_v33 = vmul.f32 %v6341_v42, %v1372_v0  ;;  %1709 = vmatpush.bf16.msra.mxu0 %v4956_v6  ;;  %vm1397_vm6 = vweird.f32 %v6341_v42  ;;  %v1354_v0 = vsub.f32 %v5768_v26, %v6323_v18  ;;  %v6401_v26 = vld [vmem:[%s10003_s4] ss:$0 sm:$0xff]  ;;  %v1355_v18 = vsub.f32 %v5838_v5, %v6336_v2 }
  0xdf   : > { %v1337_v25 = vsub.f32 %v1301_v48, %v1319_v10  ;;  %vm6375_vm8 = vmor %vm1396_vm7, %vm1397_vm6 }
  0xe0   : > { %v1392_v30 = vmul.f32 %v6341_v42, %v1391_v33 }
  0xe1   : > { %v1199_v52 = vpop.xlane.xlu2 %1198  ;;  %v1373_v36 = vadd.f32 1e-05, %v1337_v25 }
  0xe2   : > { %v6354_v63 = vmul.f32 0.03125, %v1199_v52  ;;  %v1251_v9 = vpop.xlane.xlu0 %1250  ;;  %v1393_v29 = vmul.f32 0.5, %v1392_v30  ;;  %1710 = vmatpush.bf16.msra.mxu0 %v4955_v49 }
  0xe3   : > { %v1302_v59 = vmul.f32 0.03125, %v1251_v9  ;;  %5119 = vrsqrt.f32 %v1373_v36  ;;  %vm1406_vm10 = vweird.f32 %v1373_v36 }
  0xe4   : > { %v1321_v4 = vmul.f32 %v6354_v63, %v6354_v63  ;;  %v1253_v40 = vpop.xlane.xlu1 %1252  ;;  %v1394_v60 = vsub.f32 1.5, %v1393_v29 }
  0xe5   : > { %v1338_v23 = vsub.f32 %v1302_v59, %v1320_v31  ;;  %v1303_v44 = vmul.f32 0.03125, %v1253_v40 }
  0xe6   : > { %v1395_v33 = vmul.f32 %v6341_v42, %v1394_v60 }
  0xe7   : > { %v6361_v19 = vadd.f32 1e-05, %v1338_v23  ;;  %v1339_v43 = vsub.f32 %v1303_v44, %v1321_v4 }
  0xe8   : > { %v1399_v4 = vsel %vm6375_vm8, %v6341_v42, %v1395_v33 }
  0xe9   : > { %5121 = vrsqrt.f32 %v6361_v19  ;;  %v1201_v53 = vpop.xlane.xlu2 %1200  ;;  %v6364_v14 = vadd.f32 1e-05, %v1339_v43  ;;  %v5120_v56 = vpop.eup %5119  ;;  %vm1416_vm6 = vweird.f32 %v6361_v19 }
  0xea   : > { %v6366_v20 = vmul.f32 0.03125, %v1201_v53  ;;  %v1401_v8 = vmul.f32 %v5120_v56, %v1373_v36  ;;  %vm1407_vm9 = vweird.f32 %v5120_v56 }
  0xeb   : > { %5123 = vrsqrt.f32 %v6364_v14  ;;  %vm1408_vm11 = vmor %vm1406_vm10, %vm1407_vm9  ;;  %vm1426_vm12 = vweird.f32 %v6364_v14 }
  0xec   : > { %v1322_v10 = vmul.f32 %v6366_v20, %v6366_v20  ;;  %v1255_v48 = vpop.xlane.xlu1 %1254  ;;  %v1402_v6 = vmul.f32 %v5120_v56, %v1401_v8 }
  0xed   : > { %v1304_v30 = vmul.f32 0.03125, %v1255_v48 }
  0xee   : > { %v1403_v52 = vmul.f32 0.5, %v1402_v6 }
  0xef   : > { %v6373_v25 = vpop.eup %5121  ;;  %v1203_v9 = vpop.xlane.xlu0 %1202  ;;  %v1340_v59 = vsub.f32 %v1304_v30, %v1322_v10  ;;  %v1570_v10 = vmul.f32 %v1399_v4, %v1354_v0  ;;  %v6412_v4 = vld [vmem:[%s9883_s5] ss:$0 sm:$0xff] }
  0xf0   : > { %v1411_v49 = vmul.f32 %v6373_v25, %v6361_v19  ;;  %v6381_v29 = vmul.f32 0.03125, %v1203_v9  ;;  %v1404_v23 = vsub.f32 1.5, %v1403_v52  ;;  %vm1417_vm14 = vweird.f32 %v6373_v25 }
  0xf1   : > { %v6386_v40 = vpop.eup %5123  ;;  %v1257_v44 = vpop.xlane.xlu2 %1256  ;;  %v6390_v43 = vadd.f32 1e-05, %v1340_v59  ;;  %vm1418_vm7 = vmor %vm1416_vm6, %vm1417_vm14 }
  0xf2   : > { %v1412_v60 = vmul.f32 %v6373_v25, %v1411_v49  ;;  %v1421_v53 = vmul.f32 %v6386_v40, %v6364_v14  ;;  %v1323_v8 = vmul.f32 %v6381_v29, %v6381_v29  ;;  %v1405_v42 = vmul.f32 %v5120_v56, %v1404_v23 }
  0xf3   : > { %v1305_v33 = vmul.f32 0.03125, %v1257_v44  ;;  %5125 = vrsqrt.f32 %v6390_v43  ;;  %v1590_v49 = vmul.f32 %v6401_v26, %v1570_v10  ;;  %vm1427_vm13 = vweird.f32 %v6386_v40 }
  0xf4   : > { %v1413_v36 = vmul.f32 0.5, %v1412_v60  ;;  %v1422_v48 = vmul.f32 %v6386_v40, %v1421_v53  ;;  %v1409_v30 = vsel %vm1408_vm11, %v5120_v56, %v1405_v42  ;;  %vm6431_vm15 = vmor %vm1426_vm12, %vm1427_vm13  ;;  %vm1436_vm10 = vweird.f32 %v6390_v43 }
  0xf5   : > { %v1341_v6 = vsub.f32 %v1305_v33, %v1323_v8  ;;  %v1571_v52 = vmul.f32 %v1409_v30, %v1355_v18  ;;  %v1610_v33 = vadd.f32 %v6412_v4, %v1590_v49  ;;  %v1357_v49 = vsub.f32 %v5871_v1, %v6354_v63 }
  0xf6   : > { %v1423_v31 = vmul.f32 0.5, %v1422_v48  ;;  %v1414_v0 = vsub.f32 1.5, %v1413_v36 }
  0xf7   : > { %v6406_v9 = vadd.f32 1e-05, %v1341_v6  ;;  %v1205_v59 = vpop.xlane.xlu0 %1204  ;;  %v1591_v23 = vmul.f32 %v6401_v26, %v1571_v52 }
  0xf8   : > { %v1424_v5 = vsub.f32 1.5, %v1423_v31  ;;  %v6414_v2 = vmul.f32 0.03125, %v1205_v59  ;;  %v1415_v14 = vmul.f32 %v6373_v25, %v1414_v0 }
  0xf9   : > { %v6417_v44 = vpop.eup %5125  ;;  %5127 = vrsqrt.f32 %v6406_v9  ;;  %v1259_v56 = vpop.xlane.xlu2 %1258  ;;  %v1611_v10 = vadd.f32 %v6412_v4, %v1591_v23  ;;  %vm1446_vm8 = vweird.f32 %v6406_v9 }
  0xfa   : > { %v1425_v60 = vmul.f32 %v6386_v40, %v1424_v5  ;;  %v1431_v53 = vmul.f32 %v6417_v44, %v6390_v43  ;;  %v1324_v8 = vmul.f32 %v6414_v2, %v6414_v2  ;;  %v1306_v42 = vmul.f32 0.03125, %v1259_v56 }
  0xfb   : > { %v1628_v6 = vpack.c.bf16 %v1611_v10, %v1610_v33  ;;  %v1419_v56 = vsel %vm1418_vm7, %v6373_v25, %v1415_v14  ;;  %vm1437_vm11 = vweird.f32 %v6417_v44 }
  0xfc   : > { %v1342_v36 = vsub.f32 %v1306_v42, %v1324_v8  ;;  %v1432_v30 = vmul.f32 %v6417_v44, %v1431_v53  ;;  %v1429_v52 = vsel %vm6431_vm15, %v6386_v40, %v1425_v60  ;;  %v1356_v53 = vsub.f32 %v5812_v46, %v6343_v21  ;;  %vm1438_vm13 = vmor %vm1436_vm10, %vm1437_vm11 }
  0xfd   : > { %v1207_v48 = vpop.xlane.xlu1 %1206  ;;  %1711 = vmatmul.bf16.vlgmr.msra.gmra.mxu0 %v1628_v6  ;;  %v1573_v60 = vmul.f32 %v1429_v52, %v1357_v49 }
  0xfe   : > { %v6437_v31 = vmul.f32 0.03125, %v1207_v48  ;;  %v6444_v0 = vadd.f32 1e-05, %v1342_v36  ;;  %v1433_v42 = vmul.f32 0.5, %v1432_v30  ;;  %v1572_v63 = vmul.f32 %v1419_v56, %v1356_v53 }
  0xff   : > { %v5128_v59 = vpop.eup %5127  ;;  %v1261_v5 = vpop.xlane.xlu0 %1260  ;;  %v1593_v36 = vmul.f32 %v6401_v26, %v1573_v60 }
 0x100   : > { %v1441_v23 = vmul.f32 %v5128_v59, %v6406_v9  ;;  %v1325_v19 = vmul.f32 %v6437_v31, %v6437_v31  ;;  %v1307_v40 = vmul.f32 0.03125, %v1261_v5  ;;  %5129 = vrsqrt.f32 %v6444_v0 }
 0x101   : > { %v1434_v6 = vsub.f32 1.5, %v1433_v42  ;;  %v1592_v21 = vmul.f32 %v6401_v26, %v1572_v63  ;;  %vm1447_vm9 = vweird.f32 %v5128_v59  ;;  %v1613_v49 = vadd.f32 %v6412_v4, %v1593_v36 }
 0x102   : > { %v1442_v8 = vmul.f32 %v5128_v59, %v1441_v23  ;;  %v1343_v1 = vsub.f32 %v1307_v40, %v1325_v19  ;;  %vm6469_vm12 = vmor %vm1446_vm8, %vm1447_vm9  ;;  %v1358_v36 = vsub.f32 %v5906_v37, %v6366_v20  ;;  %vm1456_vm6 = vweird.f32 %v6444_v0 }
 0x103   : > { %v1435_v23 = vmul.f32 %v6417_v44, %v1434_v6  ;;  %v1612_v53 = vadd.f32 %v6412_v4, %v1592_v21 }
 0x104   : > { %v1443_v33 = vmul.f32 0.5, %v1442_v8  ;;  %v6453_v10 = vadd.f32 1e-05, %v1343_v1 }
 0x105   : > { %v1209_v18 = vpop.xlane.xlu1 %1208  ;;  %v1629_v43 = vpack.c.bf16 %v1613_v49, %v1612_v53 }
 0x106   : > { %v1444_v48 = vsub.f32 1.5, %v1443_v33  ;;  %v6456_v25 = vmul.f32 0.03125, %v1209_v18  ;;  %5131 = vrsqrt.f32 %v6453_v10  ;;  %v6463_v30 = vpop.eup %5129  ;;  %v1439_v33 = vsel %vm1438_vm13, %v6417_v44, %v1435_v23 }
 0x107   : > { %v1263_v46 = vpop.xlane.xlu0 %1262  ;;  %v1451_v40 = vmul.f32 %v6463_v30, %v6444_v0  ;;  %v1574_v49 = vmul.f32 %v1439_v33, %v1358_v36  ;;  %vm1466_vm14 = vweird.f32 %v6453_v10  ;;  %vm1457_vm7 = vweird.f32 %v6463_v30 }
 0x108   : > { %v1326_v14 = vmul.f32 %v6456_v25, %v6456_v25  ;;  %v1308_v52 = vmul.f32 0.03125, %v1263_v46  ;;  %v1445_v5 = vmul.f32 %v5128_v59, %v1444_v48  ;;  %v1359_v48 = vsub.f32 %v5939_v57, %v6381_v29  ;;  %vm6529_vm9 = vmor %vm1456_vm6, %vm1457_vm7 }
 0x109   : > { %v1452_v21 = vmul.f32 %v6463_v30, %v1451_v40  ;;  %v1594_v29 = vmul.f32 %v6401_v26, %v1574_v49 }
 0x10a   : > { %v1344_v56 = vsub.f32 %v1308_v52, %v1326_v14  ;;  %v1449_v18 = vsel %vm6469_vm12, %v5128_v59, %v1445_v5 }
 0x10b   : > { %v1211_v9 = vpop.xlane.xlu2 %1210  ;;  %v1575_v44 = vmul.f32 %v1449_v18, %v1359_v48  ;;  %v1453_v20 = vmul.f32 0.5, %v1452_v21 }
 0x10c   : > { %v6476_v60 = vmul.f32 0.03125, %v1211_v9  ;;  %v6478_v8 = vpop.eup %5131  ;;  %v6491_v6 = vadd.f32 1e-05, %v1344_v56 }
 0x10d   : > { %v1265_v42 = vpop.xlane.xlu1 %1264  ;;  %v1461_v1 = vmul.f32 %v6478_v8, %v6453_v10  ;;  %1716 = vmatmul.bf16.gmra.mxu0 %v1629_v43  ;;  %v1595_v19 = vmul.f32 %v6401_v26, %v1575_v44  ;;  %v1454_v40 = vsub.f32 1.5, %v1453_v20  ;;  %vm1467_vm15 = vweird.f32 %v6478_v8 }
 0x10e   : > { %v1327_v63 = vmul.f32 %v6476_v60, %v6476_v60  ;;  %v1309_v46 = vmul.f32 0.03125, %v1265_v42  ;;  %5133 = vrsqrt.f32 %v6491_v6  ;;  %vm6518_vm8 = vmor %vm1466_vm14, %vm1467_vm15  ;;  %vm1476_vm12 = vweird.f32 %v6491_v6 }
 0x10f   : > { %v1462_v14 = vmul.f32 %v6478_v8, %v1461_v1  ;;  %v1615_v33 = vadd.f32 %v6412_v4, %v1595_v19  ;;  %v1455_v21 = vmul.f32 %v6463_v30, %v1454_v40 }
 0x110   : > { %v1345_v52 = vsub.f32 %v1309_v46, %v1327_v63  ;;  %v1614_v63 = vadd.f32 %v6412_v4, %v1594_v29  ;;  %v1361_v29 = vsub.f32 %v6007_v55, %v6437_v31 }
 0x111   : > { %v1463_v23 = vmul.f32 0.5, %v1462_v14 }
 0x112   : > { %v6496_v59 = vadd.f32 1e-05, %v1345_v52 }
 0x113   : > { %v1213_v37 = vpop.xlane.xlu2 %1212  ;;  %v1464_v9 = vsub.f32 1.5, %v1463_v23 }
 0x114   : > { %v6498_v5 = vmul.f32 0.03125, %v1213_v37  ;;  %5135 = vrsqrt.f32 %v6496_v59  ;;  %v6507_v42 = vpop.eup %5133  ;;  %v1630_v37 = vpack.c.bf16 %v1615_v33, %v1614_v63  ;;  %vm1486_vm10 = vweird.f32 %v6496_v59 }
 0x115   : > { %v1267_v57 = vpop.xlane.xlu1 %1266  ;;  %v1465_v18 = vmul.f32 %v6478_v8, %v1464_v9  ;;  %v1471_v14 = vmul.f32 %v6507_v42, %v6491_v6  ;;  %vm1477_vm13 = vweird.f32 %v6507_v42 }
 0x116   : > { %v1328_v56 = vmul.f32 %v6498_v5, %v6498_v5  ;;  %v1310_v53 = vmul.f32 0.03125, %v1267_v57  ;;  %vm6587_vm15 = vmor %vm1476_vm12, %vm1477_vm13 }
 0x117   : > { %v1469_v57 = vsel %vm6518_vm8, %v6478_v8, %v1465_v18  ;;  %v1472_v9 = vmul.f32 %v6507_v42, %v1471_v14 }
 0x118   : > { %v1346_v1 = vsub.f32 %v1310_v53, %v1328_v56  ;;  %v1459_v56 = vsel %vm6529_vm9, %v6463_v30, %v1455_v21  ;;  %v1360_v53 = vsub.f32 %v5974_v32, %v6414_v2  ;;  %v1577_v8 = vmul.f32 %v1469_v57, %v1361_v29 }
 0x119   : > { %v1215_v43 = vpop.xlane.xlu0 %1214  ;;  %v1473_v33 = vmul.f32 0.5, %v1472_v9 }
 0x11a   : > { %v6514_v36 = vmul.f32 0.03125, %v1215_v43  ;;  %v6516_v48 = vpop.eup %5135  ;;  %v6533_v23 = vadd.f32 1e-05, %v1346_v1  ;;  %v1576_v31 = vmul.f32 %v1459_v56, %v1360_v53  ;;  %v1597_v32 = vmul.f32 %v6401_v26, %v1577_v8 }
 0x11b   : > { %v1269_v46 = vpop.xlane.xlu2 %1268  ;;  %v1481_v0 = vmul.f32 %v6516_v48, %v6496_v59  ;;  %v1474_v14 = vsub.f32 1.5, %v1473_v33  ;;  %vm1487_vm11 = vweird.f32 %v6516_v48  ;;  %v1363_v8 = vsub.f32 %v6075_v47, %v6476_v60 }
 0x11c   : > { %v1329_v52 = vmul.f32 %v6514_v36, %v6514_v36  ;;  %v1311_v44 = vmul.f32 0.03125, %v1269_v46  ;;  %5137 = vrsqrt.f32 %v6533_v23  ;;  %v1596_v21 = vmul.f32 %v6401_v26, %v1576_v31  ;;  %vm6577_vm14 = vmor %vm1486_vm10, %vm1487_vm11 }
 0x11d   : > { %v1482_v20 = vmul.f32 %v6516_v48, %v1481_v0  ;;  %1721 = vmatmul.bf16.gmra.mxu0 %v1630_v37  ;;  %v1617_v37 = vadd.f32 %v6412_v4, %v1597_v32  ;;  %v1475_v53 = vmul.f32 %v6507_v42, %v1474_v14  ;;  %vm1496_vm6 = vweird.f32 %v6533_v23 }
 0x11e   : > { %v1347_v19 = vsub.f32 %v1311_v44, %v1329_v52  ;;  %v1616_v56 = vadd.f32 %v6412_v4, %v1596_v21 }
 0x11f   : > { %v1483_v1 = vmul.f32 0.5, %v1482_v20  ;;  %v1479_v60 = vsel %vm6587_vm15, %v6507_v42, %v1475_v53 }
 0x120   : > { %v6547_v40 = vadd.f32 1e-05, %v1347_v19  ;;  %v1631_v59 = vpack.c.bf16 %v1617_v37, %v1616_v56 }
 0x121   : > { %v1217_v43 = vpop.xlane.xlu0 %1216  ;;  %v1484_v2 = vsub.f32 1.5, %v1483_v1 }
 0x122   : > { %v6550_v63 = vmul.f32 0.03125, %v1217_v43  ;;  %5139 = vrsqrt.f32 %v6547_v40  ;;  %v6556_v10 = vpop.eup %5137  ;;  %vm1506_vm8 = vweird.f32 %v6547_v40 }
 0x123   : > { %v1271_v55 = vpop.xlane.xlu2 %1270  ;;  %v1485_v20 = vmul.f32 %v6516_v48, %v1484_v2  ;;  %v1491_v29 = vmul.f32 %v6556_v10, %v6533_v23  ;;  %v1362_v2 = vsub.f32 %v6042_v39, %v6456_v25  ;;  %vm1497_vm7 = vweird.f32 %v6556_v10 }
 0x124   : > { %v1330_v30 = vmul.f32 %v6550_v63, %v6550_v63  ;;  %v1312_v18 = vmul.f32 0.03125, %v1271_v55  ;;  %vm6626_vm10 = vmor %vm1496_vm6, %vm1497_vm7 }
 0x125   : > { %v1492_v33 = vmul.f32 %v6556_v10, %v1491_v29 }
 0x126   : > { %v1348_v52 = vsub.f32 %v1312_v18, %v1330_v30  ;;  %v1489_v30 = vsel %vm6577_vm14, %v6516_v48, %v1485_v20 }
 0x127   : > { %v1219_v46 = vpop.xlane.xlu1 %1218  ;;  %v1579_v21 = vmul.f32 %v1489_v30, %v1363_v8  ;;  %v1493_v14 = vmul.f32 0.5, %v1492_v33 }
 0x128   : > { %v6561_v0 = vmul.f32 0.03125, %v1219_v46  ;;  %v6563_v49 = vpop.eup %5139  ;;  %v6583_v43 = vadd.f32 1e-05, %v1348_v52  ;;  %v1578_v52 = vmul.f32 %v1479_v60, %v1362_v2  ;;  %v1364_v2 = vsub.f32 %v6110_v24, %v6498_v5 }
 0x129   : > { %v1273_v44 = vpop.xlane.xlu0 %1272  ;;  %v1501_v57 = vmul.f32 %v6563_v49, %v6547_v40  ;;  %vm1507_vm9 = vweird.f32 %v6563_v49 }
 0x12a   : > { %v1331_v19 = vmul.f32 %v6561_v0, %v6561_v0  ;;  %v1313_v9 = vmul.f32 0.03125, %v1273_v44  ;;  %5141 = vrsqrt.f32 %v6583_v43  ;;  %vm6634_vm11 = vmor %vm1506_vm8, %vm1507_vm9  ;;  %vm1516_vm12 = vweird.f32 %v6583_v43 }
 0x12b   : > { %v1502_v31 = vmul.f32 %v6563_v49, %v1501_v57  ;;  %v1599_v57 = vmul.f32 %v6401_v26, %v1579_v21 }
 0x12c   : > { %v1349_v55 = vsub.f32 %v1313_v9, %v1331_v19  ;;  %v1494_v19 = vsub.f32 1.5, %v1493_v14  ;;  %v1598_v9 = vmul.f32 %v6401_v26, %v1578_v52 }
 0x12d   : > { %1726 = vmatmul.bf16.gmra.mxu0 %v1631_v59  ;;  %v1503_v48 = vmul.f32 0.5, %v1502_v31  ;;  %v1619_v1 = vadd.f32 %v6412_v4, %v1599_v57 }
 0x12e   : > { %v6596_v18 = vadd.f32 1e-05, %v1349_v55  ;;  %v1495_v23 = vmul.f32 %v6556_v10, %v1494_v19 }
 0x12f   : > { %v1221_v32 = vpop.xlane.xlu1 %1220  ;;  %v1504_v42 = vsub.f32 1.5, %v1503_v48 }
 0x130   : > { %v6599_v47 = vmul.f32 0.03125, %v1221_v32  ;;  %5143 = vrsqrt.f32 %v6596_v18  ;;  %v6610_v29 = vpop.eup %5141  ;;  %v1618_v32 = vadd.f32 %v6412_v4, %v1598_v9  ;;  %vm1526_vm14 = vweird.f32 %v6596_v18 }
 0x131   : > { %v1275_v46 = vpop.xlane.xlu0 %1274  ;;  %v1505_v55 = vmul.f32 %v6563_v49, %v1504_v42  ;;  %v1511_v40 = vmul.f32 %v6610_v29, %v6583_v43  ;;  %vm1517_vm13 = vweird.f32 %v6610_v29 }
 0x132   : > { %v1332_v44 = vmul.f32 %v6599_v47, %v6599_v47  ;;  %v1314_v37 = vmul.f32 0.03125, %v1275_v46  ;;  %v1365_v46 = vsub.f32 %v6143_v27, %v6514_v36  ;;  %v1632_v14 = vpack.c.bf16 %v1619_v1, %v1618_v32  ;;  %vm6674_vm6 = vmor %vm1516_vm12, %vm1517_vm13 }
 0x133   : > { %v1512_v52 = vmul.f32 %v6610_v29, %v1511_v40 }
 0x134   : > { %v1350_v53 = vsub.f32 %v1314_v37, %v1332_v44  ;;  %v1499_v37 = vsel %vm6626_vm10, %v6556_v10, %v1495_v23 }
 0x135   : > { %v1223_v20 = vpop.xlane.xlu2 %1222  ;;  %v1580_v57 = vmul.f32 %v1499_v37, %v1364_v2  ;;  %v1513_v19 = vmul.f32 0.5, %v1512_v52  ;;  %v1366_v52 = vsub.f32 %v6178_v12, %v6550_v63 }
 0x136   : > { %v6612_v6 = vmul.f32 0.03125, %v1223_v20  ;;  %v6614_v39 = vpop.eup %5143  ;;  %v6639_v60 = vadd.f32 1e-05, %v1350_v53  ;;  %v1509_v20 = vsel %vm6634_vm11, %v6563_v49, %v1505_v55 }
 0x137   : > { %v1277_v25 = vpop.xlane.xlu1 %1276  ;;  %v1521_v31 = vmul.f32 %v6614_v39, %v6596_v18  ;;  %v1581_v42 = vmul.f32 %v1509_v20, %v1365_v46  ;;  %v1600_v53 = vmul.f32 %v6401_v26, %v1580_v57  ;;  %v1514_v55 = vsub.f32 1.5, %v1513_v19 }
 0x138   : > { %v1333_v56 = vmul.f32 %v6612_v6, %v6612_v6  ;;  %v1315_v8 = vmul.f32 0.03125, %v1277_v25  ;;  %5145 = vrsqrt.f32 %v6639_v60  ;;  %vm1527_vm15 = vweird.f32 %v6614_v39 }
 0x139   : > { %v1522_v44 = vmul.f32 %v6614_v39, %v1521_v31  ;;  %v1515_v2 = vmul.f32 %v6610_v29, %v1514_v55  ;;  %vm1528_vm7 = vmor %vm1526_vm14, %vm1527_vm15  ;;  %vm1536_vm8 = vweird.f32 %v6639_v60 }
 0x13a   : > { %v1351_v30 = vsub.f32 %v1315_v8, %v1333_v56  ;;  %v1601_v8 = vmul.f32 %v6401_v26, %v1581_v42 }
 0x13b   : > { %v1523_v25 = vmul.f32 0.5, %v1522_v44  ;;  %v1367_v44 = vsub.f32 %v6212_v62, %v6561_v0  ;;  %v1519_v57 = vsel %vm6674_vm6, %v6610_v29, %v1515_v2 }
 0x13c   : > { %v6645_v21 = vadd.f32 1e-05, %v1351_v30  ;;  %v1620_v30 = vadd.f32 %v6412_v4, %v1600_v53  ;;  %v1621_v32 = vadd.f32 %v6412_v4, %v1601_v8  ;;  %v1582_v19 = vmul.f32 %v1519_v57, %v1366_v52 }
 0x13d   : > { %v1225_v48 = vpop.xlane.xlu2 %1224  ;;  %1731 = vmatmul.bf16.gmra.mxu0 %v1632_v14  ;;  %v1524_v23 = vsub.f32 1.5, %v1523_v25 }
 0x13e   : > { %v6656_v27 = vmul.f32 0.03125, %v1225_v48  ;;  %5147 = vrsqrt.f32 %v6645_v21  ;;  %v5146_v1 = vpop.eup %5145  ;;  %v1633_v20 = vpack.c.bf16 %v1621_v32, %v1620_v30  ;;  %v1602_v63 = vmul.f32 %v6401_v26, %v1582_v19 }
 0x13f   : > { %v1279_v36 = vpop.xlane.xlu1 %1278  ;;  %v1525_v43 = vmul.f32 %v6614_v39, %v1524_v23  ;;  %v1531_v48 = vmul.f32 %v5146_v1, %v6639_v60  ;;  %vm1537_vm9 = vweird.f32 %v5146_v1  ;;  %vm1546_vm10 = vweird.f32 %v6645_v21 }
 0x140   : > { %v1334_v10 = vmul.f32 %v6656_v27, %v6656_v27  ;;  %v1316_v9 = vmul.f32 0.03125, %v1279_v36  ;;  %v1622_v29 = vadd.f32 %v6412_v4, %v1602_v63  ;;  %vm1538_vm12 = vmor %vm1536_vm8, %vm1537_vm9  ;;  %v1369_v60 = vsub.f32 %v6288_v28, %v6612_v6 }
 0x141   : > { %v1529_v42 = vsel %vm1528_vm7, %v6614_v39, %v1525_v43 }
 0x142   : > { %v1227_v24 = vpop.xlane.xlu0 %1226  ;;  %v1352_v31 = vsub.f32 %v1316_v9, %v1334_v10  ;;  %v1583_v25 = vmul.f32 %v1529_v42, %v1367_v44 }
 0x143   : > { %v6659_v5 = vmul.f32 0.03125, %v1227_v24  ;;  %v1532_v24 = vmul.f32 %v5146_v1, %v1531_v48 }
 0x144   : > { %v5148_v40 = vpop.eup %5147  ;;  %v1388_v14 = vadd.f32 1e-05, %v1352_v31  ;;  %v1603_v62 = vmul.f32 %v6401_v26, %v1583_v25  ;;  %v6712_v25 = vld [vmem:[%s9885_s7] ss:$0 sm:$0xff] }
 0x145   : > { %v1335_v49 = vmul.f32 %v6659_v5, %v6659_v5  ;;  %v1281_v56 = vpop.xlane.xlu2 %1280  ;;  %v1541_v18 = vmul.f32 %v5148_v40, %v6645_v21  ;;  %v1533_v10 = vmul.f32 0.5, %v1532_v24  ;;  %vm1547_vm11 = vweird.f32 %v5148_v40 }
 0x146   : > { %v1317_v59 = vmul.f32 0.03125, %v1281_v56  ;;  %5149 = vrsqrt.f32 %v1388_v14  ;;  %v1623_v39 = vadd.f32 %v6412_v4, %v1603_v62  ;;  %vm1548_vm13 = vmor %vm1546_vm10, %vm1547_vm11  ;;  %vm1556_vm14 = vweird.f32 %v1388_v14 }
 0x147   : > { %v1542_v36 = vmul.f32 %v5148_v40, %v1541_v18  ;;  %v1534_v9 = vsub.f32 1.5, %v1533_v10 }
 0x148   : > { %v1353_v33 = vsub.f32 %v1317_v59, %v1335_v49  ;;  %v1368_v59 = vsub.f32 %v6246_v13, %v6599_v47  ;;  %v1634_v31 = vpack.c.bf16 %v1623_v39, %v1622_v29 }
 0x149   : > { %v1543_v12 = vmul.f32 0.5, %v1542_v36  ;;  %v1535_v53 = vmul.f32 %v5146_v1, %v1534_v9 }
 0x14a   : > { %v1389_v37 = vadd.f32 1e-05, %v1353_v33 }
 0x14b   : > { %v1544_v49 = vsub.f32 1.5, %v1543_v12  ;;  %v1539_v30 = vsel %vm1538_vm12, %v5146_v1, %v1535_v53  ;;  %v1370_v1 = vsub.f32 %v6306_v22, %v6656_v27  ;;  %v4969_v53 = vld [vmem:[#allocation7 + $0x30] sm:$0xff] }
 0x14c   : > { %5151 = vrsqrt.f32 %v1389_v37  ;;  %v5150_v0 = vpop.eup %5149  ;;  %v1584_v2 = vmul.f32 %v1539_v30, %v1368_v59  ;;  %vm1566_vm6 = vweird.f32 %v1389_v37 }
 0x14d   : > { %1736 = vmatmul.bf16.gmra.mxu0 %v1633_v20  ;;  %v1545_v8 = vmul.f32 %v5148_v40, %v1544_v49  ;;  %v1551_v23 = vmul.f32 %v5150_v0, %v1388_v14  ;;  %vm1557_vm15 = vweird.f32 %v5150_v0  ;;  %v4970_v49 = vld [vmem:[#allocation7 + $0x38] sm:$0xff] }
 0x14e   : > { %v1604_v18 = vmul.f32 %v6401_v26, %v1584_v2  ;;  %vm1558_vm8 = vmor %vm1556_vm14, %vm1557_vm15  ;;  %2552 = vmatpush.bf16.msra.mxu1 %v4970_v49 }
 0x14f   : > { %v1552_v21 = vmul.f32 %v5150_v0, %v1551_v23  ;;  %v1549_v32 = vsel %vm1548_vm13, %v5148_v40, %v1545_v8  ;;  %v1371_v40 = vsub.f32 %v6315_v38, %v6659_v5 }
 0x150   : > { %v1585_v46 = vmul.f32 %v1549_v32, %v1369_v60  ;;  %v1624_v13 = vadd.f32 %v6412_v4, %v1604_v18 }
 0x151   : > { %v1553_v48 = vmul.f32 0.5, %v1552_v21 }
 0x152   : > { %v5152_v56 = vpop.eup %5151  ;;  %v1605_v52 = vmul.f32 %v6401_v26, %v1585_v46  ;;  %2553 = vmatpush.bf16.msra.mxu1 %v4969_v53 }
 0x153   : > { %v1561_v55 = vmul.f32 %v5152_v56, %v1389_v37  ;;  %v1554_v20 = vsub.f32 1.5, %v1553_v48  ;;  %vm1567_vm7 = vweird.f32 %v5152_v56  ;;  %v4967_v48 = vld [vmem:[#allocation7 + $0x20] sm:$0xff] }
 0x154   : > { %v1625_v28 = vadd.f32 %v6412_v4, %v1605_v52  ;;  %vm1568_vm9 = vmor %vm1566_vm6, %vm1567_vm7 }
 0x155   : > { %v1562_v33 = vmul.f32 %v5152_v56, %v1561_v55  ;;  %v1555_v6 = vmul.f32 %v5150_v0, %v1554_v20 }
 0x156   : > { %v1635_v24 = vpack.c.bf16 %v1625_v28, %v1624_v13 }
 0x157   : > { %v1563_v43 = vmul.f32 0.5, %v1562_v33  ;;  %v1559_v36 = vsel %vm1558_vm8, %v5150_v0, %v1555_v6  ;;  %v4968_v33 = vld [vmem:[#allocation7 + $0x28] sm:$0xff] }
 0x158   : > { %v1586_v37 = vmul.f32 %v1559_v36, %v1370_v1  ;;  %2554 = vmatpush.bf16.msra.mxu1 %v4968_v33  ;;  %v4964_v33 = vld [vmem:[#allocation7 + $0x8] sm:$0xff] }
 0x159   : > { %v1564_v44 = vsub.f32 1.5, %v1563_v43 }
 0x15a   : > { %v1606_v42 = vmul.f32 %v6401_v26, %v1586_v37 }
 0x15b   : > { %v1565_v47 = vmul.f32 %v5152_v56, %v1564_v44 }
 0x15c   : > { %v1626_v22 = vadd.f32 %v6412_v4, %v1606_v42  ;;  %2555 = vmatpush.bf16.msra.mxu1 %v4967_v48 }
 0x15d   : > { %1741 = vmatmul.bf16.gmra.mxu0 %v1634_v31  ;;  %v1569_v14 = vsel %vm1568_vm9, %v5152_v56, %v1565_v47 }
 0x15e   : > { %v1587_v57 = vmul.f32 %v1569_v14, %v1371_v40  ;;  %v4966_v40 = vld [vmem:[#allocation7 + $0x18] sm:$0xff] }
 0x160   : > { %v1607_v19 = vmul.f32 %v6401_v26, %v1587_v57  ;;  %2556 = vmatpush.bf16.msra.mxu1 %v4966_v40 }
 0x162   : > { %v1627_v27 = vadd.f32 %v6412_v4, %v1607_v19 }
 0x164   : > { %v1636_v10 = vpack.c.bf16 %v1627_v27, %v1626_v22 }
 0x16d   : > { %1746 = vmatmul.bf16.gmra.mxu0 %v1635_v24 }
 0x17a   : > { %v1712_v38 = vpop.f32.mrf.mxu0 }
 0x17b   : > { %v6717_v5 = vadd.f32 %v6712_v25, %v1712_v38 }
 0x17d   : > { %v6720_v12 = vmul.f32 0.70710677, %v6717_v5  ;;  %1751 = vmatmul.bf16.gmra.mxu0 %v1636_v10  ;;  %v4965_v10 = vld [vmem:[#allocation7 + $0x10] sm:$0xff] }
 0x17e   : > { %2557 = vmatpush.bf16.msra.mxu1 %v4965_v10 }
 0x17f   : > { %v1829_v26 = vand.u32 2147483647, %v6720_v12 }
 0x181   : > { %v1847_v63 = vmul.f32 0.3275911, %v1829_v26  ;;  %v2315_v6 = vsub.f32 0.0, %v1829_v26 }
 0x182   : > { %v1714_v62 = vpop.f32.mrf.mxu0  ;;  %2558 = vmatpush.bf16.msra.mxu1 %v4964_v33 }
 0x183   : > { %v1865_v0 = vadd.f32 1.0, %v1847_v63  ;;  %v6724_v9 = vadd.f32 %v6712_v25, %v1714_v62  ;;  %v2333_v22 = vmul.f32 %v2315_v6, %v1829_v26  ;;  %v4963_v6 = vld [vmem:[#allocation7] sm:$0xff] }
 0x185   : > { %5153 = vrcp.f32 %v1865_v0  ;;  %v6727_v4 = vmul.f32 0.70710677, %v6724_v9  ;;  %v1894_v32 = vand.u32 2147483648, %v1865_v0  ;;  %v1892_v46 = vand.u32 2147483647, %v1865_v0 }
 0x186   : > { %vm1888_vm11 = vweird.f32 %v1865_v0  ;;  %2559 = vmatpush.bf16.msra.mxu1 %v4963_v6 }
 0x187   : > { %v6730_v56 = vand.u32 2147483647, %v6727_v4  ;;  %v1895_v28 = vor.u32 1.1754944e-38, %v1894_v32  ;;  %vm1893_vm13 = vcmp.eq.f32.partialorder %v1892_v46, 8.507059e+37 }
 0x189   : > { %v1848_v29 = vmul.f32 0.3275911, %v6730_v56 }
 0x18a   : > { %v1717_v39 = vpop.f32.mrf.mxu0 }
 0x18b   : > { %v5154_v8 = vpop.eup %5153  ;;  %v6734_v55 = vadd.f32 %v6712_v25, %v1717_v39  ;;  %v1866_v59 = vadd.f32 1.0, %v1848_v29 }
 0x18c   : > { %v1884_v23 = vmul.f32 %v5154_v8, %v1865_v0  ;;  %vm1889_vm10 = vweird.f32 %v5154_v8 }
 0x18d   : > { %v6737_v60 = vmul.f32 0.70710677, %v6734_v55  ;;  %5155 = vrcp.f32 %v1866_v59  ;;  %vm1890_vm12 = vmor %vm1888_vm11, %vm1889_vm10  ;;  %v1909_v42 = vand.u32 2147483648, %v1866_v59  ;;  %v1907_v63 = vand.u32 2147483647, %v1866_v59 }
 0x18e   : > { %v1885_v31 = vsub.f32 1.0, %v1884_v23  ;;  %vm1903_vm15 = vweird.f32 %v1866_v59 }
 0x18f   : > { %v6740_v21 = vand.u32 2147483647, %v6737_v60  ;;  %v1910_v23 = vor.u32 1.1754944e-38, %v1909_v42  ;;  %vm1908_vm7 = vcmp.eq.f32.partialorder %v1907_v63, 8.507059e+37 }
 0x190   : > { %v1886_v30 = vmul.f32 %v5154_v8, %v1885_v31 }
 0x191   : > { %v1849_v2 = vmul.f32 0.3275911, %v6740_v21 }
 0x192   : > { %v1719_v43 = vpop.f32.mrf.mxu0  ;;  %v1887_v18 = vadd.f32 %v5154_v8, %v1886_v30  ;;  %v2351_v30 = vmul.f32 1.442695, %v2333_v22 }
 0x193   : > { %v6743_v52 = vadd.f32 1.0, %v1849_v2  ;;  %v6746_v44 = vadd.f32 %v6712_v25, %v1719_v43  ;;  %v5156_v20 = vpop.eup %5155  ;;  %v2316_v43 = vsub.f32 0.0, %v6730_v56 }
 0x194   : > { %v1891_v13 = vsel %vm1890_vm12, %v5154_v8, %v1887_v18  ;;  %v1899_v47 = vmul.f32 %v5156_v20, %v1866_v59  ;;  %vm1904_vm14 = vweird.f32 %v5156_v20 }
 0x195   : > { %5157 = vrcp.f32 %v6743_v52  ;;  %v6750_v1 = vmul.f32 0.70710677, %v6746_v44  ;;  %v6752_v24 = vsel %vm1893_vm13, %v1895_v28, %v1891_v13  ;;  %vm1905_vm6 = vmor %vm1903_vm15, %vm1904_vm14  ;;  %v1924_v28 = vand.u32 2147483648, %v6743_v52 }
 0x196   : > { %v1900_v36 = vsub.f32 1.0, %v1899_v47  ;;  %v2153_v14 = vmul.f32 1.0614054, %v6752_v24  ;;  %vm1918_vm9 = vweird.f32 %v6743_v52  ;;  %vm1793_vm15 = vcmp.ge.f32.partialorder %v6720_v12, 0.0 }
 0x197   : > { %v6756_v37 = vand.u32 2147483647, %v6750_v1  ;;  %v1757_v12 = vmul.f32 0.5, %v6717_v5 }
 0x198   : > { %v1901_v57 = vmul.f32 %v5156_v20, %v1900_v36  ;;  %v2171_v19 = vadd.f32 -1.4531521, %v2153_v14  ;;  %v1922_v14 = vand.u32 2147483647, %v6743_v52 }
 0x199   : > { %v1850_v27 = vmul.f32 0.3275911, %v6756_v37 }
 0x19a   : > { %v1722_v38 = vpop.f32.mrf.mxu0  ;;  %v1902_v49 = vadd.f32 %v5156_v20, %v1901_v57  ;;  %v2189_v29 = vmul.f32 %v2171_v19, %v6752_v24  ;;  %vm1923_vm11 = vcmp.eq.f32.partialorder %v1922_v14, 8.507059e+37 }
 0x19b   : > { %v5158_v62 = vpop.eup %5157  ;;  %v6760_v0 = vadd.f32 %v6712_v25, %v1722_v38  ;;  %v6764_v53 = vadd.f32 1.0, %v1850_v27  ;;  %v2334_v38 = vmul.f32 %v2316_v43, %v6730_v56 }
 0x19c   : > { %v1914_v39 = vmul.f32 %v5158_v62, %v6743_v52  ;;  %v1906_v8 = vsel %vm1905_vm6, %v5156_v20, %v1902_v49  ;;  %v2207_v31 = vadd.f32 1.4214138, %v2189_v29  ;;  %vm1919_vm8 = vweird.f32 %v5158_v62 }
 0x19d   : > { %v6768_v26 = vmul.f32 0.70710677, %v6760_v0  ;;  %5159 = vrcp.f32 %v6764_v53  ;;  %v6774_v2 = vsel %vm1908_vm7, %v1910_v23, %v1906_v8  ;;  %vm6789_vm10 = vmor %vm1918_vm9, %vm1919_vm8  ;;  %v1925_v49 = vor.u32 1.1754944e-38, %v1924_v28 }
 0x19e   : > { %v1915_v59 = vsub.f32 1.0, %v1914_v39  ;;  %v2225_v46 = vmul.f32 %v2207_v31, %v6752_v24  ;;  %v2154_v18 = vmul.f32 1.0614054, %v6774_v2  ;;  %v2353_v31 = vmul.f32 1.442695, %v2334_v38 }
 0x19f   : > { %v6772_v32 = vand.u32 2147483647, %v6768_v26  ;;  %vm1933_vm13 = vweird.f32 %v6764_v53  ;;  %v2317_v38 = vsub.f32 0.0, %v6740_v21  ;;  %vm1794_vm7 = vcmp.ge.f32.partialorder %v6727_v4, 0.0 }
 0x1a0   : > { %v1916_v48 = vmul.f32 %v5158_v62, %v1915_v59  ;;  %v2243_v13 = vadd.f32 -0.28449672, %v2225_v46  ;;  %v2172_v40 = vadd.f32 -1.4531521, %v2154_v18  ;;  %vm1795_vm8 = vcmp.ge.f32.partialorder %v6737_v60, 0.0 }
 0x1a1   : > { %v1851_v20 = vmul.f32 0.3275911, %v6772_v32  ;;  %v2335_v5 = vmul.f32 %v2317_v38, %v6740_v21  ;;  %v6858_v60 = vmul.f32 0.5, %v6734_v55 }
 0x1a2   : > { %v1724_v47 = vpop.f32.mrf.mxu0  ;;  %v1917_v36 = vadd.f32 %v5158_v62, %v1916_v48  ;;  %v2261_v19 = vmul.f32 %v2243_v13, %v6752_v24  ;;  %v2190_v10 = vmul.f32 %v2172_v40, %v6774_v2 }
 0x1a3   : > { %v6783_v57 = vadd.f32 1.0, %v1851_v20  ;;  %v6786_v42 = vadd.f32 %v6712_v25, %v1724_v47  ;;  %v5160_v27 = vpop.eup %5159  ;;  %v1937_v47 = vand.u32 2147483647, %v6764_v53 }
 0x1a4   : > { %v1921_v52 = vsel %vm6789_vm10, %v5158_v62, %v1917_v36  ;;  %v1929_v63 = vmul.f32 %v5160_v27, %v6764_v53  ;;  %v2208_v39 = vadd.f32 1.4214138, %v2190_v10  ;;  %v2279_v23 = vadd.f32 0.2548296, %v2261_v19 }
 0x1a5   : > { %5161 = vrcp.f32 %v6783_v57  ;;  %v6800_v29 = vmul.f32 0.70710677, %v6786_v42  ;;  %v6802_v56 = vsel %vm1923_vm11, %v1925_v49, %v1921_v52  ;;  %vm1934_vm12 = vweird.f32 %v5160_v27 }
 0x1a6   : > { %5163 = vpow2.f32 %v2351_v30  ;;  %v1930_v8 = vsub.f32 1.0, %v1929_v63  ;;  %v2226_v62 = vmul.f32 %v2208_v39, %v6774_v2  ;;  %v2297_v46 = vmul.f32 %v2279_v23, %v6752_v24  ;;  %vm6822_vm14 = vmor %vm1933_vm13, %vm1934_vm12 }
 0x1a7   : > { %v6805_v59 = vand.u32 2147483647, %v6800_v29  ;;  %v1939_v30 = vand.u32 2147483648, %v6764_v53  ;;  %v2155_v20 = vmul.f32 1.0614054, %v6802_v56  ;;  %5165 = vpow2.f32 %v2353_v31 }
 0x1a8   : > { %v1931_v33 = vmul.f32 %v5160_v27, %v1930_v8  ;;  %v2244_v18 = vadd.f32 -0.28449672, %v2226_v62  ;;  %v2318_v63 = vsub.f32 0.0, %v6756_v37  ;;  %vm1938_vm6 = vcmp.eq.f32.partialorder %v1937_v47, 8.507059e+37 }
 0x1a9   : > { %v1852_v43 = vmul.f32 0.3275911, %v6805_v59  ;;  %v1940_v10 = vor.u32 1.1754944e-38, %v1939_v30  ;;  %v2173_v52 = vadd.f32 -1.4531521, %v2155_v20  ;;  %v9903_v8 = vmov -1.0  }
 0x1aa   : > { %v1727_v48 = vpop.f32.mrf.mxu0  ;;  %v1932_v28 = vadd.f32 %v5160_v27, %v1931_v33  ;;  %v2262_v36 = vmul.f32 %v2244_v18, %v6774_v2  ;;  %v1811_v23 = vsel %vm1793_vm15, 1.0, %v9903_v8  ;;  %v1758_v31 = vmul.f32 0.5, %v6724_v9 }
 0x1ab   : > { %v6812_v13 = vpop.eup %5161  ;;  %v6818_v40 = vadd.f32 1.0, %v1852_v43  ;;  %v6828_v19 = vadd.f32 %v6712_v25, %v1727_v48  ;;  %v2191_v9 = vmul.f32 %v2173_v52, %v6802_v56  ;;  %v2336_v18 = vmul.f32 %v2318_v63, %v6756_v37 }
 0x1ac   : > { %v5164_v6 = vpop.eup %5163  ;;  %v1944_v24 = vmul.f32 %v6812_v13, %v6783_v57  ;;  %v1936_v22 = vsel %vm6822_vm14, %v5160_v27, %v1932_v28  ;;  %v2280_v39 = vadd.f32 0.2548296, %v2262_v36  ;;  %v1812_v47 = vsel %vm1794_vm7, 1.0, %v9903_v8 }
 0x1ad   : > { %v2387_v53 = vmul.f32 %v5164_v6, %v2297_v46  ;;  %5167 = vrcp.f32 %v6818_v40  ;;  %v6838_v62 = vsel %vm1938_vm6, %v1940_v10, %v1936_v22  ;;  %v6842_v27 = vmul.f32 0.70710677, %v6828_v19  ;;  %v5166_v30 = vpop.eup %5165 }
 0x1ae   : > { %v1945_v49 = vsub.f32 1.0, %v1944_v24  ;;  %v2298_v33 = vmul.f32 %v2280_v39, %v6774_v2  ;;  %v2156_v48 = vmul.f32 1.0614054, %v6838_v62  ;;  %v2209_v6 = vadd.f32 1.4214138, %v2191_v9 }
 0x1af   : > { %v2405_v46 = vsub.f32 1.0, %v2387_v53  ;;  %v6861_v24 = vsel %vm1795_vm8, 1.0, %v9903_v8  ;;  %v6866_v36 = vand.u32 2147483647, %v6842_v27  ;;  %v2355_v53 = vmul.f32 1.442695, %v2335_v5 }
 0x1b0   : > { %v1946_v4 = vmul.f32 %v6812_v13, %v1945_v49  ;;  %v2388_v28 = vmul.f32 %v5166_v30, %v2298_v33  ;;  %v2174_v21 = vadd.f32 -1.4531521, %v2156_v48  ;;  %v2357_v10 = vmul.f32 1.442695, %v2336_v18 }
 0x1b1   : > { %v2423_v14 = vmul.f32 %v2405_v46, %v1811_v23  ;;  %v2227_v52 = vmul.f32 %v2209_v6, %v6802_v56  ;;  %vm1949_vm9 = vweird.f32 %v6812_v13  ;;  %v1853_v46 = vmul.f32 0.3275911, %v6866_v36 }
 0x1b2   : > { %v1729_v43 = vpop.f32.mrf.mxu0  ;;  %v2406_v38 = vsub.f32 1.0, %v2388_v28  ;;  %v2192_v55 = vmul.f32 %v2174_v21, %v6838_v62  ;;  %v1947_v63 = vadd.f32 %v6812_v13, %v1946_v4  ;;  %vm1948_vm10 = vweird.f32 %v6783_v57 }
 0x1b3   : > { %v6852_v20 = vadd.f32 %v6712_v25, %v1729_v43  ;;  %v6854_v2 = vpop.eup %5167  ;;  %v2441_v30 = vadd.f32 1.0, %v2423_v14  ;;  %v2245_v5 = vadd.f32 -0.28449672, %v2227_v52  ;;  %v1954_v43 = vand.u32 2147483648, %v6783_v57  ;;  %vm6890_vm12 = vmor %vm1948_vm10, %vm1949_vm9 }
 0x1b4   : > { %v1959_v37 = vmul.f32 %v6854_v2, %v6818_v40  ;;  %v2424_v33 = vmul.f32 %v2406_v38, %v1812_v47  ;;  %v2210_v23 = vadd.f32 1.4214138, %v2192_v55  ;;  %v1952_v4 = vand.u32 2147483647, %v6783_v57 }
 0x1b5   : > { %v6869_v22 = vmul.f32 0.70710677, %v6852_v20  ;;  %5169 = vpow2.f32 %v2355_v53  ;;  %v6884_v28 = vmul.f32 0.5, %v6746_v44  ;;  %vm1796_vm11 = vcmp.ge.f32.partialorder %v6750_v1, 0.0 }
 0x1b6   : > { %v1960_v49 = vsub.f32 1.0, %v1959_v37  ;;  %v2442_v9 = vadd.f32 1.0, %v2424_v33  ;;  %v2228_v18 = vmul.f32 %v2210_v23, %v6838_v62  ;;  %v2263_v14 = vmul.f32 %v2245_v5, %v6802_v56 }
 0x1b7   : > { %v6876_v39 = vand.u32 2147483647, %v6869_v22  ;;  %v1951_v44 = vsel %vm6890_vm12, %v6812_v13, %v1947_v63  ;;  %v6899_v57 = vadd.f32 1.0, %v1853_v46  ;;  %v2459_v53 = vmul.f32 %v2441_v30, %v1757_v12 }
 0x1b8   : > { %v1961_v6 = vmul.f32 %v6854_v2, %v1960_v49  ;;  %v2460_v37 = vmul.f32 %v2442_v9, %v1758_v31  ;;  %v2246_v38 = vadd.f32 -0.28449672, %v2228_v18  ;;  %v1955_v55 = vor.u32 1.1754944e-38, %v1954_v43 }
 0x1b9   : > { %v1854_v47 = vmul.f32 0.3275911, %v6876_v39  ;;  %5171 = vpow2.f32 %v2357_v10  ;;  %v2319_v52 = vsub.f32 0.0, %v6772_v32  ;;  %vm1953_vm13 = vcmp.eq.f32.partialorder %v1952_v4, 8.507059e+37 }
 0x1ba   : > { %v1732_v48 = vpop.f32.mrf.mxu0  ;;  %v2477_v31 = vpack.c.bf16 %v2460_v37, %v2459_v53  ;;  %v2264_v23 = vmul.f32 %v2246_v38, %v6838_v62  ;;  %v6908_v5 = vsel %vm1953_vm13, %v1955_v55, %v1951_v44  ;;  %vm1797_vm14 = vcmp.ge.f32.partialorder %v6768_v26, 0.0 }
 0x1bb   : > { %v6903_v33 = vadd.f32 %v6712_v25, %v1732_v48  ;;  %v6905_v49 = vadd.f32 1.0, %v1854_v47  ;;  %v2281_v13 = vadd.f32 0.2548296, %v2263_v14  ;;  %v1962_v12 = vadd.f32 %v6854_v2, %v1961_v6  ;;  %v5170_v10 = vpop.eup %5169 }
 0x1bc   : > { %vm1964_vm15 = vweird.f32 %v6854_v2  ;;  %vm1963_vm6 = vweird.f32 %v6818_v40  ;;  %v2320_v63 = vsub.f32 0.0, %v6805_v59  ;;  %5173 = vrcp.f32 %v6899_v57  ;;  %2560 = vmatmul.bf16.vlgmr.msra.gmra.mxu1 %v2477_v31 }
 0x1bd   : > { %v2282_v46 = vadd.f32 0.2548296, %v2264_v23  ;;  %v2299_v43 = vmul.f32 %v2281_v13, %v6802_v56  ;;  %v1967_v48 = vand.u32 2147483647, %v6818_v40  ;;  %v1969_v9 = vand.u32 2147483648, %v6818_v40  ;;  %vm6928_vm7 = vmor %vm1963_vm6, %vm1964_vm15 }
 0x1be   : > { %v2157_v18 = vmul.f32 1.0614054, %v6908_v5  ;;  %v2337_v4 = vmul.f32 %v2319_v52, %v6772_v32  ;;  %5175 = vrcp.f32 %v6905_v49  ;;  %v6923_v47 = vmul.f32 0.70710677, %v6903_v33 }
 0x1bf   : > { %v2300_v21 = vmul.f32 %v2282_v46, %v6838_v62  ;;  %v5172_v56 = vpop.eup %5171  ;;  %v2389_v37 = vmul.f32 %v5170_v10, %v2299_v43  ;;  %v1966_v32 = vsel %vm6928_vm7, %v6854_v2, %v1962_v12  ;;  %v1814_v62 = vsel %vm1796_vm11, 1.0, %v9903_v8 }
 0x1c0   : > { %v2175_v14 = vadd.f32 -1.4531521, %v2157_v18  ;;  %v6942_v44 = vmul.f32 0.5, %v6760_v0  ;;  %v6947_v53 = vsel %vm1797_vm14, 1.0, %v9903_v8  ;;  %v1970_v38 = vor.u32 1.1754944e-38, %v1969_v9 }
 0x1c1   : > { %v2338_v55 = vmul.f32 %v2320_v63, %v6805_v59  ;;  %v2390_v52 = vmul.f32 %v5172_v56, %v2300_v21  ;;  %v2407_v31 = vsub.f32 1.0, %v2389_v37  ;;  %vm1968_vm8 = vcmp.eq.f32.partialorder %v1967_v48, 8.507059e+37 }
 0x1c2   : > { %v1734_v30 = vpop.f32.mrf.mxu0  ;;  %v6950_v2 = vpop.eup %5173  ;;  %v2359_v23 = vmul.f32 1.442695, %v2337_v4  ;;  %v6953_v1 = vand.u32 2147483647, %v6923_v47  ;;  %v6955_v13 = vsel %vm1968_vm8, %v1970_v38, %v1966_v32  ;;  %v2193_v0 = vmul.f32 %v2175_v14, %v6908_v5 }
 0x1c3   : > { %v6933_v40 = vadd.f32 %v6712_v25, %v1734_v30  ;;  %v2321_v26 = vsub.f32 0.0, %v6866_v36  ;;  %v2408_v10 = vsub.f32 1.0, %v2390_v52  ;;  %v2425_v59 = vmul.f32 %v2407_v31, %v6861_v24 }
 0x1c4   : > { %v6963_v63 = vpop.eup %5175  ;;  %v6966_v46 = vmul.f32 0.5, %v6786_v42  ;;  %vm1798_vm9 = vcmp.ge.f32.partialorder %v6800_v29, 0.0  ;;  %v2158_v30 = vmul.f32 1.0614054, %v6955_v13  ;;  %v2211_v43 = vadd.f32 1.4214138, %v2193_v0 }
 0x1c5   : > { %v6960_v12 = vmul.f32 0.70710677, %v6933_v40  ;;  %v2361_v48 = vmul.f32 1.442695, %v2338_v55  ;;  %v1974_v9 = vmul.f32 %v6950_v2, %v6899_v57  ;;  %v2322_v18 = vsub.f32 0.0, %v6876_v39 }
 0x1c6   : > { %v2426_v21 = vmul.f32 %v2408_v10, %v1814_v62  ;;  %5177 = vpow2.f32 %v2359_v23  ;;  %v1855_v24 = vmul.f32 0.3275911, %v6953_v1  ;;  %v2443_v6 = vadd.f32 1.0, %v2425_v59 }
 0x1c7   : > { %v2176_v56 = vadd.f32 -1.4531521, %v2158_v30  ;;  %v2339_v42 = vmul.f32 %v2321_v26, %v6866_v36  ;;  %v6976_v37 = vand.u32 2147483647, %v6960_v12  ;;  %v2229_v14 = vmul.f32 %v2211_v43, %v6908_v5 }
 0x1c8   : > { %v2444_v32 = vadd.f32 1.0, %v2426_v21  ;;  %v6982_v38 = vsel %vm1798_vm9, 1.0, %v9903_v8  ;;  %v6985_v62 = vmul.f32 0.5, %v6828_v19  ;;  %v1989_v55 = vmul.f32 %v6963_v63, %v6905_v49 }
 0x1c9   : > { %v2194_v52 = vmul.f32 %v2176_v56, %v6955_v13  ;;  %vm1799_vm10 = vcmp.ge.f32.partialorder %v6842_v27, 0.0  ;;  %v1975_v36 = vsub.f32 1.0, %v1974_v9  ;;  %v2340_v31 = vmul.f32 %v2322_v18, %v6876_v39 }
 0x1ca   : > { %v1737_v4 = vpop.f32.mrf.mxu0  ;;  %v6995_v0 = vadd.f32 1.0, %v1855_v24  ;;  %v2461_v29 = vmul.f32 %v2443_v6, %v6858_v60  ;;  %v2462_v19 = vmul.f32 %v2444_v32, %v6884_v28  ;;  %5179 = vpow2.f32 %v2361_v48 }
 0x1cb   : > { %v6993_v23 = vadd.f32 %v6712_v25, %v1737_v4  ;;  %v2212_v26 = vadd.f32 1.4214138, %v2194_v52  ;;  %v2363_v10 = vmul.f32 1.442695, %v2339_v42  ;;  %v1856_v59 = vmul.f32 0.3275911, %v6976_v37 }
 0x1cc   : > { %v2247_v30 = vadd.f32 -0.28449672, %v2229_v14  ;;  %v5178_v43 = vpop.eup %5177  ;;  %v7001_v27 = vsel %vm1799_vm10, 1.0, %v9903_v8  ;;  %v1990_v39 = vsub.f32 1.0, %v1989_v55  ;;  %v2478_v9 = vpack.c.bf16 %v2462_v19, %v2461_v29 }
 0x1cd   : > { %v2230_v18 = vmul.f32 %v2212_v26, %v6955_v13  ;;  %vm1978_vm11 = vweird.f32 %v6899_v57  ;;  %vm1800_vm12 = vcmp.ge.f32.partialorder %v6869_v22, 0.0  ;;  %v2365_v60 = vmul.f32 1.442695, %v2340_v31 }
 0x1ce   : > { %v7007_v28 = vmul.f32 0.70710677, %v6993_v23  ;;  %v2265_v4 = vmul.f32 %v2247_v30, %v6908_v5  ;;  %v1976_v21 = vmul.f32 %v6950_v2, %v1975_v36  ;;  %5181 = vrcp.f32 %v6995_v0  ;;  %2565 = vmatmul.bf16.gmra.mxu1 %v2478_v9 }
 0x1cf   : > { %v2323_v24 = vsub.f32 0.0, %v6953_v1  ;;  %v2248_v6 = vadd.f32 -0.28449672, %v2230_v18  ;;  %5183 = vpow2.f32 %v2363_v10  ;;  %v7014_v56 = vmul.f32 0.5, %v6852_v20 }
 0x1d0   : > { %v7016_v22 = vadd.f32 1.0, %v1856_v59  ;;  %v2283_v42 = vadd.f32 0.2548296, %v2265_v4  ;;  %v7019_v32 = vsel %vm1800_vm12, 1.0, %v9903_v8  ;;  %v1991_v14 = vmul.f32 %v6963_v63, %v1990_v39  ;;  %v5180_v52 = vpop.eup %5179 }
 0x1d1   : > { %vm1993_vm13 = vweird.f32 %v6905_v49  ;;  %v7024_v55 = vmul.f32 0.5, %v6903_v33  ;;  %vm1801_vm14 = vcmp.ge.f32.partialorder %v6923_v47, 0.0  ;;  %v7028_v36 = vand.u32 2147483647, %v7007_v28 }
 0x1d2   : > { %v1739_v48 = vpop.f32.mrf.mxu0  ;;  %v2266_v20 = vmul.f32 %v2248_v6, %v6955_v13  ;;  %v2301_v31 = vmul.f32 %v2283_v42, %v6908_v5  ;;  %5185 = vpow2.f32 %v2365_v60  ;;  %v2341_v29 = vmul.f32 %v2323_v24, %v6953_v1 }
 0x1d3   : > { %v7034_v19 = vadd.f32 %v6712_v25, %v1739_v48  ;;  %v1977_v26 = vadd.f32 %v6950_v2, %v1976_v21  ;;  %5187 = vrcp.f32 %v7016_v22  ;;  %vm1979_vm15 = vweird.f32 %v6950_v2 }
 0x1d4   : > { %v2284_v33 = vadd.f32 0.2548296, %v2266_v20  ;;  %v2391_v10 = vmul.f32 %v5178_v43, %v2301_v31  ;;  %v7039_v59 = vpop.eup %5181  ;;  %v2324_v30 = vsub.f32 0.0, %v6976_v37  ;;  %v1984_v5 = vand.u32 2147483648, %v6899_v57  ;;  %vm7060_vm7 = vmor %vm1978_vm11, %vm1979_vm15 }
 0x1d5   : > { %v1992_v39 = vadd.f32 %v6963_v63, %v1991_v14  ;;  %vm1994_vm6 = vweird.f32 %v6963_v63  ;;  %v7045_v1 = vpop.eup %5183  ;;  %v1857_v9 = vmul.f32 0.3275911, %v7028_v36  ;;  %v1982_v48 = vand.u32 2147483647, %v6899_v57 }
 0x1d6   : > { %v2302_v60 = vmul.f32 %v2284_v33, %v6955_v13  ;;  %v2409_v43 = vsub.f32 1.0, %v2391_v10  ;;  %v7053_v4 = vsel %vm1801_vm14, 1.0, %v9903_v8  ;;  %v7056_v21 = vmul.f32 0.70710677, %v7034_v19  ;;  %vm7075_vm8 = vmor %vm1993_vm13, %vm1994_vm6 }
 0x1d7   : > { %v1997_v6 = vand.u32 2147483647, %v6905_v49  ;;  %v1999_v13 = vand.u32 2147483648, %v6905_v49  ;;  %v2004_v42 = vmul.f32 %v7039_v59, %v6995_v0  ;;  %v2367_v14 = vmul.f32 1.442695, %v2341_v29 }
 0x1d8   : > { %v2392_v47 = vmul.f32 %v5180_v52, %v2302_v60  ;;  %v1981_v20 = vsel %vm7060_vm7, %v6950_v2, %v1977_v26  ;;  %v7079_v31 = vpop.eup %5185  ;;  %v2342_v33 = vmul.f32 %v2324_v30, %v6976_v37  ;;  %v1985_v52 = vor.u32 1.1754944e-38, %v1984_v5 }
 0x1d9   : > { %v1996_v2 = vsel %vm7075_vm8, %v6963_v63, %v1992_v39  ;;  %v7088_v29 = vpop.eup %5187  ;;  %v7090_v26 = vadd.f32 1.0, %v1857_v9  ;;  %v2427_v49 = vmul.f32 %v2409_v43, %v6947_v53  ;;  %vm1983_vm9 = vcmp.eq.f32.partialorder %v1982_v48, 8.507059e+37 }
 0x1da   : > { %v1742_v18 = vpop.f32.mrf.mxu0  ;;  %v2000_v60 = vor.u32 1.1754944e-38, %v1999_v13  ;;  %v7094_v24 = vand.u32 2147483647, %v7056_v21  ;;  %v2410_v37 = vsub.f32 1.0, %v2392_v47  ;;  %v7096_v30 = vsel %vm1983_vm9, %v1985_v52, %v1981_v20 }
 0x1db   : > { %v7083_v10 = vadd.f32 %v6712_v25, %v1742_v18  ;;  %vm1998_vm10 = vcmp.eq.f32.partialorder %v1997_v6, 8.507059e+37  ;;  %v2005_v5 = vsub.f32 1.0, %v2004_v42  ;;  %v7099_v18 = vmul.f32 0.5, %v6933_v40 }
 0x1dc   : > { %vm1802_vm11 = vcmp.ge.f32.partialorder %v6960_v12, 0.0  ;;  %v7102_v63 = vsel %vm1998_vm10, %v2000_v60, %v1996_v2  ;;  %v2019_v53 = vmul.f32 %v7088_v29, %v7016_v22  ;;  %v2369_v39 = vmul.f32 1.442695, %v2342_v33 }
 0x1dd   : > { %v7107_v9 = vmul.f32 0.70710677, %v7083_v10  ;;  %v2428_v43 = vmul.f32 %v2410_v37, %v6982_v38  ;;  %vm2008_vm12 = vweird.f32 %v6995_v0  ;;  %5189 = vrcp.f32 %v7090_v26 }
 0x1de   : > { %v2445_v48 = vadd.f32 1.0, %v2427_v49  ;;  %v2159_v6 = vmul.f32 1.0614054, %v7096_v30  ;;  %v2160_v12 = vmul.f32 1.0614054, %v7102_v63  ;;  %5191 = vpow2.f32 %v2367_v14 }
 0x1df   : > { %v7115_v13 = vsel %vm1802_vm11, 1.0, %v9903_v8  ;;  %v1858_v42 = vmul.f32 0.3275911, %v7094_v24  ;;  %v2446_v47 = vadd.f32 1.0, %v2428_v43  ;;  %v2006_v20 = vmul.f32 %v7039_v59, %v2005_v5 }
 0x1e0   : > { %vm1803_vm13 = vcmp.ge.f32.partialorder %v7007_v28, 0.0  ;;  %v2177_v38 = vadd.f32 -1.4531521, %v2159_v6  ;;  %v2178_v57 = vadd.f32 -1.4531521, %v2160_v12  ;;  %5193 = vpow2.f32 %v2369_v39 }
 0x1e1   : > { %v7121_v33 = vmul.f32 0.5, %v6993_v23  ;;  %v2325_v52 = vsub.f32 0.0, %v7028_v36  ;;  %v1841_v14 = vand.u32 2147483647, %v7107_v9  ;;  %v2020_v2 = vsub.f32 1.0, %v2019_v53 }
 0x1e2   : > { %v1744_v40 = vpop.f32.mrf.mxu0  ;;  %v2463_v49 = vmul.f32 %v2445_v48, %v6942_v44  ;;  %v2464_v60 = vmul.f32 %v2446_v47, %v6966_v46  ;;  %v2195_v37 = vmul.f32 %v2177_v38, %v7096_v30  ;;  %v7129_v5 = vsel %vm1803_vm13, 1.0, %v9903_v8 }
 0x1e3   : > { %v7131_v28 = vadd.f32 1.0, %v1858_v42  ;;  %v7134_v39 = vadd.f32 %v6712_v25, %v1744_v40  ;;  %v2196_v23 = vmul.f32 %v2178_v57, %v7102_v63  ;;  %v7137_v43 = vpop.eup %5189  ;;  %v2007_v44 = vadd.f32 %v7039_v59, %v2006_v20 }
 0x1e4   : > { %v2479_v6 = vpack.c.bf16 %v2464_v60, %v2463_v49  ;;  %v2213_v53 = vadd.f32 1.4214138, %v2195_v37  ;;  %vm2009_vm14 = vweird.f32 %v7039_v59  ;;  %v7141_v46 = vpop.eup %5191  ;;  %v2343_v48 = vmul.f32 %v2325_v52, %v7028_v36 }
 0x1e5   : > { %v1859_v12 = vmul.f32 0.3275911, %v1841_v14  ;;  %v2214_v42 = vadd.f32 1.4214138, %v2196_v23  ;;  %v2014_v47 = vand.u32 2147483648, %v6995_v0  ;;  %v2021_v40 = vmul.f32 %v7088_v29, %v2020_v2  ;;  %vm7167_vm6 = vmor %vm2008_vm12, %vm2009_vm14 }
 0x1e6   : > { %vm2023_vm15 = vweird.f32 %v7016_v22  ;;  %v2326_v38 = vsub.f32 0.0, %v7094_v24  ;;  %2570 = vmatmul.bf16.gmra.mxu1 %v2479_v6  ;;  %v2231_v20 = vmul.f32 %v2213_v53, %v7096_v30  ;;  %v2012_v49 = vand.u32 2147483647, %v6995_v0  ;;  %v7150_v60 = vpop.eup %5193 }
 0x1e7   : > { %v7154_v36 = vmul.f32 %v7137_v43, %v7090_v26  ;;  %v7157_v52 = vmul.f32 0.70710677, %v7134_v39  ;;  %v2232_v37 = vmul.f32 %v2214_v42, %v7102_v63  ;;  %5195 = vrcp.f32 %v7131_v28 }
 0x1e8   : > { %v2327_v6 = vsub.f32 0.0, %v1841_v14  ;;  %v2249_v53 = vadd.f32 -0.28449672, %v2231_v20  ;;  %v2011_v8 = vsel %vm7167_vm6, %v7039_v59, %v2007_v44  ;;  %v2015_v3 = vor.u32 1.1754944e-38, %v2014_v47 }
 0x1e9   : > { %v2250_v17 = vadd.f32 -0.28449672, %v2232_v37  ;;  %v2371_v0 = vmul.f32 1.442695, %v2343_v48  ;;  %v7181_v54 = vmul.f32 0.5, %v7034_v19  ;;  %v2344_v35 = vmul.f32 %v2326_v38, %v7094_v24 }
 0x1ea   : > { %v1747_v57 = vpop.f32.mrf.mxu0  ;;  %vm2013_vm7 = vcmp.eq.f32.partialorder %v2012_v49, 8.507059e+37  ;;  %v1842_v20 = vand.u32 2147483647, %v7157_v52  ;;  %v2267_v34 = vmul.f32 %v2249_v53, %v7096_v30  ;;  %v2022_v48 = vadd.f32 %v7088_v29, %v2021_v40 }
 0x1eb   : > { %v7160_v2 = vadd.f32 %v6712_v25, %v1747_v57  ;;  %v7175_v57 = vadd.f32 1.0, %v1859_v12  ;;  %v2268_v59 = vmul.f32 %v2250_v17, %v7102_v63  ;;  %v7187_v44 = vsel %vm2013_vm7, %v2015_v3, %v2011_v8 }
 0x1ec   : > { %v2035_v12 = vsub.f32 1.0, %v7154_v36  ;;  %vm2024_vm8 = vweird.f32 %v7088_v29  ;;  %v2345_v19 = vmul.f32 %v2327_v6, %v1841_v14  ;;  %v2285_v24 = vadd.f32 0.2548296, %v2267_v34 }
 0x1ed   : > { %v7178_v42 = vmul.f32 0.70710677, %v7160_v2  ;;  %5197 = vrcp.f32 %v7175_v57  ;;  %v2029_v47 = vand.u32 2147483648, %v7016_v22  ;;  %v7197_v38 = vpop.eup %5195  ;;  %v2286_v17 = vadd.f32 0.2548296, %v2268_v59  ;;  %vm7209_vm9 = vmor %vm2023_vm15, %vm2024_vm8 }
 0x1ee   : > { %5199 = vpow2.f32 %v2371_v0  ;;  %v2027_v8 = vand.u32 2147483647, %v7016_v22  ;;  %v2161_v49 = vmul.f32 1.0614054, %v7187_v44  ;;  %v2373_v36 = vmul.f32 1.442695, %v2344_v35 }
 0x1ef   : > { %v7191_v37 = vand.u32 2147483647, %v7178_v42  ;;  %v1860_v23 = vmul.f32 0.3275911, %v1842_v20  ;;  %v2303_v40 = vmul.f32 %v2285_v24, %v7096_v30  ;;  %vm1804_vm10 = vcmp.ge.f32.partialorder %v7056_v21, 0.0 }
 0x1f0   : > { %v2304_v35 = vmul.f32 %v2286_v17, %v7102_v63  ;;  %v2026_v30 = vsel %vm7209_vm9, %v7088_v29, %v2022_v48  ;;  %v2179_v6 = vadd.f32 -1.4531521, %v2161_v49  ;;  %v2049_v0 = vmul.f32 %v7197_v38, %v7131_v28 }
 0x1f1   : > { %v1861_v14 = vmul.f32 0.3275911, %v7191_v37  ;;  %vm1805_vm11 = vcmp.ge.f32.partialorder %v7107_v9, 0.0  ;;  %v2375_v22 = vmul.f32 1.442695, %v2345_v19  ;;  %v2030_v59 = vor.u32 1.1754944e-38, %v2029_v47 }
 0x1f2   : > { %v1749_v3 = vpop.f32.mrf.mxu0  ;;  %v2393_v24 = vmul.f32 %v7045_v1, %v2303_v40  ;;  %vm2028_vm12 = vcmp.eq.f32.partialorder %v2027_v8, 8.507059e+37  ;;  %v7229_v17 = vadd.f32 1.0, %v1860_v23  ;;  %v2328_v29 = vsub.f32 0.0, %v1842_v20 }
 0x1f3   : > { %v7203_v53 = vadd.f32 %v6712_v25, %v1749_v3  ;;  %v2394_v3 = vmul.f32 %v7079_v31, %v2304_v35  ;;  %v7227_v63 = vpop.eup %5197  ;;  %v7231_v48 = vsel %vm2028_vm12, %v2030_v59, %v2026_v30  ;;  %v2197_v49 = vmul.f32 %v2179_v6, %v7187_v44 }
 0x1f4   : > { %v7234_v34 = vpop.eup %5199  ;;  %v7236_v19 = vadd.f32 1.0, %v1861_v14  ;;  %v2411_v1 = vsub.f32 1.0, %v2393_v24  ;;  %v2036_v8 = vmul.f32 %v7137_v43, %v2035_v12  ;;  %v2050_v40 = vsub.f32 1.0, %v2049_v0 }
 0x1f5   : > { %v7225_v61 = vmul.f32 0.70710677, %v7203_v53  ;;  %v2412_v47 = vsub.f32 1.0, %v2394_v3  ;;  %v2162_v23 = vmul.f32 1.0614054, %v7231_v48  ;;  %v2064_v30 = vmul.f32 %v7227_v63, %v7175_v57 }
 0x1f6   : > { %v2215_v35 = vadd.f32 1.4214138, %v2197_v49  ;;  %v2429_v6 = vmul.f32 %v2411_v1, %v7001_v27  ;;  %vm2038_vm13 = vweird.f32 %v7090_v26  ;;  %5201 = vrcp.f32 %v7229_v17 }
 0x1f7   : > { %v7239_v31 = vand.u32 2147483647, %v7225_v61  ;;  %v2430_v59 = vmul.f32 %v2412_v47, %v7019_v32  ;;  %v2346_v3 = vmul.f32 %v2328_v29, %v1842_v20  ;;  %v2180_v0 = vadd.f32 -1.4531521, %v2162_v23 }
 0x1f8   : > { %5203 = vrcp.f32 %v7236_v19  ;;  %v2447_v49 = vadd.f32 1.0, %v2429_v6  ;;  %v2233_v1 = vmul.f32 %v2215_v35, %v7187_v44  ;;  %v2065_v47 = vsub.f32 1.0, %v2064_v30 }
 0x1f9   : > { %v1862_v14 = vmul.f32 0.3275911, %v7239_v31  ;;  %v2448_v41 = vadd.f32 1.0, %v2430_v59  ;;  %5205 = vpow2.f32 %v2373_v36  ;;  %v2198_v32 = vmul.f32 %v2180_v0, %v7231_v48 }
 0x1fa   : > { %v1752_v24 = vpop.f32.mrf.mxu0  ;;  %v2465_v20 = vmul.f32 %v2447_v49, %v6985_v62  ;;  %v10039_v29 = vmov -1.0   ;;  %v2051_v62 = vmul.f32 %v7197_v38, %v2050_v40  ;;  %v2377_v30 = vmul.f32 1.442695, %v2346_v3 }
 0x1fb   : > { %v7251_v12 = vadd.f32 %v6712_v25, %v1752_v24  ;;  %v7254_v58 = vadd.f32 1.0, %v1862_v14  ;;  %v2466_v25 = vmul.f32 %v2448_v41, %v7014_v56  ;;  %v7267_v23 = vsel %vm1804_vm10, 1.0, %v10039_v29 }
 0x1fc   : > { %v7272_v36 = vsel %vm1805_vm11, 1.0, %v10039_v29  ;;  %v2216_v56 = vadd.f32 1.4214138, %v2198_v32  ;;  %v7278_v6 = vpop.eup %5201  ;;  %vm2053_vm14 = vweird.f32 %v7131_v28  ;;  %v2251_v59 = vadd.f32 -0.28449672, %v2233_v1 }
 0x1fd   : > { %10038 = vst [vmem:[#allocation34_spill] sm:$0xff] %v7251_v12  ;;  %v7257_v27 = vmul.f32 0.70710677, %v7251_v12  ;;  %5207 = vrcp.f32 %v7254_v58  ;;  %v2480_v41 = vpack.c.bf16 %v2466_v25, %v2465_v20  ;;  %v2037_v9 = vadd.f32 %v7137_v43, %v2036_v8  ;;  %v5333_v1 = vld [vmem:[%s9885_s7] ss:$0 sm:$0xff] }
 0x1fe   : > { %5209 = vpow2.f32 %v2375_v22  ;;  %vm2039_vm15 = vweird.f32 %v7137_v43  ;;  %v7284_v22 = vpop.eup %5203  ;;  %v2066_v14 = vmul.f32 %v7227_v63, %v2065_v47  ;;  %v2329_v40 = vsub.f32 0.0, %v7191_v37 }
 0x1ff   : > { %v7275_v35 = vand.u32 2147483647, %v7257_v27  ;;  %2575 = vmatmul.bf16.gmra.mxu1 %v2480_v41  ;;  %v2234_v24 = vmul.f32 %v2216_v56, %v7231_v48  ;;  %v2044_v0 = vand.u32 2147483648, %v7090_v26  ;;  %v7290_v49 = vpop.eup %5205  ;;  %v2269_v8 = vmul.f32 %v2251_v59, %v7187_v44  ;;  %vm7310_vm6 = vmor %vm2038_vm13, %vm2039_vm15 }
 0x200   : > { %v2042_v47 = vand.u32 2147483647, %v7090_v26  ;;  %v2079_v41 = vmul.f32 %v7278_v6, %v7229_v17  ;;  %5211 = vpow2.f32 %v2377_v30  ;;  %v2330_v56 = vsub.f32 0.0, %v7239_v31 }
 0x201   : > { %v1863_v21 = vmul.f32 0.3275911, %v7275_v35  ;;  %v2041_v30 = vsel %vm7310_vm6, %v7137_v43, %v2037_v9  ;;  %v2287_v7 = vadd.f32 0.2548296, %v2269_v8  ;;  %v7329_v50 = vmul.f32 %v2329_v40, %v7191_v37 }
 0x202   : > { %v1754_v3 = vpop.f32.mrf.mxu0  ;;  %vm2043_vm7 = vcmp.eq.f32.partialorder %v2042_v47, 8.507059e+37  ;;  %v2052_v12 = vadd.f32 %v7197_v38, %v2051_v62  ;;  %vm2054_vm8 = vweird.f32 %v7197_v38  ;;  %vm2068_vm9 = vweird.f32 %v7175_v57 }
 0x203   : > { %v7292_v32 = vadd.f32 1.0, %v1863_v21  ;;  %v7298_v20 = vadd.f32 %v5333_v1, %v1754_v3  ;;  %v7301_v25 = vpop.eup %5207  ;;  %v2252_v21 = vadd.f32 -0.28449672, %v2234_v24  ;;  %v2094_v1 = vmul.f32 %v7284_v22, %v7236_v19  ;;  %vm7351_vm10 = vmor %vm2053_vm14, %vm2054_vm8 }
 0x204   : > { %v7314_v3 = vpop.eup %5209  ;;  %v2045_v24 = vor.u32 1.1754944e-38, %v2044_v0  ;;  %v2109_v45 = vmul.f32 %v7301_v25, %v7254_v58  ;;  %v2305_v9 = vmul.f32 %v2287_v7, %v7187_v44  ;;  %v2348_v37 = vmul.f32 %v2330_v56, %v7239_v31 }
 0x205   : > { %10040 = vst [vmem:[#allocation35_spill] sm:$0xff] %v7298_v20  ;;  %5213 = vrcp.f32 %v7292_v32  ;;  %v2270_v26 = vmul.f32 %v2252_v21, %v7231_v48  ;;  %v7326_v51 = vmul.f32 0.70710677, %v7298_v20  ;;  %v2080_v21 = vsub.f32 1.0, %v2079_v41 }
 0x206   : > { %v7338_v8 = vsel %vm2043_vm7, %v2045_v24, %v2041_v30  ;;  %v2095_v59 = vsub.f32 1.0, %v2094_v1  ;;  %v2057_v40 = vand.u32 2147483647, %v7131_v28  ;;  %v7342_v47 = vpop.eup %5211  ;;  %v2110_v62 = vsub.f32 1.0, %v2109_v45 }
 0x207   : > { %v2288_v43 = vadd.f32 0.2548296, %v2270_v26  ;;  %v7336_v0 = vand.u32 2147483647, %v7326_v51  ;;  %v2395_v26 = vmul.f32 %v7141_v46, %v2305_v9  ;;  %v2056_v45 = vsel %vm7351_vm10, %v7197_v38, %v2052_v12 }
 0x208   : > { %vm7360_vm11 = vcmp.eq.f32.partialorder %v2057_v40, 8.507059e+37  ;;  %v2059_v46 = vand.u32 2147483648, %v7131_v28  ;;  %v2163_v41 = vmul.f32 1.0614054, %v7338_v8  ;;  %vm2083_vm12 = vweird.f32 %v7229_v17 }
 0x209   : > { %v2306_v20 = vmul.f32 %v2288_v43, %v7231_v48  ;;  %v1864_v7 = vmul.f32 0.3275911, %v7336_v0  ;;  %v2413_v30 = vsub.f32 1.0, %v2395_v26  ;;  %v2067_v12 = vadd.f32 %v7227_v63, %v2066_v14 }
 0x20a   : > { %v2060_v43 = vor.u32 1.1754944e-38, %v2059_v46  ;;  %v2181_v38 = vadd.f32 -1.4531521, %v2163_v41  ;;  %vm2069_vm13 = vweird.f32 %v7227_v63  ;;  %v2081_v44 = vmul.f32 %v7278_v6, %v2080_v21 }
 0x20b   : > { %v7355_v31 = vpop.eup %5213  ;;  %v2396_v1 = vmul.f32 %v7150_v60, %v2306_v20  ;;  %v7370_v24 = vadd.f32 1.0, %v1864_v7  ;;  %v2431_v40 = vmul.f32 %v2413_v30, %v7053_v4  ;;  %v7377_v16 = vmul.f32 1.442695, %v2348_v37  ;;  %vm7396_vm15 = vmor %vm2068_vm9, %vm2069_vm13 }
 0x20c   : > { %v2124_v56 = vmul.f32 %v7355_v31, %v7292_v32  ;;  %v7381_v60 = vsel %vm7360_vm11, %v2060_v43, %v2056_v45  ;;  %v2199_v20 = vmul.f32 %v2181_v38, %v7338_v8  ;;  %v2096_v14 = vmul.f32 %v7284_v22, %v2095_v59 }
 0x20d   : > { %v2414_v28 = vsub.f32 1.0, %v2396_v1  ;;  %5215 = vrcp.f32 %v7370_v24  ;;  %vm2098_vm14 = vweird.f32 %v7236_v19  ;;  %v2449_v7 = vadd.f32 1.0, %v2431_v40 }
 0x20e   : > { %v2125_v9 = vsub.f32 1.0, %v2124_v56  ;;  %v2164_v4 = vmul.f32 1.0614054, %v7381_v60  ;;  %v2111_v46 = vmul.f32 %v7301_v25, %v2110_v62  ;;  %v2217_v37 = vadd.f32 1.4214138, %v2199_v20 }
 0x20f   : > { %v2432_v26 = vmul.f32 %v2414_v28, %v7115_v13  ;;  %v2072_v59 = vand.u32 2147483647, %v7175_v57  ;;  %v2071_v62 = vsel %vm7396_vm15, %v7227_v63, %v2067_v12  ;;  %v2074_v41 = vand.u32 2147483648, %v7175_v57 }
 0x210   : > { %v7390_v21 = vmul.f32 %v7355_v31, %v2125_v9  ;;  %v2182_v48 = vadd.f32 -1.4531521, %v2164_v4  ;;  %v2467_v56 = vmul.f32 %v2449_v7, %v7024_v55  ;;  %v2235_v1 = vmul.f32 %v2217_v37, %v7338_v8 }
 0x211   : > { %v2450_v13 = vadd.f32 1.0, %v2432_v26  ;;  %v2082_v30 = vadd.f32 %v7278_v6, %v2081_v44  ;;  %vm2084_vm6 = vweird.f32 %v7278_v6  ;;  %vm2113_vm7 = vweird.f32 %v7254_v58 }
 0x212   : > { %v2200_v9 = vmul.f32 %v2182_v48, %v7381_v60  ;;  %v2075_v28 = vor.u32 1.1754944e-38, %v2074_v41  ;;  %v2087_v63 = vand.u32 2147483647, %v7229_v17  ;;  %v2253_v57 = vadd.f32 -0.28449672, %v2235_v1  ;;  %vm7421_vm9 = vmor %vm2083_vm12, %vm2084_vm6 }
 0x213   : > { %v7409_v43 = vpop.eup %5215  ;;  %v2468_v38 = vmul.f32 %v2450_v13, %v7099_v18  ;;  %vm2073_vm8 = vcmp.eq.f32.partialorder %v2072_v59, 8.507059e+37  ;;  %v2089_v40 = vand.u32 2147483648, %v7229_v17  ;;  %v2086_v26 = vsel %vm7421_vm9, %v7278_v6, %v2082_v30 }
 0x214   : > { %v7417_v55 = vmul.f32 %v7409_v43, %v7370_v24  ;;  %v2218_v44 = vadd.f32 1.4214138, %v2200_v9  ;;  %v7426_v20 = vsel %vm2073_vm8, %v2075_v28, %v2071_v62  ;;  %v2271_v7 = vmul.f32 %v2253_v57, %v7338_v8 }
 0x215   : > { %v2481_v18 = vpack.c.bf16 %v2468_v38, %v2467_v56  ;;  %vm2088_vm10 = vcmp.eq.f32.partialorder %v2087_v63, 8.507059e+37  ;;  %v2090_v4 = vor.u32 1.1754944e-38, %v2089_v40  ;;  %v2165_v37 = vmul.f32 1.0614054, %v7426_v20 }
 0x216   : > { %v2236_v45 = vmul.f32 %v2218_v44, %v7381_v60  ;;  %v2097_v59 = vadd.f32 %v7284_v22, %v2096_v14  ;;  %vm2099_vm11 = vweird.f32 %v7284_v22  ;;  %v2102_v17 = vand.u32 2147483647, %v7236_v19 }
 0x217   : > { %2580 = vmatmul.bf16.gmra.mxu1 %v2481_v18  ;;  %v2140_v13 = vsub.f32 1.0, %v7417_v55  ;;  %v2289_v48 = vadd.f32 0.2548296, %v2271_v7  ;;  %v7438_v62 = vsel %vm2088_vm10, %v2090_v4, %v2086_v26  ;;  %v2183_v6 = vadd.f32 -1.4531521, %v2165_v37  ;;  %vm7442_vm12 = vmor %vm2098_vm14, %vm2099_vm11 }
 0x218   : > { %v2254_v56 = vadd.f32 -0.28449672, %v2236_v45  ;;  %v2166_v1 = vmul.f32 1.0614054, %v7438_v62  ;;  %v2101_v14 = vsel %vm7442_vm12, %v7284_v22, %v2097_v59  ;;  %vm7450_vm13 = vcmp.eq.f32.partialorder %v2102_v17, 8.507059e+37 }
 0x219   : > { %vm2128_vm15 = vweird.f32 %v7292_v32  ;;  %v2307_v38 = vmul.f32 %v2289_v48, %v7338_v8  ;;  %v2201_v9 = vmul.f32 %v2183_v6, %v7426_v20  ;;  %v2104_v28 = vand.u32 2147483648, %v7236_v19 }
 0x21a   : > { %v2112_v63 = vadd.f32 %v7301_v25, %v2111_v46  ;;  %v2272_v55 = vmul.f32 %v2254_v56, %v7381_v60  ;;  %v2184_v57 = vadd.f32 -1.4531521, %v2166_v1  ;;  %vm2114_vm14 = vweird.f32 %v7301_v25 }
 0x21b   : > { %v2117_v22 = vand.u32 2147483647, %v7254_v58  ;;  %v2397_v12 = vmul.f32 %v7234_v34, %v2307_v38  ;;  %v2219_v40 = vadd.f32 1.4214138, %v2201_v9  ;;  %v2105_v18 = vor.u32 1.1754944e-38, %v2104_v28  ;;  %vm7465_vm6 = vmor %vm2113_vm7, %vm2114_vm14 }
 0x21c   : > { %v2119_v19 = vand.u32 2147483648, %v7254_v58  ;;  %v2290_v46 = vadd.f32 0.2548296, %v2272_v55  ;;  %v2202_v44 = vmul.f32 %v2184_v57, %v7438_v62  ;;  %v2116_v26 = vsel %vm7465_vm6, %v7301_v25, %v2112_v63 }
 0x21d   : > { %vm2118_vm8 = vcmp.eq.f32.partialorder %v2117_v22, 8.507059e+37  ;;  %v2415_v7 = vsub.f32 1.0, %v2397_v12  ;;  %v2237_v34 = vmul.f32 %v2219_v40, %v7426_v20  ;;  %v7477_v4 = vsel %vm7450_vm13, %v2105_v18, %v2101_v14 }
 0x21e   : > { %v2120_v37 = vor.u32 1.1754944e-38, %v2119_v19  ;;  %v2308_v45 = vmul.f32 %v2290_v46, %v7381_v60  ;;  %v2220_v59 = vadd.f32 1.4214138, %v2202_v44  ;;  %v2167_v58 = vmul.f32 1.0614054, %v7477_v4 }
 0x21f   : > { %v2127_v17 = vadd.f32 %v7355_v31, %v7390_v21  ;;  %vm2143_vm7 = vweird.f32 %v7370_v24  ;;  %v2433_v25 = vmul.f32 %v2415_v7, %v7129_v5  ;;  %v2255_v48 = vadd.f32 -0.28449672, %v2237_v34 }
 0x220   : > { %v7485_v6 = vsel %vm2118_vm8, %v2120_v37, %v2116_v26  ;;  %vm2129_vm9 = vweird.f32 %v7355_v31  ;;  %vm1806_vm10 = vcmp.ge.f32.partialorder %v7157_v52, 0.0  ;;  %v2398_v41 = vmul.f32 %v7290_v49, %v2308_v45 }
 0x221   : > { %v2238_v60 = vmul.f32 %v2220_v59, %v7438_v62  ;;  %v2168_v56 = vmul.f32 1.0614054, %v7485_v6  ;;  %v2185_v1 = vadd.f32 -1.4531521, %v2167_v58  ;;  %v2141_v21 = vmul.f32 %v7409_v43, %v2140_v13  ;;  %vm7498_vm11 = vmor %vm2128_vm15, %vm2129_vm9 }
 0x222   : > { %v2451_v14 = vadd.f32 1.0, %v2433_v25  ;;  %v2273_v30 = vmul.f32 %v2255_v48, %v7426_v20  ;;  %v2132_v5 = vand.u32 2147483647, %v7292_v32  ;;  %v2416_v38 = vsub.f32 1.0, %v2398_v41 }
 0x223   : > { %v2256_v9 = vadd.f32 -0.28449672, %v2238_v60  ;;  %v2186_v28 = vadd.f32 -1.4531521, %v2168_v56  ;;  %v2203_v63 = vmul.f32 %v2185_v1, %v7477_v4  ;;  %v2131_v13 = vsel %vm7498_vm11, %v7355_v31, %v2127_v17 }
 0x224   : > { %v2469_v55 = vmul.f32 %v2451_v14, %v7121_v33  ;;  %v2291_v57 = vadd.f32 0.2548296, %v2273_v30  ;;  %v2134_v22 = vand.u32 2147483648, %v7292_v32  ;;  %v2434_v12 = vmul.f32 %v2416_v38, %v7267_v23 }
 0x225   : > { %v2274_v40 = vmul.f32 %v2256_v9, %v7438_v62  ;;  %v2204_v18 = vmul.f32 %v2186_v28, %v7485_v6  ;;  %v2221_v8 = vadd.f32 1.4214138, %v2203_v63  ;;  %vm2133_vm12 = vcmp.eq.f32.partialorder %v2132_v5, 8.507059e+37 }
 0x226   : > { %v2309_v19 = vmul.f32 %v2291_v57, %v7426_v20  ;;  %v2135_v46 = vor.u32 1.1754944e-38, %v2134_v22  ;;  %vm2144_vm13 = vweird.f32 %v7409_v43  ;;  %v2452_v33 = vadd.f32 1.0, %v2434_v12 }
 0x227   : > { %v2292_v44 = vadd.f32 0.2548296, %v2274_v40  ;;  %v2222_v26 = vadd.f32 1.4214138, %v2204_v18  ;;  %v2239_v31 = vmul.f32 %v2221_v8, %v7477_v4  ;;  %v2142_v23 = vadd.f32 %v7409_v43, %v2141_v21  ;;  %vm7523_vm15 = vmor %vm2143_vm7, %vm2144_vm13 }
 0x228   : > { %v2399_v32 = vmul.f32 %v7314_v3, %v2309_v19  ;;  %v7514_v7 = vsel %vm2133_vm12, %v2135_v46, %v2131_v13  ;;  %v2147_v34 = vand.u32 2147483647, %v7370_v24  ;;  %v2470_v37 = vmul.f32 %v2452_v33, %v7181_v54 }
 0x229   : > { %v2310_v20 = vmul.f32 %v2292_v44, %v7438_v62  ;;  %v2240_v45 = vmul.f32 %v2222_v26, %v7485_v6  ;;  %v2257_v59 = vadd.f32 -0.28449672, %v2239_v31  ;;  %v2146_v17 = vsel %vm7523_vm15, %v7409_v43, %v2142_v23 }
 0x22a   : > { %v2417_v3 = vsub.f32 1.0, %v2399_v32  ;;  %v2149_v25 = vand.u32 2147483648, %v7370_v24  ;;  %v2169_v54 = vmul.f32 1.0614054, %v7514_v7  ;;  %v2482_v48 = vpack.c.bf16 %v2470_v37, %v2469_v55 }
 0x22b   : > { %v2400_v62 = vmul.f32 %v7342_v47, %v2310_v20  ;;  %v2258_v41 = vadd.f32 -0.28449672, %v2240_v45  ;;  %v2275_v60 = vmul.f32 %v2257_v59, %v7477_v4  ;;  %v1824_v56 = vsel %vm1806_vm10, 1.0, %v10039_v29 }
 0x22c   : > { %v2379_v1 = vmul.f32 1.442695, %v7329_v50  ;;  %v2150_v21 = vor.u32 1.1754944e-38, %v2149_v25  ;;  %v2187_v14 = vadd.f32 -1.4531521, %v2169_v54  ;;  %5217 = vpow2.f32 %v7377_v16  ;;  %2585 = vmatmul.bf16.gmra.mxu1 %v2482_v48 }
 0x22d   : > { %v2418_v24 = vsub.f32 1.0, %v2400_v62  ;;  %v2276_v43 = vmul.f32 %v2258_v41, %v7485_v6  ;;  %vm2148_vm14 = vcmp.eq.f32.partialorder %v2147_v34, 8.507059e+37  ;;  %v2332_v47 = vsub.f32 0.0, %v7336_v0  ;;  %v7565_v48 = vld [vmem:[%s9888_s10] ss:$0 sm:$0xff] }
 0x22e   : > { %v2435_v30 = vmul.f32 %v2417_v3, %v7272_v36  ;;  %v2151_v5 = vsel %vm2148_vm14, %v2150_v21, %v2146_v17  ;;  %v2205_v38 = vmul.f32 %v2187_v14, %v7514_v7  ;;  %v2293_v9 = vadd.f32 0.2548296, %v2275_v60 }
 0x22f   : > { %v2436_v52 = vmul.f32 %v2418_v24, %v1824_v56  ;;  %v2294_v28 = vadd.f32 0.2548296, %v2276_v43  ;;  %v2170_v50 = vmul.f32 1.0614054, %v2151_v5  ;;  %5219 = vpow2.f32 %v2379_v1 }
 0x230   : > { %v2331_v63 = vsub.f32 0.0, %v7275_v35  ;;  %v2223_v16 = vadd.f32 1.4214138, %v2205_v38  ;;  %v2350_v13 = vmul.f32 %v2332_v47, %v7336_v0  ;;  %v1770_v12 = vmul.f32 0.5, %v7134_v39 }
 0x231   : > { %v2454_v49 = vadd.f32 1.0, %v2436_v52  ;;  %v2312_v55 = vmul.f32 %v2294_v28, %v7485_v6  ;;  %v2188_v57 = vadd.f32 -1.4531521, %v2170_v50  ;;  %v2453_v40 = vadd.f32 1.0, %v2435_v30 }
 0x232   : > { %v2241_v22 = vmul.f32 %v2223_v16, %v7514_v7  ;;  %v5218_v36 = vpop.eup %5217  ;;  %v2311_v18 = vmul.f32 %v2293_v9, %v7477_v4  ;;  %v2349_v19 = vmul.f32 %v2331_v63, %v7275_v35  ;;  %v1769_v33 = vmul.f32 0.5, %v7083_v10  ;;  %v7557_v10 = vld [vmem:[%s9887_s9] ss:$0 sm:$0xff] }
 0x233   : > { %v2206_v8 = vmul.f32 %v2188_v57, %v2151_v5  ;;  %v2472_v44 = vmul.f32 %v2454_v49, %v1770_v12  ;;  %v2402_v26 = vmul.f32 %v5218_v36, %v2312_v55  ;;  %v2385_v32 = vmul.f32 1.442695, %v2350_v13 }
 0x234   : > { %v2259_v46 = vadd.f32 -0.28449672, %v2241_v22  ;;  %v2471_v0 = vmul.f32 %v2453_v40, %v1769_v33  ;;  %v2383_v39 = vmul.f32 1.442695, %v2349_v19  ;;  %vm1808_vm6 = vcmp.ge.f32.partialorder %v7225_v61, 0.0  ;;  %v10063_v40 = vld [vmem:[#allocation17_spill] sm:$0xff] }
 0x235   : > { %v2224_v6 = vadd.f32 1.4214138, %v2206_v8  ;;  %v5220_v31 = vpop.eup %5219  ;;  %v2420_v20 = vsub.f32 1.0, %v2402_v26  ;;  %vm1807_vm8 = vcmp.ge.f32.partialorder %v7178_v42, 0.0  ;;  %5221 = vpow2.f32 %v2385_v32  ;;  %v7597_v33 = vld [vmem:[%s9976_s2 + $0x8] sm:$0x7f] }
 0x236   : > { %v2401_v23 = vmul.f32 %v5220_v31, %v2311_v18  ;;  %v2277_v37 = vmul.f32 %v2259_v46, %v7514_v7  ;;  %v2483_v4 = vpack.c.bf16 %v2472_v44, %v2471_v0  ;;  %v1826_v3 = vsel %vm1808_vm6, 1.0, %v10039_v29  ;;  %v10065_v44 = vld [vmem:[#allocation35_spill] sm:$0xff] }
 0x237   : > { %v2242_v34 = vmul.f32 %v2224_v6, %v2151_v5  ;;  %5223 = vpow2.f32 %v2383_v39  ;;  %v2438_v17 = vmul.f32 %v2420_v20, %v1826_v3  ;;  %v1825_v54 = vsel %vm1807_vm8, 1.0, %v10039_v29 }
 0x238   : > { %v2419_v35 = vsub.f32 1.0, %v2401_v23  ;;  %v2295_v58 = vadd.f32 0.2548296, %v2277_v37  ;;  %v581_v62 = vadd.s32 8, %v5627_v11  ;;  %v1772_v30 = vmul.f32 0.5, %v7203_v53 }
 0x239   : > { %v2260_v45 = vadd.f32 -0.28449672, %v2242_v34  ;;  %v2561_v61 = vpop.f32.mrf.mxu1  ;;  %v2456_v21 = vadd.f32 1.0, %v2438_v17  ;;  %v7572_v9 = vstv %s5612_s21  ;;  %v1771_v28 = vmul.f32 0.5, %v7160_v2 }
 0x23a   : > { %v2562_v42 = vadd.f32 %v7557_v10, %v2561_v61  ;;  %v2437_v41 = vmul.f32 %v2419_v35, %v1825_v54  ;;  %v2313_v60 = vmul.f32 %v2295_v58, %v7514_v7  ;;  %v600_v47 = vadd.s32 4294967288, %v581_v62  ;;  %10061 = vst [vmem:[#allocation36_spill] sm:$0xff] %v7572_v9 }
 0x23b   : > { %v2278_v59 = vmul.f32 %v2260_v45, %v2151_v5  ;;  %v5222_v1 = vpop.eup %5221  ;;  %vm1810_vm7 = vcmp.ge.f32.partialorder %v7326_v51, 0.0  ;;  %v2474_v50 = vmul.f32 %v2456_v21, %v1772_v30  ;;  %vm1809_vm10 = vcmp.ge.f32.partialorder %v7257_v27, 0.0 }
 0x23c   : > { %2590 = vmatmul.bf16.gmra.mxu1 %v2483_v4  ;;  %v2608_v24 = vmul.f32 %v7565_v48, %v2562_v42  ;;  %v2455_v38 = vadd.f32 1.0, %v2437_v41  ;;  %vm637_vm9 = vcmp.lt.s32.totalorder %v600_v47, %v7572_v9  ;;  %v582_v55 = vadd.s32 16, %v5627_v11 }
 0x23d   : > { %v2296_v25 = vadd.f32 0.2548296, %v2278_v59  ;;  %v5224_v14 = vpop.eup %5223  ;;  %v1828_v2 = vsel %vm1810_vm7, 1.0, %v10039_v29  ;;  %v9926_v13 = vmov 0.0   ;;  %v1827_v36 = vsel %vm1809_vm10, 1.0, %v10039_v29 }
 0x23e   : > { %v2403_v52 = vmul.f32 %v5224_v14, %v2313_v60  ;;  %v2473_v53 = vmul.f32 %v2455_v38, %v1771_v28  ;;  %v7584_v22 = vsel %vm637_vm9, 1.0, %v9926_v13  ;;  %v601_v19 = vadd.s32 4294967288, %v582_v55  ;;  %v10068_v14 = vld [vmem:[#allocation19_spill] sm:$0xff] }
 0x23f   : > { %v2314_v56 = vmul.f32 %v2296_v25, %v2151_v5  ;;  %v2626_v5 = vadd.f32 %v5640_v15, %v2608_v24  ;;  %10062 = vst [vmem:[#allocation37_spill] sm:$0xff] %v7584_v22  ;;  %v583_v15 = vadd.s32 24, %v5627_v11  ;;  %v1774_v26 = vmul.f32 0.5, %v10065_v44  ;;  %v10066_v25 = vld [vmem:[#allocation34_spill] sm:$0xff] }
 0x240   : > { %v2421_v49 = vsub.f32 1.0, %v2403_v52  ;;  %v2484_v51 = vpack.c.bf16 %v2474_v50, %v2473_v53  ;;  %v7601_v31 = vperm.slane %v7597_v33, 0  ;;  %vm638_vm11 = vcmp.lt.s32.totalorder %v601_v19, %v7572_v9 }
 0x241   : > { %v2404_v43 = vmul.f32 %v5222_v1, %v2314_v56  ;;  %v2563_v7 = vpop.f32.mrf.mxu1  ;;  %v7588_v12 = vmul.f32 0.0, %v2626_v5  ;;  %v602_v6 = vadd.s32 4294967288, %v583_v15  ;;  %v7608_v4 = vperm.slane %v7597_v33, 3 }
 0x242   : > { %v2564_v16 = vadd.f32 %v7557_v10, %v2563_v7  ;;  %v2439_v8 = vmul.f32 %v2421_v49, %v1827_v36  ;;  %v7617_v59 = vperm.slane %v7597_v33, 1  ;;  %v1773_v54 = vmul.f32 0.5, %v10066_v25 }
 0x243   : > { %v2422_v63 = vsub.f32 1.0, %v2404_v43  ;;  %v9924_v0 = vrot.slane %v7588_v12, 5  ;;  %v9923_v20 = vrot.slane %v7588_v12, 6  ;;  %v9922_v41 = vrot.slane %v7588_v12, 7 }
 0x244   : > { %v2609_v57 = vmul.f32 %v7565_v48, %v2564_v16  ;;  %v2457_v37 = vadd.f32 1.0, %v2439_v8  ;;  %v7631_v60 = vsel %vm638_vm11, 1.0, %v9926_v13  ;;  %vm639_vm12 = vcmp.lt.s32.totalorder %v602_v6, %v7572_v9 }
 0x245   : > { %v2440_v27 = vmul.f32 %v2422_v63, %v1828_v2  ;;  %10067 = vst [vmem:[#allocation35_spill] sm:$0xff] %v7631_v60  ;;  %v7635_v1 = vperm.slane %v7597_v33, 2  ;;  %v7647_v52 = vsel %vm639_vm12, 1.0, %v9926_v13  ;;  %v7652_v63 = vperm.slane %v7597_v33, 4 }
 0x246   : > { %v2627_v18 = vadd.f32 %v10063_v40, %v2609_v57  ;;  %v2475_v21 = vmul.f32 %v2457_v37, %v1773_v54  ;;  %10070 = vst [vmem:[#allocation19_spill] sm:$0xff] %v7647_v52  ;;  %v7660_v2 = vperm.slane %v7597_v33, 5  ;;  %v7691_v25 = vperm.slane %v7597_v33, 6 }
 0x247   : > { %v2458_v32 = vadd.f32 1.0, %v2440_v27 }
 0x248   : > { %v7592_v46 = vmul.f32 %v7584_v22, %v2627_v18 }
 0x249   : > { %v2476_v42 = vmul.f32 %v2458_v32, %v1774_v26  ;;  %v10071_v32 = vld [vmem:[#allocation20_spill] sm:$0xff] }
 0x24a   : > { %10064 = vst [vmem:[#allocation17_spill] sm:$0xff] %v7592_v46  ;;  %v2684_v23 = vrot.slane %v7592_v46, 5  ;;  %v2757_v34 = vrot.slane %v7592_v46, 6  ;;  %v2830_v58 = vrot.slane %v7592_v46, 7  ;;  %v2666_v3 = vmul.f32 %v7608_v4, %v7592_v46 }
 0x24b   : > { %v2566_v39 = vpop.f32.mrf.mxu1  ;;  %v2485_v30 = vpack.c.bf16 %v2476_v42, %v2475_v21  ;;  %v9925_v5 = vrot.slane %v7592_v46, 1  ;;  %v9921_v16 = vrot.slane %v7592_v46, 2  ;;  %v7703_v21 = vld [vmem:[%s9981_s3 + $0x1] ss:$0 sm:$0xff] }
 0x24c   : > { %2595 = vmatmul.bf16.gmra.mxu1 %v2484_v51  ;;  %v2567_v45 = vadd.f32 %v7557_v10, %v2566_v39  ;;  %v2717_v35 = vsel %vm746_vm0, %v9924_v0, %v2684_v23  ;;  %v2790_v61 = vsel %vm820_vm1, %v9923_v20, %v2757_v34  ;;  %v2863_v47 = vsel %vm894_vm2, %v9922_v41, %v2830_v58 }
 0x24d   : > { %v2721_v17 = vmul.f32 %v7601_v31, %v2717_v35  ;;  %v2794_v43 = vmul.f32 %v7617_v59, %v2790_v61  ;;  %v2867_v7 = vmul.f32 %v7635_v1, %v2863_v47  ;;  %v9920_v51 = vrot.slane %v7592_v46, 3 }
 0x24e   : > { %v2610_v62 = vmul.f32 %v7565_v48, %v2567_v45 }
 0x24f   : > { %v2739_v56 = vadd.f32 %v2721_v17, %v2666_v3  ;;  %v584_v3 = vadd.s32 32, %v5627_v11 }
 0x250   : > { %v2628_v24 = vadd.f32 %v10068_v14, %v2610_v62 }
 0x251   : > { %v2812_v28 = vadd.f32 %v2794_v43, %v2739_v56 }
 0x252   : > { %v7644_v38 = vmul.f32 %v7631_v60, %v2628_v24 }
 0x253   : > { %v2568_v50 = vpop.f32.mrf.mxu1  ;;  %v2885_v40 = vadd.f32 %v2867_v7, %v2812_v28  ;;  %v603_v28 = vadd.s32 4294967288, %v584_v3 }
 0x254   : > { %10069 = vst [vmem:[#allocation34_spill] sm:$0xff] %v7644_v38  ;;  %v2569_v53 = vadd.f32 %v7557_v10, %v2568_v50  ;;  %v2904_v49 = vrot.slane %v7644_v38, 1  ;;  %v2977_v55 = vrot.slane %v7644_v38, 2  ;;  %v3050_v57 = vrot.slane %v7644_v38, 3 }
 0x255   : > { %v2685_v15 = vrot.slane %v7644_v38, 5  ;;  %v2758_v36 = vrot.slane %v7644_v38, 6  ;;  %v2667_v26 = vmul.f32 %v7608_v4, %v7644_v38  ;;  %v2831_v35 = vrot.slane %v7644_v38, 7 }
 0x256   : > { %v2611_v27 = vmul.f32 %v7565_v48, %v2569_v53  ;;  %v2935_v18 = vsel %vm968_vm3, %v9925_v5, %v2904_v49  ;;  %v3008_v8 = vsel %vm1042_vm4, %v9921_v16, %v2977_v55  ;;  %v3081_v44 = vsel %vm1116_vm5, %v9920_v51, %v3050_v57  ;;  %v10086_v16 = vld [vmem:[#allocation25_spill] sm:$0xff] }
 0x257   : > { %v2940_v19 = vmul.f32 %v7652_v63, %v2935_v18  ;;  %v2716_v6 = vsel %vm746_vm0, %v2684_v23, %v2685_v15  ;;  %v2789_v45 = vsel %vm820_vm1, %v2757_v34, %v2758_v36  ;;  %v3013_v61 = vmul.f32 %v7660_v2, %v3008_v8 }
 0x258   : > { %v2629_v37 = vadd.f32 %v10071_v32, %v2611_v27  ;;  %v2722_v39 = vmul.f32 %v7601_v31, %v2716_v6  ;;  %v2795_v42 = vmul.f32 %v7617_v59, %v2789_v45  ;;  %v2862_v34 = vsel %vm894_vm2, %v2830_v58, %v2831_v35 }
 0x259   : > { %v2958_v17 = vadd.f32 %v2940_v19, %v2885_v40  ;;  %v3086_v56 = vmul.f32 %v7691_v25, %v3081_v44  ;;  %v585_v40 = vadd.s32 40, %v5627_v11  ;;  %vm640_vm13 = vcmp.lt.s32.totalorder %v603_v28, %v7572_v9 }
 0x25a   : > { %v7694_v23 = vmul.f32 %v7647_v52, %v2629_v37  ;;  %v2740_v54 = vadd.f32 %v2722_v39, %v2667_v26 }
 0x25b   : > { %v3031_v62 = vadd.f32 %v3013_v61, %v2958_v17  ;;  %v604_v37 = vadd.s32 4294967288, %v585_v40 }
 0x25c   : > { %2600 = vmatmul.bf16.gmra.mxu1 %v2485_v30  ;;  %10072 = vst [vmem:[#allocation20_spill] sm:$0xff] %v7694_v23  ;;  %v2813_v14 = vadd.f32 %v2795_v42, %v2740_v54  ;;  %v2905_v33 = vrot.slane %v7694_v23, 1  ;;  %v2978_v24 = vrot.slane %v7694_v23, 2  ;;  %v3051_v43 = vrot.slane %v7694_v23, 3 }
 0x25d   : > { %v3104_v47 = vadd.f32 %v3086_v56, %v3031_v62  ;;  %v2868_v30 = vmul.f32 %v7635_v1, %v2862_v34  ;;  %v2668_v39 = vmul.f32 %v7608_v4, %v7694_v23  ;;  %v2832_v54 = vrot.slane %v7694_v23, 7  ;;  %v10074_v62 = vld [vmem:[#allocation21_spill] sm:$0xff] }
 0x25e   : > { %v2934_v58 = vsel %vm968_vm3, %v2904_v49, %v2905_v33  ;;  %v3007_v50 = vsel %vm1042_vm4, %v2977_v55, %v2978_v24  ;;  %v3080_v18 = vsel %vm1116_vm5, %v3050_v57, %v3051_v43  ;;  %v2686_v49 = vrot.slane %v7694_v23, 5 }
 0x25f   : > { %v7714_v7 = vadd.f32 %v7703_v21, %v3104_v47  ;;  %v2886_v53 = vadd.f32 %v2868_v30, %v2813_v14  ;;  %v2941_v27 = vmul.f32 %v7652_v63, %v2934_v58  ;;  %v3014_v19 = vmul.f32 %v7660_v2, %v3007_v50 }
 0x260   : > { %v2759_v55 = vrot.slane %v7694_v23, 6  ;;  %v3087_v32 = vmul.f32 %v7691_v25, %v3080_v18  ;;  %v2715_v57 = vsel %vm746_vm0, %v2685_v15, %v2686_v49  ;;  %v7737_v42 = vsel %vm640_vm13, 1.0, %v9926_v13 }
 0x261   : > { %3143 = vadd.xlane.f32.xlu1 %v7714_v7  ;;  %v2959_v8 = vadd.f32 %v2941_v27, %v2886_v53  ;;  %v2723_v45 = vmul.f32 %v7601_v31, %v2715_v57  ;;  %10073 = vst [vmem:[#allocation38_spill] sm:$0xff] %v7737_v42  ;;  %vm641_vm15 = vcmp.lt.s32.totalorder %v604_v37, %v7572_v9 }
 0x262   : > { %v2788_v61 = vsel %vm820_vm1, %v2758_v36, %v2759_v55  ;;  %v2861_v36 = vsel %vm894_vm2, %v2831_v35, %v2832_v54  ;;  %v7756_v40 = vsel %vm641_vm15, 1.0, %v9926_v13 }
 0x263   : > { %v2571_v44 = vpop.f32.mrf.mxu1  ;;  %v3032_v6 = vadd.f32 %v3014_v19, %v2959_v8  ;;  %v2741_v34 = vadd.f32 %v2723_v45, %v2668_v39  ;;  %v2796_v14 = vmul.f32 %v7617_v59, %v2788_v61  ;;  %10076 = vst [vmem:[#allocation39_spill] sm:$0xff] %v7756_v40  ;;  %v2869_v18 = vmul.f32 %v7635_v1, %v2861_v36  ;;  %v10077_v45 = vld [vmem:[#allocation22_spill] sm:$0xff] }
 0x264   : > { %v2572_v26 = vadd.f32 %v7557_v10, %v2571_v44  ;;  %v586_v61 = vadd.s32 48, %v5627_v11 }
 0x265   : > { %v3105_v17 = vadd.f32 %v3087_v32, %v3032_v6  ;;  %v2814_v28 = vadd.f32 %v2796_v14, %v2741_v34 }
 0x266   : > { %v2612_v3 = vmul.f32 %v7565_v48, %v2572_v26 }
 0x267   : > { %v7741_v56 = vadd.f32 %v7703_v21, %v3105_v17  ;;  %v2887_v32 = vadd.f32 %v2869_v18, %v2814_v28 }
 0x268   : > { %v2630_v15 = vadd.f32 %v10074_v62, %v2612_v3 }
 0x269   : > { %3145 = vadd.xlane.f32.xlu1 %v7741_v56 }
 0x26a   : > { %v7745_v47 = vmul.f32 %v7737_v42, %v2630_v15 }
 0x26b   : > { %v2573_v30 = vpop.f32.mrf.mxu1 }
 0x26c   : > { %10075 = vst [vmem:[#allocation21_spill] sm:$0xff] %v7745_v47  ;;  %v2574_v58 = vadd.f32 %v7557_v10, %v2573_v30  ;;  %v2906_v50 = vrot.slane %v7745_v47, 1  ;;  %v2979_v53 = vrot.slane %v7745_v47, 2  ;;  %v3052_v27 = vrot.slane %v7745_v47, 3 }
 0x26d   : > { %v2687_v8 = vrot.slane %v7745_v47, 5  ;;  %v2760_v19 = vrot.slane %v7745_v47, 6  ;;  %v2833_v6 = vrot.slane %v7745_v47, 7  ;;  %v2669_v37 = vmul.f32 %v7608_v4, %v7745_v47 }
 0x26e   : > { %v2613_v35 = vmul.f32 %v7565_v48, %v2574_v58  ;;  %v2933_v44 = vsel %vm968_vm3, %v2905_v33, %v2906_v50  ;;  %v3006_v26 = vsel %vm1042_vm4, %v2978_v24, %v2979_v53  ;;  %v3079_v17 = vsel %vm1116_vm5, %v3051_v43, %v3052_v27 }
 0x26f   : > { %v2942_v57 = vmul.f32 %v7652_v63, %v2933_v44  ;;  %v2714_v39 = vsel %vm746_vm0, %v2686_v49, %v2687_v8  ;;  %v2787_v24 = vsel %vm820_vm1, %v2759_v55, %v2760_v19  ;;  %v3015_v62 = vmul.f32 %v7660_v2, %v3006_v26 }
 0x270   : > { %v2631_v3 = vadd.f32 %v10077_v45, %v2613_v35  ;;  %v2724_v33 = vmul.f32 %v7601_v31, %v2714_v39  ;;  %v2797_v49 = vmul.f32 %v7617_v59, %v2787_v24  ;;  %v2860_v36 = vsel %vm894_vm2, %v2832_v54, %v2833_v6 }
 0x271   : > { %v2960_v34 = vadd.f32 %v2942_v57, %v2887_v32  ;;  %v3088_v30 = vmul.f32 %v7691_v25, %v3079_v17  ;;  %v2870_v44 = vmul.f32 %v7635_v1, %v2860_v36  ;;  %v605_v32 = vadd.s32 4294967288, %v586_v61 }
 0x272   : > { %v7781_v15 = vmul.f32 %v7756_v40, %v2631_v3  ;;  %v2742_v14 = vadd.f32 %v2724_v33, %v2669_v37 }
 0x273   : > { %v3033_v43 = vadd.f32 %v3015_v62, %v2960_v34  ;;  %vm642_vm14 = vcmp.lt.s32.totalorder %v605_v32, %v7572_v9 }
 0x274   : > { %10078 = vst [vmem:[#allocation22_spill] sm:$0xff] %v7781_v15  ;;  %v2815_v28 = vadd.f32 %v2797_v49, %v2742_v14  ;;  %v2907_v55 = vrot.slane %v7781_v15, 1  ;;  %v2980_v58 = vrot.slane %v7781_v15, 2  ;;  %v3053_v18 = vrot.slane %v7781_v15, 3 }
 0x275   : > { %v3106_v35 = vadd.f32 %v3088_v30, %v3033_v43  ;;  %v2688_v26 = vrot.slane %v7781_v15, 5  ;;  %v2670_v3 = vmul.f32 %v7608_v4, %v7781_v15  ;;  %v2761_v33 = vrot.slane %v7781_v15, 6 }
 0x276   : > { %v2932_v57 = vsel %vm968_vm3, %v2906_v50, %v2907_v55  ;;  %v3005_v54 = vsel %vm1042_vm4, %v2979_v53, %v2980_v58  ;;  %v2888_v39 = vadd.f32 %v2870_v44, %v2815_v28  ;;  %v3078_v17 = vsel %vm1116_vm5, %v3052_v27, %v3053_v18 }
 0x277   : > { %v7797_v37 = vadd.f32 %v7703_v21, %v3106_v35  ;;  %v2943_v45 = vmul.f32 %v7652_v63, %v2932_v57  ;;  %v2713_v50 = vsel %vm746_vm0, %v2687_v8, %v2688_v26  ;;  %v2834_v53 = vrot.slane %v7781_v15, 7  ;;  %v10111_v15 = vld [vmem:[#allocation31_spill] sm:$0xff] }
 0x278   : > { %v3016_v34 = vmul.f32 %v7660_v2, %v3005_v54  ;;  %v2725_v62 = vmul.f32 %v7601_v31, %v2713_v50  ;;  %v587_v14 = vadd.s32 56, %v5627_v11  ;;  %v2786_v27 = vsel %vm820_vm1, %v2760_v19, %v2761_v33 }
 0x279   : > { %v3180_v24 = vmul.f32 %v7797_v37, %v7797_v37  ;;  %v2961_v61 = vadd.f32 %v2943_v45, %v2888_v39  ;;  %v2859_v8 = vsel %vm894_vm2, %v2833_v6, %v2834_v53  ;;  %v3089_v43 = vmul.f32 %v7691_v25, %v3078_v17  ;;  %v10080_v17 = vld [vmem:[#allocation23_spill] sm:$0xff] }
 0x27a   : > { %v2743_v30 = vadd.f32 %v2725_v62, %v2670_v3  ;;  %v2798_v28 = vmul.f32 %v7617_v59, %v2786_v27  ;;  %v2871_v54 = vmul.f32 %v7635_v1, %v2859_v8  ;;  %v606_v39 = vadd.s32 4294967288, %v587_v14 }
 0x27b   : > { %3201 = vadd.xlane.f32.xlu1 %v3180_v24  ;;  %v3034_v36 = vadd.f32 %v3016_v34, %v2961_v61  ;;  %v7826_v6 = vsel %vm642_vm14, 1.0, %v9926_v13 }
 0x27c   : > { %v2576_v49 = vpop.f32.mrf.mxu1  ;;  %v2816_v57 = vadd.f32 %v2798_v28, %v2743_v30  ;;  %10079 = vst [vmem:[#allocation40_spill] sm:$0xff] %v7826_v6  ;;  %vm643_vm6 = vcmp.lt.s32.totalorder %v606_v39, %v7572_v9 }
 0x27d   : > { %v2577_v35 = vadd.f32 %v7557_v10, %v2576_v49  ;;  %v3107_v44 = vadd.f32 %v3089_v43, %v3034_v36  ;;  %v7842_v27 = vsel %vm643_vm6, 1.0, %v9926_v13 }
 0x27e   : > { %v2889_v3 = vadd.f32 %v2871_v54, %v2816_v57  ;;  %10082 = vst [vmem:[#allocation41_spill] sm:$0xff] %v7842_v27 }
 0x27f   : > { %v2614_v19 = vmul.f32 %v7565_v48, %v2577_v35  ;;  %v7829_v45 = vadd.f32 %v7703_v21, %v3107_v44 }
 0x281   : > { %v2632_v50 = vadd.f32 %v10080_v17, %v2614_v19  ;;  %v3181_v32 = vmul.f32 %v7829_v45, %v7829_v45  ;;  %v10083_v19 = vld [vmem:[#allocation24_spill] sm:$0xff] }
 0x283   : > { %v7835_v24 = vmul.f32 %v7826_v6, %v2632_v50  ;;  %3203 = vadd.xlane.f32.xlu1 %v3181_v32 }
 0x284   : > { %v2578_v61 = vpop.f32.mrf.mxu1 }
 0x285   : > { %10081 = vst [vmem:[#allocation23_spill] sm:$0xff] %v7835_v24  ;;  %v2579_v34 = vadd.f32 %v7557_v10, %v2578_v61  ;;  %v2689_v62 = vrot.slane %v7835_v24, 5  ;;  %v2762_v14 = vrot.slane %v7835_v24, 6  ;;  %v2908_v8 = vrot.slane %v7835_v24, 1 }
 0x286   : > { %v2981_v49 = vrot.slane %v7835_v24, 2  ;;  %v2835_v43 = vrot.slane %v7835_v24, 7  ;;  %v3054_v30 = vrot.slane %v7835_v24, 3  ;;  %v2671_v44 = vmul.f32 %v7608_v4, %v7835_v24 }
 0x287   : > { %v2615_v36 = vmul.f32 %v7565_v48, %v2579_v34  ;;  %v2712_v28 = vsel %vm746_vm0, %v2688_v26, %v2689_v62  ;;  %v2931_v35 = vsel %vm968_vm3, %v2907_v55, %v2908_v8  ;;  %v2785_v54 = vsel %vm820_vm1, %v2761_v33, %v2762_v14 }
 0x288   : > { %v2726_v57 = vmul.f32 %v7601_v31, %v2712_v28  ;;  %v2944_v17 = vmul.f32 %v7652_v63, %v2931_v35  ;;  %v3004_v50 = vsel %vm1042_vm4, %v2980_v58, %v2981_v49  ;;  %v2799_v26 = vmul.f32 %v7617_v59, %v2785_v54 }
 0x289   : > { %v2633_v39 = vadd.f32 %v10083_v19, %v2615_v36  ;;  %v588_v61 = vadd.s32 64, %v5627_v11  ;;  %v3077_v33 = vsel %vm1116_vm5, %v3053_v18, %v3054_v30  ;;  %v3017_v36 = vmul.f32 %v7660_v2, %v3004_v50 }
 0x28a   : > { %v2744_v32 = vadd.f32 %v2726_v57, %v2671_v44  ;;  %v2962_v34 = vadd.f32 %v2944_v17, %v2889_v3  ;;  %v2858_v58 = vsel %vm894_vm2, %v2834_v53, %v2835_v43  ;;  %v3090_v3 = vmul.f32 %v7691_v25, %v3077_v33 }
 0x28b   : > { %v7864_v55 = vmul.f32 %v7842_v27, %v2633_v39  ;;  %v607_v19 = vadd.s32 4294967288, %v588_v61  ;;  %v2872_v17 = vmul.f32 %v7635_v1, %v2858_v58  ;;  %v589_v50 = vadd.s32 72, %v5627_v11  ;;  %v10096_v27 = vld [vmem:[#allocation28_spill] sm:$0xff] }
 0x28c   : > { %v2817_v28 = vadd.f32 %v2799_v26, %v2744_v32  ;;  %v3035_v54 = vadd.f32 %v3017_v36, %v2962_v34 }
 0x28d   : > { %10084 = vst [vmem:[#allocation24_spill] sm:$0xff] %v7864_v55  ;;  %v2690_v35 = vrot.slane %v7864_v55, 5  ;;  %v2909_v44 = vrot.slane %v7864_v55, 1  ;;  %v2982_v57 = vrot.slane %v7864_v55, 2  ;;  %v3055_v18 = vrot.slane %v7864_v55, 3 }
 0x28e   : > { %v7883_v53 = vadd.f32 %v3090_v3, %v3035_v54  ;;  %v2763_v32 = vrot.slane %v7864_v55, 6  ;;  %v2890_v26 = vadd.f32 %v2872_v17, %v2817_v28  ;;  %vm644_vm8 = vcmp.lt.s32.totalorder %v607_v19, %v7572_v9 }
 0x28f   : > { %v2711_v39 = vsel %vm746_vm0, %v2689_v62, %v2690_v35  ;;  %v2930_v34 = vsel %vm968_vm3, %v2908_v8, %v2909_v44  ;;  %v3003_v61 = vsel %vm1042_vm4, %v2981_v49, %v2982_v57  ;;  %v3076_v54 = vsel %vm1116_vm5, %v3054_v30, %v3055_v18 }
 0x290   : > { %v2727_v62 = vmul.f32 %v7601_v31, %v2711_v39  ;;  %v2945_v36 = vmul.f32 %v7652_v63, %v2930_v34  ;;  %v2672_v28 = vmul.f32 %v7608_v4, %v7864_v55  ;;  %v3018_v8 = vmul.f32 %v7660_v2, %v3003_v61 }
 0x291   : > { %v608_v17 = vadd.s32 4294967288, %v589_v50  ;;  %v2784_v39 = vsel %vm820_vm1, %v2762_v14, %v2763_v32  ;;  %v2836_v34 = vrot.slane %v7864_v55, 7  ;;  %v7904_v19 = vsel %vm644_vm8, 1.0, %v9926_v13 }
 0x292   : > { %v2963_v3 = vadd.f32 %v2945_v36, %v2890_v26  ;;  %10085 = vst [vmem:[#allocation42_spill] sm:$0xff] %v7904_v19  ;;  %v3091_v30 = vmul.f32 %v7691_v25, %v3076_v54  ;;  %v2800_v26 = vmul.f32 %v7617_v59, %v2784_v39 }
 0x293   : > { %vm645_vm7 = vcmp.lt.s32.totalorder %v608_v17, %v7572_v9  ;;  %v2857_v14 = vsel %vm894_vm2, %v2835_v43, %v2836_v34 }
 0x294   : > { %v2581_v33 = vpop.f32.mrf.mxu1  ;;  %v3036_v51 = vadd.f32 %v3018_v8, %v2963_v3 }
 0x295   : > { %v2582_v58 = vadd.f32 %v7557_v10, %v2581_v33  ;;  %v2745_v33 = vadd.f32 %v2727_v62, %v2672_v28 }
 0x296   : > { %v7909_v61 = vadd.f32 %v3091_v30, %v3036_v51  ;;  %v7922_v51 = vsel %vm645_vm7, 1.0, %v9926_v13 }
 0x297   : > { %v2616_v49 = vmul.f32 %v7565_v48, %v2582_v58  ;;  %v2818_v58 = vadd.f32 %v2800_v26, %v2745_v33  ;;  %10088 = vst [vmem:[#allocation43_spill] sm:$0xff] %v7922_v51 }
 0x299   : > { %v2634_v41 = vadd.f32 %v10086_v16, %v2616_v49 }
 0x29b   : > { %v7912_v50 = vmul.f32 %v7904_v19, %v2634_v41  ;;  %v2873_v41 = vmul.f32 %v7635_v1, %v2857_v14 }
 0x29c   : > { %v2583_v36 = vpop.f32.mrf.mxu1 }
 0x29d   : > { %10087 = vst [vmem:[#allocation25_spill] sm:$0xff] %v7912_v50  ;;  %v2584_v62 = vadd.f32 %v7557_v10, %v2583_v36  ;;  %v2910_v54 = vrot.slane %v7912_v50, 1  ;;  %v2983_v16 = vrot.slane %v7912_v50, 2  ;;  %v3056_v28 = vrot.slane %v7912_v50, 3  ;;  %v10089_v36 = vld [vmem:[#allocation26_spill] sm:$0xff] }
 0x29e   : > { %v2691_v3 = vrot.slane %v7912_v50, 5  ;;  %v2764_v8 = vrot.slane %v7912_v50, 6  ;;  %v2837_v39 = vrot.slane %v7912_v50, 7  ;;  %v2891_v33 = vadd.f32 %v2873_v41, %v2818_v58 }
 0x29f   : > { %v2617_v43 = vmul.f32 %v7565_v48, %v2584_v62  ;;  %v2929_v49 = vsel %vm968_vm3, %v2909_v44, %v2910_v54  ;;  %v3002_v17 = vsel %vm1042_vm4, %v2982_v57, %v2983_v16  ;;  %v2673_v26 = vmul.f32 %v7608_v4, %v7912_v50 }
 0x2a0   : > { %v2946_v30 = vmul.f32 %v7652_v63, %v2929_v49  ;;  %v2710_v14 = vsel %vm746_vm0, %v2690_v35, %v2691_v3  ;;  %v3075_v62 = vsel %vm1116_vm5, %v3055_v18, %v3056_v28  ;;  %v2783_v57 = vsel %vm820_vm1, %v2763_v32, %v2764_v8 }
 0x2a1   : > { %v2635_v20 = vadd.f32 %v10089_v36, %v2617_v43  ;;  %v2728_v44 = vmul.f32 %v7601_v31, %v2710_v14  ;;  %v590_v58 = vadd.s32 80, %v5627_v11  ;;  %v3019_v49 = vmul.f32 %v7660_v2, %v3002_v17 }
 0x2a2   : > { %v2964_v41 = vadd.f32 %v2946_v30, %v2891_v33  ;;  %v2801_v35 = vmul.f32 %v7617_v59, %v2783_v57  ;;  %v2856_v43 = vsel %vm894_vm2, %v2836_v34, %v2837_v39  ;;  %v3092_v14 = vmul.f32 %v7691_v25, %v3075_v62 }
 0x2a3   : > { %v7947_v0 = vmul.f32 %v7922_v51, %v2635_v20  ;;  %v2746_v5 = vadd.f32 %v2728_v44, %v2673_v26  ;;  %v2874_v20 = vmul.f32 %v7635_v1, %v2856_v43  ;;  %v609_v26 = vadd.s32 4294967288, %v590_v58 }
 0x2a4   : > { %v3037_v18 = vadd.f32 %v3019_v49, %v2964_v41  ;;  %v591_v44 = vadd.s32 88, %v5627_v11  ;;  %v594_v51 = vadd.s32 112, %v5627_v11 }
 0x2a5   : > { %10090 = vst [vmem:[#allocation26_spill] sm:$0xff] %v7947_v0  ;;  %v2819_v36 = vadd.f32 %v2801_v35, %v2746_v5  ;;  %v2911_v32 = vrot.slane %v7947_v0, 1  ;;  %v2984_v13 = vrot.slane %v7947_v0, 2  ;;  %v3057_v33 = vrot.slane %v7947_v0, 3 }
 0x2a6   : > { %v3110_v17 = vadd.f32 %v3092_v14, %v3037_v18  ;;  %v2692_v30 = vrot.slane %v7947_v0, 5  ;;  %v2765_v35 = vrot.slane %v7947_v0, 6  ;;  %vm646_vm9 = vcmp.lt.s32.totalorder %v609_v26, %v7572_v9 }
 0x2a7   : > { %v2928_v34 = vsel %vm968_vm3, %v2910_v54, %v2911_v32  ;;  %v3001_v5 = vsel %vm1042_vm4, %v2983_v16, %v2984_v13  ;;  %v2892_v57 = vadd.f32 %v2874_v20, %v2819_v36  ;;  %v3074_v49 = vsel %vm1116_vm5, %v3056_v28, %v3057_v33 }
 0x2a8   : > { %v7964_v62 = vadd.f32 %v7703_v21, %v3110_v17  ;;  %v2947_v41 = vmul.f32 %v7652_v63, %v2928_v34  ;;  %v2709_v58 = vsel %vm746_vm0, %v2691_v3, %v2692_v30  ;;  %v3020_v16 = vmul.f32 %v7660_v2, %v3001_v5 }
 0x2a9   : > { %v2586_v43 = vpop.f32.mrf.mxu1  ;;  %v2729_v18 = vmul.f32 %v7601_v31, %v2709_v58  ;;  %v610_v36 = vadd.s32 4294967288, %v591_v44  ;;  %v3093_v28 = vmul.f32 %v7691_v25, %v3074_v49  ;;  %v2674_v3 = vmul.f32 %v7608_v4, %v7947_v0 }
 0x2aa   : > { %3155 = vadd.xlane.f32.xlu1 %v7964_v62  ;;  %v2965_v54 = vadd.f32 %v2947_v41, %v2892_v57  ;;  %v2587_v14 = vadd.f32 %v7557_v10, %v2586_v43  ;;  %v2782_v34 = vsel %vm820_vm1, %v2764_v8, %v2765_v35  ;;  %v2838_v5 = vrot.slane %v7947_v0, 7  ;;  %v10093_v43 = vld [vmem:[#allocation27_spill] sm:$0xff] }
 0x2ab   : > { %v10091_v57 = vmov 0.0   ;;  %v592_v58 = vadd.s32 96, %v5627_v11  ;;  %v2747_v44 = vadd.f32 %v2729_v18, %v2674_v3  ;;  %vm647_vm10 = vcmp.lt.s32.totalorder %v610_v36, %v7572_v9 }
 0x2ac   : > { %v3038_v17 = vadd.f32 %v3020_v16, %v2965_v54  ;;  %v2618_v20 = vmul.f32 %v7565_v48, %v2587_v14  ;;  %v7985_v41 = vsel %vm646_vm9, 1.0, %v10091_v57  ;;  %v2802_v16 = vmul.f32 %v7617_v59, %v2782_v34 }
 0x2ad   : > { %10092 = vst [vmem:[#allocation44_spill] sm:$0xff] %v7985_v41  ;;  %v2855_v14 = vsel %vm894_vm2, %v2837_v39, %v2838_v5  ;;  %v611_v18 = vadd.s32 4294967288, %v592_v58  ;;  %v593_v36 = vadd.s32 104, %v5627_v11 }
 0x2ae   : > { %v3111_v26 = vadd.f32 %v3093_v28, %v3038_v17  ;;  %v2636_v54 = vadd.f32 %v10093_v43, %v2618_v20  ;;  %v8000_v17 = vsel %vm647_vm10, 1.0, %v10091_v57  ;;  %v2820_v3 = vadd.f32 %v2802_v16, %v2747_v44 }
 0x2af   : > { %10095 = vst [vmem:[#allocation45_spill] sm:$0xff] %v8000_v17  ;;  %v2875_v39 = vmul.f32 %v7635_v1, %v2855_v14  ;;  %vm648_vm11 = vcmp.lt.s32.totalorder %v611_v18, %v7572_v9 }
 0x2b0   : > { %v7991_v49 = vadd.f32 %v7703_v21, %v3111_v26  ;;  %v7995_v8 = vmul.f32 %v7985_v41, %v2636_v54 }
 0x2b1   : > { %v2588_v28 = vpop.f32.mrf.mxu1  ;;  %v2893_v0 = vadd.f32 %v2875_v39, %v2820_v3 }
 0x2b2   : > { %10094 = vst [vmem:[#allocation27_spill] sm:$0xff] %v7995_v8  ;;  %3157 = vadd.xlane.f32.xlu1 %v7991_v49  ;;  %v2589_v20 = vadd.f32 %v7557_v10, %v2588_v28  ;;  %v2912_v34 = vrot.slane %v7995_v8, 1  ;;  %v2985_v26 = vrot.slane %v7995_v8, 2  ;;  %v3058_v43 = vrot.slane %v7995_v8, 3 }
 0x2b3   : > { %v2693_v54 = vrot.slane %v7995_v8, 5  ;;  %v2839_v28 = vrot.slane %v7995_v8, 7  ;;  %v2675_v14 = vmul.f32 %v7608_v4, %v7995_v8 }
 0x2b4   : > { %v2619_v58 = vmul.f32 %v7565_v48, %v2589_v20  ;;  %v2927_v44 = vsel %vm968_vm3, %v2911_v32, %v2912_v34  ;;  %v3000_v16 = vsel %vm1042_vm4, %v2984_v13, %v2985_v26  ;;  %v3073_v20 = vsel %vm1116_vm5, %v3057_v33, %v3058_v43 }
 0x2b5   : > { %v2948_v19 = vmul.f32 %v7652_v63, %v2927_v44  ;;  %v2708_v41 = vsel %vm746_vm0, %v2692_v30, %v2693_v54  ;;  %v10097_v13 = vrot.slane %v7995_v8, 6  ;;  %v3021_v44 = vmul.f32 %v7660_v2, %v3000_v16 }
 0x2b6   : > { %v2637_v50 = vadd.f32 %v10096_v27, %v2619_v58  ;;  %v2730_v32 = vmul.f32 %v7601_v31, %v2708_v41  ;;  %v8035_v30 = vmul.f32 %v7608_v4, %v7588_v12  ;;  %v613_v16 = vadd.s32 4294967288, %v594_v51 }
 0x2b7   : > { %v2781_v3 = vsel %vm820_vm1, %v2765_v35, %v10097_v13  ;;  %v2966_v39 = vadd.f32 %v2948_v19, %v2893_v0  ;;  %v2854_v35 = vsel %vm894_vm2, %v2838_v5, %v2839_v28  ;;  %v3094_v0 = vmul.f32 %v7691_v25, %v3073_v20 }
 0x2b8   : > { %v8038_v27 = vmul.f32 %v8000_v17, %v2637_v50  ;;  %v2748_v33 = vadd.f32 %v2730_v32, %v2675_v14  ;;  %v2803_v41 = vmul.f32 %v7617_v59, %v2781_v3  ;;  %v612_v19 = vadd.s32 4294967288, %v593_v36 }
 0x2b9   : > { %v2591_v58 = vpop.f32.mrf.mxu1  ;;  %v3039_v13 = vadd.f32 %v3021_v44, %v2966_v39  ;;  %v2876_v3 = vmul.f32 %v7635_v1, %v2854_v35  ;;  %v9938_v5 = vrot.slane %v7588_v12, 1  ;;  %v8055_v20 = vsel %vm648_vm11, 1.0, %v10091_v57 }
 0x2ba   : > { %10098 = vst [vmem:[#allocation28_spill] sm:$0xff] %v8038_v27  ;;  %v2592_v55 = vadd.f32 %v7557_v10, %v2591_v58  ;;  %v2821_v6 = vadd.f32 %v2803_v41, %v2748_v33  ;;  %v2913_v50 = vrot.slane %v8038_v27, 1  ;;  %v2986_v14 = vrot.slane %v8038_v27, 2  ;;  %v10100_v58 = vld [vmem:[#allocation29_spill] sm:$0xff] }
 0x2bb   : > { %v3112_v32 = vadd.f32 %v3094_v0, %v3039_v13  ;;  %v9937_v17 = vrot.slane %v8038_v27, 3  ;;  %10099 = vst [vmem:[#allocation46_spill] sm:$0xff] %v8055_v20  ;;  %v595_v35 = vadd.s32 120, %v5627_v11  ;;  %vm649_vm12 = vcmp.lt.s32.totalorder %v612_v19, %v7572_v9 }
 0x2bc   : > { %v2620_v51 = vmul.f32 %v7565_v48, %v2592_v55  ;;  %v2926_v36 = vsel %vm968_vm3, %v2912_v34, %v2913_v50  ;;  %v2999_v39 = vsel %vm1042_vm4, %v2985_v26, %v2986_v14  ;;  %v2894_v33 = vadd.f32 %v2876_v3, %v2821_v6 }
 0x2bd   : > { %v8063_v44 = vadd.f32 %v7703_v21, %v3112_v32  ;;  %v2949_v41 = vmul.f32 %v7652_v63, %v2926_v36  ;;  %v3072_v55 = vsel %vm1116_vm5, %v3058_v43, %v9937_v17  ;;  %vm650_vm13 = vcmp.lt.s32.totalorder %v613_v16, %v7572_v9 }
 0x2be   : > { %v2638_v18 = vadd.f32 %v10100_v58, %v2620_v51  ;;  %v3022_v6 = vmul.f32 %v7660_v2, %v2999_v39  ;;  %v2694_v13 = vrot.slane %v8038_v27, 5  ;;  %v9939_v3 = vrot.slane %v8038_v27, 6 }
 0x2bf   : > { %v3186_v34 = vmul.f32 %v8063_v44, %v8063_v44  ;;  %v2967_v26 = vadd.f32 %v2949_v41, %v2894_v33  ;;  %v9940_v51 = vrot.slane %v8038_v27, 7  ;;  %v3095_v58 = vmul.f32 %v7691_v25, %v3072_v55 }
 0x2c0   : > { %v8079_v0 = vmul.f32 %v8055_v20, %v2638_v18  ;;  %v614_v17 = vadd.s32 4294967288, %v595_v35  ;;  %v2707_v39 = vsel %vm746_vm0, %v2693_v54, %v2694_v13  ;;  %v8090_v33 = vsel %vm649_vm12, 1.0, %v10091_v57 }
 0x2c1   : > { %3213 = vadd.xlane.f32.xlu1 %v3186_v34  ;;  %v2593_v43 = vpop.f32.mrf.mxu1  ;;  %v3040_v36 = vadd.f32 %v3022_v6, %v2967_v26  ;;  %10102 = vst [vmem:[#allocation47_spill] sm:$0xff] %v8090_v33  ;;  %v8096_v18 = vsel %vm650_vm13, 1.0, %v10091_v57  ;;  %v10104_v34 = vrot.slane %v7592_v46, 1  ;;  %v2676_v19 = vmul.f32 %v7608_v4, %v8038_v27 }
 0x2c2   : > { %10101 = vst [vmem:[#allocation29_spill] sm:$0xff] %v8079_v0  ;;  %v2594_v41 = vadd.f32 %v7557_v10, %v2593_v43  ;;  %v2731_v55 = vmul.f32 %v7601_v31, %v2707_v39  ;;  %v10105_v16 = vrot.slane %v7995_v8, 6  ;;  %v596_v43 = vadd.s32 128, %v5627_v11 }
 0x2c3   : > { %10103 = vst [vmem:[#allocation48_spill] sm:$0xff] %v8096_v18  ;;  %v8104_v35 = vsel %vm968_vm3, %v9938_v5, %v10104_v34  ;;  %v3113_v54 = vadd.f32 %v3095_v58, %v3040_v36  ;;  %v2853_v36 = vsel %vm894_vm2, %v2839_v28, %v9940_v51  ;;  %v9941_v58 = vrot.slane %v8079_v0, 1 }
 0x2c4   : > { %v2780_v26 = vsel %vm820_vm1, %v10105_v16, %v9939_v3  ;;  %v2621_v6 = vmul.f32 %v7565_v48, %v2594_v41  ;;  %vm651_vm15 = vcmp.lt.s32.totalorder %v614_v17, %v7572_v9  ;;  %v2749_v34 = vadd.f32 %v2731_v55, %v2676_v19  ;;  %v10106_v41 = vld [vmem:[#allocation30_spill] sm:$0xff] }
 0x2c5   : > { %v8125_v39 = vadd.f32 %v7703_v21, %v3113_v54  ;;  %v2804_v16 = vmul.f32 %v7617_v59, %v2780_v26  ;;  %v2695_v32 = vrot.slane %v8079_v0, 5  ;;  %v2925_v3 = vsel %vm968_vm3, %v2913_v50, %v9941_v58 }
 0x2c6   : > { %v2639_v5 = vadd.f32 %v10106_v41, %v2621_v6  ;;  %v9943_v28 = vrot.slane %v8079_v0, 2  ;;  %v2877_v17 = vmul.f32 %v7635_v1, %v2853_v36  ;;  %v8144_v26 = vsel %vm651_vm15, 1.0, %v10091_v57 }
 0x2c7   : > { %v3187_v54 = vmul.f32 %v8125_v39, %v8125_v39  ;;  %v2822_v51 = vadd.f32 %v2804_v16, %v2749_v34  ;;  %10108 = vst [vmem:[#allocation49_spill] sm:$0xff] %v8144_v26  ;;  %v2950_v6 = vmul.f32 %v7652_v63, %v2925_v3  ;;  %v8151_v34 = vadd.s32 4294967288, %v596_v43 }
 0x2c8   : > { %v8141_v55 = vmul.f32 %v8090_v33, %v2639_v5  ;;  %v2998_v50 = vsel %vm1042_vm4, %v2986_v14, %v9943_v28  ;;  %v2768_v36 = vrot.slane %v8079_v0, 6  ;;  %v597_v16 = vadd.s32 136, %v5627_v11 }
 0x2c9   : > { %3215 = vadd.xlane.f32.xlu1 %v3187_v54  ;;  %v2596_v41 = vpop.f32.mrf.mxu1  ;;  %v2895_v5 = vadd.f32 %v2877_v17, %v2822_v51  ;;  %v2706_v20 = vsel %vm746_vm0, %v2694_v13, %v2695_v32  ;;  %v2841_v14 = vrot.slane %v8079_v0, 7  ;;  %v3023_v43 = vmul.f32 %v7660_v2, %v2998_v50 }
 0x2ca   : > { %10107 = vst [vmem:[#allocation30_spill] sm:$0xff] %v8141_v55  ;;  %v2597_v58 = vadd.f32 %v7557_v10, %v2596_v41  ;;  %v2696_v19 = vrot.slane %v8141_v55, 5  ;;  %v2769_v3 = vrot.slane %v8141_v55, 6  ;;  %v2842_v54 = vrot.slane %v8141_v55, 7 }
 0x2cb   : > { %v10109_v28 = vrot.slane %v8079_v0, 3  ;;  %v10110_v33 = vrot.slane %v8038_v27, 3  ;;  %v2968_v41 = vadd.f32 %v2950_v6, %v2895_v5  ;;  %v2678_v8 = vmul.f32 %v7608_v4, %v8141_v55 }
 0x2cc   : > { %v2622_v51 = vmul.f32 %v7565_v48, %v2597_v58  ;;  %v2705_v17 = vsel %vm746_vm0, %v2695_v32, %v2696_v19  ;;  %v2778_v13 = vsel %vm820_vm1, %v2768_v36, %v2769_v3  ;;  %v8177_v40 = vadd.s32 4294967288, %v597_v16 }
 0x2cd   : > { %v3071_v10 = vsel %vm1116_vm5, %v10110_v33, %v10109_v28  ;;  %v2733_v50 = vmul.f32 %v7601_v31, %v2705_v17  ;;  %v2732_v24 = vmul.f32 %v7601_v31, %v2706_v20  ;;  %vm652_vm14 = vcmp.lt.s32.totalorder %v8151_v34, %v7572_v9 }
 0x2ce   : > { %v2640_v33 = vadd.f32 %v10111_v15, %v2622_v51  ;;  %v2851_v48 = vsel %vm894_vm2, %v2841_v14, %v2842_v54  ;;  %v3041_v32 = vadd.f32 %v3023_v43, %v2968_v41  ;;  %v3096_v58 = vmul.f32 %v7691_v25, %v3071_v10 }
 0x2cf   : > { %v2751_v28 = vadd.f32 %v2733_v50, %v2678_v8  ;;  %v2806_v6 = vmul.f32 %v7617_v59, %v2778_v13  ;;  %v9952_v5 = vrot.slane %v8141_v55, 1  ;;  %v2677_v16 = vmul.f32 %v7608_v4, %v8079_v0 }
 0x2d0   : > { %v8191_v20 = vmul.f32 %v8096_v18, %v2640_v33  ;;  %v8194_v51 = vadd.f32 %v3096_v58, %v3041_v32  ;;  %v10113_v17 = vrot.slane %v8038_v27, 6  ;;  %v2879_v13 = vmul.f32 %v7635_v1, %v2851_v48  ;;  %v8205_v33 = vld [vmem:[%s9887_s9] ss:$0 sm:$0xff] }
 0x2d1   : > { %v2598_v8 = vpop.f32.mrf.mxu1  ;;  %v2824_v10 = vadd.f32 %v2806_v6, %v2751_v28  ;;  %v2750_v50 = vadd.f32 %v2732_v24, %v2677_v16  ;;  %v10114_v24 = vrot.slane %v8038_v27, 7  ;;  %vm653_vm6 = vcmp.lt.s32.totalorder %v8177_v40, %v7572_v9 }
 0x2d2   : > { %10112 = vst [vmem:[#allocation31_spill] sm:$0xff] %v8191_v20  ;;  %v2779_v43 = vsel %vm820_vm1, %v10113_v17, %v2768_v36  ;;  %v2599_v32 = vadd.f32 %v8205_v33, %v2598_v8  ;;  %v2916_v58 = vrot.slane %v8191_v20, 1  ;;  %v2989_v15 = vrot.slane %v8191_v20, 2  ;;  %v8221_v17 = vld [vmem:[%s9888_s10] ss:$0 sm:$0xff] }
 0x2d3   : > { %v3062_v36 = vrot.slane %v8191_v20, 3  ;;  %v2697_v28 = vrot.slane %v8191_v20, 5  ;;  %v2770_v48 = vrot.slane %v8191_v20, 6  ;;  %v2805_v6 = vmul.f32 %v7617_v59, %v2779_v43 }
 0x2d4   : > { %v2852_v16 = vsel %vm894_vm2, %v10114_v24, %v2841_v14  ;;  %v2623_v8 = vmul.f32 %v8221_v17, %v2599_v32  ;;  %v2897_v41 = vadd.f32 %v2879_v13, %v2824_v10  ;;  %v2923_v18 = vsel %vm968_vm3, %v9952_v5, %v2916_v58  ;;  %v10117_v32 = vld [vmem:[#allocation32_spill] sm:$0xff] }
 0x2d5   : > { %v10115_v43 = vrot.slane %v8141_v55, 2  ;;  %v2952_v14 = vmul.f32 %v7652_v63, %v2923_v18  ;;  %v10116_v24 = vrot.slane %v8141_v55, 3  ;;  %v2679_v10 = vmul.f32 %v7608_v4, %v8191_v20 }
 0x2d6   : > { %v2704_v13 = vsel %vm746_vm0, %v2696_v19, %v2697_v28  ;;  %v2641_v5 = vadd.f32 %v10117_v32, %v2623_v8  ;;  %v2843_v18 = vrot.slane %v8191_v20, 7  ;;  %v2823_v60 = vadd.f32 %v2805_v6, %v2750_v50 }
 0x2d7   : > { %v2996_v27 = vsel %vm1042_vm4, %v10115_v43, %v2989_v15  ;;  %v3069_v42 = vsel %vm1116_vm5, %v10116_v24, %v3062_v36  ;;  %v2734_v52 = vmul.f32 %v7601_v31, %v2704_v13  ;;  %v2777_v43 = vsel %vm820_vm1, %v2769_v3, %v2770_v48 }
 0x2d8   : > { %v2970_v47 = vadd.f32 %v2952_v14, %v2897_v41  ;;  %v3025_v23 = vmul.f32 %v7660_v2, %v2996_v27  ;;  %v2878_v24 = vmul.f32 %v7635_v1, %v2852_v16  ;;  %v8249_v22 = vmul.f32 %v8144_v26, %v2641_v5 }
 0x2d9   : > { %v2752_v38 = vadd.f32 %v2734_v52, %v2679_v10  ;;  %v2807_v19 = vmul.f32 %v7617_v59, %v2777_v43  ;;  %v2850_v8 = vsel %vm894_vm2, %v2842_v54, %v2843_v18  ;;  %v8258_v3 = vsel %vm652_vm14, 1.0, %v10091_v57  ;;  %v2601_v41 = vpop.f32.mrf.mxu1 }
 0x2da   : > { %10118 = vst [vmem:[#allocation32_spill] sm:$0xff] %v8249_v22  ;;  %v3043_v27 = vadd.f32 %v3025_v23, %v2970_v47  ;;  %v3098_v50 = vmul.f32 %v7691_v25, %v3069_v42  ;;  %v8261_v6 = vadd.f32 %v2878_v24, %v2823_v60  ;;  %v2602_v5 = vadd.f32 %v8205_v33, %v2601_v41  ;;  %v10120_v24 = vld [vmem:[#allocation33_spill] sm:$0xff] }
 0x2db   : > { %10119 = vst [vmem:[#allocation50_spill] sm:$0xff] %v8258_v3  ;;  %v2825_v52 = vadd.f32 %v2807_v19, %v2752_v38  ;;  %v2917_v16 = vrot.slane %v8249_v22, 1  ;;  %v2990_v14 = vrot.slane %v8249_v22, 2  ;;  %v2880_v10 = vmul.f32 %v7635_v1, %v2850_v8 }
 0x2dc   : > { %v3116_v54 = vadd.f32 %v3098_v50, %v3043_v27  ;;  %v3063_v34 = vrot.slane %v8249_v22, 3  ;;  %v2698_v13 = vrot.slane %v8249_v22, 5  ;;  %v2624_v23 = vmul.f32 %v8221_v17, %v2602_v5 }
 0x2dd   : > { %v2922_v60 = vsel %vm968_vm3, %v2916_v58, %v2917_v16  ;;  %v2995_v38 = vsel %vm1042_vm4, %v2989_v15, %v2990_v14  ;;  %v2898_v47 = vadd.f32 %v2880_v10, %v2825_v52  ;;  %v2680_v8 = vmul.f32 %v7608_v4, %v8249_v22 }
 0x2de   : > { %v8277_v42 = vadd.f32 %v7703_v21, %v3116_v54  ;;  %v2953_v32 = vmul.f32 %v7652_v63, %v2922_v60  ;;  %v3068_v43 = vsel %vm1116_vm5, %v3062_v36, %v3063_v34  ;;  %v2642_v19 = vadd.f32 %v10120_v24, %v2624_v23 }
 0x2df   : > { %v2703_v58 = vsel %vm746_vm0, %v2697_v28, %v2698_v13  ;;  %v2771_v41 = vrot.slane %v8249_v22, 6  ;;  %v3026_v27 = vmul.f32 %v7660_v2, %v2995_v38  ;;  %v2844_v5 = vrot.slane %v8249_v22, 7 }
 0x2e0   : > { %3167 = vadd.xlane.f32.xlu1 %v8277_v42  ;;  %v2971_v15 = vadd.f32 %v2953_v32, %v2898_v47  ;;  %v2735_v50 = vmul.f32 %v7601_v31, %v2703_v58  ;;  %v8293_v36 = vmul.f32 %v8258_v3, %v2642_v19  ;;  %v4798_v52 = vsel %vm653_vm6, 1.0, %v10091_v57 }
 0x2e1   : > { %v3099_v28 = vmul.f32 %v7691_v25, %v3068_v43  ;;  %v2776_v54 = vsel %vm820_vm1, %v2770_v48, %v2771_v41  ;;  %v2603_v10 = vpop.f32.mrf.mxu1  ;;  %v2849_v47 = vsel %vm894_vm2, %v2843_v18, %v2844_v5  ;;  %v10122_v19 = vrot.slane %v8141_v55, 1 }
 0x2e2   : > { %10121 = vst [vmem:[#allocation33_spill] sm:$0xff] %v8293_v36  ;;  %v3044_v23 = vadd.f32 %v3026_v27, %v2971_v15  ;;  %v2753_v60 = vadd.f32 %v2735_v50, %v2680_v8  ;;  %v2808_v38 = vmul.f32 %v7617_v59, %v2776_v54  ;;  %v2604_v32 = vadd.f32 %v8205_v33, %v2603_v10 }
 0x2e3   : > { %v2918_v24 = vrot.slane %v8293_v36, 1  ;;  %v2991_v40 = vrot.slane %v8293_v36, 2  ;;  %v10123_v43 = vrot.slane %v8079_v0, 1  ;;  %v2881_v15 = vmul.f32 %v7635_v1, %v2849_v47 }
 0x2e4   : > { %v3117_v58 = vadd.f32 %v3099_v28, %v3044_v23  ;;  %v2826_v8 = vadd.f32 %v2808_v38, %v2753_v60  ;;  %v3064_v27 = vrot.slane %v8293_v36, 3  ;;  %v2625_v18 = vmul.f32 %v8221_v17, %v2604_v32  ;;  %v10124_v60 = vld [vmem:[#allocation18_spill] sm:$0xff] }
 0x2e5   : > { %v2924_v48 = vsel %vm968_vm3, %v10123_v43, %v10122_v19  ;;  %v2921_v33 = vsel %vm968_vm3, %v2917_v16, %v2918_v24  ;;  %v2994_v50 = vsel %vm1042_vm4, %v2990_v14, %v2991_v40  ;;  %v2699_v54 = vrot.slane %v8293_v36, 5 }
 0x2e6   : > { %v8323_v10 = vadd.f32 %v7703_v21, %v3117_v58  ;;  %v2899_v19 = vadd.f32 %v2881_v15, %v2826_v8  ;;  %v2954_v28 = vmul.f32 %v7652_v63, %v2921_v33  ;;  %v2681_v23 = vmul.f32 %v7608_v4, %v8293_v36 }
 0x2e7   : > { %v2643_v38 = vadd.f32 %v10124_v60, %v2625_v18  ;;  %v3067_v17 = vsel %vm1116_vm5, %v3063_v34, %v3064_v27  ;;  %v2702_v16 = vsel %vm746_vm0, %v2698_v13, %v2699_v54  ;;  %v2772_v14 = vrot.slane %v8293_v36, 6 }
 0x2e8   : > { %3169 = vadd.xlane.f32.xlu1 %v8323_v10  ;;  %v2972_v47 = vadd.f32 %v2954_v28, %v2899_v19  ;;  %v3027_v32 = vmul.f32 %v7660_v2, %v2994_v50  ;;  %v2736_v43 = vmul.f32 %v7601_v31, %v2702_v16  ;;  %v2845_v58 = vrot.slane %v8293_v36, 7 }
 0x2e9   : > { %v8338_v8 = vmul.f32 %v4798_v52, %v2643_v38  ;;  %v3100_v15 = vmul.f32 %v7691_v25, %v3067_v17  ;;  %v2775_v34 = vsel %vm820_vm1, %v2771_v41, %v2772_v14  ;;  %v2951_v13 = vmul.f32 %v7652_v63, %v2924_v48 }
 0x2ea   : > { %v3045_v18 = vadd.f32 %v3027_v32, %v2972_v47  ;;  %v2754_v33 = vadd.f32 %v2736_v43, %v2681_v23  ;;  %v2809_v60 = vmul.f32 %v7617_v59, %v2775_v34  ;;  %v2848_v50 = vsel %vm894_vm2, %v2844_v5, %v2845_v58 }
 0x2eb   : > { %v2882_v19 = vmul.f32 %v7635_v1, %v2848_v50  ;;  %v2919_v28 = vrot.slane %v8338_v8, 1  ;;  %v2992_v52 = vrot.slane %v8338_v8, 2  ;;  %v3065_v38 = vrot.slane %v8338_v8, 3 }
 0x2ec   : > { %v3118_v17 = vadd.f32 %v3100_v15, %v3045_v18  ;;  %v2827_v16 = vadd.f32 %v2809_v60, %v2754_v33  ;;  %v2700_v41 = vrot.slane %v8338_v8, 5  ;;  %v2773_v48 = vrot.slane %v8338_v8, 6 }
 0x2ed   : > { %v2920_v23 = vsel %vm968_vm3, %v2918_v24, %v2919_v28  ;;  %v2993_v5 = vsel %vm1042_vm4, %v2991_v40, %v2992_v52  ;;  %v2846_v47 = vrot.slane %v8338_v8, 7  ;;  %v10125_v32 = vrot.slane %v8141_v55, 2 }
 0x2ee   : > { %v10126_v43 = vrot.slane %v8079_v0, 2  ;;  %v8365_v34 = vadd.f32 %v7703_v21, %v3118_v17  ;;  %v2900_v18 = vadd.f32 %v2882_v19, %v2827_v16  ;;  %v2955_v33 = vmul.f32 %v7652_v63, %v2920_v23 }
 0x2ef   : > { %v3066_v24 = vsel %vm1116_vm5, %v3064_v27, %v3065_v38  ;;  %v10127_v40 = vrot.slane %v7588_v12, 5  ;;  %v10128_v50 = vrot.slane %v7588_v12, 6  ;;  %v10130_v19 = vrot.slane %v8141_v55, 3 }
 0x2f0   : > { %v2997_v15 = vsel %vm1042_vm4, %v10126_v43, %v10125_v32  ;;  %v10129_v32 = vrot.slane %v7588_v12, 7  ;;  %v10131_v17 = vrot.slane %v8079_v0, 3  ;;  %v3192_v16 = vmul.f32 %v8365_v34, %v8365_v34 }
 0x2f1   : > { %v2718_v60 = vsel %vm746_vm0, %v2700_v41, %v10127_v40  ;;  %v2791_v57 = vsel %vm820_vm1, %v2773_v48, %v10128_v50  ;;  %v2973_v23 = vadd.f32 %v2955_v33, %v2900_v18  ;;  %v3028_v43 = vmul.f32 %v7660_v2, %v2993_v5 }
 0x2f2   : > { %v2864_v21 = vsel %vm894_vm2, %v2846_v47, %v10129_v32  ;;  %v3070_v27 = vsel %vm1116_vm5, %v10131_v17, %v10130_v19  ;;  %v2720_v40 = vmul.f32 %v7601_v31, %v2718_v60  ;;  %v3101_v50 = vmul.f32 %v7691_v25, %v3066_v24  ;;  %3225 = vadd.xlane.f32.xlu1 %v3192_v16 }
 0x2f3   : > { %v10132_v9 = vrot.slane %v7592_v46, 2  ;;  %v10133_v32 = vrot.slane %v7588_v12, 2  ;;  %v2969_v55 = vadd.f32 %v2951_v13, %v8261_v6  ;;  %v3024_v19 = vmul.f32 %v7660_v2, %v2997_v15 }
 0x2f4   : > { %v3046_v17 = vadd.f32 %v3028_v43, %v2973_v23  ;;  %v2738_v18 = vadd.f32 %v2720_v40, %v8035_v30  ;;  %v2793_v5 = vmul.f32 %v7617_v59, %v2791_v57  ;;  %v2866_v33 = vmul.f32 %v7635_v1, %v2864_v21 }
 0x2f5   : > { %v3009_v0 = vsel %vm1042_vm4, %v10133_v32, %v10132_v9  ;;  %v3042_v24 = vadd.f32 %v3024_v19, %v2969_v55  ;;  %v3097_v60 = vmul.f32 %v7691_v25, %v3070_v27  ;;  %v2682_v20 = vmul.f32 %v7608_v4, %v8338_v8  ;;  %v8420_v4 = vld [vmem:[%s9981_s3 + $0x1] ss:$0 sm:$0xff] }
 0x2f6   : > { %v2701_v9 = vsel %vm746_vm0, %v2699_v54, %v2700_v41  ;;  %v3119_v6 = vadd.f32 %v3101_v50, %v3046_v17  ;;  %v2811_v13 = vadd.f32 %v2793_v5, %v2738_v18  ;;  %v2774_v30 = vsel %vm820_vm1, %v2772_v14, %v2773_v48 }
 0x2f7   : > { %v2737_v15 = vmul.f32 %v7601_v31, %v2701_v9  ;;  %v2939_v57 = vmul.f32 %v7652_v63, %v8104_v35  ;;  %v3048_v55 = vrot.slane %v7588_v12, 3  ;;  %v3115_v21 = vadd.f32 %v3097_v60, %v3042_v24 }
 0x2f8   : > { %v2847_v27 = vsel %vm894_vm2, %v2845_v58, %v2846_v47  ;;  %v8423_v54 = vadd.f32 %v8420_v4, %v3119_v6  ;;  %v2884_v31 = vadd.f32 %v2866_v33, %v2811_v13  ;;  %v2810_v14 = vmul.f32 %v7617_v59, %v2774_v30 }
 0x2f9   : > { %v2755_v8 = vadd.f32 %v2737_v15, %v2682_v20  ;;  %v3012_v35 = vmul.f32 %v7660_v2, %v3009_v0  ;;  %v10134_v41 = vrot.slane %v7592_v46, 3  ;;  %v10135_v58 = vrot.slane %v7588_v12, 1 }
 0x2fa   : > { %v3193_v16 = vmul.f32 %v8423_v54, %v8423_v54  ;;  %v2957_v23 = vadd.f32 %v2939_v57, %v2884_v31  ;;  %v2883_v20 = vmul.f32 %v7635_v1, %v2847_v27  ;;  %v10136_v59 = vmov %v10133_v32  ;;  %v4978_v27 = vld [vmem:[%s9884_s6 + $0x78] sm:$0xff] }
 0x2fb   : > { %v3082_v48 = vsel %vm1116_vm5, %v3048_v55, %v10134_v41  ;;  %v2937_v47 = vsel %vm968_vm3, %v2919_v28, %v10135_v58  ;;  %v2828_v43 = vadd.f32 %v2810_v14, %v2755_v8  ;;  %v3010_v0 = vsel %vm1042_vm4, %v2992_v52, %v10136_v59  ;;  %3653 = vmatpush.bf16.msra.mxu2 %v4978_v27 }
 0x2fc   : > { %3227 = vadd.xlane.f32.xlu1 %v3193_v16  ;;  %v3030_v40 = vadd.f32 %v3012_v35, %v2957_v23  ;;  %v3085_v50 = vmul.f32 %v7691_v25, %v3082_v48  ;;  %v2956_v19 = vmul.f32 %v7652_v63, %v2937_v47  ;;  %v3083_v28 = vsel %vm1116_vm5, %v3065_v38, %v3048_v55  ;;  %v4977_v47 = vld [vmem:[%s9884_s6 + $0x70] sm:$0xff]  ;;  %v4976_v23 = vld [vmem:[%s9884_s6 + $0x68] sm:$0xff] }
 0x2fd   : > { %v2901_v32 = vadd.f32 %v2883_v20, %v2828_v43  ;;  %v3029_v5 = vmul.f32 %v7660_v2, %v3010_v0  ;;  %v3102_v52 = vmul.f32 %v7691_v25, %v3083_v28  ;;  %v3178_v11 = vmul.f32 %v7714_v7, %v7714_v7 }
 0x2fe   : > { %v3103_v17 = vadd.f32 %v3085_v50, %v3030_v40  ;;  %v3179_v63 = vmul.f32 %v7741_v56, %v7741_v56  ;;  %v8462_v2 = vadd.f32 %v8420_v4, %v7883_v53  ;;  %v8469_v38 = vadd.f32 %v8420_v4, %v7909_v61 }
 0x2ff   : > { %v2974_v18 = vadd.f32 %v2956_v19, %v2901_v32  ;;  %v3184_v53 = vmul.f32 %v7964_v62, %v7964_v62  ;;  %v3185_v9 = vmul.f32 %v7991_v49, %v7991_v49  ;;  %v8482_v61 = vadd.f32 %v8420_v4, %v8194_v51  ;;  %3654 = vmatpush.bf16.msra.mxu2 %v4977_v47 }
 0x300   : > { %v8448_v1 = vadd.f32 %v8420_v4, %v3103_v17  ;;  %v3182_v25 = vmul.f32 %v8462_v2, %v8462_v2  ;;  %v3183_v60 = vmul.f32 %v8469_v38, %v8469_v38  ;;  %v8488_v13 = vadd.f32 %v8420_v4, %v3115_v21  ;;  %v3144_v21 = vpop.xlane.xlu1 %3143 }
 0x301   : > { %v3047_v12 = vadd.f32 %v3029_v5, %v2974_v18  ;;  %v3188_v6 = vmul.f32 %v8482_v61, %v8482_v61  ;;  %v3190_v30 = vmul.f32 %v8277_v42, %v8277_v42  ;;  %v3191_v51 = vmul.f32 %v8323_v10, %v8323_v10  ;;  %v4975_v5 = vld [vmem:[%s9884_s6 + $0x60] sm:$0xff] }
 0x302   : > { %3141 = vadd.xlane.f32.xlu0 %v8448_v1  ;;  %v3177_v33 = vmul.f32 %v8448_v1, %v8448_v1  ;;  %v3189_v15 = vmul.f32 %v8488_v13, %v8488_v13  ;;  %v8512_v48 = vmul.f32 0.03125, %v3144_v21 }
 0x303   : > { %v3120_v24 = vadd.f32 %v3102_v52, %v3047_v12  ;;  %3655 = vmatpush.bf16.msra.mxu2 %v4976_v23 }
 0x304   : > { %3195 = vadd.xlane.f32.xlu2 %v3177_v33  ;;  %v3268_v59 = vmul.f32 %v8512_v48, %v8512_v48  ;;  %v4974_v33 = vld [vmem:[%s9884_s6 + $0x58] sm:$0xff] }
 0x305   : > { %v8500_v57 = vadd.f32 %v8420_v4, %v3120_v24 }
 0x307   : > { %v3194_v55 = vmul.f32 %v8500_v57, %v8500_v57  ;;  %3656 = vmatpush.bf16.msra.mxu2 %v4975_v5 }
 0x308   : > { %v3146_v31 = vpop.xlane.xlu1 %3145 }
 0x309   : > { %v8524_v19 = vmul.f32 0.03125, %v3146_v31 }
 0x30a   : > { %3197 = vadd.xlane.f32.xlu0 %v3178_v11 }
 0x30b   : > { %3657 = vmatpush.bf16.msra.mxu2 %v4974_v33 }
 0x30c   : > { %3147 = vadd.xlane.f32.xlu2 %v7797_v37 }
 0x310   : > { %v3202_v43 = vpop.xlane.xlu1 %3201 }
 0x311   : > { %v3252_v28 = vmul.f32 0.03125, %v3202_v43 }
 0x312   : > { %3199 = vadd.xlane.f32.xlu0 %v3179_v63  ;;  %v3269_v63 = vmul.f32 %v8524_v19, %v8524_v19 }
 0x314   : > { %3149 = vadd.xlane.f32.xlu2 %v7829_v45 }
 0x31a   : > { %3151 = vadd.xlane.f32.xlu0 %v8462_v2 }
 0x31c   : > { %3205 = vadd.xlane.f32.xlu2 %v3182_v25 }
 0x322   : > { %3153 = vadd.xlane.f32.xlu0 %v8469_v38 }
 0x324   : > { %3207 = vadd.xlane.f32.xlu2 %v3183_v60 }
 0x32a   : > { %3209 = vadd.xlane.f32.xlu0 %v3184_v53  ;;  %v3204_v53 = vpop.xlane.xlu1 %3203 }
 0x32b   : > { %v3253_v27 = vmul.f32 0.03125, %v3204_v53 }
 0x32c   : > { %3159 = vadd.xlane.f32.xlu2 %v8063_v44 }
 0x332   : > { %3211 = vadd.xlane.f32.xlu0 %v3185_v9 }
 0x334   : > { %3161 = vadd.xlane.f32.xlu2 %v8125_v39 }
 0x33a   : > { %3163 = vadd.xlane.f32.xlu0 %v8482_v61 }
 0x33c   : > { %3217 = vadd.xlane.f32.xlu2 %v3188_v6 }
 0x342   : > { %3165 = vadd.xlane.f32.xlu0 %v8488_v13 }
 0x344   : > { %3219 = vadd.xlane.f32.xlu2 %v3189_v15 }
 0x34a   : > { %3221 = vadd.xlane.f32.xlu0 %v3190_v30 }
 0x34c   : > { %3171 = vadd.xlane.f32.xlu2 %v8365_v34 }
 0x352   : > { %3223 = vadd.xlane.f32.xlu0 %v3191_v51  ;;  %v4973_v51 = vld [vmem:[%s9884_s6 + $0x50] sm:$0xff] }
 0x353   : > { %3658 = vmatpush.bf16.msra.mxu2 %v4973_v51  ;;  %v8585_v51 = vld [vmem:[%s10003_s4 + $0x1] ss:$0 sm:$0xff] }
 0x354   : > { %3173 = vadd.xlane.f32.xlu2 %v8423_v54 }
 0x35a   : > { %3175 = vadd.xlane.f32.xlu0 %v8500_v57 }
 0x35c   : > { %3229 = vadd.xlane.f32.xlu2 %v3194_v55 }
 0x375   : > { %v3142_v8 = vpop.xlane.xlu0 %3141 }
 0x376   : > { %v8508_v14 = vmul.f32 0.03125, %v3142_v8 }
 0x377   : > { %v3196_v35 = vpop.xlane.xlu2 %3195 }
 0x378   : > { %v3267_v4 = vmul.f32 %v8508_v14, %v8508_v14  ;;  %v3249_v41 = vmul.f32 0.03125, %v3196_v35 }
 0x37a   : > { %v3285_v58 = vsub.f32 %v3249_v41, %v3267_v4 }
 0x37c   : > { %v3321_v16 = vadd.f32 1e-05, %v3285_v58  ;;  %v4972_v58 = vld [vmem:[%s9884_s6 + $0x48] sm:$0xff] }
 0x37d   : > { %v3198_v20 = vpop.xlane.xlu0 %3197  ;;  %3659 = vmatpush.bf16.msra.mxu2 %v4972_v58 }
 0x37e   : > { %5225 = vrsqrt.f32 %v3321_v16  ;;  %v3250_v0 = vmul.f32 0.03125, %v3198_v20  ;;  %vm3345_vm1 = vweird.f32 %v3321_v16 }
 0x37f   : > { %v3148_v40 = vpop.xlane.xlu2 %3147 }
 0x380   : > { %v3286_v50 = vsub.f32 %v3250_v0, %v3268_v59  ;;  %v8522_v32 = vmul.f32 0.03125, %v3148_v40 }
 0x382   : > { %v3322_v17 = vadd.f32 1e-05, %v3286_v50  ;;  %v3270_v18 = vmul.f32 %v8522_v32, %v8522_v32 }
 0x384   : > { %v5226_v12 = vpop.eup %5225  ;;  %5227 = vrsqrt.f32 %v3322_v17  ;;  %v3288_v52 = vsub.f32 %v3252_v28, %v3270_v18  ;;  %vm3355_vm4 = vweird.f32 %v3322_v17 }
 0x385   : > { %v3340_v24 = vmul.f32 %v5226_v12, %v3321_v16  ;;  %v3200_v11 = vpop.xlane.xlu0 %3199  ;;  %vm3346_vm0 = vweird.f32 %v5226_v12  ;;  %v4971_v16 = vld [vmem:[%s9884_s6 + $0x40] sm:$0xff] }
 0x386   : > { %v8536_v25 = vadd.f32 1e-05, %v3288_v52  ;;  %v3251_v60 = vmul.f32 0.03125, %v3200_v11  ;;  %vm8558_vm2 = vmor %vm3345_vm1, %vm3346_vm0  ;;  %3660 = vmatpush.bf16.msra.mxu2 %v4971_v16 }
 0x387   : > { %v3341_v9 = vmul.f32 %v5226_v12, %v3340_v24  ;;  %v3150_v6 = vpop.xlane.xlu2 %3149 }
 0x388   : > { %5229 = vrsqrt.f32 %v8536_v25  ;;  %v3287_v15 = vsub.f32 %v3251_v60, %v3269_v63  ;;  %v8539_v30 = vmul.f32 0.03125, %v3150_v6  ;;  %v3303_v60 = vsub.f32 %v8448_v1, %v8508_v14  ;;  %v3156_v1 = vpop.xlane.xlu1 %3155 }
 0x389   : > { %v3342_v55 = vmul.f32 0.5, %v3341_v9  ;;  %v3304_v6 = vsub.f32 %v7714_v7, %v8512_v48  ;;  %vm3375_vm11 = vweird.f32 %v8536_v25 }
 0x38a   : > { %v5228_v21 = vpop.eup %5227  ;;  %v8544_v31 = vadd.f32 1e-05, %v3287_v15  ;;  %v3271_v8 = vmul.f32 %v8539_v30, %v8539_v30 }
 0x38b   : > { %v3343_v35 = vsub.f32 1.5, %v3342_v55  ;;  %v3350_v4 = vmul.f32 %v5228_v21, %v3322_v17  ;;  %vm3356_vm3 = vweird.f32 %v5228_v21 }
 0x38c   : > { %5231 = vrsqrt.f32 %v8544_v31  ;;  %v3289_v41 = vsub.f32 %v3253_v27, %v3271_v8  ;;  %vm3357_vm5 = vmor %vm3355_vm4, %vm3356_vm3  ;;  %vm3365_vm9 = vweird.f32 %v8544_v31 }
 0x38d   : > { %v3344_v47 = vmul.f32 %v5226_v12, %v3343_v35  ;;  %v3351_v23 = vmul.f32 %v5228_v21, %v3350_v4  ;;  %v3152_v43 = vpop.xlane.xlu0 %3151 }
 0x38e   : > { %v8552_v20 = vpop.eup %5229  ;;  %v8554_v59 = vmul.f32 0.03125, %v3152_v43  ;;  %v8562_v18 = vadd.f32 1e-05, %v3289_v41 }
 0x38f   : > { %v3352_v0 = vmul.f32 0.5, %v3351_v23  ;;  %v3370_v40 = vmul.f32 %v8552_v20, %v8536_v25  ;;  %v3206_v50 = vpop.xlane.xlu2 %3205  ;;  %v3348_v11 = vsel %vm8558_vm2, %v5226_v12, %v3344_v47  ;;  %v8599_v47 = vld [vmem:[%s9883_s5 + $0x1] ss:$0 sm:$0xff]  ;;  %vm3376_vm7 = vweird.f32 %v8552_v20 }
 0x390   : > { %v3272_v5 = vmul.f32 %v8554_v59, %v8554_v59  ;;  %v3254_v24 = vmul.f32 0.03125, %v3206_v50  ;;  %5233 = vrsqrt.f32 %v8562_v18  ;;  %v3519_v12 = vmul.f32 %v3348_v11, %v3303_v60  ;;  %vm3377_vm12 = vmor %vm3375_vm11, %vm3376_vm7 }
 0x391   : > { %v3353_v52 = vsub.f32 1.5, %v3352_v0  ;;  %v3371_v33 = vmul.f32 %v8552_v20, %v3370_v40  ;;  %v8603_v40 = vmul.f32 0.03125, %v3156_v1  ;;  %vm3385_vm0 = vweird.f32 %v8562_v18 }
 0x392   : > { %v8572_v63 = vpop.eup %5231  ;;  %v3290_v15 = vsub.f32 %v3254_v24, %v3272_v5  ;;  %v3539_v58 = vmul.f32 %v8585_v51, %v3519_v12  ;;  %v3158_v12 = vpop.xlane.xlu1 %3157 }
 0x393   : > { %v3354_v53 = vmul.f32 %v5228_v21, %v3353_v52  ;;  %v3360_v9 = vmul.f32 %v8572_v63, %v8544_v31  ;;  %v3372_v14 = vmul.f32 0.5, %v3371_v33  ;;  %vm3366_vm8 = vweird.f32 %v8572_v63 }
 0x394   : > { %v8588_v8 = vadd.f32 1e-05, %v3290_v15  ;;  %v3559_v16 = vadd.f32 %v8599_v47, %v3539_v58  ;;  %vm8619_vm10 = vmor %vm3365_vm9, %vm3366_vm8 }
 0x395   : > { %v3361_v17 = vmul.f32 %v8572_v63, %v3360_v9  ;;  %v3154_v55 = vpop.xlane.xlu0 %3153  ;;  %v3358_v27 = vsel %vm3357_vm5, %v5228_v21, %v3354_v53  ;;  %v3373_v21 = vsub.f32 1.5, %v3372_v14  ;;  %v3274_v53 = vmul.f32 %v8603_v40, %v8603_v40 }
 0x396   : > { %v8590_v7 = vmul.f32 0.03125, %v3154_v55  ;;  %v3520_v48 = vmul.f32 %v3358_v27, %v3304_v6  ;;  %5235 = vrsqrt.f32 %v8588_v8  ;;  %v8601_v0 = vpop.eup %5233  ;;  %v3305_v55 = vsub.f32 %v7741_v56, %v8524_v19 }
 0x397   : > { %v3362_v35 = vmul.f32 0.5, %v3361_v17  ;;  %v3208_v4 = vpop.xlane.xlu2 %3207  ;;  %v3374_v33 = vmul.f32 %v8552_v20, %v3373_v21  ;;  %v3380_v24 = vmul.f32 %v8601_v0, %v8562_v18  ;;  %v8643_v56 = vmul.f32 0.03125, %v3158_v12 }
 0x398   : > { %v3273_v41 = vmul.f32 %v8590_v7, %v8590_v7  ;;  %v3255_v43 = vmul.f32 0.03125, %v3208_v4  ;;  %v3540_v50 = vmul.f32 %v8585_v51, %v3520_v48  ;;  %v3306_v4 = vsub.f32 %v7797_v37, %v8522_v32 }
 0x399   : > { %v3363_v23 = vsub.f32 1.5, %v3362_v35  ;;  %v3378_v25 = vsel %vm3377_vm12, %v8552_v20, %v3374_v33  ;;  %v3381_v48 = vmul.f32 %v8601_v0, %v3380_v24  ;;  %v3275_v32 = vmul.f32 %v8643_v56, %v8643_v56 }
 0x39a   : > { %v3291_v5 = vsub.f32 %v3255_v43, %v3273_v41  ;;  %v3560_v52 = vadd.f32 %v8599_v47, %v3540_v50  ;;  %v3522_v19 = vmul.f32 %v3378_v25, %v3306_v4  ;;  %vm3386_vm15 = vweird.f32 %v8601_v0 }
 0x39b   : > { %v3364_v28 = vmul.f32 %v8572_v63, %v3363_v23  ;;  %v3382_v20 = vmul.f32 0.5, %v3381_v48  ;;  %vm3395_vm14 = vweird.f32 %v8588_v8  ;;  %vm3387_vm1 = vmor %vm3385_vm0, %vm3386_vm15  ;;  %v3307_v18 = vsub.f32 %v7829_v45, %v8539_v30 }
 0x39c   : > { %v8615_v60 = vpop.eup %5235  ;;  %v3577_v15 = vpack.c.bf16 %v3560_v52, %v3559_v16  ;;  %v8626_v1 = vadd.f32 1e-05, %v3291_v5  ;;  %v3542_v16 = vmul.f32 %v8585_v51, %v3522_v19 }
 0x39d   : > { %v3210_v11 = vpop.xlane.xlu0 %3209  ;;  %v3390_v31 = vmul.f32 %v8615_v60, %v8588_v8  ;;  %v3368_v17 = vsel %vm8619_vm10, %v8572_v63, %v3364_v28  ;;  %v3214_v28 = vpop.xlane.xlu1 %3213  ;;  %v3383_v33 = vsub.f32 1.5, %v3382_v20  ;;  %vm3396_vm13 = vweird.f32 %v8615_v60 }
 0x39e   : > { %v3256_v6 = vmul.f32 0.03125, %v3210_v11  ;;  %3661 = vmatmul.bf16.vlgmr.msra.gmra.mxu2 %v3577_v15  ;;  %v3521_v63 = vmul.f32 %v3368_v17, %v3305_v55  ;;  %5237 = vrsqrt.f32 %v8626_v1  ;;  %vm8669_vm6 = vmor %vm3395_vm14, %vm3396_vm13  ;;  %v3308_v8 = vsub.f32 %v8462_v2, %v8554_v59 }
 0x39f   : > { %v3160_v14 = vpop.xlane.xlu2 %3159  ;;  %v3391_v35 = vmul.f32 %v8615_v60, %v3390_v31  ;;  %v3384_v17 = vmul.f32 %v8601_v0, %v3383_v33  ;;  %vm3405_vm8 = vweird.f32 %v8626_v1 }
 0x3a0   : > { %v3292_v27 = vsub.f32 %v3256_v6, %v3274_v53  ;;  %v8646_v21 = vmul.f32 0.03125, %v3160_v14  ;;  %v3541_v50 = vmul.f32 %v8585_v51, %v3521_v63  ;;  %v3258_v53 = vmul.f32 0.03125, %v3214_v28 }
 0x3a1   : > { %v3392_v58 = vmul.f32 0.5, %v3391_v35  ;;  %v3562_v14 = vadd.f32 %v8599_v47, %v3542_v16  ;;  %v3388_v19 = vsel %vm3387_vm1, %v8601_v0, %v3384_v17 }
 0x3a2   : > { %v8640_v41 = vadd.f32 1e-05, %v3292_v27  ;;  %v3276_v5 = vmul.f32 %v8646_v21, %v8646_v21  ;;  %v3561_v6 = vadd.f32 %v8599_v47, %v3541_v50  ;;  %v3523_v28 = vmul.f32 %v3388_v19, %v3307_v18 }
 0x3a3   : > { %v3393_v37 = vsub.f32 1.5, %v3392_v58  ;;  %v3310_v19 = vsub.f32 %v7964_v62, %v8603_v40 }
 0x3a4   : > { %5239 = vrsqrt.f32 %v8640_v41  ;;  %v8654_v52 = vpop.eup %5237  ;;  %v3294_v31 = vsub.f32 %v3258_v53, %v3276_v5  ;;  %v3578_v48 = vpack.c.bf16 %v3562_v14, %v3561_v6  ;;  %v3543_v33 = vmul.f32 %v8585_v51, %v3523_v28 }
 0x3a5   : > { %v3212_v23 = vpop.xlane.xlu0 %3211  ;;  %v3394_v15 = vmul.f32 %v8615_v60, %v3393_v37  ;;  %v3400_v55 = vmul.f32 %v8654_v52, %v8626_v1  ;;  %v3216_v45 = vpop.xlane.xlu1 %3215  ;;  %vm3406_vm3 = vweird.f32 %v8654_v52  ;;  %vm3415_vm4 = vweird.f32 %v8640_v41 }
 0x3a6   : > { %v3257_v43 = vmul.f32 0.03125, %v3212_v23  ;;  %v8682_v58 = vadd.f32 1e-05, %v3294_v31  ;;  %v3259_v6 = vmul.f32 0.03125, %v3216_v45  ;;  %vm3407_vm7 = vmor %vm3405_vm8, %vm3406_vm3 }
 0x3a7   : > { %v3162_v24 = vpop.xlane.xlu2 %3161  ;;  %v3398_v63 = vsel %vm8669_vm6, %v8615_v60, %v3394_v15  ;;  %v3401_v20 = vmul.f32 %v8654_v52, %v3400_v55  ;;  %v3563_v55 = vadd.f32 %v8599_v47, %v3543_v33 }
 0x3a8   : > { %v3293_v9 = vsub.f32 %v3257_v43, %v3275_v32  ;;  %v3524_v43 = vmul.f32 %v3398_v63, %v3308_v8  ;;  %v8692_v2 = vmul.f32 0.03125, %v3162_v24  ;;  %vm3435_vm13 = vweird.f32 %v8682_v58 }
 0x3a9   : > { %v3402_v59 = vmul.f32 0.5, %v3401_v20 }
 0x3aa   : > { %v8656_v11 = vpop.eup %5239  ;;  %v8673_v25 = vadd.f32 1e-05, %v3293_v9  ;;  %v3544_v32 = vmul.f32 %v8585_v51, %v3524_v43  ;;  %v3277_v16 = vmul.f32 %v8692_v2, %v8692_v2 }
 0x3ab   : > { %v3410_v12 = vmul.f32 %v8656_v11, %v8640_v41  ;;  %v3403_v53 = vsub.f32 1.5, %v3402_v59  ;;  %vm3416_vm2 = vweird.f32 %v8656_v11 }
 0x3ac   : > { %5241 = vrsqrt.f32 %v8673_v25  ;;  %v3295_v17 = vsub.f32 %v3259_v6, %v3277_v16  ;;  %vm3417_vm5 = vmor %vm3415_vm4, %vm3416_vm2  ;;  %vm3425_vm11 = vweird.f32 %v8673_v25 }
 0x3ad   : > { %v3411_v35 = vmul.f32 %v8656_v11, %v3410_v12  ;;  %v3164_v4 = vpop.xlane.xlu0 %3163  ;;  %5243 = vrsqrt.f32 %v8682_v58  ;;  %v3564_v12 = vadd.f32 %v8599_v47, %v3544_v32  ;;  %v3404_v27 = vmul.f32 %v8654_v52, %v3403_v53  ;;  %v3168_v41 = vpop.xlane.xlu1 %3167 }
 0x3ae   : > { %3666 = vmatmul.bf16.gmra.mxu2 %v3578_v48  ;;  %v8689_v23 = vmul.f32 0.03125, %v3164_v4  ;;  %v8722_v20 = vadd.f32 1e-05, %v3295_v17  ;;  %v8729_v28 = vmul.f32 0.03125, %v3168_v41  ;;  %v3311_v41 = vsub.f32 %v7991_v49, %v8643_v56 }
 0x3af   : > { %v3412_v60 = vmul.f32 0.5, %v3411_v35  ;;  %v3218_v50 = vpop.xlane.xlu2 %3217  ;;  %v3579_v4 = vpack.c.bf16 %v3564_v12, %v3563_v55  ;;  %v3408_v43 = vsel %vm3407_vm7, %v8654_v52, %v3404_v27 }
 0x3b0   : > { %v3278_v0 = vmul.f32 %v8689_v23, %v8689_v23  ;;  %v3260_v37 = vmul.f32 0.03125, %v3218_v50  ;;  %vm3445_vm2 = vweird.f32 %v8722_v20 }
 0x3b1   : > { %v3413_v30 = vsub.f32 1.5, %v3412_v60  ;;  %v3309_v60 = vsub.f32 %v8469_v38, %v8590_v7  ;;  %v3280_v38 = vmul.f32 %v8729_v28, %v8729_v28 }
 0x3b2   : > { %v8697_v5 = vpop.eup %5241  ;;  %v3296_v15 = vsub.f32 %v3260_v37, %v3278_v0 }
 0x3b3   : > { %v8702_v24 = vpop.eup %5243  ;;  %v3414_v31 = vmul.f32 %v8656_v11, %v3413_v30  ;;  %v3420_v14 = vmul.f32 %v8697_v5, %v8673_v25  ;;  %v3525_v40 = vmul.f32 %v3408_v43, %v3309_v60  ;;  %vm3426_vm9 = vweird.f32 %v8697_v5 }
 0x3b4   : > { %v3430_v48 = vmul.f32 %v8702_v24, %v8682_v58  ;;  %v8715_v35 = vadd.f32 1e-05, %v3296_v15  ;;  %vm3436_vm10 = vweird.f32 %v8702_v24  ;;  %vm8755_vm12 = vmor %vm3425_vm11, %vm3426_vm9  ;;  %v3312_v58 = vsub.f32 %v8063_v44, %v8646_v21 }
 0x3b5   : > { %v3166_v9 = vpop.xlane.xlu0 %3165  ;;  %v3421_v63 = vmul.f32 %v8697_v5, %v3420_v14  ;;  %v3418_v8 = vsel %vm3417_vm5, %v8656_v11, %v3414_v31  ;;  %v3545_v16 = vmul.f32 %v8585_v51, %v3525_v40  ;;  %vm3437_vm15 = vmor %vm3435_vm13, %vm3436_vm10 }
 0x3b6   : > { %v3431_v18 = vmul.f32 %v8702_v24, %v3430_v48  ;;  %5245 = vrsqrt.f32 %v8715_v35  ;;  %v3526_v1 = vmul.f32 %v3418_v8, %v3310_v19  ;;  %v8732_v62 = vmul.f32 0.03125, %v3166_v9 }
 0x3b7   : > { %v3422_v50 = vmul.f32 0.5, %v3421_v63  ;;  %5247 = vrsqrt.f32 %v8722_v20  ;;  %v3220_v0 = vpop.xlane.xlu2 %3219  ;;  %v3565_v14 = vadd.f32 %v8599_v47, %v3545_v16  ;;  %v3170_v63 = vpop.xlane.xlu1 %3169  ;;  %vm3455_vm0 = vweird.f32 %v8715_v35 }
 0x3b8   : > { %v3432_v59 = vmul.f32 0.5, %v3431_v18  ;;  %v3546_v52 = vmul.f32 %v8585_v51, %v3526_v1  ;;  %v3279_v7 = vmul.f32 %v8732_v62, %v8732_v62  ;;  %v3261_v30 = vmul.f32 0.03125, %v3220_v0 }
 0x3b9   : > { %v3423_v32 = vsub.f32 1.5, %v3422_v50 }
 0x3ba   : > { %v3433_v33 = vsub.f32 1.5, %v3432_v59  ;;  %v3566_v6 = vadd.f32 %v8599_v47, %v3546_v52  ;;  %v3297_v31 = vsub.f32 %v3261_v30, %v3279_v7 }
 0x3bb   : > { %v3424_v15 = vmul.f32 %v8697_v5, %v3423_v32 }
 0x3bc   : > { %v8735_v45 = vpop.eup %5245  ;;  %v3434_v17 = vmul.f32 %v8702_v24, %v3433_v33  ;;  %v8768_v18 = vadd.f32 1e-05, %v3297_v31 }
 0x3bd   : > { %v3222_v11 = vpop.xlane.xlu0 %3221  ;;  %v8742_v53 = vpop.eup %5247  ;;  %v3450_v12 = vmul.f32 %v8735_v45, %v8715_v35  ;;  %v3428_v25 = vsel %vm8755_vm12, %v8697_v5, %v3424_v15  ;;  %v8775_v5 = vmul.f32 0.03125, %v3170_v63  ;;  %vm3456_vm14 = vweird.f32 %v8735_v45 }
 0x3be   : > { %3671 = vmatmul.bf16.gmra.mxu2 %v3579_v4  ;;  %v3262_v37 = vmul.f32 0.03125, %v3222_v11  ;;  %v3440_v55 = vmul.f32 %v8742_v53, %v8722_v20  ;;  %v3580_v4 = vpack.c.bf16 %v3566_v6, %v3565_v14  ;;  %v3438_v43 = vsel %vm3437_vm15, %v8702_v24, %v3434_v17  ;;  %vm8801_vm1 = vmor %vm3455_vm0, %vm3456_vm14 }
 0x3bf   : > { %v3451_v8 = vmul.f32 %v8735_v45, %v3450_v12  ;;  %v3172_v19 = vpop.xlane.xlu2 %3171  ;;  %v3527_v1 = vmul.f32 %v3428_v25, %v3311_v41  ;;  %v3528_v40 = vmul.f32 %v3438_v43, %v3312_v58  ;;  %v3226_v0 = vpop.xlane.xlu1 %3225  ;;  %v3281_v44 = vmul.f32 %v8775_v5, %v8775_v5 }
 0x3c0   : > { %v3298_v9 = vsub.f32 %v3262_v37, %v3280_v38  ;;  %v3441_v60 = vmul.f32 %v8742_v53, %v3440_v55  ;;  %v8778_v49 = vmul.f32 0.03125, %v3172_v19  ;;  %v3264_v16 = vmul.f32 0.03125, %v3226_v0 }
 0x3c1   : > { %v3452_v50 = vmul.f32 0.5, %v3451_v8  ;;  %v3547_v24 = vmul.f32 %v8585_v51, %v3527_v1  ;;  %v3548_v32 = vmul.f32 %v8585_v51, %v3528_v40  ;;  %vm3446_vm6 = vweird.f32 %v8742_v53 }
 0x3c2   : > { %v8759_v48 = vadd.f32 1e-05, %v3298_v9  ;;  %v3442_v56 = vmul.f32 0.5, %v3441_v60  ;;  %v3282_v21 = vmul.f32 %v8778_v49, %v8778_v49  ;;  %vm3447_vm3 = vmor %vm3445_vm2, %vm3446_vm6  ;;  %v3314_v35 = vsub.f32 %v8482_v61, %v8689_v23 }
 0x3c3   : > { %v3453_v37 = vsub.f32 1.5, %v3452_v50  ;;  %v3567_v9 = vadd.f32 %v8599_v47, %v3547_v24  ;;  %v3568_v31 = vadd.f32 %v8599_v47, %v3548_v32  ;;  %v3313_v20 = vsub.f32 %v8125_v39, %v8692_v2 }
 0x3c4   : > { %5249 = vrsqrt.f32 %v8759_v48  ;;  %v3443_v38 = vsub.f32 1.5, %v3442_v56  ;;  %v3300_v12 = vsub.f32 %v3264_v16, %v3282_v21  ;;  %vm3475_vm8 = vweird.f32 %v8759_v48 }
 0x3c5   : > { %v3224_v11 = vpop.xlane.xlu0 %3223  ;;  %5251 = vrsqrt.f32 %v8768_v18  ;;  %v3454_v6 = vmul.f32 %v8735_v45, %v3453_v37  ;;  %vm3465_vm9 = vweird.f32 %v8768_v18 }
 0x3c6   : > { %v3263_v59 = vmul.f32 0.03125, %v3224_v11  ;;  %v3444_v14 = vmul.f32 %v8742_v53, %v3443_v38  ;;  %v8814_v25 = vadd.f32 1e-05, %v3300_v12 }
 0x3c7   : > { %v3174_v7 = vpop.xlane.xlu2 %3173  ;;  %v3458_v19 = vsel %vm8801_vm1, %v8735_v45, %v3454_v6  ;;  %v3228_v39 = vpop.xlane.xlu1 %3227 }
 0x3c8   : > { %v3299_v33 = vsub.f32 %v3263_v59, %v3281_v44  ;;  %v3448_v41 = vsel %vm3447_vm3, %v8742_v53, %v3444_v14  ;;  %v3530_v58 = vmul.f32 %v3458_v19, %v3314_v35  ;;  %v8824_v61 = vmul.f32 0.03125, %v3174_v7 }
 0x3c9   : > { %v3529_v50 = vmul.f32 %v3448_v41, %v3313_v20  ;;  %v3265_v44 = vmul.f32 0.03125, %v3228_v39  ;;  %vm3495_vm14 = vweird.f32 %v8814_v25 }
 0x3ca   : > { %v8781_v52 = vpop.eup %5249  ;;  %v8805_v27 = vadd.f32 1e-05, %v3299_v33  ;;  %v3550_v40 = vmul.f32 %v8585_v51, %v3530_v58  ;;  %v3283_v59 = vmul.f32 %v8824_v61, %v8824_v61 }
 0x3cb   : > { %v8788_v30 = vpop.eup %5251  ;;  %v3470_v15 = vmul.f32 %v8781_v52, %v8759_v48  ;;  %v3549_v24 = vmul.f32 %v8585_v51, %v3529_v50  ;;  %vm3476_vm4 = vweird.f32 %v8781_v52 }
 0x3cc   : > { %v3460_v17 = vmul.f32 %v8788_v30, %v8768_v18  ;;  %5253 = vrsqrt.f32 %v8805_v27  ;;  %v3570_v32 = vadd.f32 %v8599_v47, %v3550_v40  ;;  %v3301_v16 = vsub.f32 %v3265_v44, %v3283_v59  ;;  %vm3477_vm7 = vmor %vm3475_vm8, %vm3476_vm4 }
 0x3cd   : > { %v3471_v63 = vmul.f32 %v8781_v52, %v3470_v15  ;;  %v3176_v8 = vpop.xlane.xlu0 %3175  ;;  %5255 = vrsqrt.f32 %v8814_v25  ;;  %v3569_v33 = vadd.f32 %v8599_v47, %v3549_v24  ;;  %vm3466_vm5 = vweird.f32 %v8788_v30 }
 0x3ce   : > { %3676 = vmatmul.bf16.gmra.mxu2 %v3580_v4  ;;  %v3581_v4 = vpack.c.bf16 %v3568_v31, %v3567_v9  ;;  %v3461_v43 = vmul.f32 %v8788_v30, %v3460_v17  ;;  %v8821_v60 = vmul.f32 0.03125, %v3176_v8  ;;  %v3316_v17 = vsub.f32 %v8277_v42, %v8729_v28  ;;  %vm3467_vm10 = vmor %vm3465_vm9, %vm3466_vm5 }
 0x3cf   : > { %v3472_v45 = vmul.f32 0.5, %v3471_v63  ;;  %v3230_v1 = vpop.xlane.xlu2 %3229  ;;  %v3582_v12 = vpack.c.bf16 %v3570_v32, %v3569_v33  ;;  %v3337_v55 = vadd.f32 1e-05, %v3301_v16  ;;  %v3315_v63 = vsub.f32 %v8488_v13, %v8732_v62 }
 0x3d0   : > { %v3462_v23 = vmul.f32 0.5, %v3461_v43  ;;  %v3284_v53 = vmul.f32 %v8821_v60, %v8821_v60  ;;  %v3266_v11 = vmul.f32 0.03125, %v3230_v1  ;;  %vm3485_vm13 = vweird.f32 %v8805_v27 }
 0x3d1   : > { %v3473_v2 = vsub.f32 1.5, %v3472_v45  ;;  %vm3505_vm4 = vweird.f32 %v3337_v55  ;;  %v3319_v16 = vsub.f32 %v8423_v54, %v8824_v61 }
 0x3d2   : > { %v8829_v56 = vpop.eup %5253  ;;  %v3463_v0 = vsub.f32 1.5, %v3462_v23  ;;  %v3302_v21 = vsub.f32 %v3266_v11, %v3284_v53  ;;  %v3317_v11 = vsub.f32 %v8323_v10, %v8775_v5 }
 0x3d3   : > { %v5256_v37 = vpop.eup %5255  ;;  %v3474_v38 = vmul.f32 %v8781_v52, %v3473_v2  ;;  %v3480_v7 = vmul.f32 %v8829_v56, %v8805_v27  ;;  %vm3486_vm11 = vweird.f32 %v8829_v56  ;;  %v3318_v2 = vsub.f32 %v8365_v34, %v8778_v49 }
 0x3d4   : > { %v3464_v9 = vmul.f32 %v8788_v30, %v3463_v0  ;;  %v3490_v6 = vmul.f32 %v5256_v37, %v8814_v25  ;;  %v3338_v15 = vadd.f32 1e-05, %v3302_v21  ;;  %vm3496_vm12 = vweird.f32 %v5256_v37  ;;  %vm3487_vm15 = vmor %vm3485_vm13, %vm3486_vm11 }
 0x3d5   : > { %v3481_v31 = vmul.f32 %v8829_v56, %v3480_v7  ;;  %v3478_v14 = vsel %vm3477_vm7, %v8781_v52, %v3474_v38  ;;  %vm3497_vm6 = vmor %vm3495_vm14, %vm3496_vm12  ;;  %v3320_v38 = vsub.f32 %v8500_v57, %v8821_v60  ;;  %v8880_v57 = vld [vmem:[%s9885_s7 + $0x1] ss:$0 sm:$0xff] }
 0x3d6   : > { %v3468_v48 = vsel %vm3467_vm10, %v8788_v30, %v3464_v9  ;;  %5257 = vrsqrt.f32 %v3338_v15  ;;  %v3532_v8 = vmul.f32 %v3478_v14, %v3316_v17  ;;  %vm3515_vm2 = vweird.f32 %v3338_v15 }
 0x3d7   : > { %v3482_v19 = vmul.f32 0.5, %v3481_v31  ;;  %5259 = vrsqrt.f32 %v3337_v55  ;;  %v3531_v18 = vmul.f32 %v3468_v48, %v3315_v63 }
 0x3d8   : > { %v3552_v52 = vmul.f32 %v8585_v51, %v3532_v8 }
 0x3d9   : > { %v3483_v41 = vsub.f32 1.5, %v3482_v19  ;;  %v3551_v42 = vmul.f32 %v8585_v51, %v3531_v18 }
 0x3da   : > { %v3572_v58 = vadd.f32 %v8599_v47, %v3552_v52 }
 0x3db   : > { %v3484_v30 = vmul.f32 %v8829_v56, %v3483_v41  ;;  %v3571_v62 = vadd.f32 %v8599_v47, %v3551_v42 }
 0x3dc   : > { %v5258_v43 = vpop.eup %5257 }
 0x3dd   : > { %v5260_v20 = vpop.eup %5259  ;;  %v3510_v13 = vmul.f32 %v5258_v43, %v3338_v15  ;;  %v3583_v50 = vpack.c.bf16 %v3572_v58, %v3571_v62  ;;  %v3488_v53 = vsel %vm3487_vm15, %v8829_v56, %v3484_v30  ;;  %vm3516_vm0 = vweird.f32 %v5258_v43  ;;  %v4986_v58 = vld [vmem:[#allocation7 + $0x78] sm:$0xff] }
 0x3de   : > { %3681 = vmatmul.bf16.gmra.mxu2 %v3581_v4  ;;  %v3491_v4 = vmul.f32 %v5256_v37, %v3490_v6  ;;  %v3500_v1 = vmul.f32 %v5260_v20, %v3337_v55  ;;  %v3533_v59 = vmul.f32 %v3488_v53, %v3317_v11  ;;  %vm3506_vm1 = vweird.f32 %v5260_v20  ;;  %vm3517_vm3 = vmor %vm3515_vm2, %vm3516_vm0  ;;  %4503 = vmatpush.bf16.msra.mxu3 %v4986_v58 }
 0x3df   : > { %v3511_v23 = vmul.f32 %v5258_v43, %v3510_v13  ;;  %vm3507_vm5 = vmor %vm3505_vm4, %vm3506_vm1 }
 0x3e0   : > { %v3492_v35 = vmul.f32 0.5, %v3491_v4  ;;  %v3501_v39 = vmul.f32 %v5260_v20, %v3500_v1  ;;  %v3553_v44 = vmul.f32 %v8585_v51, %v3533_v59  ;;  %v4985_v1 = vld [vmem:[#allocation7 + $0x70] sm:$0xff] }
 0x3e1   : > { %v3512_v27 = vmul.f32 0.5, %v3511_v23 }
 0x3e2   : > { %v3493_v28 = vsub.f32 1.5, %v3492_v35  ;;  %v3502_v0 = vmul.f32 0.5, %v3501_v39  ;;  %v3573_v32 = vadd.f32 %v8599_v47, %v3553_v44  ;;  %4504 = vmatpush.bf16.msra.mxu3 %v4985_v1 }
 0x3e3   : > { %v3513_v25 = vsub.f32 1.5, %v3512_v27 }
 0x3e4   : > { %v3494_v45 = vmul.f32 %v5256_v37, %v3493_v28  ;;  %v3503_v56 = vsub.f32 1.5, %v3502_v0 }
 0x3e5   : > { %v3514_v10 = vmul.f32 %v5258_v43, %v3513_v25 }
 0x3e6   : > { %v3498_v40 = vsel %vm3497_vm6, %v5256_v37, %v3494_v45  ;;  %v3504_v37 = vmul.f32 %v5260_v20, %v3503_v56  ;;  %v4984_v56 = vld [vmem:[#allocation7 + $0x68] sm:$0xff] }
 0x3e7   : > { %v3534_v24 = vmul.f32 %v3498_v40, %v3318_v2  ;;  %v3518_v49 = vsel %vm3517_vm3, %v5258_v43, %v3514_v10  ;;  %4505 = vmatpush.bf16.msra.mxu3 %v4984_v56 }
 0x3e8   : > { %v3508_v7 = vsel %vm3507_vm5, %v5260_v20, %v3504_v37  ;;  %v3536_v33 = vmul.f32 %v3518_v49, %v3320_v38 }
 0x3e9   : > { %v3554_v21 = vmul.f32 %v8585_v51, %v3534_v24  ;;  %v3535_v9 = vmul.f32 %v3508_v7, %v3319_v16  ;;  %v4983_v16 = vld [vmem:[#allocation7 + $0x60] sm:$0xff] }
 0x3ea   : > { %v3556_v6 = vmul.f32 %v8585_v51, %v3536_v33 }
 0x3eb   : > { %v3574_v5 = vadd.f32 %v8599_v47, %v3554_v21  ;;  %4506 = vmatpush.bf16.msra.mxu3 %v4983_v16  ;;  %v4980_v16 = vld [vmem:[#allocation7 + $0x48] sm:$0xff] }
 0x3ec   : > { %v3576_v15 = vadd.f32 %v8599_v47, %v3556_v6 }
 0x3ed   : > { %v3584_v34 = vpack.c.bf16 %v3574_v5, %v3573_v32 }
 0x3ee   : > { %3686 = vmatmul.bf16.gmra.mxu2 %v3582_v12  ;;  %v3555_v12 = vmul.f32 %v8585_v51, %v3535_v9 }
 0x3f0   : > { %v3575_v31 = vadd.f32 %v8599_v47, %v3555_v12 }
 0x3f2   : > { %v3585_v14 = vpack.c.bf16 %v3576_v15, %v3575_v31 }
 0x3fe   : > { %3691 = vmatmul.bf16.gmra.mxu2 %v3583_v50 }
 0x40e   : > { %3696 = vmatmul.bf16.gmra.mxu2 %v3584_v34 }
 0x41e   : > { %3701 = vmatmul.bf16.gmra.mxu2 %v3585_v14 }
 0x421   : > { %v3662_v60 = vpop.f32.mrf.mxu2 }
 0x422   : > { %v8883_v54 = vadd.f32 %v8880_v57, %v3662_v60 }
 0x424   : > { %v8886_v61 = vmul.f32 0.70710677, %v8883_v54 }
 0x426   : > { %v3779_v51 = vand.u32 2147483647, %v8886_v61  ;;  %vm3743_vm5 = vcmp.ge.f32.partialorder %v8886_v61, 0.0  ;;  %v3707_v61 = vmul.f32 0.5, %v8883_v54 }
 0x428   : > { %v3797_v17 = vmul.f32 0.3275911, %v3779_v51  ;;  %v4265_v59 = vsub.f32 0.0, %v3779_v51 }
 0x429   : > { %v3664_v55 = vpop.f32.mrf.mxu2 }
 0x42a   : > { %v3815_v4 = vadd.f32 1.0, %v3797_v17  ;;  %v8890_v47 = vadd.f32 %v8880_v57, %v3664_v55  ;;  %v4283_v5 = vmul.f32 %v4265_v59, %v3779_v51 }
 0x42c   : > { %5261 = vrcp.f32 %v3815_v4  ;;  %v8893_v48 = vmul.f32 0.70710677, %v8890_v47  ;;  %v3844_v30 = vand.u32 2147483648, %v3815_v4  ;;  %v3842_v62 = vand.u32 2147483647, %v3815_v4 }
 0x42d   : > { %vm3838_vm7 = vweird.f32 %v3815_v4  ;;  %v4301_v17 = vmul.f32 1.442695, %v4283_v5 }
 0x42e   : > { %v8896_v63 = vand.u32 2147483647, %v8893_v48  ;;  %v3845_v39 = vor.u32 1.1754944e-38, %v3844_v30  ;;  %vm3843_vm10 = vcmp.eq.f32.partialorder %v3842_v62, 8.507059e+37 }
 0x430   : > { %v3798_v8 = vmul.f32 0.3275911, %v8896_v63 }
 0x431   : > { %v3667_v19 = vpop.f32.mrf.mxu2 }
 0x432   : > { %v5262_v18 = vpop.eup %5261  ;;  %v8900_v35 = vadd.f32 %v8880_v57, %v3667_v19  ;;  %v3816_v41 = vadd.f32 1.0, %v3798_v8  ;;  %v4266_v19 = vsub.f32 0.0, %v8896_v63 }
 0x433   : > { %v3834_v52 = vmul.f32 %v5262_v18, %v3815_v4  ;;  %vm3839_vm8 = vweird.f32 %v5262_v18 }
 0x434   : > { %v8903_v43 = vmul.f32 0.70710677, %v8900_v35  ;;  %5263 = vrcp.f32 %v3816_v41  ;;  %vm3840_vm9 = vmor %vm3838_vm7, %vm3839_vm8  ;;  %v3859_v32 = vand.u32 2147483648, %v3816_v41  ;;  %v3857_v49 = vand.u32 2147483647, %v3816_v41 }
 0x435   : > { %v3835_v42 = vsub.f32 1.0, %v3834_v52  ;;  %vm3853_vm12 = vweird.f32 %v3816_v41  ;;  %v4982_v52 = vld [vmem:[#allocation7 + $0x58] sm:$0xff]  ;;  %v4284_v59 = vmul.f32 %v4266_v19, %v8896_v63  ;;  %vm3744_vm7 = vcmp.ge.f32.partialorder %v8893_v48, 0.0 }
 0x436   : > { %v8906_v28 = vand.u32 2147483647, %v8903_v43  ;;  %v3860_v14 = vor.u32 1.1754944e-38, %v3859_v32  ;;  %vm3858_vm15 = vcmp.eq.f32.partialorder %v3857_v49, 8.507059e+37  ;;  %4507 = vmatpush.bf16.msra.mxu3 %v4982_v52 }
 0x437   : > { %v3836_v20 = vmul.f32 %v5262_v18, %v3835_v42 }
 0x438   : > { %v3799_v13 = vmul.f32 0.3275911, %v8906_v28 }
 0x439   : > { %v3669_v45 = vpop.f32.mrf.mxu2  ;;  %v3837_v50 = vadd.f32 %v5262_v18, %v3836_v20 }
 0x43a   : > { %v8909_v23 = vadd.f32 1.0, %v3799_v13  ;;  %v8912_v53 = vadd.f32 %v8880_v57, %v3669_v45  ;;  %v5264_v11 = vpop.eup %5263 }
 0x43b   : > { %v3841_v40 = vsel %vm3840_vm9, %v5262_v18, %v3837_v50  ;;  %v3849_v2 = vmul.f32 %v5264_v11, %v3816_v41  ;;  %vm3854_vm11 = vweird.f32 %v5264_v11  ;;  %vm3745_vm9 = vcmp.ge.f32.partialorder %v8903_v43, 0.0 }
 0x43c   : > { %5265 = vrcp.f32 %v8909_v23  ;;  %v8916_v27 = vmul.f32 0.70710677, %v8912_v53  ;;  %v8918_v24 = vsel %vm3843_vm10, %v3845_v39, %v3841_v40  ;;  %vm3855_vm13 = vmor %vm3853_vm12, %vm3854_vm11  ;;  %v3874_v58 = vand.u32 2147483648, %v8909_v23 }
 0x43d   : > { %v3850_v0 = vsub.f32 1.0, %v3849_v2  ;;  %v4103_v44 = vmul.f32 1.0614054, %v8918_v24  ;;  %vm3868_vm6 = vweird.f32 %v8909_v23  ;;  %v3872_v45 = vand.u32 2147483647, %v8909_v23 }
 0x43e   : > { %v8922_v25 = vand.u32 2147483647, %v8916_v27  ;;  %v3761_v39 = vsel %vm3743_vm5, 1.0, %v10039_v29 }
 0x43f   : > { %v3851_v21 = vmul.f32 %v5264_v11, %v3850_v0  ;;  %v4121_v10 = vadd.f32 -1.4531521, %v4103_v44  ;;  %vm3873_vm1 = vcmp.eq.f32.partialorder %v3872_v45, 8.507059e+37 }
 0x440   : > { %v3800_v37 = vmul.f32 0.3275911, %v8922_v25  ;;  %v4268_v45 = vsub.f32 0.0, %v8922_v25 }
 0x441   : > { %v3672_v34 = vpop.f32.mrf.mxu2  ;;  %v3852_v33 = vadd.f32 %v5264_v11, %v3851_v21  ;;  %v4139_v9 = vmul.f32 %v4121_v10, %v8918_v24  ;;  %v3875_v21 = vor.u32 1.1754944e-38, %v3874_v58 }
 0x442   : > { %v5266_v38 = vpop.eup %5265  ;;  %v8926_v7 = vadd.f32 %v8880_v57, %v3672_v34  ;;  %v8930_v12 = vadd.f32 1.0, %v3800_v37  ;;  %v4303_v37 = vmul.f32 1.442695, %v4284_v59 }
 0x443   : > { %v3864_v6 = vmul.f32 %v5266_v38, %v8909_v23  ;;  %v3856_v31 = vsel %vm3855_vm13, %v5264_v11, %v3852_v33  ;;  %v4157_v60 = vadd.f32 1.4214138, %v4139_v9  ;;  %vm3869_vm14 = vweird.f32 %v5266_v38  ;;  %v4981_v11 = vld [vmem:[#allocation7 + $0x50] sm:$0xff] }
 0x444   : > { %v8934_v15 = vmul.f32 0.70710677, %v8926_v7  ;;  %5267 = vrcp.f32 %v8930_v12  ;;  %v8940_v4 = vsel %vm3858_vm15, %v3860_v14, %v3856_v31  ;;  %vm8955_vm0 = vmor %vm3868_vm6, %vm3869_vm14  ;;  %4508 = vmatpush.bf16.msra.mxu3 %v4981_v11  ;;  %v3889_v9 = vand.u32 2147483648, %v8930_v12 }
 0x445   : > { %v3865_v51 = vsub.f32 1.0, %v3864_v6  ;;  %v4175_v8 = vmul.f32 %v4157_v60, %v8918_v24  ;;  %v4104_v41 = vmul.f32 1.0614054, %v8940_v4  ;;  %vm3883_vm3 = vweird.f32 %v8930_v12 }
 0x446   : > { %v8938_v55 = vand.u32 2147483647, %v8934_v15  ;;  %v3887_v19 = vand.u32 2147483647, %v8930_v12  ;;  %vm3746_vm15 = vcmp.ge.f32.partialorder %v8916_v27, 0.0 }
 0x447   : > { %v3866_v18 = vmul.f32 %v5266_v38, %v3865_v51  ;;  %v4193_v20 = vadd.f32 -0.28449672, %v4175_v8  ;;  %v4122_v13 = vadd.f32 -1.4531521, %v4104_v41 }
 0x448   : > { %v3801_v42 = vmul.f32 0.3275911, %v8938_v55  ;;  %4509 = vmatpush.bf16.msra.mxu3 %v4980_v16  ;;  %vm3888_vm8 = vcmp.eq.f32.partialorder %v3887_v19, 8.507059e+37  ;;  %v3762_v16 = vsel %vm3744_vm7, 1.0, %v10039_v29 }
 0x449   : > { %v3674_v30 = vpop.f32.mrf.mxu2  ;;  %v3867_v62 = vadd.f32 %v5266_v38, %v3866_v18  ;;  %v4211_v40 = vmul.f32 %v4193_v20, %v8918_v24  ;;  %v4140_v0 = vmul.f32 %v4122_v13, %v8940_v4  ;;  %v3890_v13 = vor.u32 1.1754944e-38, %v3889_v9 }
 0x44a   : > { %v8949_v1 = vadd.f32 1.0, %v3801_v42  ;;  %v8952_v50 = vadd.f32 %v8880_v57, %v3674_v30  ;;  %v5268_v2 = vpop.eup %5267  ;;  %v4267_v30 = vsub.f32 0.0, %v8906_v28 }
 0x44b   : > { %v3871_v23 = vsel %vm8955_vm0, %v5266_v38, %v3867_v62  ;;  %v3879_v44 = vmul.f32 %v5268_v2, %v8930_v12  ;;  %v4158_v32 = vadd.f32 1.4214138, %v4140_v0  ;;  %v4229_v5 = vadd.f32 0.2548296, %v4211_v40 }
 0x44c   : > { %5269 = vrcp.f32 %v8949_v1  ;;  %v8966_v56 = vmul.f32 0.70710677, %v8952_v50  ;;  %v8968_v63 = vsel %vm3873_vm1, %v3875_v21, %v3871_v23  ;;  %vm3884_vm2 = vweird.f32 %v5268_v2 }
 0x44d   : > { %5271 = vpow2.f32 %v4301_v17  ;;  %v3880_v10 = vsub.f32 1.0, %v3879_v44  ;;  %v4176_v49 = vmul.f32 %v4158_v32, %v8940_v4  ;;  %v4247_v33 = vmul.f32 %v4229_v5, %v8918_v24  ;;  %v4979_v17 = vld [vmem:[#allocation7 + $0x40] sm:$0xff]  ;;  %vm8988_vm4 = vmor %vm3883_vm3, %vm3884_vm2 }
 0x44e   : > { %v8971_v34 = vand.u32 2147483647, %v8966_v56  ;;  %v4105_v60 = vmul.f32 1.0614054, %v8968_v63  ;;  %5273 = vpow2.f32 %v4303_v37  ;;  %4510 = vmatpush.bf16.msra.mxu3 %v4979_v17  ;;  %v3708_v21 = vmul.f32 0.5, %v8890_v47 }
 0x44f   : > { %v3881_v38 = vmul.f32 %v5268_v2, %v3880_v10  ;;  %v4194_v14 = vadd.f32 -0.28449672, %v4176_v49  ;;  %v4285_v32 = vmul.f32 %v4267_v30, %v8906_v28  ;;  %v4286_v37 = vmul.f32 %v4268_v45, %v8922_v25 }
 0x450   : > { %v3802_v6 = vmul.f32 0.3275911, %v8971_v34  ;;  %v4123_v62 = vadd.f32 -1.4531521, %v4105_v60  ;;  %v9023_v47 = vmul.f32 0.5, %v8900_v35  ;;  %vm3898_vm11 = vweird.f32 %v8949_v1 }
 0x451   : > { %v3677_v31 = vpop.f32.mrf.mxu2  ;;  %v3882_v8 = vadd.f32 %v5268_v2, %v3881_v38  ;;  %v4212_v41 = vmul.f32 %v4194_v14, %v8940_v4  ;;  %v4307_v35 = vmul.f32 1.442695, %v4286_v37  ;;  %vm3747_vm1 = vcmp.ge.f32.partialorder %v8934_v15, 0.0 }
 0x452   : > { %v8978_v51 = vpop.eup %5269  ;;  %v8984_v52 = vadd.f32 1.0, %v3802_v6  ;;  %v8994_v20 = vadd.f32 %v8880_v57, %v3677_v31  ;;  %v4141_v5 = vmul.f32 %v4123_v62, %v8968_v63  ;;  %v4305_v31 = vmul.f32 1.442695, %v4285_v32 }
 0x453   : > { %v5272_v18 = vpop.eup %5271  ;;  %v3894_v24 = vmul.f32 %v8978_v51, %v8949_v1  ;;  %v3886_v58 = vsel %vm8988_vm4, %v5268_v2, %v3882_v8  ;;  %v4230_v40 = vadd.f32 0.2548296, %v4212_v41  ;;  %vm3899_vm10 = vweird.f32 %v8978_v51 }
 0x454   : > { %v4337_v12 = vmul.f32 %v5272_v18, %v4247_v33  ;;  %5275 = vrcp.f32 %v8984_v52  ;;  %v9003_v59 = vsel %vm3888_vm8, %v3890_v13, %v3886_v58  ;;  %v9007_v2 = vmul.f32 0.70710677, %v8994_v20  ;;  %v5274_v44 = vpop.eup %5273  ;;  %vm9055_vm12 = vmor %vm3898_vm11, %vm3899_vm10 }
 0x455   : > { %v3895_v11 = vsub.f32 1.0, %v3894_v24  ;;  %v4248_v0 = vmul.f32 %v4230_v40, %v8940_v4  ;;  %v4106_v54 = vmul.f32 1.0614054, %v9003_v59  ;;  %v4159_v33 = vadd.f32 1.4214138, %v4141_v5 }
 0x456   : > { %v4355_v23 = vsub.f32 1.0, %v4337_v12  ;;  %v9029_v9 = vand.u32 2147483647, %v9007_v2  ;;  %v3904_v13 = vand.u32 2147483648, %v8949_v1  ;;  %v3902_v40 = vand.u32 2147483647, %v8949_v1 }
 0x457   : > { %v3896_v48 = vmul.f32 %v8978_v51, %v3895_v11  ;;  %v4338_v38 = vmul.f32 %v5274_v44, %v4248_v0  ;;  %v4124_v28 = vadd.f32 -1.4531521, %v4106_v54  ;;  %v4177_v8 = vmul.f32 %v4159_v33, %v8968_v63 }
 0x458   : > { %v4373_v6 = vmul.f32 %v4355_v23, %v3761_v39  ;;  %v3803_v12 = vmul.f32 0.3275911, %v9029_v9  ;;  %v3763_v39 = vsel %vm3745_vm9, 1.0, %v10039_v29  ;;  %5277 = vpow2.f32 %v4305_v31 }
 0x459   : > { %v3679_v10 = vpop.f32.mrf.mxu2  ;;  %v4356_v60 = vsub.f32 1.0, %v4338_v38  ;;  %v4142_v17 = vmul.f32 %v4124_v28, %v9003_v59  ;;  %v3897_v19 = vadd.f32 %v8978_v51, %v3896_v48  ;;  %v4195_v30 = vadd.f32 -0.28449672, %v4177_v8 }
 0x45a   : > { %v9017_v49 = vadd.f32 %v8880_v57, %v3679_v10  ;;  %v9019_v4 = vpop.eup %5275  ;;  %v4391_v58 = vadd.f32 1.0, %v4373_v6  ;;  %v9050_v0 = vmul.f32 0.5, %v8912_v53  ;;  %v9064_v54 = vadd.f32 1.0, %v3803_v12 }
 0x45b   : > { %v3909_v25 = vmul.f32 %v9019_v4, %v8984_v52  ;;  %v4374_v41 = vmul.f32 %v4356_v60, %v3762_v16  ;;  %v4160_v42 = vadd.f32 1.4214138, %v4142_v17  ;;  %v4213_v1 = vmul.f32 %v4195_v30, %v8968_v63 }
 0x45c   : > { %v9032_v14 = vmul.f32 0.70710677, %v9017_v49  ;;  %v3901_v43 = vsel %vm9055_vm12, %v8978_v51, %v3897_v19  ;;  %v4409_v53 = vmul.f32 %v4391_v58, %v3707_v61  ;;  %v3905_v37 = vor.u32 1.1754944e-38, %v3904_v13 }
 0x45d   : > { %v3910_v18 = vsub.f32 1.0, %v3909_v25  ;;  %v4392_v45 = vadd.f32 1.0, %v4374_v41  ;;  %v4178_v11 = vmul.f32 %v4160_v42, %v9003_v59  ;;  %5279 = vpow2.f32 %v4307_v35 }
 0x45e   : > { %v9039_v24 = vand.u32 2147483647, %v9032_v14  ;;  %v4269_v48 = vsub.f32 0.0, %v8938_v55  ;;  %vm3903_vm13 = vcmp.eq.f32.partialorder %v3902_v40, 8.507059e+37  ;;  %v4231_v51 = vadd.f32 0.2548296, %v4213_v1  ;;  %v5278_v25 = vpop.eup %5277 }
 0x45f   : > { %v3911_v32 = vmul.f32 %v9019_v4, %v3910_v18  ;;  %v4410_v10 = vmul.f32 %v4392_v45, %v3708_v21  ;;  %v4196_v5 = vadd.f32 -0.28449672, %v4178_v11  ;;  %v9073_v33 = vsel %vm3903_vm13, %v3905_v37, %v3901_v43 }
 0x460   : > { %v3804_v23 = vmul.f32 0.3275911, %v9039_v24  ;;  %vm3914_vm14 = vweird.f32 %v9019_v4  ;;  %vm3913_vm6 = vweird.f32 %v8984_v52  ;;  %v4270_v6 = vsub.f32 0.0, %v8971_v34 }
 0x461   : > { %v3682_v62 = vpop.f32.mrf.mxu2  ;;  %v4427_v21 = vpack.c.bf16 %v4410_v10, %v4409_v53  ;;  %v4214_v28 = vmul.f32 %v4196_v5, %v9003_v59  ;;  %v3912_v61 = vadd.f32 %v9019_v4, %v3911_v32  ;;  %5281 = vrcp.f32 %v9064_v54  ;;  %vm9093_vm0 = vmor %vm3913_vm6, %vm3914_vm14 }
 0x462   : > { %v9068_v38 = vadd.f32 %v8880_v57, %v3682_v62  ;;  %v9070_v16 = vadd.f32 1.0, %v3804_v23  ;;  %v4249_v17 = vmul.f32 %v4231_v51, %v8968_v63  ;;  %v3917_v35 = vand.u32 2147483647, %v8984_v52 }
 0x463   : > { %4511 = vmatmul.bf16.vlgmr.msra.gmra.mxu3 %v4427_v21  ;;  %v4232_v31 = vadd.f32 0.2548296, %v4214_v28  ;;  %v3919_v8 = vand.u32 2147483648, %v8984_v52  ;;  %v4107_v19 = vmul.f32 1.0614054, %v9073_v33  ;;  %v4287_v18 = vmul.f32 %v4269_v48, %v8938_v55  ;;  %v5280_v63 = vpop.eup %5279 }
 0x464   : > { %5283 = vrcp.f32 %v9070_v16  ;;  %v9088_v41 = vmul.f32 0.70710677, %v9068_v38  ;;  %v4339_v58 = vmul.f32 %v5278_v25, %v4249_v17  ;;  %v3916_v55 = vsel %vm9093_vm0, %v9019_v4, %v3912_v61 }
 0x465   : > { %v4250_v42 = vmul.f32 %v4232_v31, %v9003_v59  ;;  %v4125_v30 = vadd.f32 -1.4531521, %v4107_v19  ;;  %v3764_v59 = vsel %vm3746_vm15, 1.0, %v10039_v29  ;;  %v9107_v13 = vmul.f32 0.5, %v8926_v7 }
 0x466   : > { %v3920_v62 = vor.u32 1.1754944e-38, %v3919_v8  ;;  %v4288_v45 = vmul.f32 %v4270_v6, %v8971_v34  ;;  %v4357_v40 = vsub.f32 1.0, %v4339_v58  ;;  %vm3918_vm2 = vcmp.eq.f32.partialorder %v3917_v35, 8.507059e+37 }
 0x467   : > { %v4340_v11 = vmul.f32 %v5280_v63, %v4250_v42  ;;  %v9111_v23 = vpop.eup %5281  ;;  %v4309_v44 = vmul.f32 1.442695, %v4287_v18  ;;  %v9114_v4 = vand.u32 2147483647, %v9088_v41  ;;  %v4143_v27 = vmul.f32 %v4125_v30, %v9073_v33 }
 0x468   : > { %v9116_v32 = vsel %vm3918_vm2, %v3920_v62, %v3916_v55  ;;  %v4271_v7 = vsub.f32 0.0, %v9029_v9  ;;  %v4375_v34 = vmul.f32 %v4357_v40, %v3763_v39  ;;  %v9128_v53 = vsel %vm3747_vm1, 1.0, %v10039_v29 }
 0x469   : > { %v3684_v60 = vpop.f32.mrf.mxu2  ;;  %v4358_v1 = vsub.f32 1.0, %v4340_v11  ;;  %vm3748_vm3 = vcmp.ge.f32.partialorder %v8966_v56, 0.0  ;;  %v4108_v5 = vmul.f32 1.0614054, %v9116_v32  ;;  %v4161_v37 = vadd.f32 1.4214138, %v4143_v27 }
 0x46a   : > { %v9098_v52 = vadd.f32 %v8880_v57, %v3684_v60  ;;  %v9123_v43 = vpop.eup %5283  ;;  %v4311_v48 = vmul.f32 1.442695, %v4288_v45  ;;  %v3924_v21 = vmul.f32 %v9111_v23, %v9064_v54  ;;  %v4272_v28 = vsub.f32 0.0, %v9039_v24 }
 0x46b   : > { %v4376_v39 = vmul.f32 %v4358_v1, %v3764_v59  ;;  %v9136_v61 = vmul.f32 0.5, %v8952_v50  ;;  %v3805_v15 = vmul.f32 0.3275911, %v9114_v4  ;;  %v4393_v25 = vadd.f32 1.0, %v4375_v34 }
 0x46c   : > { %v9121_v10 = vmul.f32 0.70710677, %v9098_v52  ;;  %v4126_v6 = vadd.f32 -1.4531521, %v4108_v5  ;;  %v4289_v31 = vmul.f32 %v4271_v7, %v9029_v9  ;;  %v4179_v35 = vmul.f32 %v4161_v37, %v9073_v33 }
 0x46d   : > { %v4394_v17 = vadd.f32 1.0, %v4376_v39  ;;  %5285 = vpow2.f32 %v4309_v44  ;;  %v9147_v8 = vsel %vm3748_vm3, 1.0, %v10039_v29  ;;  %v3939_v50 = vmul.f32 %v9123_v43, %v9070_v16 }
 0x46e   : > { %v9141_v60 = vand.u32 2147483647, %v9121_v10  ;;  %v4144_v19 = vmul.f32 %v4126_v6, %v9116_v32  ;;  %v9153_v18 = vmul.f32 0.5, %v8994_v20  ;;  %vm3749_vm4 = vcmp.ge.f32.partialorder %v9007_v2, 0.0 }
 0x46f   : > { %v3925_v9 = vsub.f32 1.0, %v3924_v21  ;;  %v4290_v42 = vmul.f32 %v4272_v28, %v9039_v24  ;;  %v9157_v12 = vadd.f32 1.0, %v3805_v15  ;;  %v4411_v63 = vmul.f32 %v4393_v25, %v9023_v47 }
 0x470   : > { %v4412_v56 = vmul.f32 %v4394_v17, %v9050_v0  ;;  %v4162_v58 = vadd.f32 1.4214138, %v4144_v19  ;;  %5287 = vpow2.f32 %v4311_v48  ;;  %v4313_v55 = vmul.f32 1.442695, %v4289_v31 }
 0x471   : > { %v3687_v51 = vpop.f32.mrf.mxu2  ;;  %v3806_v30 = vmul.f32 0.3275911, %v9141_v60  ;;  %v4197_v59 = vadd.f32 -0.28449672, %v4179_v35  ;;  %v3940_v62 = vsub.f32 1.0, %v3939_v50  ;;  %v9167_v24 = vsel %vm3749_vm4, 1.0, %v10039_v29 }
 0x472   : > { %v9163_v20 = vadd.f32 %v8880_v57, %v3687_v51  ;;  %v4428_v2 = vpack.c.bf16 %v4412_v56, %v4411_v63  ;;  %v4180_v45 = vmul.f32 %v4162_v58, %v9116_v32  ;;  %vm3928_vm5 = vweird.f32 %v9064_v54 }
 0x473   : > { %vm3750_vm8 = vcmp.ge.f32.partialorder %v9032_v14, 0.0  ;;  %v4215_v0 = vmul.f32 %v4197_v59, %v9073_v33  ;;  %v5286_v11 = vpop.eup %5285  ;;  %v3926_v40 = vmul.f32 %v9111_v23, %v3925_v9  ;;  %v4315_v44 = vmul.f32 1.442695, %v4290_v42 }
 0x474   : > { %5289 = vrcp.f32 %v9157_v12  ;;  %4515 = vmatmul.bf16.gmra.mxu3 %v4428_v2  ;;  %v4198_v27 = vadd.f32 -0.28449672, %v4180_v45  ;;  %v9175_v7 = vmul.f32 0.5, %v9017_v49  ;;  %v9177_v1 = vadd.f32 1.0, %v3806_v30 }
 0x475   : > { %5291 = vpow2.f32 %v4313_v55  ;;  %v4233_v34 = vadd.f32 0.2548296, %v4215_v0  ;;  %v9180_v14 = vsel %vm3750_vm8, 1.0, %v10039_v29  ;;  %v3941_v5 = vmul.f32 %v9123_v43, %v3940_v62 }
 0x476   : > { %v9184_v37 = vmul.f32 0.5, %v9068_v38  ;;  %v9187_v48 = vmul.f32 0.70710677, %v9163_v20  ;;  %v5288_v21 = vpop.eup %5287  ;;  %vm3943_vm7 = vweird.f32 %v9070_v16  ;;  %v4273_v49 = vsub.f32 0.0, %v9114_v4 }
 0x477   : > { %v4216_v28 = vmul.f32 %v4198_v27, %v9116_v32  ;;  %v4251_v51 = vmul.f32 %v4233_v34, %v9073_v33  ;;  %5293 = vpow2.f32 %v4315_v44  ;;  %vm3751_vm9 = vcmp.ge.f32.partialorder %v9088_v41, 0.0 }
 0x478   : > { %v3927_v38 = vadd.f32 %v9111_v23, %v3926_v40  ;;  %5295 = vrcp.f32 %v9177_v1  ;;  %vm3929_vm10 = vweird.f32 %v9111_v23  ;;  %v9203_v31 = vand.u32 2147483647, %v9187_v48 }
 0x479   : > { %v3689_v47 = vpop.f32.mrf.mxu2  ;;  %v4234_v15 = vadd.f32 0.2548296, %v4216_v28  ;;  %v4341_v25 = vmul.f32 %v5286_v11, %v4251_v51  ;;  %v3934_v33 = vand.u32 2147483648, %v9064_v54  ;;  %v3942_v17 = vadd.f32 %v9123_v43, %v3941_v5  ;;  %vm9223_vm12 = vmor %vm3928_vm5, %vm3929_vm10 }
 0x47a   : > { %v9195_v39 = vadd.f32 %v8880_v57, %v3689_v47  ;;  %v9200_v6 = vpop.eup %5289  ;;  %vm3944_vm11 = vweird.f32 %v9123_v43  ;;  %v4291_v50 = vmul.f32 %v4273_v49, %v9114_v4  ;;  %v3932_v63 = vand.u32 2147483647, %v9064_v54 }
 0x47b   : > { %v9208_v35 = vpop.eup %5291  ;;  %v4252_v9 = vmul.f32 %v4234_v15, %v9116_v32  ;;  %v4359_v42 = vsub.f32 1.0, %v4341_v25  ;;  %v9216_v56 = vsel %vm3751_vm9, 1.0, %v10039_v29  ;;  %v3947_v4 = vand.u32 2147483647, %v9070_v16  ;;  %vm9239_vm13 = vmor %vm3943_vm7, %vm3944_vm11 }
 0x47c   : > { %v9219_v58 = vmul.f32 0.70710677, %v9195_v39  ;;  %v3949_v32 = vand.u32 2147483648, %v9070_v16  ;;  %v3954_v30 = vmul.f32 %v9200_v6, %v9157_v12  ;;  %v4274_v41 = vsub.f32 0.0, %v9141_v60 }
 0x47d   : > { %v4342_v59 = vmul.f32 %v5288_v21, %v4252_v9  ;;  %v3931_v62 = vsel %vm9223_vm12, %v9111_v23, %v3927_v38  ;;  %v9243_v2 = vpop.eup %5293  ;;  %v3807_v45 = vmul.f32 0.3275911, %v9203_v31  ;;  %v3935_v0 = vor.u32 1.1754944e-38, %v3934_v33 }
 0x47e   : > { %v3946_v23 = vsel %vm9239_vm13, %v9123_v43, %v3942_v17  ;;  %v9252_v11 = vpop.eup %5295  ;;  %v4317_v40 = vmul.f32 1.442695, %v4291_v50  ;;  %v4377_v16 = vmul.f32 %v4359_v42, %v9128_v53  ;;  %vm3933_vm15 = vcmp.eq.f32.partialorder %v3932_v63, 8.507059e+37 }
 0x47f   : > { %v3950_v44 = vor.u32 1.1754944e-38, %v3949_v32  ;;  %v9256_v27 = vand.u32 2147483647, %v9219_v58  ;;  %v4360_v34 = vsub.f32 1.0, %v4342_v59  ;;  %v9258_v5 = vsel %vm3933_vm15, %v3935_v0, %v3931_v62 }
 0x480   : > { %vm3948_vm14 = vcmp.eq.f32.partialorder %v3947_v4, 8.507059e+37  ;;  %v3955_v21 = vsub.f32 1.0, %v3954_v30  ;;  %v9261_v49 = vmul.f32 0.5, %v9098_v52  ;;  %vm3752_vm6 = vcmp.ge.f32.partialorder %v9121_v10, 0.0 }
 0x481   : > { %v3692_v19 = vpop.f32.mrf.mxu2  ;;  %v9264_v43 = vsel %vm3948_vm14, %v3950_v44, %v3946_v23  ;;  %v4292_v28 = vmul.f32 %v4274_v41, %v9141_v60  ;;  %v9267_v53 = vadd.f32 1.0, %v3807_v45  ;;  %v4378_v38 = vmul.f32 %v4360_v34, %v9147_v8 }
 0x482   : > { %v9247_v47 = vadd.f32 %v8880_v57, %v3692_v19  ;;  %vm3958_vm0 = vweird.f32 %v9157_v12  ;;  %v3969_v15 = vmul.f32 %v9252_v11, %v9177_v1  ;;  %v4395_v52 = vadd.f32 1.0, %v4377_v16 }
 0x483   : > { %v4109_v10 = vmul.f32 1.0614054, %v9258_v5  ;;  %v4110_v33 = vmul.f32 1.0614054, %v9264_v43  ;;  %5297 = vpow2.f32 %v4317_v40  ;;  %v9279_v60 = vsel %vm3752_vm6, 1.0, %v10039_v29 }
 0x484   : > { %v9270_v51 = vmul.f32 0.70710677, %v9247_v47  ;;  %v3808_v17 = vmul.f32 0.3275911, %v9256_v27  ;;  %v4396_v50 = vadd.f32 1.0, %v4378_v38  ;;  %v3956_v8 = vmul.f32 %v9200_v6, %v3955_v21 }
 0x485   : > { %v9284_v19 = vmul.f32 0.5, %v9163_v20  ;;  %v4127_v9 = vadd.f32 -1.4531521, %v4109_v10  ;;  %v4128_v42 = vadd.f32 -1.4531521, %v4110_v33  ;;  %5299 = vrcp.f32 %v9267_v53 }
 0x486   : > { %v4319_v63 = vmul.f32 1.442695, %v4292_v28  ;;  %v4275_v55 = vsub.f32 0.0, %v9203_v31  ;;  %v3791_v4 = vand.u32 2147483647, %v9270_v51  ;;  %v3970_v32 = vsub.f32 1.0, %v3969_v15 }
 0x487   : > { %v4413_v30 = vmul.f32 %v4395_v52, %v9107_v13  ;;  %v4414_v41 = vmul.f32 %v4396_v50, %v9136_v61  ;;  %v4145_v59 = vmul.f32 %v4127_v9, %v9258_v5  ;;  %vm3753_vm1 = vcmp.ge.f32.partialorder %v9187_v48, 0.0 }
 0x488   : > { %v9293_v20 = vadd.f32 1.0, %v3808_v17  ;;  %v4146_v54 = vmul.f32 %v4128_v42, %v9264_v43  ;;  %v3957_v23 = vadd.f32 %v9200_v6, %v3956_v8  ;;  %vm3959_vm2 = vweird.f32 %v9200_v6 }
 0x489   : > { %v3694_v25 = vpop.f32.mrf.mxu2  ;;  %v4429_v45 = vpack.c.bf16 %v4414_v41, %v4413_v30  ;;  %v4163_v0 = vadd.f32 1.4214138, %v4145_v59  ;;  %v9301_v13 = vpop.eup %5297  ;;  %5301 = vpow2.f32 %v4319_v63  ;;  %v3809_v61 = vmul.f32 0.3275911, %v3791_v4  ;;  %vm9323_vm4 = vmor %vm3958_vm0, %vm3959_vm2 }
 0x48a   : > { %v9296_v62 = vadd.f32 %v8880_v57, %v3694_v25  ;;  %v4164_v40 = vadd.f32 1.4214138, %v4146_v54  ;;  %v3964_v16 = vand.u32 2147483648, %v9157_v12  ;;  %v3971_v44 = vmul.f32 %v9252_v11, %v3970_v32 }
 0x48b   : > { %vm3973_vm3 = vweird.f32 %v9177_v1  ;;  %v4293_v34 = vmul.f32 %v4275_v55, %v9203_v31  ;;  %4520 = vmatmul.bf16.gmra.mxu3 %v4429_v45  ;;  %v4181_v28 = vmul.f32 %v4163_v0, %v9258_v5  ;;  %v3962_v38 = vand.u32 2147483647, %v9157_v12  ;;  %v9309_v15 = vpop.eup %5299 }
 0x48c   : > { %v4276_v52 = vsub.f32 0.0, %v9256_v27  ;;  %v9313_v25 = vmul.f32 0.70710677, %v9296_v62  ;;  %v4182_v33 = vmul.f32 %v4164_v40, %v9264_v43  ;;  %5303 = vrcp.f32 %v9293_v20 }
 0x48d   : > { %v4277_v17 = vsub.f32 0.0, %v3791_v4  ;;  %v4199_v50 = vadd.f32 -0.28449672, %v4181_v28  ;;  %v3961_v8 = vsel %vm9323_vm4, %v9200_v6, %v3957_v23  ;;  %v9331_v9 = vadd.f32 1.0, %v3809_v61 }
 0x48e   : > { %v4200_v63 = vadd.f32 -0.28449672, %v4182_v33  ;;  %v3965_v55 = vor.u32 1.1754944e-38, %v3964_v16  ;;  %v9339_v12 = vsel %vm3753_vm1, 1.0, %v10039_v29  ;;  %v3984_v32 = vmul.f32 %v9309_v15, %v9267_v53 }
 0x48f   : > { %v4321_v30 = vmul.f32 1.442695, %v4293_v34  ;;  %vm3963_vm5 = vcmp.eq.f32.partialorder %v3962_v38, 8.507059e+37  ;;  %v9343_v41 = vpop.eup %5301  ;;  %v3792_v6 = vand.u32 2147483647, %v9313_v25  ;;  %v4217_v59 = vmul.f32 %v4199_v50, %v9258_v5 }
 0x490   : > { %v4218_v54 = vmul.f32 %v4200_v63, %v9264_v43  ;;  %v9348_v45 = vsel %vm3963_vm5, %v3965_v55, %v3961_v8  ;;  %v4294_v0 = vmul.f32 %v4276_v52, %v9256_v27  ;;  %v3972_v23 = vadd.f32 %v9252_v11, %v3971_v44 }
 0x491   : > { %v3697_v21 = vpop.f32.mrf.mxu2  ;;  %vm3974_vm8 = vweird.f32 %v9252_v11  ;;  %5305 = vrcp.f32 %v9331_v9  ;;  %v4295_v61 = vmul.f32 %v4277_v17, %v3791_v4  ;;  %v4235_v40 = vadd.f32 0.2548296, %v4217_v59 }
 0x492   : > { %v9316_v10 = vadd.f32 %v8880_v57, %v3697_v21  ;;  %v3979_v16 = vand.u32 2147483648, %v9177_v1  ;;  %v9358_v34 = vpop.eup %5303  ;;  %5307 = vpow2.f32 %v4321_v30  ;;  %v4236_v21 = vadd.f32 0.2548296, %v4218_v54  ;;  %vm9370_vm7 = vmor %vm3973_vm3, %vm3974_vm8 }
 0x493   : > { %v3977_v27 = vand.u32 2147483647, %v9177_v1  ;;  %v4111_v38 = vmul.f32 1.0614054, %v9348_v45  ;;  %v3985_v52 = vsub.f32 1.0, %v3984_v32  ;;  %v4253_v44 = vmul.f32 %v4235_v40, %v9258_v5 }
 0x494   : > { %v9334_v42 = vmul.f32 0.70710677, %v9316_v10  ;;  %v3810_v33 = vmul.f32 0.3275911, %v3792_v6  ;;  %vm3754_vm9 = vcmp.ge.f32.partialorder %v9219_v58, 0.0  ;;  %v4254_v50 = vmul.f32 %v4236_v21, %v9264_v43 }
 0x495   : > { %v3976_v5 = vsel %vm9370_vm7, %v9252_v11, %v3972_v23  ;;  %v4129_v8 = vadd.f32 -1.4531521, %v4111_v38  ;;  %v3999_v63 = vmul.f32 %v9358_v34, %v9293_v20  ;;  %v4323_v55 = vmul.f32 1.442695, %v4294_v0 }
 0x496   : > { %v9352_v48 = vand.u32 2147483647, %v9334_v42  ;;  %v4325_v1 = vmul.f32 1.442695, %v4295_v61  ;;  %v3980_v32 = vor.u32 1.1754944e-38, %v3979_v16  ;;  %v4343_v30 = vmul.f32 %v9208_v35, %v4253_v44 }
 0x497   : > { %v4344_v59 = vmul.f32 %v9243_v2, %v4254_v50  ;;  %vm3978_vm10 = vcmp.eq.f32.partialorder %v3977_v27, 8.507059e+37  ;;  %v9387_v43 = vpop.eup %5305  ;;  %v9389_v40 = vadd.f32 1.0, %v3810_v33  ;;  %v4278_v11 = vsub.f32 0.0, %v3792_v6 }
 0x498   : > { %v3811_v17 = vmul.f32 0.3275911, %v9352_v48  ;;  %v9391_v23 = vsel %vm3978_vm10, %v3980_v32, %v3976_v5  ;;  %v4147_v21 = vmul.f32 %v4129_v8, %v9348_v45  ;;  %v9394_v0 = vpop.eup %5307  ;;  %v4361_v35 = vsub.f32 1.0, %v4343_v30 }
 0x499   : > { %v3699_v28 = vpop.f32.mrf.mxu2  ;;  %v4362_v16 = vsub.f32 1.0, %v4344_v59  ;;  %v4000_v27 = vsub.f32 1.0, %v3999_v63  ;;  %v4112_v38 = vmul.f32 1.0614054, %v9391_v23  ;;  %v4014_v44 = vmul.f32 %v9387_v43, %v9331_v9 }
 0x49a   : > { %v9364_v31 = vadd.f32 %v8880_v57, %v3699_v28  ;;  %v9396_v61 = vadd.f32 1.0, %v3811_v17  ;;  %v3986_v28 = vmul.f32 %v9309_v15, %v3985_v52  ;;  %v4165_v33 = vadd.f32 1.4214138, %v4147_v21 }
 0x49b   : > { %v4379_v4 = vmul.f32 %v4361_v35, %v9167_v24  ;;  %v4380_v50 = vmul.f32 %v4362_v16, %v9180_v14  ;;  %vm3988_vm11 = vweird.f32 %v9267_v53  ;;  %5309 = vrcp.f32 %v9389_v40 }
 0x49c   : > { %v9385_v54 = vmul.f32 0.70710677, %v9364_v31  ;;  %v4296_v8 = vmul.f32 %v4278_v11, %v3792_v6  ;;  %v4130_v63 = vadd.f32 -1.4531521, %v4112_v38  ;;  %5311 = vrcp.f32 %v9396_v61 }
 0x49d   : > { %v4397_v32 = vadd.f32 1.0, %v4379_v4  ;;  %v4398_v30 = vadd.f32 1.0, %v4380_v50  ;;  %5313 = vpow2.f32 %v4323_v55  ;;  %v4183_v21 = vmul.f32 %v4165_v33, %v9348_v45 }
 0x49e   : > { %v9399_v2 = vand.u32 2147483647, %v9385_v54  ;;  %v4148_v14 = vmul.f32 %v4130_v63, %v9391_v23  ;;  %v4015_v35 = vsub.f32 1.0, %v4014_v44  ;;  %v9425_v11 = vmul.f32 0.5, %v9195_v39 }
 0x49f   : > { %v4415_v6 = vmul.f32 %v4397_v32, %v9153_v18  ;;  %v9430_v55 = vsel %vm3754_vm9, 1.0, %v10039_v29  ;;  %v4001_v38 = vmul.f32 %v9358_v34, %v4000_v27  ;;  %v4327_v33 = vmul.f32 1.442695, %v4296_v8 }
 0x4a0   : > { %v3812_v17 = vmul.f32 0.3275911, %v9399_v2  ;;  %v4166_v44 = vadd.f32 1.4214138, %v4148_v14  ;;  %vm4003_vm12 = vweird.f32 %v9293_v20  ;;  %v4201_v4 = vadd.f32 -0.28449672, %v4183_v21 }
 0x4a1   : > { %v3702_v5 = vpop.f32.mrf.mxu2  ;;  %v3987_v58 = vadd.f32 %v9309_v15, %v3986_v28  ;;  %vm3989_vm13 = vweird.f32 %v9309_v15  ;;  %v4016_v50 = vmul.f32 %v9387_v43, %v4015_v35  ;;  %v4279_v27 = vsub.f32 0.0, %v9352_v48 }
 0x4a2   : > { %v9411_v52 = vadd.f32 %v8880_v57, %v3702_v5  ;;  %v9414_v59 = vadd.f32 1.0, %v3812_v17  ;;  %v4416_v57 = vmul.f32 %v4398_v30, %v9175_v7  ;;  %v9436_v7 = vpop.eup %5309  ;;  %v4184_v17 = vmul.f32 %v4166_v44, %v9391_v23  ;;  %v5337_v30 = vld [vmem:[%s9885_s7 + $0x1] ss:$0 sm:$0xff]  ;;  %vm9468_vm15 = vmor %vm3988_vm11, %vm3989_vm13 }
 0x4a3   : > { %v3994_v8 = vand.u32 2147483648, %v9267_v53  ;;  %v4219_v28 = vmul.f32 %v4201_v4, %v9348_v45  ;;  %v3992_v21 = vand.u32 2147483647, %v9267_v53  ;;  %v9487_v26 = vmul.f32 %v4279_v27, %v9352_v48 }
 0x4a4   : > { %v9417_v24 = vmul.f32 0.70710677, %v9411_v52  ;;  %5315 = vrcp.f32 %v9414_v59  ;;  %v4430_v18 = vpack.c.bf16 %v4416_v57, %v4415_v6  ;;  %v4029_v6 = vmul.f32 %v9436_v7, %v9389_v40 }
 0x4a5   : > { %5317 = vpow2.f32 %v4325_v1  ;;  %v9442_v1 = vpop.eup %5311  ;;  %v4280_v57 = vsub.f32 0.0, %v9399_v2  ;;  %vm3993_vm14 = vcmp.eq.f32.partialorder %v3992_v21, 8.507059e+37  ;;  %v4002_v36 = vadd.f32 %v9358_v34, %v4001_v38 }
 0x4a6   : > { %v9433_v16 = vand.u32 2147483647, %v9417_v24  ;;  %4525 = vmatmul.bf16.gmra.mxu3 %v4430_v18  ;;  %v9448_v63 = vpop.eup %5313  ;;  %5319 = vpow2.f32 %v4327_v33  ;;  %v4202_v18 = vadd.f32 -0.28449672, %v4184_v17  ;;  %v4044_v4 = vmul.f32 %v9442_v1, %v9396_v61 }
 0x4a7   : > { %v3991_v33 = vsel %vm9468_vm15, %v9309_v15, %v3987_v58  ;;  %v3995_v17 = vor.u32 1.1754944e-38, %v3994_v8  ;;  %vm4004_vm6 = vweird.f32 %v9358_v34  ;;  %vm4018_vm0 = vweird.f32 %v9331_v9 }
 0x4a8   : > { %v3813_v39 = vmul.f32 0.3275911, %v9433_v16  ;;  %v4220_v53 = vmul.f32 %v4202_v18, %v9391_v23  ;;  %v4030_v18 = vsub.f32 1.0, %v4029_v6  ;;  %v4045_v44 = vsub.f32 1.0, %v4044_v4  ;;  %vm9509_vm1 = vmor %vm4003_vm12, %vm4004_vm6 }
 0x4a9   : > { %v3704_v5 = vpop.f32.mrf.mxu2  ;;  %v4298_v48 = vmul.f32 %v4280_v57, %v9399_v2  ;;  %v4007_v27 = vand.u32 2147483647, %v9293_v20  ;;  %v4006_v57 = vsel %vm9509_vm1, %v9358_v34, %v4002_v36  ;;  %vm4033_vm3 = vweird.f32 %v9389_v40 }
 0x4aa   : > { %v9450_v32 = vadd.f32 1.0, %v3813_v39  ;;  %v9456_v14 = vadd.f32 %v5337_v30, %v3704_v5  ;;  %v9459_v35 = vpop.eup %5315  ;;  %v4237_v30 = vadd.f32 0.2548296, %v4219_v28  ;;  %v4238_v15 = vadd.f32 0.2548296, %v4220_v53 }
 0x4ab   : > { %v9472_v39 = vpop.eup %5317  ;;  %v4059_v5 = vmul.f32 %v9459_v35, %v9414_v59  ;;  %v9496_v28 = vsel %vm3993_vm14, %v3995_v17, %v3991_v33  ;;  %vm9518_vm2 = vcmp.eq.f32.partialorder %v4007_v27, 8.507059e+37  ;;  %v4017_v34 = vadd.f32 %v9387_v43, %v4016_v50 }
 0x4ac   : > { %5321 = vrcp.f32 %v9450_v32  ;;  %v9484_v3 = vmul.f32 0.70710677, %v9456_v14  ;;  %v4255_v58 = vmul.f32 %v4237_v30, %v9348_v45  ;;  %v9500_v21 = vpop.eup %5319  ;;  %v4256_v22 = vmul.f32 %v4238_v15, %v9391_v23 }
 0x4ad   : > { %v4060_v38 = vsub.f32 1.0, %v4059_v5  ;;  %v4113_v4 = vmul.f32 1.0614054, %v9496_v28  ;;  %vm4019_vm4 = vweird.f32 %v9387_v43  ;;  %v4031_v6 = vmul.f32 %v9436_v7, %v4030_v18 }
 0x4ae   : > { %v9494_v8 = vand.u32 2147483647, %v9484_v3  ;;  %v4345_v53 = vmul.f32 %v9301_v13, %v4255_v58  ;;  %v4009_v13 = vand.u32 2147483648, %v9293_v20  ;;  %v4346_v17 = vmul.f32 %v9343_v41, %v4256_v22  ;;  %vm9554_vm8 = vmor %vm4018_vm0, %vm4019_vm4 }
 0x4af   : > { %v4131_v36 = vadd.f32 -1.4531521, %v4113_v4  ;;  %v9535_v46 = vmul.f32 1.442695, %v4298_v48  ;;  %v4046_v50 = vmul.f32 %v9442_v1, %v4045_v44  ;;  %vm4048_vm5 = vweird.f32 %v9396_v61 }
 0x4b0   : > { %v3814_v45 = vmul.f32 0.3275911, %v9494_v8  ;;  %v4363_v5 = vsub.f32 1.0, %v4345_v53  ;;  %v4010_v15 = vor.u32 1.1754944e-38, %v4009_v13  ;;  %v4364_v20 = vsub.f32 1.0, %v4346_v17 }
 0x4b1   : > { %v4149_v41 = vmul.f32 %v4131_v36, %v9496_v28  ;;  %v4061_v13 = vmul.f32 %v9459_v35, %v4060_v38  ;;  %v4022_v44 = vand.u32 2147483647, %v9331_v9  ;;  %v4021_v38 = vsel %vm9554_vm8, %v9387_v43, %v4017_v34 }
 0x4b2   : > { %v9513_v2 = vpop.eup %5321  ;;  %v9528_v30 = vadd.f32 1.0, %v3814_v45  ;;  %v4381_v27 = vmul.f32 %v4363_v5, %v9216_v56  ;;  %v9539_v22 = vsel %vm9518_vm2, %v4010_v15, %v4006_v57  ;;  %v4382_v53 = vmul.f32 %v4364_v20, %v9279_v60 }
 0x4b3   : > { %v4074_v33 = vmul.f32 %v9513_v2, %v9450_v32  ;;  %v4114_v56 = vmul.f32 1.0614054, %v9539_v22  ;;  %v4167_v48 = vadd.f32 1.4214138, %v4149_v41  ;;  %v4024_v4 = vand.u32 2147483648, %v9331_v9 }
 0x4b4   : > { %5323 = vrcp.f32 %v9528_v30  ;;  %v4399_v45 = vadd.f32 1.0, %v4381_v27  ;;  %v4400_v60 = vadd.f32 1.0, %v4382_v53  ;;  %v4032_v5 = vadd.f32 %v9436_v7, %v4031_v6 }
 0x4b5   : > { %v4075_v58 = vsub.f32 1.0, %v4074_v33  ;;  %v4132_v23 = vadd.f32 -1.4531521, %v4114_v56  ;;  %v4185_v17 = vmul.f32 %v4167_v48, %v9496_v28  ;;  %vm4034_vm7 = vweird.f32 %v9436_v7 }
 0x4b6   : > { %v4417_v33 = vmul.f32 %v4399_v45, %v9184_v37  ;;  %vm4063_vm9 = vweird.f32 %v9414_v59  ;;  %v4418_v36 = vmul.f32 %v4400_v60, %v9261_v49  ;;  %v4025_v20 = vor.u32 1.1754944e-38, %v4024_v4  ;;  %vm9579_vm11 = vmor %vm4033_vm3, %vm4034_vm7 }
 0x4b7   : > { %v9548_v18 = vmul.f32 %v9513_v2, %v4075_v58  ;;  %v4150_v58 = vmul.f32 %v4132_v23, %v9539_v22  ;;  %v4037_v43 = vand.u32 2147483647, %v9389_v40  ;;  %v4203_v9 = vadd.f32 -0.28449672, %v4185_v17 }
 0x4b8   : > { %vm4023_vm10 = vcmp.eq.f32.partialorder %v4022_v44, 8.507059e+37  ;;  %v4039_v27 = vand.u32 2147483648, %v9389_v40  ;;  %v4431_v49 = vpack.c.bf16 %v4418_v36, %v4417_v33  ;;  %v4036_v53 = vsel %vm9579_vm11, %v9436_v7, %v4032_v5 }
 0x4b9   : > { %v4168_v6 = vadd.f32 1.4214138, %v4150_v58  ;;  %v9584_v41 = vsel %vm4023_vm10, %v4025_v20, %v4021_v38  ;;  %v4221_v45 = vmul.f32 %v4203_v9, %v9496_v28  ;;  %vm4038_vm12 = vcmp.eq.f32.partialorder %v4037_v43, 8.507059e+37 }
 0x4ba   : > { %v9567_v15 = vpop.eup %5323  ;;  %v4040_v56 = vor.u32 1.1754944e-38, %v4039_v27  ;;  %v4115_v48 = vmul.f32 1.0614054, %v9584_v41  ;;  %4530 = vmatmul.bf16.gmra.mxu3 %v4431_v49  ;;  %v4047_v44 = vadd.f32 %v9442_v1, %v4046_v50  ;;  %vm4049_vm13 = vweird.f32 %v9442_v1 }
 0x4bb   : > { %v9575_v37 = vmul.f32 %v9567_v15, %v9528_v30  ;;  %v4186_v57 = vmul.f32 %v4168_v6, %v9539_v22  ;;  %v4052_v40 = vand.u32 2147483647, %v9396_v61  ;;  %v4239_v23 = vadd.f32 0.2548296, %v4221_v45  ;;  %vm9600_vm15 = vmor %vm4048_vm5, %vm4049_vm13 }
 0x4bc   : > { %v9596_v38 = vsel %vm4038_vm12, %v4040_v56, %v4036_v53  ;;  %v4133_v7 = vadd.f32 -1.4531521, %v4115_v48  ;;  %v4051_v50 = vsel %vm9600_vm15, %v9442_v1, %v4047_v44  ;;  %vm4078_vm6 = vweird.f32 %v9450_v32 }
 0x4bd   : > { %v4090_v60 = vsub.f32 1.0, %v9575_v37  ;;  %v4204_v33 = vadd.f32 -0.28449672, %v4186_v57  ;;  %v4116_v17 = vmul.f32 1.0614054, %v9596_v38  ;;  %vm9608_vm14 = vcmp.eq.f32.partialorder %v4052_v40, 8.507059e+37 }
 0x4be   : > { %v4257_v36 = vmul.f32 %v4239_v23, %v9496_v28  ;;  %v4151_v58 = vmul.f32 %v4133_v7, %v9584_v41  ;;  %v4054_v20 = vand.u32 2147483648, %v9396_v61  ;;  %v4062_v43 = vadd.f32 %v9459_v35, %v4061_v13 }
 0x4bf   : > { %v4222_v37 = vmul.f32 %v4204_v33, %v9539_v22  ;;  %v4134_v9 = vadd.f32 -1.4531521, %v4116_v17  ;;  %vm4064_vm0 = vweird.f32 %v9459_v35  ;;  %v4067_v1 = vand.u32 2147483647, %v9414_v59 }
 0x4c0   : > { %v4347_v34 = vmul.f32 %v9394_v0, %v4257_v36  ;;  %v4169_v27 = vadd.f32 1.4214138, %v4151_v58  ;;  %v4055_v49 = vor.u32 1.1754944e-38, %v4054_v20  ;;  %vm9623_vm1 = vmor %vm4063_vm9, %vm4064_vm0  ;;  %v4069_v61 = vand.u32 2147483648, %v9414_v59 }
 0x4c1   : > { %v4240_v13 = vadd.f32 0.2548296, %v4222_v37  ;;  %v4152_v6 = vmul.f32 %v4134_v9, %v9596_v38  ;;  %v4066_v53 = vsel %vm9623_vm1, %v9459_v35, %v4062_v43  ;;  %vm4068_vm2 = vcmp.eq.f32.partialorder %v4067_v1, 8.507059e+37 }
 0x4c2   : > { %v4365_v45 = vsub.f32 1.0, %v4347_v34  ;;  %v4187_v0 = vmul.f32 %v4169_v27, %v9584_v41  ;;  %v9635_v56 = vsel %vm9608_vm14, %v4055_v49, %v4051_v50  ;;  %v4070_v48 = vor.u32 1.1754944e-38, %v4069_v61 }
 0x4c3   : > { %v4258_v57 = vmul.f32 %v4240_v13, %v9539_v22  ;;  %v4170_v44 = vadd.f32 1.4214138, %v4152_v6  ;;  %v4117_v59 = vmul.f32 1.0614054, %v9635_v56  ;;  %v4077_v40 = vadd.f32 %v9513_v2, %v9548_v18 }
 0x4c4   : > { %vm4093_vm3 = vweird.f32 %v9528_v30  ;;  %v4383_v35 = vmul.f32 %v4365_v45, %v9339_v12  ;;  %v4205_v23 = vadd.f32 -0.28449672, %v4187_v0  ;;  %v9643_v7 = vsel %vm4068_vm2, %v4070_v48, %v4066_v53 }
 0x4c5   : > { %vm4079_vm4 = vweird.f32 %v9513_v2  ;;  %vm3755_vm5 = vcmp.ge.f32.partialorder %v9270_v51, 0.0  ;;  %v4348_v4 = vmul.f32 %v9448_v63, %v4258_v57  ;;  %v4188_v22 = vmul.f32 %v4170_v44, %v9596_v38 }
 0x4c6   : > { %v4118_v33 = vmul.f32 1.0614054, %v9643_v7  ;;  %v4135_v17 = vadd.f32 -1.4531521, %v4117_v59  ;;  %vm3756_vm8 = vcmp.ge.f32.partialorder %v9313_v25, 0.0  ;;  %v4091_v18 = vmul.f32 %v9567_v15, %v4090_v60  ;;  %vm9659_vm7 = vmor %vm4078_vm6, %vm4079_vm4 }
 0x4c7   : > { %v4401_v50 = vadd.f32 1.0, %v4383_v35  ;;  %v4223_v12 = vmul.f32 %v4205_v23, %v9584_v41  ;;  %v4082_v5 = vand.u32 2147483647, %v9450_v32  ;;  %v4366_v36 = vsub.f32 1.0, %v4348_v4 }
 0x4c8   : > { %v4206_v58 = vadd.f32 -0.28449672, %v4188_v22  ;;  %v4136_v20 = vadd.f32 -1.4531521, %v4118_v33  ;;  %v4153_v43 = vmul.f32 %v4135_v17, %v9635_v56  ;;  %v4081_v9 = vsel %vm9659_vm7, %v9513_v2, %v4077_v40 }
 0x4c9   : > { %v4419_v60 = vmul.f32 %v4401_v50, %v9284_v19  ;;  %v4241_v37 = vadd.f32 0.2548296, %v4223_v12  ;;  %v4084_v1 = vand.u32 2147483648, %v9450_v32  ;;  %v4384_v34 = vmul.f32 %v4366_v36, %v9430_v55 }
 0x4ca   : > { %v4224_v27 = vmul.f32 %v4206_v58, %v9596_v38  ;;  %v4154_v49 = vmul.f32 %v4136_v20, %v9643_v7  ;;  %v4171_v28 = vadd.f32 1.4214138, %v4153_v43  ;;  %vm4083_vm9 = vcmp.eq.f32.partialorder %v4082_v5, 8.507059e+37 }
 0x4cb   : > { %v4259_v61 = vmul.f32 %v4241_v37, %v9584_v41  ;;  %v4085_v13 = vor.u32 1.1754944e-38, %v4084_v1  ;;  %vm4094_vm10 = vweird.f32 %v9567_v15  ;;  %v4402_v19 = vadd.f32 1.0, %v4384_v34 }
 0x4cc   : > { %v4242_v6 = vadd.f32 0.2548296, %v4224_v27  ;;  %v4172_v53 = vadd.f32 1.4214138, %v4154_v49  ;;  %v4189_v2 = vmul.f32 %v4171_v28, %v9635_v56  ;;  %v4092_v55 = vadd.f32 %v9567_v15, %v4091_v18  ;;  %vm9684_vm11 = vmor %vm4093_vm3, %vm4094_vm10 }
 0x4cd   : > { %v4349_v32 = vmul.f32 %v9472_v39, %v4259_v61  ;;  %v9675_v45 = vsel %vm4083_vm9, %v4085_v13, %v4081_v9  ;;  %v4097_v0 = vand.u32 2147483647, %v9528_v30  ;;  %v4420_v48 = vmul.f32 %v4402_v19, %v9425_v11 }
 0x4ce   : > { %v4260_v41 = vmul.f32 %v4242_v6, %v9596_v38  ;;  %v4190_v57 = vmul.f32 %v4172_v53, %v9643_v7  ;;  %v4207_v44 = vadd.f32 -0.28449672, %v4189_v2  ;;  %v4096_v40 = vsel %vm9684_vm11, %v9567_v15, %v4092_v55 }
 0x4cf   : > { %v4367_v39 = vsub.f32 1.0, %v4349_v32  ;;  %v4099_v35 = vand.u32 2147483648, %v9528_v30  ;;  %v4119_v11 = vmul.f32 1.0614054, %v9675_v45  ;;  %v4432_v23 = vpack.c.bf16 %v4420_v48, %v4419_v60 }
 0x4d0   : > { %v4350_v38 = vmul.f32 %v9500_v21, %v4260_v41  ;;  %v4208_v4 = vadd.f32 -0.28449672, %v4190_v57  ;;  %v4225_v22 = vmul.f32 %v4207_v44, %v9635_v56  ;;  %v3773_v33 = vsel %vm3755_vm5, 1.0, %v10039_v29 }
 0x4d1   : > { %v4329_v17 = vmul.f32 1.442695, %v9487_v26  ;;  %v4100_v18 = vor.u32 1.1754944e-38, %v4099_v35  ;;  %v4137_v50 = vadd.f32 -1.4531521, %v4119_v11  ;;  %v3774_v30 = vsel %vm3756_vm8, 1.0, %v10039_v29  ;;  %4535 = vmatmul.bf16.gmra.mxu3 %v4432_v23 }
 0x4d2   : > { %v4368_v15 = vsub.f32 1.0, %v4350_v38  ;;  %v4226_v12 = vmul.f32 %v4208_v4, %v9643_v7  ;;  %vm4098_vm12 = vcmp.eq.f32.partialorder %v4097_v0, 8.507059e+37  ;;  %5325 = vpow2.f32 %v9535_v46 }
 0x4d3   : > { %v4385_v21 = vmul.f32 %v4367_v39, %v3773_v33  ;;  %v4101_v5 = vsel %vm4098_vm12, %v4100_v18, %v4096_v40  ;;  %v4155_v51 = vmul.f32 %v4137_v50, %v9675_v45  ;;  %v4243_v58 = vadd.f32 0.2548296, %v4225_v22 }
 0x4d4   : > { %v4386_v36 = vmul.f32 %v4368_v15, %v3774_v30  ;;  %v4244_v26 = vadd.f32 0.2548296, %v4226_v12  ;;  %v4120_v20 = vmul.f32 1.0614054, %v4101_v5  ;;  %5327 = vpow2.f32 %v4329_v17 }
 0x4d5   : > { %v4173_v43 = vadd.f32 1.4214138, %v4155_v51  ;;  %v3720_v37 = vmul.f32 0.5, %v9296_v62  ;;  %v4282_v9 = vsub.f32 0.0, %v9494_v8  ;;  %v4403_v1 = vadd.f32 1.0, %v4385_v21 }
 0x4d6   : > { %v4404_v63 = vadd.f32 1.0, %v4386_v36  ;;  %v4262_v25 = vmul.f32 %v4244_v26, %v9643_v7  ;;  %v4138_v60 = vadd.f32 -1.4531521, %v4120_v20  ;;  %v4261_v46 = vmul.f32 %v4243_v58, %v9635_v56 }
 0x4d7   : > { %v4191_v27 = vmul.f32 %v4173_v43, %v9675_v45  ;;  %v4281_v28 = vsub.f32 0.0, %v9433_v16  ;;  %v3719_v61 = vmul.f32 0.5, %v9247_v47  ;;  %v4300_v53 = vmul.f32 %v4282_v9, %v9494_v8 }
 0x4d8   : > { %v4156_v34 = vmul.f32 %v4138_v60, %v4101_v5  ;;  %v5326_v49 = vpop.eup %5325  ;;  %v4422_v13 = vmul.f32 %v4404_v63, %v3720_v37  ;;  %vm3758_vm13 = vcmp.ge.f32.partialorder %v9385_v54, 0.0  ;;  %vm3757_vm15 = vcmp.ge.f32.partialorder %v9334_v42, 0.0 }
 0x4d9   : > { %v4352_v19 = vmul.f32 %v5326_v49, %v4262_v25  ;;  %v4421_v62 = vmul.f32 %v4403_v1, %v3719_v61  ;;  %v4209_v55 = vadd.f32 -0.28449672, %v4191_v27  ;;  %v4299_v56 = vmul.f32 %v4281_v28, %v9433_v16  ;;  %v10183_v27 = vld [vmem:[#allocation17_spill] sm:$0xff]  ;;  %v10184_v49 = vld [vmem:[#allocation34_spill] sm:$0xff] }
 0x4da   : > { %v4174_v6 = vadd.f32 1.4214138, %v4156_v34  ;;  %v5328_v7 = vpop.eup %5327  ;;  %v4335_v57 = vmul.f32 1.442695, %v4300_v53  ;;  %v3776_v8 = vsel %vm3758_vm13, 1.0, %v10039_v29  ;;  %v3775_v16 = vsel %vm3757_vm15, 1.0, %v10039_v29 }
 0x4db   : > { %v4351_v2 = vmul.f32 %v5328_v7, %v4261_v46  ;;  %v4433_v0 = vpack.c.bf16 %v4422_v13, %v4421_v62  ;;  %v4370_v48 = vsub.f32 1.0, %v4352_v19  ;;  %v4227_v44 = vmul.f32 %v4209_v55, %v9675_v45  ;;  %v10185_v13 = vld [vmem:[#allocation37_spill] sm:$0xff] }
 0x4dc   : > { %v4192_v32 = vmul.f32 %v4174_v6, %v4101_v5  ;;  %v4333_v39 = vmul.f32 1.442695, %v4299_v56  ;;  %5329 = vpow2.f32 %v4335_v57  ;;  %v3722_v42 = vmul.f32 0.5, %v9364_v31  ;;  %v10186_v6 = vld [vmem:[#allocation35_spill] sm:$0xff]  ;;  %v10187_v56 = vld [vmem:[#allocation20_spill] sm:$0xff] }
 0x4dd   : > { %v4369_v47 = vsub.f32 1.0, %v4351_v2  ;;  %v4388_v40 = vmul.f32 %v4370_v48, %v3776_v8  ;;  %v4245_v11 = vadd.f32 0.2548296, %v4227_v44  ;;  %v3721_v18 = vmul.f32 0.5, %v9316_v10 }
 0x4de   : > { %v4210_v41 = vadd.f32 -0.28449672, %v4192_v32  ;;  %5331 = vpow2.f32 %v4333_v39  ;;  %vm3760_vm14 = vcmp.ge.f32.partialorder %v9484_v3, 0.0  ;;  %vm3759_vm6 = vcmp.ge.f32.partialorder %v9417_v24, 0.0  ;;  %v9730_v3 = vld [vmem:[%s9887_s9 + $0x1] ss:$0 sm:$0xff] }
 0x4df   : > { %v4387_v54 = vmul.f32 %v4369_v47, %v3775_v16  ;;  %v4406_v23 = vadd.f32 1.0, %v4388_v40  ;;  %v4263_v22 = vmul.f32 %v4245_v11, %v9675_v45  ;;  %v3778_v58 = vsel %vm3760_vm14, 1.0, %v10039_v29  ;;  %v10189_v47 = vld [vmem:[#allocation19_spill] sm:$0xff] }
 0x4e0   : > { %v4228_v59 = vmul.f32 %v4210_v41, %v4101_v5  ;;  %v3777_v26 = vsel %vm3759_vm6, 1.0, %v10039_v29  ;;  %v3724_v43 = vmul.f32 0.5, %v9456_v14  ;;  %v3723_v24 = vmul.f32 0.5, %v9411_v52  ;;  %v9737_v29 = vld [vmem:[%s9888_s10 + $0x1] ss:$0 sm:$0xff]  ;;  %v10188_v41 = vld [vmem:[#allocation21_spill] sm:$0xff] }
 0x4e1   : > { %4540 = vmatmul.bf16.gmra.mxu3 %v4433_v0  ;;  %v4405_v4 = vadd.f32 1.0, %v4387_v54  ;;  %v4424_v50 = vmul.f32 %v4406_v23, %v3722_v42  ;;  %v10191_v23 = vld [vmem:[#allocation22_spill] sm:$0xff] }
 0x4e2   : > { %v4246_v35 = vadd.f32 0.2548296, %v4228_v59  ;;  %v5330_v17 = vpop.eup %5329  ;;  %v10190_v59 = vld [vmem:[#allocation38_spill] sm:$0xff] }
 0x4e3   : > { %v4423_v12 = vmul.f32 %v4405_v4, %v3721_v18  ;;  %v10192_v4 = vld [vmem:[#allocation23_spill] sm:$0xff]  ;;  %v10194_v18 = vld [vmem:[#allocation40_spill] sm:$0xff] }
 0x4e4   : > { %v4264_v38 = vmul.f32 %v4246_v35, %v4101_v5  ;;  %v5332_v15 = vpop.eup %5331 }
 0x4e5   : > { %v4353_v21 = vmul.f32 %v5332_v15, %v4263_v22  ;;  %v4434_v51 = vpack.c.bf16 %v4424_v50, %v4423_v12 }
 0x4e6   : > { %v4512_v33 = vpop.f32.mrf.mxu3  ;;  %v4354_v30 = vmul.f32 %v5330_v17, %v4264_v38 }
 0x4e7   : > { %v4371_v5 = vsub.f32 1.0, %v4353_v21  ;;  %v10193_v33 = vld [vmem:[#allocation39_spill] sm:$0xff] }
 0x4e8   : > { %v4372_v36 = vsub.f32 1.0, %v4354_v30 }
 0x4e9   : > { %v4389_v10 = vmul.f32 %v4371_v5, %v3777_v26  ;;  %v10195_v5 = vld [vmem:[#allocation24_spill] sm:$0xff] }
 0x4ea   : > { %v4390_v45 = vmul.f32 %v4372_v36, %v3778_v58 }
 0x4eb   : > { %v4407_v63 = vadd.f32 1.0, %v4389_v10  ;;  %v10197_v10 = vld [vmem:[#allocation41_spill] sm:$0xff] }
 0x4ec   : > { %v4408_v20 = vadd.f32 1.0, %v4390_v45  ;;  %v10196_v45 = vld [vmem:[#allocation25_spill] sm:$0xff] }
 0x4ed   : > { %v4425_v37 = vmul.f32 %v4407_v63, %v3723_v24 }
 0x4ee   : > { %v4513_v31 = vpop.f32.mrf.mxu3  ;;  %v4426_v25 = vmul.f32 %v4408_v20, %v3724_v43  ;;  %v10198_v43 = vld [vmem:[#allocation42_spill] sm:$0xff] }
 0x4ef   : > { %v4514_v9 = vadd.f32 %v9730_v3, %v4513_v31 }
 0x4f0   : > { %v4435_v1 = vpack.c.bf16 %v4426_v25, %v4425_v37 }
 0x4f1   : > { %4545 = vmatmul.bf16.gmra.mxu3 %v4434_v51  ;;  %v4557_v46 = vmul.f32 %v9737_v29, %v4514_v9 }
 0x4f3   : > { %v4573_v52 = vadd.f32 %v4557_v46, %v10183_v27  ;;  %v10200_v27 = vld [vmem:[#allocation27_spill] sm:$0xff] }
 0x4f5   : > { %v9745_v19 = vmul.f32 %v10185_v13, %v4573_v52 }
 0x4f7   : > { %v4516_v60 = vpop.f32.mrf.mxu3 }
 0x4f8   : > { %v4517_v14 = vadd.f32 %v9730_v3, %v4516_v60 }
 0x4fa   : > { %v4558_v34 = vmul.f32 %v9737_v29, %v4517_v14 }
 0x4fc   : > { %v4574_v28 = vadd.f32 %v4558_v34, %v10184_v49  ;;  %v10201_v49 = vld [vmem:[#allocation43_spill] sm:$0xff] }
 0x4fe   : > { %v9748_v7 = vmul.f32 %v10186_v6, %v4574_v28 }
 0x4ff   : > { %v4518_v61 = vpop.f32.mrf.mxu3 }
 0x500   : > { %v4605_v53 = vpack.c.bf16 %v9748_v7, %v9745_v19  ;;  %v4519_v62 = vadd.f32 %v9730_v3, %v4518_v61  ;;  %v10202_v61 = vld [vmem:[#allocation44_spill] sm:$0xff] }
 0x501   : > { %4550 = vmatmul.bf16.gmra.mxu3 %v4435_v1  ;;  %v10199_v1 = vld [vmem:[#allocation26_spill] sm:$0xff] }
 0x502   : > { %v4559_v2 = vmul.f32 %v9737_v29, %v4519_v62 }
 0x504   : > { %v4575_v0 = vadd.f32 %v4559_v2, %v10187_v56 }
 0x506   : > { %v9759_v44 = vmul.f32 %v10189_v47, %v4575_v0 }
 0x50e   : > { %v4521_v32 = vpop.f32.mrf.mxu3 }
 0x50f   : > { %v4522_v55 = vadd.f32 %v9730_v3, %v4521_v32 }
 0x511   : > { %v4560_v48 = vmul.f32 %v9737_v29, %v4522_v55 }
 0x513   : > { %v4576_v57 = vadd.f32 %v4560_v48, %v10188_v41 }
 0x515   : > { %v9762_v8 = vmul.f32 %v10190_v59, %v4576_v57 }
 0x516   : > { %v4523_v40 = vpop.f32.mrf.mxu3 }
 0x517   : > { %v4606_v39 = vpack.c.bf16 %v9762_v8, %v9759_v44  ;;  %v4524_v35 = vadd.f32 %v9730_v3, %v4523_v40  ;;  %v10203_v40 = vld [vmem:[#allocation32_spill] sm:$0xff] }
 0x519   : > { %v4561_v16 = vmul.f32 %v9737_v29, %v4524_v35 }
 0x51b   : > { %v4577_v38 = vadd.f32 %v4561_v16, %v10191_v23 }
 0x51d   : > { %v9773_v17 = vmul.f32 %v10193_v33, %v4577_v38 }
 0x529   : > { %v4526_v54 = vpop.f32.mrf.mxu3 }
 0x52a   : > { %v4527_v11 = vadd.f32 %v9730_v3, %v4526_v54 }
 0x52c   : > { %v4562_v42 = vmul.f32 %v9737_v29, %v4527_v11  ;;  %v10204_v11 = vld [vmem:[#allocation33_spill] sm:$0xff] }
 0x52e   : > { %v4578_v22 = vadd.f32 %v4562_v42, %v10192_v4  ;;  %v10205_v42 = vld [vmem:[#allocation49_spill] sm:$0xff] }
 0x530   : > { %v9776_v50 = vmul.f32 %v10194_v18, %v4578_v22  ;;  %v10206_v22 = vld [vmem:[#allocation50_spill] sm:$0xff] }
 0x531   : > { %v4528_v15 = vpop.f32.mrf.mxu3 }
 0x532   : > { %v4607_v30 = vpack.c.bf16 %v9776_v50, %v9773_v17  ;;  %v4529_v12 = vadd.f32 %v9730_v3, %v4528_v15 }
 0x534   : > { %v4563_v21 = vmul.f32 %v9737_v29, %v4529_v12  ;;  %v10207_v12 = vld [vmem:[#allocation31_spill] sm:$0xff] }
 0x536   : > { %v4579_v31 = vadd.f32 %v4563_v21, %v10195_v5  ;;  %v10208_v5 = vld [vmem:[#allocation30_spill] sm:$0xff] }
 0x538   : > { %v4595_v20 = vmul.f32 %v10197_v10, %v4579_v31 }
 0x53d   : > { %v4531_v51 = vpop.f32.mrf.mxu3 }
 0x53e   : > { %v4532_v36 = vadd.f32 %v9730_v3, %v4531_v51 }
 0x540   : > { %v4564_v58 = vmul.f32 %v9737_v29, %v4532_v36 }
 0x542   : > { %v4580_v26 = vadd.f32 %v4564_v58, %v10196_v45  ;;  %v10209_v45 = vld [vmem:[#allocation48_spill] sm:$0xff] }
 0x544   : > { %v4596_v63 = vmul.f32 %v10198_v43, %v4580_v26 }
 0x545   : > { %v4533_v25 = vpop.f32.mrf.mxu3 }
 0x546   : > { %v4608_v24 = vpack.c.bf16 %v4596_v63, %v4595_v20  ;;  %v4534_v60 = vadd.f32 %v9730_v3, %v4533_v25  ;;  %v10210_v20 = vld [vmem:[#allocation47_spill] sm:$0xff]  ;;  %v10211_v63 = vld [vmem:[#allocation29_spill] sm:$0xff] }
 0x548   : > { %v4565_v37 = vmul.f32 %v9737_v29, %v4534_v60 }
 0x54a   : > { %v4581_v46 = vadd.f32 %v4565_v37, %v10199_v1  ;;  %v10212_v37 = vld [vmem:[#allocation28_spill] sm:$0xff] }
 0x54c   : > { %v4597_v28 = vmul.f32 %v10201_v49, %v4581_v46 }
 0x554   : > { %v4536_v9 = vpop.f32.mrf.mxu3 }
 0x555   : > { %v4537_v14 = vadd.f32 %v9730_v3, %v4536_v9 }
 0x557   : > { %v4566_v34 = vmul.f32 %v9737_v29, %v4537_v14  ;;  %v10213_v14 = vld [vmem:[#allocation46_spill] sm:$0xff] }
 0x559   : > { %v4582_v52 = vadd.f32 %v4566_v34, %v10200_v27  ;;  %v4621_v27 = vld [vmem:[#allocation6] sm:$0x1] }
 0x55b   : > { %v4598_v13 = vmul.f32 %v10202_v61, %v4582_v52  ;;  %v5474_v52 = vmov 0   ;;  %v10216_v61 = vld [vmem:[#allocation36_spill] sm:$0xff] }
 0x55c   : > { %v4538_v6 = vpop.f32.mrf.mxu3  ;;  %5104 = vset.pattern.permute.xlu0 %v5474_v52 }
 0x55d   : > { %v4609_v62 = vpack.c.bf16 %v4598_v13, %v4597_v28  ;;  %v4539_v36 = vadd.f32 %v9730_v3, %v4538_v6  ;;  %4624 = vperm.xlu0 %5104, %v4621_v27  }
 0x55f   : > { %v4567_v10 = vmul.f32 %v9737_v29, %v4539_v36 }
 0x561   : > { %v4583_v9 = vadd.f32 %v4567_v10, %v10212_v37 }
 0x564   : > { %v4541_v2 = vpop.f32.mrf.mxu3 }
 0x565   : > { %v4542_v15 = vadd.f32 %v9730_v3, %v4541_v2 }
 0x567   : > { %v4568_v58 = vmul.f32 %v9737_v29, %v4542_v15 }
 0x569   : > { %v4584_v25 = vadd.f32 %v4568_v58, %v10211_v63 }
 0x56b   : > { %v4600_v1 = vmul.f32 %v10213_v14, %v4584_v25 }
 0x56c   : > { %v4543_v32 = vpop.f32.mrf.mxu3 }
 0x56d   : > { %v4544_v59 = vadd.f32 %v9730_v3, %v4543_v32 }
 0x56f   : > { %v4569_v38 = vmul.f32 %v9737_v29, %v4544_v59 }
 0x571   : > { %v4585_v31 = vadd.f32 %v4569_v38, %v10208_v5 }
 0x573   : > { %v4601_v43 = vmul.f32 %v10210_v20, %v4585_v31 }
 0x574   : > { %v4546_v55 = vpop.f32.mrf.mxu3 }
 0x575   : > { %v4547_v57 = vadd.f32 %v9730_v3, %v4546_v55 }
 0x577   : > { %v4570_v54 = vmul.f32 %v9737_v29, %v4547_v57 }
 0x579   : > { %v4586_v21 = vadd.f32 %v4570_v54, %v10207_v12 }
 0x57b   : > { %v4602_v26 = vmul.f32 %v10209_v45, %v4586_v21 }
 0x57c   : > { %v4548_v56 = vpop.f32.mrf.mxu3 }
 0x57d   : > { %v4549_v0 = vadd.f32 %v9730_v3, %v4548_v56  ;;  %v4611_v60 = vpack.c.bf16 %v4602_v26, %v4601_v43 }
 0x57f   : > { %v4571_v48 = vmul.f32 %v9737_v29, %v4549_v0 }
 0x581   : > { %v4587_v35 = vadd.f32 %v4571_v48, %v10203_v40 }
 0x583   : > { %v4603_v4 = vmul.f32 %v10205_v42, %v4587_v35 }
 0x584   : > { %v4551_v41 = vpop.f32.mrf.mxu3 }
 0x585   : > { %v4552_v47 = vadd.f32 %v9730_v3, %v4551_v41  ;;  %v10214_v3 = vld [vmem:[#allocation45_spill] sm:$0xff] }
 0x586   : > { %v4599_v46 = vmul.f32 %v10214_v3, %v4583_v9 }
 0x587   : > { %v4572_v16 = vmul.f32 %v9737_v29, %v4552_v47  ;;  %v4613_v29 = vld [vmem:[%s9889_s11] sm:$0x1] }
 0x588   : > { %v4610_v34 = vpack.c.bf16 %v4600_v1, %v4599_v46 }
 0x589   : > { %v4588_v23 = vadd.f32 %v4572_v16, %v10204_v11 }
 0x58b   : > { %v4604_v33 = vmul.f32 %v10206_v22, %v4588_v23 }
 0x58c   : > { %v4553_v18 = vpop.f32.mrf.mxu3 }
 0x58d   : > { %v4612_v51 = vpack.c.bf16 %v4604_v33, %v4603_v4 }
 0x58f   : > { %4628 = vmatpush.bf16.xpose.msrb.mxu0 %v4612_v51 }
 0x597   : > { %4629 = vmatpush.bf16.xpose.msrb.mxu0 %v4611_v60 }
 0x59f   : > { %4630 = vmatpush.bf16.xpose.msrb.mxu0 %v4610_v34 }
 0x5a7   : > { %4631 = vmatpush.bf16.xpose.msrb.mxu0 %v4609_v62 }
 0x5af   : > { %4632 = vmatpush.bf16.xpose.msrb.mxu0 %v4608_v24  ;;  %v10215_v24 = vlaneseq }
 0x5b1   : > { %v4615_v49 = vand.u32 127, %v10215_v24 }
 0x5b3   : > { %vm4618_vm0 = vcmp.lt.s32.totalorder %v4615_v49, %v10216_v61 }
 0x5b7   : > { %4633 = vmatpush.bf16.xpose.msrb.mxu0 %v4607_v30  ;;  %v10217_v30 = vmov 0.0  }
 0x5b8   : > { %v4944_v13 = vsel %vm4618_vm0, 1.0, %v10217_v30 }
 0x5bf   : > { %4634 = vmatpush.bf16.xpose.msrb.mxu0 %v4606_v39 }
 0x5c7   : > { %4635 = vmatpush.bf16.xpose.msrb.mxu0 %v4605_v53 }
 0x5ce   : > { %4636 = vmatmul.bf16.vlgmr.msrb.gmra.mxu0 %v4613_v29 }
 0x5cf   : > { %v4625_v28 = vpop.permute.xlu0 %4624 }
 0x5d0   : > { %v4627_v17 = vperm.slane %v4625_v28, 0 }
 0x64b   : > { %v4637_v50 = vpop.f32.mrf.mxu0 }
 0x64c   : > { %v4638_v44 = vadd.f32 %v4637_v50, %v4627_v17 }
 0x64e   : > { %v4641_v8 = vmul.f32 %v4944_v13, %v4638_v44 }
 0x650   : > { %4642 = vst [vmem:[%s5617_s26] sm:$0x1] %v4641_v8 }
 0x653   : > { %v4639_v39 = vpop.f32.mrf.mxu0 }
 0x654 PF: > { %4646 = sbr.rel (%p4767_p0) target bundleno = 1627 (0x65b), region = 122 }
 0x659   : > { %v5475_v19 = vmov 0.0  }
 0x65a   : > { %4647 = vst [vmem:[%s5617_s26] sm:$0x1] %v5475_v19 }
 0x65b PF: > { %s4658_s27 = scalar_lea.hbm %s9890_s13, %s5458_s0  ;;  %s4660_s28 = sshll.u32 %s5617_s26, 4  ;;  %s4661_s28 = int_to_ptr.vmem [resolvable:$true] %s4660_s28 }
 0x65c   : > { %s4662_s29 = sshll.u32 %s4658_s27, 4  ;;  %s4649_s30 = scalar_lea.sflag [#allocation9], %s405_s18  ;;  %s4663_s29 = int_to_ptr.hbm [resolvable:$true] %s4662_s29 }
 0x65d   : > { %s5394_s21 = sshra.s32 %s4663_s29, 4  ;;  %s5400_s19 = scalar_lea.hbm %s9890_s13, 2  ;;  %s5395_s21 = int_to_ptr.hbm [resolvable:$true] %s5394_s21 }
 0x65e   : > { %s5396_s1 = scalar_lea.hbm %s5395_s21, 1  ;;  %p5401_p6 = scmp.lt.s32.totalorder %s5395_s21, %s9890_s13 }
 0x65f   : > { %p5397_p2 = scmp.ne.s32.totalorder %s5395_s21, %s5396_s1  ;;  %p5402_p7 = scmp.lt.s32.totalorder %s5400_s19, %s5396_s1 }
 0x661   : > { %p5398_p3 = pnand %p5397_p2, %p5592_p4  ;;  %p5403_p9 = por %p5402_p7, %p5401_p6 }
 0x663   : > { %p5399_p5 = pneg %p5398_p3 }
 0x665   : > { %p5404_p10 = pnand %p5403_p9, %p5399_p5 }
 0x667   : > { %5407 = shalt.err (!%p5404_p10)
}
 0x668   : > { %5035 = dma.vmem_to_hbm [thread:$0]  (%p5592_p4), %s4661_s28, 16, %s4663_s29, %s4649_s30  }
 0x669 PF: > { %p5047_p11 = scmp.ge.s32.totalorder %s5466_s12, 2  ;;  %s4674_s0 = sand.u32 1, %s5446_s14  }
 0x66a   : > { %s4675_s2 = scalar_lea.sflag [#allocation9], %s4674_s0 }
 0x66b   : > { %p5042_p12 = pnand %p5047_p11, %p5599_p8 }
 0x66d   : > { %p5043_p13 = pneg %p5042_p12 }
 0x66f   : > { %5441 = dma.done.wait (%p5043_p13), %s4675_s2, 16  }
 0x670   : > { %5443 = vsyncadd (%p5043_p13), %s4675_s2, 4294967280  ;;  %s37_s12 = sadd.s32 1, %s5466_s12   ;;  %s10218_s14 = smov %s5450_s15 }
 0x671   : > { %p34_p0 = scmp.ge.s32.totalorder %s37_s12, 4   ;;  %s10219_s15 = smov %s5454_s16 }
 0x672   : > { %s10220_s16 = smov %s5605_s25  ;;  %s10221_s0 = smov %s5462_s17 }
 0x673   : > { %s10222_s17 = smov %s10224_s20  ;;  %36 = sbr.rel (!%p34_p0) target bundleno = 14 (0xe), region = 173 }
 0x678   :  { %4680 = vsyncpa [#allocation8], 1 }
 0x679   :  { %4682 = vsyncpa [#allocation8 + $0x1], 1 }
 0x67a   :  { %4683 = vsyncpa [#allocation9], 1 }
 0x67b   :  { %4685 = vsyncpa [#allocation9 + $0x1], 1 }
 0x67c   :  { %4686 = vsyncmov [#allocation3] }
 0x67f   :  { %s4687_s1 = vpop.sfrf %4686 }
 0x680   :  { %p4949_p4 = scmp.ne.s32.totalorder %s4687_s1, 0 }
 0x682   :  { %4691 = shalt.err (%p4949_p4)  }
 0x683   :  { %4693 = vsyncmov [#allocation3 + $0x1] }
 0x686   :  { %s4694_s3 = vpop.sfrf %4693 }
 0x687   :  { %p4950_p8 = scmp.ne.s32.totalorder %s4694_s3, 0 }
 0x689   :  { %4698 = shalt.err (%p4950_p8)  }

</bundles_post_ra>
